<compile_context>
chip_gen: v6e
topology: v6e:2x2x1
jax: 0.10.0
libtpu: 0.0.40
codegen_flags: <defaults>
</compile_context>

<pallas_src>
import numpy as np
import jax
import jax.numpy as jnp
from jax import lax
from jax.experimental import pallas as pl
from jax.experimental.pallas import tpu as pltpu


# ---------------------------------------------------------------------------
# packed-parameter row / slab indices
# ---------------------------------------------------------------------------
# Bdm rows: dm-wide bias / folded-BN vectors
(B_FC1_B, B_BN1_SC, B_BN1_SH,
 B_PA_A1, B_PA_A2, B_PA_B1, B_PA_B2, B_PA_D1, B_PA_D2,
 B_PA_E1, B_PA_E2, B_PA_O1, B_PA_O2,
 B_GA_A1, B_GA_A2, B_GA_B1, B_GA_B2, B_GA_O1, B_GA_O2,
 B_BNP_SC_LO, B_BNP_SC_HI, B_BNP_SH_LO, B_BNP_SH_HI,
 B_BNG_SC_LO, B_BNG_SC_HI, B_BNG_SH_LO, B_BNG_SH_HI) = range(27)
# Wdm slabs: (dm, dm) weights
(W_PA_A2, W_PA_B2, W_PA_D2, W_PA_E1, W_PA_E2, W_PA_O1, W_PA_O2,
 W_GA_A1, W_GA_A2, W_GA_B1, W_GA_B2, W_GA_O1, W_GA_O2) = range(13)
# W3 slabs: (3, dm) first-layer weights of the xyz MLPs
W3_PA_A1, W3_PA_B1, W3_PA_D1 = range(3)
# B4 rows: 4*dm-wide vectors
B4_VB1, B4_VB2, B4_BNV_SC, B4_BNV_SH = range(4)
# Bout rows: d_out-wide vectors
BO_FC3_B, BO_BN2_SC, BO_BN2_SH = range(3)


def _zero_map(nd):
    return lambda i, _nd=nd: (0,) * _nd


# ---------------------------------------------------------------------------
# fused per-voxel-batch kernel
# ---------------------------------------------------------------------------
def _fused_kernel(p_ref, feat_ref, mask_ref, fs_ref,
                  fc1w_ref, w3_ref, wdm_ref, bdm_ref,
                  wv_ref, b4_ref, fc3w_ref, bo_ref,
                  out_ref):
    TB, M, _ = p_ref.shape
    d_points = feat_ref.shape[-1]
    dm = fc1w_ref.shape[-1]
    TBM = TB * M
    inv_sqrt = np.float32(1.0 / np.sqrt(dm))

    bdm = bdm_ref[...]                      # (27, dm)

    def brow(i):                            # (1, dm) bias / affine row
        return bdm[i:i + 1, :]

    def lin(t, w, b):
        return jnp.dot(t, w, preferred_element_type=jnp.float32) + b

    def lin3(t, w, b):                      # (R,3) x (3,dm) as broadcast MAC (tiny K)
        return (t[:, 0:1] * w[0:1, :] + t[:, 1:2] * w[1:2, :]
                + t[:, 2:3] * w[2:3, :] + b)

    def mlp2(t, iw1, ib1, iw2, ib2):        # Linear -> ReLU -> Linear (stacked weights)
        h = jnp.maximum(lin(t, wdm_ref[iw1], brow(ib1)), 0.0)
        return lin(h, wdm_ref[iw2], brow(ib2))

    # ---- x = relu(bn1(fc1(features))), all TB*M points at once --------------
    fc1_w = fc1w_ref[...]
    bn1_sc, bn1_sh = brow(B_BN1_SC), brow(B_BN1_SH)
    feat = feat_ref[...].reshape(TBM, d_points)
    x = jnp.maximum(lin(feat, fc1_w, brow(B_FC1_B)) * bn1_sc + bn1_sh, 0.0)

    # ---- GlobalAttention k/v from the FPS-sampled raw feature rows (tiny) ---
    xs = jnp.maximum(lin(fs_ref[...], fc1_w, brow(B_FC1_B)) * bn1_sc + bn1_sh, 0.0)
    k_g = mlp2(xs, W_GA_B1, B_GA_B1, W_GA_B2, B_GA_B2)            # (S, dm)
    v_g = mlp2(xs, W_GA_O1, B_GA_O1, W_GA_O2, B_GA_O2)            # (S, dm)

    # ---- PointAttention, vectorized over all TB*M*M (query i, key j) pairs --
    p3 = p_ref[...]                                               # (TB, M, 3)
    p_flat = p3.reshape(TBM, 3)
    q = lin(jnp.maximum(lin3(p_flat, w3_ref[W3_PA_A1], brow(B_PA_A1)), 0.0),
            wdm_ref[W_PA_A2], brow(B_PA_A2))                      # (TBM, dm)
    k = lin(jnp.maximum(lin3(p_flat, w3_ref[W3_PA_B1], brow(B_PA_B1)), 0.0),
            wdm_ref[W_PA_B2], brow(B_PA_B2))                      # (TBM, dm)
    v_pa = mlp2(x, W_PA_O1, B_PA_O1, W_PA_O2, B_PA_O2)            # (TBM, dm)

    q3 = q.reshape(TB, M, dm)
    k3 = k.reshape(TB, M, dm)
    dist_parts, qk_parts = [], []
    for i in range(M):                      # static unroll: only cheap slice/bcast ops
        dist_parts.append(jnp.abs(p3[:, i:i + 1, :] - p3)[:, None, :, :])
        qk_parts.append((q3[:, i:i + 1, :] - k3)[:, None, :, :])
    dist = jnp.concatenate(dist_parts, axis=1).reshape(TBM * M, 3)     # (TB*M*M, 3)
    qk = jnp.concatenate(qk_parts, axis=1).reshape(TBM * M, dm)        # (TB*M*M, dm)

    pij = lin(jnp.maximum(lin3(dist, w3_ref[W3_PA_D1], brow(B_PA_D1)), 0.0),
              wdm_ref[W_PA_D2], brow(B_PA_D2))                         # (TB*M*M, dm)
    w_all = mlp2((qk + pij) * inv_sqrt, W_PA_E1, B_PA_E1, W_PA_E2, B_PA_E2)
    w3d = w_all.reshape(TBM, M, dm)                                    # (b*M+i, j, f)

    # diagonal (j == i): dist == 0, so fc_delta(0) is a single constant row
    pij_diag = lin(jnp.maximum(brow(B_PA_D1), 0.0), wdm_ref[W_PA_D2], brow(B_PA_D2))
    w_diag = mlp2((q - k + pij_diag) * inv_sqrt, W_PA_E1, B_PA_E1, W_PA_E2, B_PA_E2)

    # softmax over the key axis j, keep only the diagonal term
    mx_keep = jnp.max(w3d, axis=1, keepdims=True)                      # (TBM, 1, dm)
    denom = jnp.sum(jnp.exp(w3d - mx_keep), axis=1)                    # (TBM, dm)
    mx = jnp.max(w3d, axis=1)                                          # (TBM, dm)
    diag = jnp.exp(w_diag - mx) * pl.reciprocal(denom, approx=True)
    res_pa = diag * v_pa                                               # (TBM, dm)

    # ---- GlobalAttention on every point (invalid rows masked afterwards) ----
    q_g = mlp2(x, W_GA_A1, B_GA_A1, W_GA_A2, B_GA_A2)                  # (TBM, dm)
    w_g = lax.dot_general(q_g, k_g, (((1,), (1,)), ((), ())),
                          preferred_element_type=jnp.float32) * inv_sqrt  # (TBM, S)
    res_g = jnp.dot(w_g, v_g, preferred_element_type=jnp.float32)      # (TBM, dm)

    mask = mask_ref[...].reshape(TBM, 1)          # 1.0 valid / 0.0 padded point

    # ---- bnp / bng folded affines + relu (kept as four dm-wide slabs) -------
    l1 = jnp.maximum(res_pa * brow(B_BNP_SC_LO) + brow(B_BNP_SH_LO), 0.0)
    l2 = jnp.maximum(x * brow(B_BNP_SC_HI) + brow(B_BNP_SH_HI), 0.0)
    g1 = jnp.maximum(res_g * mask * brow(B_BNG_SC_LO) + brow(B_BNG_SH_LO), 0.0)
    g2 = jnp.maximum(x * mask * brow(B_BNG_SC_HI) + brow(B_BNG_SH_HI), 0.0)

    # ---- VoxelAttention (softmax over a size-1 query axis == plain sum) -----
    wv1 = wv_ref[0]                               # (4dm, 4dm), rows = input channel
    wv2 = wv_ref[1]
    b4 = b4_ref[...]
    h = (jnp.dot(l1, wv1[0 * dm:1 * dm, :], preferred_element_type=jnp.float32)
         + jnp.dot(l2, wv1[1 * dm:2 * dm, :], preferred_element_type=jnp.float32)
         + jnp.dot(g1, wv1[2 * dm:3 * dm, :], preferred_element_type=jnp.float32)
         + jnp.dot(g2, wv1[3 * dm:4 * dm, :], preferred_element_type=jnp.float32)
         + b4[B4_VB1:B4_VB1 + 1, :])
    v2 = lin(jnp.maximum(h, 0.0), wv2, b4[B4_VB2:B4_VB2 + 1, :])       # (TBM, 4dm)
    sv = jnp.sum(v2.reshape(TB, M, 4 * dm), axis=1)                    # (TB, 4dm)
    pre = jnp.concatenate(
        [jnp.max(l1.reshape(TB, M, dm), axis=1),
         jnp.max(l2.reshape(TB, M, dm), axis=1),
         jnp.max(g1.reshape(TB, M, dm), axis=1),
         jnp.max(g2.reshape(TB, M, dm), axis=1)], axis=-1)             # (TB, 4dm)

    vf = jnp.maximum((sv + pre) * b4[B4_BNV_SC:B4_BNV_SC + 1, :]
                     + b4[B4_BNV_SH:B4_BNV_SH + 1, :], 0.0)
    bo = bo_ref[...]
    o = lin(vf, fc3w_ref[...], bo[BO_FC3_B:BO_FC3_B + 1, :])           # (TB, d_out)
    out_ref[...] = jnp.maximum(o * bo[BO_BN2_SC:BO_BN2_SC + 1, :]
                               + bo[BO_BN2_SH:BO_BN2_SH + 1, :], 0.0)


# ---------------------------------------------------------------------------
# FPS (plain JAX glue) — mirrors pointnet2's furthest_point_sample
# ---------------------------------------------------------------------------
def furthest_point_sample(xyz, k):
    # xyz: (P, 3) -> (k,) int32; first pick is index 0.
    P = xyz.shape[0]

    def body(i, carry):
        idxs, mind, last = carry
        d = jnp.sum((xyz - xyz[last]) ** 2, axis=-1)
        mind = jnp.minimum(mind, d)
        nxt = jnp.argmax(mind).astype(jnp.int32)
        return idxs.at[i].set(nxt), mind, nxt

    idxs = jnp.zeros((k,), jnp.int32)
    mind = jnp.full((P,), 1e10, jnp.float32)
    idxs, _, _ = jax.lax.fori_loop(1, k, body, (idxs, mind, jnp.int32(0)))
    return idxs


# ---------------------------------------------------------------------------
# full forward (glue + one fused Pallas kernel)
# ---------------------------------------------------------------------------
def voxel_transformer_forward(packed, p_xyz, v_xyz, features, point_coors,
                              mask, n_sample, d_out, voxel_tile=None):
    # v_xyz only feeds terms of VoxelAttention that cannot affect the output
    # (softmax over a size-1 axis), so it is accepted but unused.
    del v_xyz
    N, M, d_points = features.shape
    tb = voxel_tile if voxel_tile is not None else (N if N <= 64 else 64)
    assert N % tb == 0, (N, tb)

    # FPS + sampled-row gather: plain-JAX glue (data-dependent, concrete mask).
    mask_np = np.asarray(mask)
    fps_idx = furthest_point_sample(point_coors, n_sample)            # (S,)
    vox_idx, pt_idx = np.nonzero(mask_np)
    flat_valid = jnp.asarray(vox_idx * M + pt_idx, dtype=jnp.int32)   # (P,)
    f_samp = features.reshape(N * M, d_points)[flat_valid[fps_idx]]   # (S, d_points)
    mask_f = jnp.asarray(mask_np.astype(np.float32))[:, :, None]      # (N, M, 1)

    weights = [packed["fc1_w"], packed["w3"], packed["wdm"], packed["bdm"],
               packed["wv"], packed["b4"], packed["fc3_w"], packed["bout"]]

    out2d = pl.pallas_call(
        _fused_kernel,
        out_shape=jax.ShapeDtypeStruct((N, d_out), jnp.float32),
        grid=(N // tb,),
        in_specs=[pl.BlockSpec((tb, M, 3), lambda i: (i, 0, 0)),
                  pl.BlockSpec((tb, M, d_points), lambda i: (i, 0, 0)),
                  pl.BlockSpec((tb, M, 1), lambda i: (i, 0, 0)),
                  pl.BlockSpec(f_samp.shape, _zero_map(2))]
        + [pl.BlockSpec(w.shape, _zero_map(w.ndim)) for w in weights],
        out_specs=pl.BlockSpec((tb, d_out), lambda i: (i, 0)),
        compiler_params=pltpu.CompilerParams(
            dimension_semantics=("parallel",)),
    )(p_xyz, features, mask_f, f_samp, *weights)
    return out2d[:, None, :]                                          # (N, 1, d_out)


# ---------------------------------------------------------------------------
# parameter init (deterministic) + packing into stacked arrays
# ---------------------------------------------------------------------------
def init_params(key, d_points, dm, d_out, eps=1e-3):
    keys = iter(jax.random.split(key, 64))

    def lin(din, dout):
        k1, k2 = jax.random.split(next(keys))
        w = jax.random.normal(k1, (din, dout), jnp.float32) / np.sqrt(din)
        b = 0.01 * jax.random.normal(k2, (1, dout), jnp.float32)
        return (w.astype(jnp.float32), b.astype(jnp.float32))

    def mlp2(din, dmid, dout):
        return lin(din, dmid) + lin(dmid, dout)

    def bn(c):
        k1, k2, k3 = jax.random.split(next(keys), 3)
        gamma = 1.0 + 0.1 * jax.random.normal(k1, (1, c), jnp.float32)
        beta = 0.1 * jax.random.normal(k2, (1, c), jnp.float32)
        mean = 0.1 * jax.random.normal(k3, (1, c), jnp.float32)
        var = jnp.ones((1, c), jnp.float32)
        scale = gamma / jnp.sqrt(var + eps)
        shift = beta - mean * scale
        return (scale.astype(jnp.float32), shift.astype(jnp.float32))

    p = {}
    p["fc1"] = lin(d_points, dm)
    p["bn1"] = bn(dm)
    p["pa_alpha"] = mlp2(3, dm, dm)
    p["pa_beta"] = mlp2(3, dm, dm)
    p["pa_delta"] = mlp2(3, dm, dm)
    p["pa_epsilon"] = mlp2(dm, dm, dm)
    p["pa_omega"] = mlp2(dm, dm, dm)
    p["bnp"] = bn(2 * dm)
    p["ga_alpha"] = mlp2(dm, dm, dm)
    p["ga_beta"] = mlp2(dm, dm, dm)
    p["ga_omega"] = mlp2(dm, dm, dm)
    p["bng"] = bn(2 * dm)
    p["va_omega"] = mlp2(4 * dm, 4 * dm, 4 * dm)   # only fc_omega affects output
    p["bnv"] = bn(4 * dm)
    p["fc3"] = lin(4 * dm, d_out)
    p["bn2"] = bn(d_out)
    return p


def pack_params(p, dm):
    def row(x):
        return jnp.reshape(x, (-1,))

    fc1_w, fc1_b = p["fc1"]
    bn1_sc, bn1_sh = p["bn1"]
    aw1, ab1, aw2, ab2 = p["pa_alpha"]
    bw1, bb1, bw2, bb2 = p["pa_beta"]
    dw1, db1, dw2, db2 = p["pa_delta"]
    ew1, eb1, ew2, eb2 = p["pa_epsilon"]
    ow1, ob1, ow2, ob2 = p["pa_omega"]
    bnp_sc, bnp_sh = p["bnp"]
    gaw1, gab1, gaw2, gab2 = p["ga_alpha"]
    gbw1, gbb1, gbw2, gbb2 = p["ga_beta"]
    gow1, gob1, gow2, gob2 = p["ga_omega"]
    bng_sc, bng_sh = p["bng"]
    vw1, vb1, vw2, vb2 = p["va_omega"]
    bnv_sc, bnv_sh = p["bnv"]
    w3f, b3f = p["fc3"]
    bn2_sc, bn2_sh = p["bn2"]

    w3 = jnp.stack([aw1, bw1, dw1], axis=0)                            # (3, 3, dm)
    wdm = jnp.stack([aw2, bw2, dw2, ew1, ew2, ow1, ow2,
                     gaw1, gaw2, gbw1, gbw2, gow1, gow2], axis=0)      # (13, dm, dm)
    bdm = jnp.stack([
        row(fc1_b), row(bn1_sc), row(bn1_sh),
        row(ab1), row(ab2), row(bb1), row(bb2), row(db1), row(db2),
        row(eb1), row(eb2), row(ob1), row(ob2),
        row(gab1), row(gab2), row(gbb1), row(gbb2), row(gob1), row(gob2),
        row(bnp_sc)[:dm], row(bnp_sc)[dm:],
        row(bnp_sh)[:dm], row(bnp_sh)[dm:],
        row(bng_sc)[:dm], row(bng_sc)[dm:],
        row(bng_sh)[:dm], row(bng_sh)[dm:]], axis=0)                   # (27, dm)
    wv = jnp.stack([vw1, vw2], axis=0)                                 # (2, 4dm, 4dm)
    b4 = jnp.stack([row(vb1), row(vb2), row(bnv_sc), row(bnv_sh)], axis=0)
    bout = jnp.stack([row(b3f), row(bn2_sc), row(bn2_sh)], axis=0)
    return dict(fc1_w=fc1_w, w3=w3, wdm=wdm, bdm=bdm, wv=wv, b4=b4,
                fc3_w=w3f, bout=bout)


# ---------------------------------------------------------------------------
if __name__ == "__main__":
    N, M = 8, 8                       # voxels, points per voxel
    d_points, d_model, d_middle, d_out, fps_num = 8, 16, 16, 32, 4
    assert d_model == d_middle        # required by the module's own wiring
    dm = d_middle

    key = jax.random.PRNGKey(0)
    k_p, k_f, k_params = jax.random.split(key, 3)
    p_xyz = jax.random.normal(k_p, (N, M, 3), jnp.float32)
    v_xyz = jnp.mean(p_xyz, axis=1)                            # (N, 3) voxel centers
    features = jax.random.normal(k_f, (N, M, d_points), jnp.float32)

    counts = np.array([8, 6, 5, 8, 7, 3, 8, 4])                # valid points / voxel
    mask = (np.arange(M)[None, :] < counts[:, None])           # (N, M) bool, P = 49
    point_coors = jnp.asarray(np.asarray(p_xyz)[mask])         # (P, 3)

    params = init_params(k_params, d_points, dm, d_out)
    packed = pack_params(params, dm)

    out = voxel_transformer_forward(packed, p_xyz, v_xyz, features,
                                    point_coors, mask, fps_num, d_out)
    out = jax.block_until_ready(out)
    assert out.shape == (N, 1, d_out), out.shape
    assert bool(jnp.all(jnp.isfinite(out)))
    print("KERNEL_OK")
</pallas_src>

<mosaic_0001>
module attributes {stable_mosaic.version = 11 : i64} {
  func.func @_fused_kernel(%arg0: i32, %arg1: memref<8x8x3xf32, #tpu.memory_space<vmem>>, %arg2: memref<8x8x8xf32, #tpu.memory_space<vmem>>, %arg3: memref<8x8x1xf32, #tpu.memory_space<vmem>>, %arg4: memref<4x8xf32, #tpu.memory_space<vmem>>, %arg5: memref<8x16xf32, #tpu.memory_space<vmem>>, %arg6: memref<3x3x16xf32, #tpu.memory_space<vmem>>, %arg7: memref<13x16x16xf32, #tpu.memory_space<vmem>>, %arg8: memref<27x16xf32, #tpu.memory_space<vmem>>, %arg9: memref<2x64x64xf32, #tpu.memory_space<vmem>>, %arg10: memref<4x64xf32, #tpu.memory_space<vmem>>, %arg11: memref<64x32xf32, #tpu.memory_space<vmem>>, %arg12: memref<3x32xf32, #tpu.memory_space<vmem>>, %arg13: memref<8x32xf32, #tpu.memory_space<vmem>>) attributes {dimension_semantics = [#tpu.dimension_semantics<parallel>], iteration_bounds = array<i64: 1>, scalar_prefetch = 0 : i64, scratch_operands = 0 : i64, tpu.core_type = #tpu.core_type<tc>, window_params = [{transform_indices = @transform_0, window_bounds = array<i64: 8, 8, 3>}, {transform_indices = @transform_1, window_bounds = array<i64: 8, 8, 8>}, {transform_indices = @transform_2, window_bounds = array<i64: 8, 8, 1>}, {pipeline_mode = #tpu.pipeline_mode<synchronous>, transform_indices = @transform_3, window_bounds = array<i64: 4, 8>}, {pipeline_mode = #tpu.pipeline_mode<synchronous>, transform_indices = @transform_4, window_bounds = array<i64: 8, 16>}, {pipeline_mode = #tpu.pipeline_mode<synchronous>, transform_indices = @transform_5, window_bounds = array<i64: 3, 3, 16>}, {pipeline_mode = #tpu.pipeline_mode<synchronous>, transform_indices = @transform_6, window_bounds = array<i64: 13, 16, 16>}, {pipeline_mode = #tpu.pipeline_mode<synchronous>, transform_indices = @transform_7, window_bounds = array<i64: 27, 16>}, {pipeline_mode = #tpu.pipeline_mode<synchronous>, transform_indices = @transform_8, window_bounds = array<i64: 2, 64, 64>}, {pipeline_mode = #tpu.pipeline_mode<synchronous>, transform_indices = @transform_9, window_bounds = array<i64: 4, 64>}, {pipeline_mode = #tpu.pipeline_mode<synchronous>, transform_indices = @transform_10, window_bounds = array<i64: 64, 32>}, {pipeline_mode = #tpu.pipeline_mode<synchronous>, transform_indices = @transform_11, window_bounds = array<i64: 3, 32>}, {transform_indices = @transform_12, window_bounds = array<i64: 8, 32>}]} {
    %c0 = arith.constant 0 : index
    %c0_0 = arith.constant 0 : index
    %0 = vector.load %arg8[%c0, %c0_0] : memref<27x16xf32, #tpu.memory_space<vmem>>, vector<27x16xf32>
    %c0_1 = arith.constant 0 : index
    %c0_2 = arith.constant 0 : index
    %1 = vector.load %arg5[%c0_1, %c0_2] : memref<8x16xf32, #tpu.memory_space<vmem>>, vector<8x16xf32>
    %2 = vector.extract_strided_slice %0 {offsets = [1, 0], sizes = [1, 16], strides = [1, 1]} : vector<27x16xf32> to vector<1x16xf32>
    %3 = vector.extract_strided_slice %0 {offsets = [2, 0], sizes = [1, 16], strides = [1, 1]} : vector<27x16xf32> to vector<1x16xf32>
    %c0_3 = arith.constant 0 : index
    %c0_4 = arith.constant 0 : index
    %c0_5 = arith.constant 0 : index
    %4 = vector.load %arg2[%c0_3, %c0_4, %c0_5] : memref<8x8x8xf32, #tpu.memory_space<vmem>>, vector<8x8x8xf32>
    %5 = vector.shape_cast %4 : vector<8x8x8xf32> to vector<64x8xf32>
    %6 = vector.extract_strided_slice %0 {offsets = [0, 0], sizes = [1, 16], strides = [1, 1]} : vector<27x16xf32> to vector<1x16xf32>
    %cst = arith.constant dense<0.000000e+00> : vector<64x16xf32>
    %7 = tpu.matmul %5, %1, %cst {dimension_numbers = #tpu.dot_dimension_numbers<[1], [0], [0], [1], [0, 0, 1, 1], [], []>} : vector<64x8xf32>, vector<8x16xf32>, vector<64x16xf32> -> vector<64x16xf32>
    %8 = vector.broadcast %6 : vector<1x16xf32> to vector<64x16xf32>
    %9 = arith.addf %7, %8 : vector<64x16xf32>
    %10 = vector.broadcast %2 : vector<1x16xf32> to vector<64x16xf32>
    %11 = arith.mulf %9, %10 : vector<64x16xf32>
    %12 = vector.broadcast %3 : vector<1x16xf32> to vector<64x16xf32>
    %13 = arith.addf %11, %12 : vector<64x16xf32>
    %cst_6 = arith.constant 0.000000e+00 : f32
    %14 = vector.broadcast %cst_6 : f32 to vector<64x16xf32>
    %15 = arith.maximumf %13, %14 : vector<64x16xf32>
    %c0_7 = arith.constant 0 : index
    %c0_8 = arith.constant 0 : index
    %16 = vector.load %arg4[%c0_7, %c0_8] : memref<4x8xf32, #tpu.memory_space<vmem>>, vector<4x8xf32>
    %17 = vector.extract_strided_slice %0 {offsets = [0, 0], sizes = [1, 16], strides = [1, 1]} : vector<27x16xf32> to vector<1x16xf32>
    %cst_9 = arith.constant dense<0.000000e+00> : vector<4x16xf32>
    %18 = tpu.matmul %16, %1, %cst_9 {dimension_numbers = #tpu.dot_dimension_numbers<[1], [0], [0], [1], [0, 0, 1, 1], [], []>} : vector<4x8xf32>, vector<8x16xf32>, vector<4x16xf32> -> vector<4x16xf32>
    %19 = vector.broadcast %17 : vector<1x16xf32> to vector<4x16xf32>
    %20 = arith.addf %18, %19 : vector<4x16xf32>
    %21 = vector.broadcast %2 : vector<1x16xf32> to vector<4x16xf32>
    %22 = arith.mulf %20, %21 : vector<4x16xf32>
    %23 = vector.broadcast %3 : vector<1x16xf32> to vector<4x16xf32>
    %24 = arith.addf %22, %23 : vector<4x16xf32>
    %cst_10 = arith.constant 0.000000e+00 : f32
    %25 = vector.broadcast %cst_10 : f32 to vector<4x16xf32>
    %26 = arith.maximumf %24, %25 : vector<4x16xf32>
    %c9 = arith.constant 9 : index
    %c0_11 = arith.constant 0 : index
    %c0_12 = arith.constant 0 : index
    %27 = vector.load %arg7[%c9, %c0_11, %c0_12] : memref<13x16x16xf32, #tpu.memory_space<vmem>>, vector<1x16x16xf32>
    %28 = vector.shape_cast %27 : vector<1x16x16xf32> to vector<16x16xf32>
    %29 = vector.extract_strided_slice %0 {offsets = [15, 0], sizes = [1, 16], strides = [1, 1]} : vector<27x16xf32> to vector<1x16xf32>
    %cst_13 = arith.constant dense<0.000000e+00> : vector<4x16xf32>
    %30 = tpu.matmul %26, %28, %cst_13 {dimension_numbers = #tpu.dot_dimension_numbers<[1], [0], [0], [1], [0, 0, 1, 1], [], []>} : vector<4x16xf32>, vector<16x16xf32>, vector<4x16xf32> -> vector<4x16xf32>
    %31 = vector.broadcast %29 : vector<1x16xf32> to vector<4x16xf32>
    %32 = arith.addf %30, %31 : vector<4x16xf32>
    %cst_14 = arith.constant 0.000000e+00 : f32
    %33 = vector.broadcast %cst_14 : f32 to vector<4x16xf32>
    %34 = arith.maximumf %32, %33 : vector<4x16xf32>
    %c10 = arith.constant 10 : index
    %c0_15 = arith.constant 0 : index
    %c0_16 = arith.constant 0 : index
    %35 = vector.load %arg7[%c10, %c0_15, %c0_16] : memref<13x16x16xf32, #tpu.memory_space<vmem>>, vector<1x16x16xf32>
    %36 = vector.shape_cast %35 : vector<1x16x16xf32> to vector<16x16xf32>
    %37 = vector.extract_strided_slice %0 {offsets = [16, 0], sizes = [1, 16], strides = [1, 1]} : vector<27x16xf32> to vector<1x16xf32>
    %cst_17 = arith.constant dense<0.000000e+00> : vector<4x16xf32>
    %38 = tpu.matmul %34, %36, %cst_17 {dimension_numbers = #tpu.dot_dimension_numbers<[1], [0], [0], [1], [0, 0, 1, 1], [], []>} : vector<4x16xf32>, vector<16x16xf32>, vector<4x16xf32> -> vector<4x16xf32>
    %39 = vector.broadcast %37 : vector<1x16xf32> to vector<4x16xf32>
    %40 = arith.addf %38, %39 : vector<4x16xf32>
    %c11 = arith.constant 11 : index
    %c0_18 = arith.constant 0 : index
    %c0_19 = arith.constant 0 : index
    %41 = vector.load %arg7[%c11, %c0_18, %c0_19] : memref<13x16x16xf32, #tpu.memory_space<vmem>>, vector<1x16x16xf32>
    %42 = vector.shape_cast %41 : vector<1x16x16xf32> to vector<16x16xf32>
    %43 = vector.extract_strided_slice %0 {offsets = [17, 0], sizes = [1, 16], strides = [1, 1]} : vector<27x16xf32> to vector<1x16xf32>
    %cst_20 = arith.constant dense<0.000000e+00> : vector<4x16xf32>
    %44 = tpu.matmul %26, %42, %cst_20 {dimension_numbers = #tpu.dot_dimension_numbers<[1], [0], [0], [1], [0, 0, 1, 1], [], []>} : vector<4x16xf32>, vector<16x16xf32>, vector<4x16xf32> -> vector<4x16xf32>
    %45 = vector.broadcast %43 : vector<1x16xf32> to vector<4x16xf32>
    %46 = arith.addf %44, %45 : vector<4x16xf32>
    %cst_21 = arith.constant 0.000000e+00 : f32
    %47 = vector.broadcast %cst_21 : f32 to vector<4x16xf32>
    %48 = arith.maximumf %46, %47 : vector<4x16xf32>
    %c12 = arith.constant 12 : index
    %c0_22 = arith.constant 0 : index
    %c0_23 = arith.constant 0 : index
    %49 = vector.load %arg7[%c12, %c0_22, %c0_23] : memref<13x16x16xf32, #tpu.memory_space<vmem>>, vector<1x16x16xf32>
    %50 = vector.shape_cast %49 : vector<1x16x16xf32> to vector<16x16xf32>
    %51 = vector.extract_strided_slice %0 {offsets = [18, 0], sizes = [1, 16], strides = [1, 1]} : vector<27x16xf32> to vector<1x16xf32>
    %cst_24 = arith.constant dense<0.000000e+00> : vector<4x16xf32>
    %52 = tpu.matmul %48, %50, %cst_24 {dimension_numbers = #tpu.dot_dimension_numbers<[1], [0], [0], [1], [0, 0, 1, 1], [], []>} : vector<4x16xf32>, vector<16x16xf32>, vector<4x16xf32> -> vector<4x16xf32>
    %53 = vector.broadcast %51 : vector<1x16xf32> to vector<4x16xf32>
    %54 = arith.addf %52, %53 : vector<4x16xf32>
    %c0_25 = arith.constant 0 : index
    %c0_26 = arith.constant 0 : index
    %c0_27 = arith.constant 0 : index
    %55 = vector.load %arg1[%c0_25, %c0_26, %c0_27] : memref<8x8x3xf32, #tpu.memory_space<vmem>>, vector<8x8x3xf32>
    %56 = vector.shape_cast %55 : vector<8x8x3xf32> to vector<64x3xf32>
    %c0_28 = arith.constant 0 : index
    %c0_29 = arith.constant 0 : index
    %c0_30 = arith.constant 0 : index
    %57 = vector.load %arg6[%c0_28, %c0_29, %c0_30] : memref<3x3x16xf32, #tpu.memory_space<vmem>>, vector<1x3x16xf32>
    %58 = vector.shape_cast %57 : vector<1x3x16xf32> to vector<3x16xf32>
    %59 = vector.extract_strided_slice %0 {offsets = [3, 0], sizes = [1, 16], strides = [1, 1]} : vector<27x16xf32> to vector<1x16xf32>
    %60 = vector.extract_strided_slice %56 {offsets = [0, 0], sizes = [64, 1], strides = [1, 1]} : vector<64x3xf32> to vector<64x1xf32>
    %61 = vector.extract_strided_slice %58 {offsets = [0, 0], sizes = [1, 16], strides = [1, 1]} : vector<3x16xf32> to vector<1x16xf32>
    %62 = vector.broadcast %60 : vector<64x1xf32> to vector<64x16xf32>
    %63 = vector.broadcast %61 : vector<1x16xf32> to vector<64x16xf32>
    %64 = arith.mulf %62, %63 : vector<64x16xf32>
    %65 = vector.extract_strided_slice %56 {offsets = [0, 1], sizes = [64, 1], strides = [1, 1]} : vector<64x3xf32> to vector<64x1xf32>
    %66 = vector.extract_strided_slice %58 {offsets = [1, 0], sizes = [1, 16], strides = [1, 1]} : vector<3x16xf32> to vector<1x16xf32>
    %67 = vector.broadcast %65 : vector<64x1xf32> to vector<64x16xf32>
    %68 = vector.broadcast %66 : vector<1x16xf32> to vector<64x16xf32>
    %69 = arith.mulf %67, %68 : vector<64x16xf32>
    %70 = arith.addf %64, %69 : vector<64x16xf32>
    %71 = vector.extract_strided_slice %56 {offsets = [0, 2], sizes = [64, 1], strides = [1, 1]} : vector<64x3xf32> to vector<64x1xf32>
    %72 = vector.extract_strided_slice %58 {offsets = [2, 0], sizes = [1, 16], strides = [1, 1]} : vector<3x16xf32> to vector<1x16xf32>
    %73 = vector.broadcast %71 : vector<64x1xf32> to vector<64x16xf32>
    %74 = vector.broadcast %72 : vector<1x16xf32> to vector<64x16xf32>
    %75 = arith.mulf %73, %74 : vector<64x16xf32>
    %76 = arith.addf %70, %75 : vector<64x16xf32>
    %77 = vector.broadcast %59 : vector<1x16xf32> to vector<64x16xf32>
    %78 = arith.addf %76, %77 : vector<64x16xf32>
    %cst_31 = arith.constant 0.000000e+00 : f32
    %79 = vector.broadcast %cst_31 : f32 to vector<64x16xf32>
    %80 = arith.maximumf %78, %79 : vector<64x16xf32>
    %c0_32 = arith.constant 0 : index
    %c0_33 = arith.constant 0 : index
    %c0_34 = arith.constant 0 : index
    %81 = vector.load %arg7[%c0_32, %c0_33, %c0_34] : memref<13x16x16xf32, #tpu.memory_space<vmem>>, vector<1x16x16xf32>
    %82 = vector.shape_cast %81 : vector<1x16x16xf32> to vector<16x16xf32>
    %83 = vector.extract_strided_slice %0 {offsets = [4, 0], sizes = [1, 16], strides = [1, 1]} : vector<27x16xf32> to vector<1x16xf32>
    %cst_35 = arith.constant dense<0.000000e+00> : vector<64x16xf32>
    %84 = tpu.matmul %80, %82, %cst_35 {dimension_numbers = #tpu.dot_dimension_numbers<[1], [0], [0], [1], [0, 0, 1, 1], [], []>} : vector<64x16xf32>, vector<16x16xf32>, vector<64x16xf32> -> vector<64x16xf32>
    %85 = vector.broadcast %83 : vector<1x16xf32> to vector<64x16xf32>
    %86 = arith.addf %84, %85 : vector<64x16xf32>
    %c1 = arith.constant 1 : index
    %c0_36 = arith.constant 0 : index
    %c0_37 = arith.constant 0 : index
    %87 = vector.load %arg6[%c1, %c0_36, %c0_37] : memref<3x3x16xf32, #tpu.memory_space<vmem>>, vector<1x3x16xf32>
    %88 = vector.shape_cast %87 : vector<1x3x16xf32> to vector<3x16xf32>
    %89 = vector.extract_strided_slice %0 {offsets = [5, 0], sizes = [1, 16], strides = [1, 1]} : vector<27x16xf32> to vector<1x16xf32>
    %90 = vector.extract_strided_slice %56 {offsets = [0, 0], sizes = [64, 1], strides = [1, 1]} : vector<64x3xf32> to vector<64x1xf32>
    %91 = vector.extract_strided_slice %88 {offsets = [0, 0], sizes = [1, 16], strides = [1, 1]} : vector<3x16xf32> to vector<1x16xf32>
    %92 = vector.broadcast %90 : vector<64x1xf32> to vector<64x16xf32>
    %93 = vector.broadcast %91 : vector<1x16xf32> to vector<64x16xf32>
    %94 = arith.mulf %92, %93 : vector<64x16xf32>
    %95 = vector.extract_strided_slice %56 {offsets = [0, 1], sizes = [64, 1], strides = [1, 1]} : vector<64x3xf32> to vector<64x1xf32>
    %96 = vector.extract_strided_slice %88 {offsets = [1, 0], sizes = [1, 16], strides = [1, 1]} : vector<3x16xf32> to vector<1x16xf32>
    %97 = vector.broadcast %95 : vector<64x1xf32> to vector<64x16xf32>
    %98 = vector.broadcast %96 : vector<1x16xf32> to vector<64x16xf32>
    %99 = arith.mulf %97, %98 : vector<64x16xf32>
    %100 = arith.addf %94, %99 : vector<64x16xf32>
    %101 = vector.extract_strided_slice %56 {offsets = [0, 2], sizes = [64, 1], strides = [1, 1]} : vector<64x3xf32> to vector<64x1xf32>
    %102 = vector.extract_strided_slice %88 {offsets = [2, 0], sizes = [1, 16], strides = [1, 1]} : vector<3x16xf32> to vector<1x16xf32>
    %103 = vector.broadcast %101 : vector<64x1xf32> to vector<64x16xf32>
    %104 = vector.broadcast %102 : vector<1x16xf32> to vector<64x16xf32>
    %105 = arith.mulf %103, %104 : vector<64x16xf32>
    %106 = arith.addf %100, %105 : vector<64x16xf32>
    %107 = vector.broadcast %89 : vector<1x16xf32> to vector<64x16xf32>
    %108 = arith.addf %106, %107 : vector<64x16xf32>
    %cst_38 = arith.constant 0.000000e+00 : f32
    %109 = vector.broadcast %cst_38 : f32 to vector<64x16xf32>
    %110 = arith.maximumf %108, %109 : vector<64x16xf32>
    %c1_39 = arith.constant 1 : index
    %c0_40 = arith.constant 0 : index
    %c0_41 = arith.constant 0 : index
    %111 = vector.load %arg7[%c1_39, %c0_40, %c0_41] : memref<13x16x16xf32, #tpu.memory_space<vmem>>, vector<1x16x16xf32>
    %112 = vector.shape_cast %111 : vector<1x16x16xf32> to vector<16x16xf32>
    %113 = vector.extract_strided_slice %0 {offsets = [6, 0], sizes = [1, 16], strides = [1, 1]} : vector<27x16xf32> to vector<1x16xf32>
    %cst_42 = arith.constant dense<0.000000e+00> : vector<64x16xf32>
    %114 = tpu.matmul %110, %112, %cst_42 {dimension_numbers = #tpu.dot_dimension_numbers<[1], [0], [0], [1], [0, 0, 1, 1], [], []>} : vector<64x16xf32>, vector<16x16xf32>, vector<64x16xf32> -> vector<64x16xf32>
    %115 = vector.broadcast %113 : vector<1x16xf32> to vector<64x16xf32>
    %116 = arith.addf %114, %115 : vector<64x16xf32>
    %c5 = arith.constant 5 : index
    %c0_43 = arith.constant 0 : index
    %c0_44 = arith.constant 0 : index
    %117 = vector.load %arg7[%c5, %c0_43, %c0_44] : memref<13x16x16xf32, #tpu.memory_space<vmem>>, vector<1x16x16xf32>
    %118 = vector.shape_cast %117 : vector<1x16x16xf32> to vector<16x16xf32>
    %119 = vector.extract_strided_slice %0 {offsets = [11, 0], sizes = [1, 16], strides = [1, 1]} : vector<27x16xf32> to vector<1x16xf32>
    %cst_45 = arith.constant dense<0.000000e+00> : vector<64x16xf32>
    %120 = tpu.matmul %15, %118, %cst_45 {dimension_numbers = #tpu.dot_dimension_numbers<[1], [0], [0], [1], [0, 0, 1, 1], [], []>} : vector<64x16xf32>, vector<16x16xf32>, vector<64x16xf32> -> vector<64x16xf32>
    %121 = vector.broadcast %119 : vector<1x16xf32> to vector<64x16xf32>
    %122 = arith.addf %120, %121 : vector<64x16xf32>
    %cst_46 = arith.constant 0.000000e+00 : f32
    %123 = vector.broadcast %cst_46 : f32 to vector<64x16xf32>
    %124 = arith.maximumf %122, %123 : vector<64x16xf32>
    %c6 = arith.constant 6 : index
    %c0_47 = arith.constant 0 : index
    %c0_48 = arith.constant 0 : index
    %125 = vector.load %arg7[%c6, %c0_47, %c0_48] : memref<13x16x16xf32, #tpu.memory_space<vmem>>, vector<1x16x16xf32>
    %126 = vector.shape_cast %125 : vector<1x16x16xf32> to vector<16x16xf32>
    %127 = vector.extract_strided_slice %0 {offsets = [12, 0], sizes = [1, 16], strides = [1, 1]} : vector<27x16xf32> to vector<1x16xf32>
    %cst_49 = arith.constant dense<0.000000e+00> : vector<64x16xf32>
    %128 = tpu.matmul %124, %126, %cst_49 {dimension_numbers = #tpu.dot_dimension_numbers<[1], [0], [0], [1], [0, 0, 1, 1], [], []>} : vector<64x16xf32>, vector<16x16xf32>, vector<64x16xf32> -> vector<64x16xf32>
    %129 = vector.broadcast %127 : vector<1x16xf32> to vector<64x16xf32>
    %130 = arith.addf %128, %129 : vector<64x16xf32>
    %131 = vector.shape_cast %86 : vector<64x16xf32> to vector<8x8x16xf32>
    %132 = vector.shape_cast %116 : vector<64x16xf32> to vector<8x8x16xf32>
    %133 = vector.extract_strided_slice %55 {offsets = [0, 0, 0], sizes = [8, 1, 3], strides = [1, 1, 1]} : vector<8x8x3xf32> to vector<8x1x3xf32>
    %134 = vector.broadcast %133 : vector<8x1x3xf32> to vector<8x8x3xf32>
    %135 = arith.subf %134, %55 : vector<8x8x3xf32>
    %136 = math.absf %135 : vector<8x8x3xf32>
    %137 = vector.shape_cast %136 : vector<8x8x3xf32> to vector<8x1x8x3xf32>
    %138 = vector.extract_strided_slice %131 {offsets = [0, 0, 0], sizes = [8, 1, 16], strides = [1, 1, 1]} : vector<8x8x16xf32> to vector<8x1x16xf32>
    %139 = vector.broadcast %138 : vector<8x1x16xf32> to vector<8x8x16xf32>
    %140 = arith.subf %139, %132 : vector<8x8x16xf32>
    %141 = vector.shape_cast %140 : vector<8x8x16xf32> to vector<8x1x8x16xf32>
    %142 = vector.extract_strided_slice %55 {offsets = [0, 1, 0], sizes = [8, 1, 3], strides = [1, 1, 1]} : vector<8x8x3xf32> to vector<8x1x3xf32>
    %143 = vector.broadcast %142 : vector<8x1x3xf32> to vector<8x8x3xf32>
    %144 = arith.subf %143, %55 : vector<8x8x3xf32>
    %145 = math.absf %144 : vector<8x8x3xf32>
    %146 = vector.shape_cast %145 : vector<8x8x3xf32> to vector<8x1x8x3xf32>
    %147 = vector.extract_strided_slice %131 {offsets = [0, 1, 0], sizes = [8, 1, 16], strides = [1, 1, 1]} : vector<8x8x16xf32> to vector<8x1x16xf32>
    %148 = vector.broadcast %147 : vector<8x1x16xf32> to vector<8x8x16xf32>
    %149 = arith.subf %148, %132 : vector<8x8x16xf32>
    %150 = vector.shape_cast %149 : vector<8x8x16xf32> to vector<8x1x8x16xf32>
    %151 = vector.extract_strided_slice %55 {offsets = [0, 2, 0], sizes = [8, 1, 3], strides = [1, 1, 1]} : vector<8x8x3xf32> to vector<8x1x3xf32>
    %152 = vector.broadcast %151 : vector<8x1x3xf32> to vector<8x8x3xf32>
    %153 = arith.subf %152, %55 : vector<8x8x3xf32>
    %154 = math.absf %153 : vector<8x8x3xf32>
    %155 = vector.shape_cast %154 : vector<8x8x3xf32> to vector<8x1x8x3xf32>
    %156 = vector.extract_strided_slice %131 {offsets = [0, 2, 0], sizes = [8, 1, 16], strides = [1, 1, 1]} : vector<8x8x16xf32> to vector<8x1x16xf32>
    %157 = vector.broadcast %156 : vector<8x1x16xf32> to vector<8x8x16xf32>
    %158 = arith.subf %157, %132 : vector<8x8x16xf32>
    %159 = vector.shape_cast %158 : vector<8x8x16xf32> to vector<8x1x8x16xf32>
    %160 = vector.extract_strided_slice %55 {offsets = [0, 3, 0], sizes = [8, 1, 3], strides = [1, 1, 1]} : vector<8x8x3xf32> to vector<8x1x3xf32>
    %161 = vector.broadcast %160 : vector<8x1x3xf32> to vector<8x8x3xf32>
    %162 = arith.subf %161, %55 : vector<8x8x3xf32>
    %163 = math.absf %162 : vector<8x8x3xf32>
    %164 = vector.shape_cast %163 : vector<8x8x3xf32> to vector<8x1x8x3xf32>
    %165 = vector.extract_strided_slice %131 {offsets = [0, 3, 0], sizes = [8, 1, 16], strides = [1, 1, 1]} : vector<8x8x16xf32> to vector<8x1x16xf32>
    %166 = vector.broadcast %165 : vector<8x1x16xf32> to vector<8x8x16xf32>
    %167 = arith.subf %166, %132 : vector<8x8x16xf32>
    %168 = vector.shape_cast %167 : vector<8x8x16xf32> to vector<8x1x8x16xf32>
    %169 = vector.extract_strided_slice %55 {offsets = [0, 4, 0], sizes = [8, 1, 3], strides = [1, 1, 1]} : vector<8x8x3xf32> to vector<8x1x3xf32>
    %170 = vector.broadcast %169 : vector<8x1x3xf32> to vector<8x8x3xf32>
    %171 = arith.subf %170, %55 : vector<8x8x3xf32>
    %172 = math.absf %171 : vector<8x8x3xf32>
    %173 = vector.shape_cast %172 : vector<8x8x3xf32> to vector<8x1x8x3xf32>
    %174 = vector.extract_strided_slice %131 {offsets = [0, 4, 0], sizes = [8, 1, 16], strides = [1, 1, 1]} : vector<8x8x16xf32> to vector<8x1x16xf32>
    %175 = vector.broadcast %174 : vector<8x1x16xf32> to vector<8x8x16xf32>
    %176 = arith.subf %175, %132 : vector<8x8x16xf32>
    %177 = vector.shape_cast %176 : vector<8x8x16xf32> to vector<8x1x8x16xf32>
    %178 = vector.extract_strided_slice %55 {offsets = [0, 5, 0], sizes = [8, 1, 3], strides = [1, 1, 1]} : vector<8x8x3xf32> to vector<8x1x3xf32>
    %179 = vector.broadcast %178 : vector<8x1x3xf32> to vector<8x8x3xf32>
    %180 = arith.subf %179, %55 : vector<8x8x3xf32>
    %181 = math.absf %180 : vector<8x8x3xf32>
    %182 = vector.shape_cast %181 : vector<8x8x3xf32> to vector<8x1x8x3xf32>
    %183 = vector.extract_strided_slice %131 {offsets = [0, 5, 0], sizes = [8, 1, 16], strides = [1, 1, 1]} : vector<8x8x16xf32> to vector<8x1x16xf32>
    %184 = vector.broadcast %183 : vector<8x1x16xf32> to vector<8x8x16xf32>
    %185 = arith.subf %184, %132 : vector<8x8x16xf32>
    %186 = vector.shape_cast %185 : vector<8x8x16xf32> to vector<8x1x8x16xf32>
    %187 = vector.extract_strided_slice %55 {offsets = [0, 6, 0], sizes = [8, 1, 3], strides = [1, 1, 1]} : vector<8x8x3xf32> to vector<8x1x3xf32>
    %188 = vector.broadcast %187 : vector<8x1x3xf32> to vector<8x8x3xf32>
    %189 = arith.subf %188, %55 : vector<8x8x3xf32>
    %190 = math.absf %189 : vector<8x8x3xf32>
    %191 = vector.shape_cast %190 : vector<8x8x3xf32> to vector<8x1x8x3xf32>
    %192 = vector.extract_strided_slice %131 {offsets = [0, 6, 0], sizes = [8, 1, 16], strides = [1, 1, 1]} : vector<8x8x16xf32> to vector<8x1x16xf32>
    %193 = vector.broadcast %192 : vector<8x1x16xf32> to vector<8x8x16xf32>
    %194 = arith.subf %193, %132 : vector<8x8x16xf32>
    %195 = vector.shape_cast %194 : vector<8x8x16xf32> to vector<8x1x8x16xf32>
    %196 = vector.extract_strided_slice %55 {offsets = [0, 7, 0], sizes = [8, 1, 3], strides = [1, 1, 1]} : vector<8x8x3xf32> to vector<8x1x3xf32>
    %197 = vector.broadcast %196 : vector<8x1x3xf32> to vector<8x8x3xf32>
    %198 = arith.subf %197, %55 : vector<8x8x3xf32>
    %199 = math.absf %198 : vector<8x8x3xf32>
    %200 = vector.shape_cast %199 : vector<8x8x3xf32> to vector<8x1x8x3xf32>
    %201 = vector.extract_strided_slice %131 {offsets = [0, 7, 0], sizes = [8, 1, 16], strides = [1, 1, 1]} : vector<8x8x16xf32> to vector<8x1x16xf32>
    %202 = vector.broadcast %201 : vector<8x1x16xf32> to vector<8x8x16xf32>
    %203 = arith.subf %202, %132 : vector<8x8x16xf32>
    %204 = vector.shape_cast %203 : vector<8x8x16xf32> to vector<8x1x8x16xf32>
    %205 = tpu.concatenate %137, %146, %155, %164, %173, %182, %191, %200 in 1 : vector<8x1x8x3xf32>, vector<8x1x8x3xf32>, vector<8x1x8x3xf32>, vector<8x1x8x3xf32>, vector<8x1x8x3xf32>, vector<8x1x8x3xf32>, vector<8x1x8x3xf32>, vector<8x1x8x3xf32> -> vector<8x8x8x3xf32>
    %206 = vector.shape_cast %205 : vector<8x8x8x3xf32> to vector<512x3xf32>
    %207 = tpu.concatenate %141, %150, %159, %168, %177, %186, %195, %204 in 1 : vector<8x1x8x16xf32>, vector<8x1x8x16xf32>, vector<8x1x8x16xf32>, vector<8x1x8x16xf32>, vector<8x1x8x16xf32>, vector<8x1x8x16xf32>, vector<8x1x8x16xf32>, vector<8x1x8x16xf32> -> vector<8x8x8x16xf32>
    %208 = vector.shape_cast %207 : vector<8x8x8x16xf32> to vector<512x16xf32>
    %c2 = arith.constant 2 : index
    %c0_50 = arith.constant 0 : index
    %c0_51 = arith.constant 0 : index
    %209 = vector.load %arg6[%c2, %c0_50, %c0_51] : memref<3x3x16xf32, #tpu.memory_space<vmem>>, vector<1x3x16xf32>
    %210 = vector.shape_cast %209 : vector<1x3x16xf32> to vector<3x16xf32>
    %211 = vector.extract_strided_slice %0 {offsets = [7, 0], sizes = [1, 16], strides = [1, 1]} : vector<27x16xf32> to vector<1x16xf32>
    %212 = vector.extract_strided_slice %206 {offsets = [0, 0], sizes = [512, 1], strides = [1, 1]} : vector<512x3xf32> to vector<512x1xf32>
    %213 = vector.extract_strided_slice %210 {offsets = [0, 0], sizes = [1, 16], strides = [1, 1]} : vector<3x16xf32> to vector<1x16xf32>
    %214 = vector.broadcast %212 : vector<512x1xf32> to vector<512x16xf32>
    %215 = vector.broadcast %213 : vector<1x16xf32> to vector<512x16xf32>
    %216 = arith.mulf %214, %215 : vector<512x16xf32>
    %217 = vector.extract_strided_slice %206 {offsets = [0, 1], sizes = [512, 1], strides = [1, 1]} : vector<512x3xf32> to vector<512x1xf32>
    %218 = vector.extract_strided_slice %210 {offsets = [1, 0], sizes = [1, 16], strides = [1, 1]} : vector<3x16xf32> to vector<1x16xf32>
    %219 = vector.broadcast %217 : vector<512x1xf32> to vector<512x16xf32>
    %220 = vector.broadcast %218 : vector<1x16xf32> to vector<512x16xf32>
    %221 = arith.mulf %219, %220 : vector<512x16xf32>
    %222 = arith.addf %216, %221 : vector<512x16xf32>
    %223 = vector.extract_strided_slice %206 {offsets = [0, 2], sizes = [512, 1], strides = [1, 1]} : vector<512x3xf32> to vector<512x1xf32>
    %224 = vector.extract_strided_slice %210 {offsets = [2, 0], sizes = [1, 16], strides = [1, 1]} : vector<3x16xf32> to vector<1x16xf32>
    %225 = vector.broadcast %223 : vector<512x1xf32> to vector<512x16xf32>
    %226 = vector.broadcast %224 : vector<1x16xf32> to vector<512x16xf32>
    %227 = arith.mulf %225, %226 : vector<512x16xf32>
    %228 = arith.addf %222, %227 : vector<512x16xf32>
    %229 = vector.broadcast %211 : vector<1x16xf32> to vector<512x16xf32>
    %230 = arith.addf %228, %229 : vector<512x16xf32>
    %cst_52 = arith.constant 0.000000e+00 : f32
    %231 = vector.broadcast %cst_52 : f32 to vector<512x16xf32>
    %232 = arith.maximumf %230, %231 : vector<512x16xf32>
    %c2_53 = arith.constant 2 : index
    %c0_54 = arith.constant 0 : index
    %c0_55 = arith.constant 0 : index
    %233 = vector.load %arg7[%c2_53, %c0_54, %c0_55] : memref<13x16x16xf32, #tpu.memory_space<vmem>>, vector<1x16x16xf32>
    %234 = vector.shape_cast %233 : vector<1x16x16xf32> to vector<16x16xf32>
    %235 = vector.extract_strided_slice %0 {offsets = [8, 0], sizes = [1, 16], strides = [1, 1]} : vector<27x16xf32> to vector<1x16xf32>
    %cst_56 = arith.constant dense<0.000000e+00> : vector<512x16xf32>
    %236 = tpu.matmul %232, %234, %cst_56 {dimension_numbers = #tpu.dot_dimension_numbers<[1], [0], [0], [1], [0, 0, 1, 1], [], []>} : vector<512x16xf32>, vector<16x16xf32>, vector<512x16xf32> -> vector<512x16xf32>
    %237 = vector.broadcast %235 : vector<1x16xf32> to vector<512x16xf32>
    %238 = arith.addf %236, %237 : vector<512x16xf32>
    %239 = arith.addf %208, %238 : vector<512x16xf32>
    %cst_57 = arith.constant 2.500000e-01 : f32
    %240 = vector.broadcast %cst_57 : f32 to vector<512x16xf32>
    %241 = arith.mulf %239, %240 : vector<512x16xf32>
    %c3 = arith.constant 3 : index
    %c0_58 = arith.constant 0 : index
    %c0_59 = arith.constant 0 : index
    %242 = vector.load %arg7[%c3, %c0_58, %c0_59] : memref<13x16x16xf32, #tpu.memory_space<vmem>>, vector<1x16x16xf32>
    %243 = vector.shape_cast %242 : vector<1x16x16xf32> to vector<16x16xf32>
    %244 = vector.extract_strided_slice %0 {offsets = [9, 0], sizes = [1, 16], strides = [1, 1]} : vector<27x16xf32> to vector<1x16xf32>
    %cst_60 = arith.constant dense<0.000000e+00> : vector<512x16xf32>
    %245 = tpu.matmul %241, %243, %cst_60 {dimension_numbers = #tpu.dot_dimension_numbers<[1], [0], [0], [1], [0, 0, 1, 1], [], []>} : vector<512x16xf32>, vector<16x16xf32>, vector<512x16xf32> -> vector<512x16xf32>
    %246 = vector.broadcast %244 : vector<1x16xf32> to vector<512x16xf32>
    %247 = arith.addf %245, %246 : vector<512x16xf32>
    %cst_61 = arith.constant 0.000000e+00 : f32
    %248 = vector.broadcast %cst_61 : f32 to vector<512x16xf32>
    %249 = arith.maximumf %247, %248 : vector<512x16xf32>
    %c4 = arith.constant 4 : index
    %c0_62 = arith.constant 0 : index
    %c0_63 = arith.constant 0 : index
    %250 = vector.load %arg7[%c4, %c0_62, %c0_63] : memref<13x16x16xf32, #tpu.memory_space<vmem>>, vector<1x16x16xf32>
    %251 = vector.shape_cast %250 : vector<1x16x16xf32> to vector<16x16xf32>
    %252 = vector.extract_strided_slice %0 {offsets = [10, 0], sizes = [1, 16], strides = [1, 1]} : vector<27x16xf32> to vector<1x16xf32>
    %cst_64 = arith.constant dense<0.000000e+00> : vector<512x16xf32>
    %253 = tpu.matmul %249, %251, %cst_64 {dimension_numbers = #tpu.dot_dimension_numbers<[1], [0], [0], [1], [0, 0, 1, 1], [], []>} : vector<512x16xf32>, vector<16x16xf32>, vector<512x16xf32> -> vector<512x16xf32>
    %254 = vector.broadcast %252 : vector<1x16xf32> to vector<512x16xf32>
    %255 = arith.addf %253, %254 : vector<512x16xf32>
    %256 = vector.shape_cast %255 : vector<512x16xf32> to vector<64x8x16xf32>
    %257 = vector.extract_strided_slice %0 {offsets = [7, 0], sizes = [1, 16], strides = [1, 1]} : vector<27x16xf32> to vector<1x16xf32>
    %cst_65 = arith.constant 0.000000e+00 : f32
    %258 = vector.broadcast %cst_65 : f32 to vector<1x16xf32>
    %259 = arith.maximumf %257, %258 : vector<1x16xf32>
    %c2_66 = arith.constant 2 : index
    %c0_67 = arith.constant 0 : index
    %c0_68 = arith.constant 0 : index
    %260 = vector.load %arg7[%c2_66, %c0_67, %c0_68] : memref<13x16x16xf32, #tpu.memory_space<vmem>>, vector<1x16x16xf32>
    %261 = vector.shape_cast %260 : vector<1x16x16xf32> to vector<16x16xf32>
    %262 = vector.extract_strided_slice %0 {offsets = [8, 0], sizes = [1, 16], strides = [1, 1]} : vector<27x16xf32> to vector<1x16xf32>
    %cst_69 = arith.constant dense<0.000000e+00> : vector<1x16xf32>
    %263 = tpu.matmul %259, %261, %cst_69 {dimension_numbers = #tpu.dot_dimension_numbers<[1], [0], [0], [1], [0, 0, 1, 1], [], []>} : vector<1x16xf32>, vector<16x16xf32>, vector<1x16xf32> -> vector<1x16xf32>
    %264 = arith.addf %263, %262 : vector<1x16xf32>
    %265 = arith.subf %86, %116 : vector<64x16xf32>
    %266 = vector.broadcast %264 : vector<1x16xf32> to vector<64x16xf32>
    %267 = arith.addf %265, %266 : vector<64x16xf32>
    %cst_70 = arith.constant 2.500000e-01 : f32
    %268 = vector.broadcast %cst_70 : f32 to vector<64x16xf32>
    %269 = arith.mulf %267, %268 : vector<64x16xf32>
    %c3_71 = arith.constant 3 : index
    %c0_72 = arith.constant 0 : index
    %c0_73 = arith.constant 0 : index
    %270 = vector.load %arg7[%c3_71, %c0_72, %c0_73] : memref<13x16x16xf32, #tpu.memory_space<vmem>>, vector<1x16x16xf32>
    %271 = vector.shape_cast %270 : vector<1x16x16xf32> to vector<16x16xf32>
    %272 = vector.extract_strided_slice %0 {offsets = [9, 0], sizes = [1, 16], strides = [1, 1]} : vector<27x16xf32> to vector<1x16xf32>
    %cst_74 = arith.constant dense<0.000000e+00> : vector<64x16xf32>
    %273 = tpu.matmul %269, %271, %cst_74 {dimension_numbers = #tpu.dot_dimension_numbers<[1], [0], [0], [1], [0, 0, 1, 1], [], []>} : vector<64x16xf32>, vector<16x16xf32>, vector<64x16xf32> -> vector<64x16xf32>
    %274 = vector.broadcast %272 : vector<1x16xf32> to vector<64x16xf32>
    %275 = arith.addf %273, %274 : vector<64x16xf32>
    %cst_75 = arith.constant 0.000000e+00 : f32
    %276 = vector.broadcast %cst_75 : f32 to vector<64x16xf32>
    %277 = arith.maximumf %275, %276 : vector<64x16xf32>
    %c4_76 = arith.constant 4 : index
    %c0_77 = arith.constant 0 : index
    %c0_78 = arith.constant 0 : index
    %278 = vector.load %arg7[%c4_76, %c0_77, %c0_78] : memref<13x16x16xf32, #tpu.memory_space<vmem>>, vector<1x16x16xf32>
    %279 = vector.shape_cast %278 : vector<1x16x16xf32> to vector<16x16xf32>
    %280 = vector.extract_strided_slice %0 {offsets = [10, 0], sizes = [1, 16], strides = [1, 1]} : vector<27x16xf32> to vector<1x16xf32>
    %cst_79 = arith.constant dense<0.000000e+00> : vector<64x16xf32>
    %281 = tpu.matmul %277, %279, %cst_79 {dimension_numbers = #tpu.dot_dimension_numbers<[1], [0], [0], [1], [0, 0, 1, 1], [], []>} : vector<64x16xf32>, vector<16x16xf32>, vector<64x16xf32> -> vector<64x16xf32>
    %282 = vector.broadcast %280 : vector<1x16xf32> to vector<64x16xf32>
    %283 = arith.addf %281, %282 : vector<64x16xf32>
    %cst_80 = arith.constant dense<0xFF800000> : vector<64x16xf32>
    %284 = vector.multi_reduction <maximumf>, %256, %cst_80 [1] : vector<64x8x16xf32> to vector<64x16xf32>
    %285 = vector.shape_cast %284 : vector<64x16xf32> to vector<64x1x16xf32>
    %286 = vector.broadcast %285 : vector<64x1x16xf32> to vector<64x8x16xf32>
    %287 = arith.subf %256, %286 : vector<64x8x16xf32>
    %288 = math.exp %287 : vector<64x8x16xf32>
    %cst_81 = arith.constant dense<0.000000e+00> : vector<64x16xf32>
    %289 = vector.multi_reduction <add>, %288, %cst_81 [1] : vector<64x8x16xf32> to vector<64x16xf32>
    %cst_82 = arith.constant dense<0xFF800000> : vector<64x16xf32>
    %290 = vector.multi_reduction <maximumf>, %256, %cst_82 [1] : vector<64x8x16xf32> to vector<64x16xf32>
    %291 = arith.subf %283, %290 : vector<64x16xf32>
    %292 = math.exp %291 : vector<64x16xf32>
    %293 = tpu.reciprocal %289 {approx = true} : vector<64x16xf32> -> vector<64x16xf32>
    %294 = arith.mulf %292, %293 : vector<64x16xf32>
    %295 = arith.mulf %294, %130 : vector<64x16xf32>
    %c7 = arith.constant 7 : index
    %c0_83 = arith.constant 0 : index
    %c0_84 = arith.constant 0 : index
    %296 = vector.load %arg7[%c7, %c0_83, %c0_84] : memref<13x16x16xf32, #tpu.memory_space<vmem>>, vector<1x16x16xf32>
    %297 = vector.shape_cast %296 : vector<1x16x16xf32> to vector<16x16xf32>
    %298 = vector.extract_strided_slice %0 {offsets = [13, 0], sizes = [1, 16], strides = [1, 1]} : vector<27x16xf32> to vector<1x16xf32>
    %cst_85 = arith.constant dense<0.000000e+00> : vector<64x16xf32>
    %299 = tpu.matmul %15, %297, %cst_85 {dimension_numbers = #tpu.dot_dimension_numbers<[1], [0], [0], [1], [0, 0, 1, 1], [], []>} : vector<64x16xf32>, vector<16x16xf32>, vector<64x16xf32> -> vector<64x16xf32>
    %300 = vector.broadcast %298 : vector<1x16xf32> to vector<64x16xf32>
    %301 = arith.addf %299, %300 : vector<64x16xf32>
    %cst_86 = arith.constant 0.000000e+00 : f32
    %302 = vector.broadcast %cst_86 : f32 to vector<64x16xf32>
    %303 = arith.maximumf %301, %302 : vector<64x16xf32>
    %c8 = arith.constant 8 : index
    %c0_87 = arith.constant 0 : index
    %c0_88 = arith.constant 0 : index
    %304 = vector.load %arg7[%c8, %c0_87, %c0_88] : memref<13x16x16xf32, #tpu.memory_space<vmem>>, vector<1x16x16xf32>
    %305 = vector.shape_cast %304 : vector<1x16x16xf32> to vector<16x16xf32>
    %306 = vector.extract_strided_slice %0 {offsets = [14, 0], sizes = [1, 16], strides = [1, 1]} : vector<27x16xf32> to vector<1x16xf32>
    %cst_89 = arith.constant dense<0.000000e+00> : vector<64x16xf32>
    %307 = tpu.matmul %303, %305, %cst_89 {dimension_numbers = #tpu.dot_dimension_numbers<[1], [0], [0], [1], [0, 0, 1, 1], [], []>} : vector<64x16xf32>, vector<16x16xf32>, vector<64x16xf32> -> vector<64x16xf32>
    %308 = vector.broadcast %306 : vector<1x16xf32> to vector<64x16xf32>
    %309 = arith.addf %307, %308 : vector<64x16xf32>
    %cst_90 = arith.constant dense<0.000000e+00> : vector<64x4xf32>
    %310 = tpu.matmul %309, %40, %cst_90 {dimension_numbers = #tpu.dot_dimension_numbers<[1], [1], [0], [0], [0, 0, 1, 0], [], []>} : vector<64x16xf32>, vector<4x16xf32>, vector<64x4xf32> -> vector<64x4xf32>
    %cst_91 = arith.constant 2.500000e-01 : f32
    %311 = vector.broadcast %cst_91 : f32 to vector<64x4xf32>
    %312 = arith.mulf %310, %311 : vector<64x4xf32>
    %cst_92 = arith.constant dense<0.000000e+00> : vector<64x16xf32>
    %313 = tpu.matmul %312, %54, %cst_92 {dimension_numbers = #tpu.dot_dimension_numbers<[1], [0], [0], [1], [0, 0, 1, 1], [], []>} : vector<64x4xf32>, vector<4x16xf32>, vector<64x16xf32> -> vector<64x16xf32>
    %c0_93 = arith.constant 0 : index
    %c0_94 = arith.constant 0 : index
    %c0_95 = arith.constant 0 : index
    %314 = vector.load %arg3[%c0_93, %c0_94, %c0_95] : memref<8x8x1xf32, #tpu.memory_space<vmem>>, vector<8x8x1xf32>
    %315 = vector.shape_cast %314 : vector<8x8x1xf32> to vector<64x1xf32>
    %316 = vector.extract_strided_slice %0 {offsets = [19, 0], sizes = [1, 16], strides = [1, 1]} : vector<27x16xf32> to vector<1x16xf32>
    %317 = vector.broadcast %316 : vector<1x16xf32> to vector<64x16xf32>
    %318 = arith.mulf %295, %317 : vector<64x16xf32>
    %319 = vector.extract_strided_slice %0 {offsets = [21, 0], sizes = [1, 16], strides = [1, 1]} : vector<27x16xf32> to vector<1x16xf32>
    %320 = vector.broadcast %319 : vector<1x16xf32> to vector<64x16xf32>
    %321 = arith.addf %318, %320 : vector<64x16xf32>
    %cst_96 = arith.constant 0.000000e+00 : f32
    %322 = vector.broadcast %cst_96 : f32 to vector<64x16xf32>
    %323 = arith.maximumf %321, %322 : vector<64x16xf32>
    %324 = vector.extract_strided_slice %0 {offsets = [20, 0], sizes = [1, 16], strides = [1, 1]} : vector<27x16xf32> to vector<1x16xf32>
    %325 = vector.broadcast %324 : vector<1x16xf32> to vector<64x16xf32>
    %326 = arith.mulf %15, %325 : vector<64x16xf32>
    %327 = vector.extract_strided_slice %0 {offsets = [22, 0], sizes = [1, 16], strides = [1, 1]} : vector<27x16xf32> to vector<1x16xf32>
    %328 = vector.broadcast %327 : vector<1x16xf32> to vector<64x16xf32>
    %329 = arith.addf %326, %328 : vector<64x16xf32>
    %cst_97 = arith.constant 0.000000e+00 : f32
    %330 = vector.broadcast %cst_97 : f32 to vector<64x16xf32>
    %331 = arith.maximumf %329, %330 : vector<64x16xf32>
    %332 = vector.broadcast %315 : vector<64x1xf32> to vector<64x16xf32>
    %333 = arith.mulf %313, %332 : vector<64x16xf32>
    %334 = vector.extract_strided_slice %0 {offsets = [23, 0], sizes = [1, 16], strides = [1, 1]} : vector<27x16xf32> to vector<1x16xf32>
    %335 = vector.broadcast %334 : vector<1x16xf32> to vector<64x16xf32>
    %336 = arith.mulf %333, %335 : vector<64x16xf32>
    %337 = vector.extract_strided_slice %0 {offsets = [25, 0], sizes = [1, 16], strides = [1, 1]} : vector<27x16xf32> to vector<1x16xf32>
    %338 = vector.broadcast %337 : vector<1x16xf32> to vector<64x16xf32>
    %339 = arith.addf %336, %338 : vector<64x16xf32>
    %cst_98 = arith.constant 0.000000e+00 : f32
    %340 = vector.broadcast %cst_98 : f32 to vector<64x16xf32>
    %341 = arith.maximumf %339, %340 : vector<64x16xf32>
    %342 = vector.broadcast %315 : vector<64x1xf32> to vector<64x16xf32>
    %343 = arith.mulf %15, %342 : vector<64x16xf32>
    %344 = vector.extract_strided_slice %0 {offsets = [24, 0], sizes = [1, 16], strides = [1, 1]} : vector<27x16xf32> to vector<1x16xf32>
    %345 = vector.broadcast %344 : vector<1x16xf32> to vector<64x16xf32>
    %346 = arith.mulf %343, %345 : vector<64x16xf32>
    %347 = vector.extract_strided_slice %0 {offsets = [26, 0], sizes = [1, 16], strides = [1, 1]} : vector<27x16xf32> to vector<1x16xf32>
    %348 = vector.broadcast %347 : vector<1x16xf32> to vector<64x16xf32>
    %349 = arith.addf %346, %348 : vector<64x16xf32>
    %cst_99 = arith.constant 0.000000e+00 : f32
    %350 = vector.broadcast %cst_99 : f32 to vector<64x16xf32>
    %351 = arith.maximumf %349, %350 : vector<64x16xf32>
    %c0_100 = arith.constant 0 : index
    %c0_101 = arith.constant 0 : index
    %c0_102 = arith.constant 0 : index
    %352 = vector.load %arg9[%c0_100, %c0_101, %c0_102] : memref<2x64x64xf32, #tpu.memory_space<vmem>>, vector<1x64x64xf32>
    %353 = vector.shape_cast %352 : vector<1x64x64xf32> to vector<64x64xf32>
    %c1_103 = arith.constant 1 : index
    %c0_104 = arith.constant 0 : index
    %c0_105 = arith.constant 0 : index
    %354 = vector.load %arg9[%c1_103, %c0_104, %c0_105] : memref<2x64x64xf32, #tpu.memory_space<vmem>>, vector<1x64x64xf32>
    %355 = vector.shape_cast %354 : vector<1x64x64xf32> to vector<64x64xf32>
    %c0_106 = arith.constant 0 : index
    %c0_107 = arith.constant 0 : index
    %356 = vector.load %arg10[%c0_106, %c0_107] : memref<4x64xf32, #tpu.memory_space<vmem>>, vector<4x64xf32>
    %357 = vector.extract_strided_slice %353 {offsets = [0, 0], sizes = [16, 64], strides = [1, 1]} : vector<64x64xf32> to vector<16x64xf32>
    %cst_108 = arith.constant dense<0.000000e+00> : vector<64x64xf32>
    %358 = tpu.matmul %323, %357, %cst_108 {dimension_numbers = #tpu.dot_dimension_numbers<[1], [0], [0], [1], [0, 0, 1, 1], [], []>} : vector<64x16xf32>, vector<16x64xf32>, vector<64x64xf32> -> vector<64x64xf32>
    %359 = vector.extract_strided_slice %353 {offsets = [16, 0], sizes = [16, 64], strides = [1, 1]} : vector<64x64xf32> to vector<16x64xf32>
    %cst_109 = arith.constant dense<0.000000e+00> : vector<64x64xf32>
    %360 = tpu.matmul %331, %359, %cst_109 {dimension_numbers = #tpu.dot_dimension_numbers<[1], [0], [0], [1], [0, 0, 1, 1], [], []>} : vector<64x16xf32>, vector<16x64xf32>, vector<64x64xf32> -> vector<64x64xf32>
    %361 = arith.addf %358, %360 : vector<64x64xf32>
    %362 = vector.extract_strided_slice %353 {offsets = [32, 0], sizes = [16, 64], strides = [1, 1]} : vector<64x64xf32> to vector<16x64xf32>
    %cst_110 = arith.constant dense<0.000000e+00> : vector<64x64xf32>
    %363 = tpu.matmul %341, %362, %cst_110 {dimension_numbers = #tpu.dot_dimension_numbers<[1], [0], [0], [1], [0, 0, 1, 1], [], []>} : vector<64x16xf32>, vector<16x64xf32>, vector<64x64xf32> -> vector<64x64xf32>
    %364 = arith.addf %361, %363 : vector<64x64xf32>
    %365 = vector.extract_strided_slice %353 {offsets = [48, 0], sizes = [16, 64], strides = [1, 1]} : vector<64x64xf32> to vector<16x64xf32>
    %cst_111 = arith.constant dense<0.000000e+00> : vector<64x64xf32>
    %366 = tpu.matmul %351, %365, %cst_111 {dimension_numbers = #tpu.dot_dimension_numbers<[1], [0], [0], [1], [0, 0, 1, 1], [], []>} : vector<64x16xf32>, vector<16x64xf32>, vector<64x64xf32> -> vector<64x64xf32>
    %367 = arith.addf %364, %366 : vector<64x64xf32>
    %368 = vector.extract_strided_slice %356 {offsets = [0, 0], sizes = [1, 64], strides = [1, 1]} : vector<4x64xf32> to vector<1x64xf32>
    %369 = vector.broadcast %368 : vector<1x64xf32> to vector<64x64xf32>
    %370 = arith.addf %367, %369 : vector<64x64xf32>
    %cst_112 = arith.constant 0.000000e+00 : f32
    %371 = vector.broadcast %cst_112 : f32 to vector<64x64xf32>
    %372 = arith.maximumf %370, %371 : vector<64x64xf32>
    %373 = vector.extract_strided_slice %356 {offsets = [1, 0], sizes = [1, 64], strides = [1, 1]} : vector<4x64xf32> to vector<1x64xf32>
    %cst_113 = arith.constant dense<0.000000e+00> : vector<64x64xf32>
    %374 = tpu.matmul %372, %355, %cst_113 {dimension_numbers = #tpu.dot_dimension_numbers<[1], [0], [0], [1], [0, 0, 1, 1], [], []>} : vector<64x64xf32>, vector<64x64xf32>, vector<64x64xf32> -> vector<64x64xf32>
    %375 = vector.broadcast %373 : vector<1x64xf32> to vector<64x64xf32>
    %376 = arith.addf %374, %375 : vector<64x64xf32>
    %377 = vector.shape_cast %376 : vector<64x64xf32> to vector<8x8x64xf32>
    %cst_114 = arith.constant dense<0.000000e+00> : vector<8x64xf32>
    %378 = vector.multi_reduction <add>, %377, %cst_114 [1] : vector<8x8x64xf32> to vector<8x64xf32>
    %379 = vector.shape_cast %323 : vector<64x16xf32> to vector<8x8x16xf32>
    %cst_115 = arith.constant dense<0xFF800000> : vector<8x16xf32>
    %380 = vector.multi_reduction <maximumf>, %379, %cst_115 [1] : vector<8x8x16xf32> to vector<8x16xf32>
    %381 = vector.shape_cast %331 : vector<64x16xf32> to vector<8x8x16xf32>
    %cst_116 = arith.constant dense<0xFF800000> : vector<8x16xf32>
    %382 = vector.multi_reduction <maximumf>, %381, %cst_116 [1] : vector<8x8x16xf32> to vector<8x16xf32>
    %383 = vector.shape_cast %341 : vector<64x16xf32> to vector<8x8x16xf32>
    %cst_117 = arith.constant dense<0xFF800000> : vector<8x16xf32>
    %384 = vector.multi_reduction <maximumf>, %383, %cst_117 [1] : vector<8x8x16xf32> to vector<8x16xf32>
    %385 = vector.shape_cast %351 : vector<64x16xf32> to vector<8x8x16xf32>
    %cst_118 = arith.constant dense<0xFF800000> : vector<8x16xf32>
    %386 = vector.multi_reduction <maximumf>, %385, %cst_118 [1] : vector<8x8x16xf32> to vector<8x16xf32>
    %387 = tpu.concatenate %380, %382, %384, %386 in 1 : vector<8x16xf32>, vector<8x16xf32>, vector<8x16xf32>, vector<8x16xf32> -> vector<8x64xf32>
    %388 = arith.addf %378, %387 : vector<8x64xf32>
    %389 = vector.extract_strided_slice %356 {offsets = [2, 0], sizes = [1, 64], strides = [1, 1]} : vector<4x64xf32> to vector<1x64xf32>
    %390 = vector.broadcast %389 : vector<1x64xf32> to vector<8x64xf32>
    %391 = arith.mulf %388, %390 : vector<8x64xf32>
    %392 = vector.extract_strided_slice %356 {offsets = [3, 0], sizes = [1, 64], strides = [1, 1]} : vector<4x64xf32> to vector<1x64xf32>
    %393 = vector.broadcast %392 : vector<1x64xf32> to vector<8x64xf32>
    %394 = arith.addf %391, %393 : vector<8x64xf32>
    %cst_119 = arith.constant 0.000000e+00 : f32
    %395 = vector.broadcast %cst_119 : f32 to vector<8x64xf32>
    %396 = arith.maximumf %394, %395 : vector<8x64xf32>
    %c0_120 = arith.constant 0 : index
    %c0_121 = arith.constant 0 : index
    %397 = vector.load %arg12[%c0_120, %c0_121] : memref<3x32xf32, #tpu.memory_space<vmem>>, vector<3x32xf32>
    %c0_122 = arith.constant 0 : index
    %c0_123 = arith.constant 0 : index
    %398 = vector.load %arg11[%c0_122, %c0_123] : memref<64x32xf32, #tpu.memory_space<vmem>>, vector<64x32xf32>
    %399 = vector.extract_strided_slice %397 {offsets = [0, 0], sizes = [1, 32], strides = [1, 1]} : vector<3x32xf32> to vector<1x32xf32>
    %cst_124 = arith.constant dense<0.000000e+00> : vector<8x32xf32>
    %400 = tpu.matmul %396, %398, %cst_124 {dimension_numbers = #tpu.dot_dimension_numbers<[1], [0], [0], [1], [0, 0, 1, 1], [], []>} : vector<8x64xf32>, vector<64x32xf32>, vector<8x32xf32> -> vector<8x32xf32>
    %401 = vector.broadcast %399 : vector<1x32xf32> to vector<8x32xf32>
    %402 = arith.addf %400, %401 : vector<8x32xf32>
    %403 = vector.extract_strided_slice %397 {offsets = [1, 0], sizes = [1, 32], strides = [1, 1]} : vector<3x32xf32> to vector<1x32xf32>
    %404 = vector.broadcast %403 : vector<1x32xf32> to vector<8x32xf32>
    %405 = arith.mulf %402, %404 : vector<8x32xf32>
    %406 = vector.extract_strided_slice %397 {offsets = [2, 0], sizes = [1, 32], strides = [1, 1]} : vector<3x32xf32> to vector<1x32xf32>
    %407 = vector.broadcast %406 : vector<1x32xf32> to vector<8x32xf32>
    %408 = arith.addf %405, %407 : vector<8x32xf32>
    %cst_125 = arith.constant 0.000000e+00 : f32
    %409 = vector.broadcast %cst_125 : f32 to vector<8x32xf32>
    %410 = arith.maximumf %408, %409 : vector<8x32xf32>
    %c0_126 = arith.constant 0 : index
    %c0_127 = arith.constant 0 : index
    %411 = vector.load %arg13[%c0_126, %c0_127] : memref<8x32xf32, #tpu.memory_space<vmem>>, vector<8x32xf32>
    tpu.vector_store %arg13[%c0_126, %c0_127], %410 {strides = array<i32>} : memref<8x32xf32, #tpu.memory_space<vmem>>, vector<8x32xf32>,
    return
  }
  func.func @transform_0(%arg0: i32) -> (i32, i32, i32) {
    %c0_i32 = arith.constant 0 : i32
    %c0_i32_0 = arith.constant 0 : i32
    %c0_i32_1 = arith.constant 0 : i32
    return %arg0, %c0_i32, %c0_i32_0 : i32, i32, i32
  }
  func.func @transform_1(%arg0: i32) -> (i32, i32, i32) {
    %c0_i32 = arith.constant 0 : i32
    %c0_i32_0 = arith.constant 0 : i32
    %c0_i32_1 = arith.constant 0 : i32
    return %arg0, %c0_i32, %c0_i32_0 : i32, i32, i32
  }
  func.func @transform_2(%arg0: i32) -> (i32, i32, i32) {
    %c0_i32 = arith.constant 0 : i32
    %c0_i32_0 = arith.constant 0 : i32
    %c0_i32_1 = arith.constant 0 : i32
    return %arg0, %c0_i32, %c0_i32_0 : i32, i32, i32
  }
  func.func @transform_3(%arg0: i32) -> (i32, i32) {
    %c0_i32 = arith.constant 0 : i32
    %c0_i32_0 = arith.constant 0 : i32
    %c0_i32_1 = arith.constant 0 : i32
    return %c0_i32, %c0_i32_0 : i32, i32
  }
  func.func @transform_4(%arg0: i32) -> (i32, i32) {
    %c0_i32 = arith.constant 0 : i32
    %c0_i32_0 = arith.constant 0 : i32
    %c0_i32_1 = arith.constant 0 : i32
    return %c0_i32, %c0_i32_0 : i32, i32
  }
  func.func @transform_5(%arg0: i32) -> (i32, i32, i32) {
    %c0_i32 = arith.constant 0 : i32
    %c0_i32_0 = arith.constant 0 : i32
    %c0_i32_1 = arith.constant 0 : i32
    %c0_i32_2 = arith.constant 0 : i32
    return %c0_i32, %c0_i32_0, %c0_i32_1 : i32, i32, i32
  }
  func.func @transform_6(%arg0: i32) -> (i32, i32, i32) {
    %c0_i32 = arith.constant 0 : i32
    %c0_i32_0 = arith.constant 0 : i32
    %c0_i32_1 = arith.constant 0 : i32
    %c0_i32_2 = arith.constant 0 : i32
    return %c0_i32, %c0_i32_0, %c0_i32_1 : i32, i32, i32
  }
  func.func @transform_7(%arg0: i32) -> (i32, i32) {
    %c0_i32 = arith.constant 0 : i32
    %c0_i32_0 = arith.constant 0 : i32
    %c0_i32_1 = arith.constant 0 : i32
    return %c0_i32, %c0_i32_0 : i32, i32
  }
  func.func @transform_8(%arg0: i32) -> (i32, i32, i32) {
    %c0_i32 = arith.constant 0 : i32
    %c0_i32_0 = arith.constant 0 : i32
    %c0_i32_1 = arith.constant 0 : i32
    %c0_i32_2 = arith.constant 0 : i32
    return %c0_i32, %c0_i32_0, %c0_i32_1 : i32, i32, i32
  }
  func.func @transform_9(%arg0: i32) -> (i32, i32) {
    %c0_i32 = arith.constant 0 : i32
    %c0_i32_0 = arith.constant 0 : i32
    %c0_i32_1 = arith.constant 0 : i32
    return %c0_i32, %c0_i32_0 : i32, i32
  }
  func.func @transform_10(%arg0: i32) -> (i32, i32) {
    %c0_i32 = arith.constant 0 : i32
    %c0_i32_0 = arith.constant 0 : i32
    %c0_i32_1 = arith.constant 0 : i32
    return %c0_i32, %c0_i32_0 : i32, i32
  }
  func.func @transform_11(%arg0: i32) -> (i32, i32) {
    %c0_i32 = arith.constant 0 : i32
    %c0_i32_0 = arith.constant 0 : i32
    %c0_i32_1 = arith.constant 0 : i32
    return %c0_i32, %c0_i32_0 : i32, i32
  }
  func.func @transform_12(%arg0: i32) -> (i32, i32) {
    %c0_i32 = arith.constant 0 : i32
    %c0_i32_0 = arith.constant 0 : i32
    return %arg0, %c0_i32 : i32, i32
  }
}

</mosaic_0001>

<bundles_post_ra>
// kernel: tpu_custom_call.1
= control target key start
LH: loop header
LB: loop body
LE: loop exit
PB: predicated region body
PF: predicated region fallthrough
CT: control target
= control target key end

     0   :  { %17 = vsyncpa [#allocation3], 0  ;;  %s15465_s0 = inlined_call_operand.vmem [shape: f32[8,8,3], index: 0, kind: input, shape index: {}]   ;;  %s15466_s1 = inlined_call_operand.vmem [shape: f32[8,8,8], index: 1, kind: input, shape index: {}]   ;;  %s15467_s2 = inlined_call_operand.vmem [shape: f32[8,8,1], index: 2, kind: input, shape index: {}]   ;;  %s15468_s3 = inlined_call_operand.hbm [shape: f32[4,8], index: 3, kind: input, shape index: {}]   ;;  %s15469_s4 = inlined_call_operand.hbm [shape: f32[8,16], index: 4, kind: input, shape index: {}]   ;;  %s15470_s5 = inlined_call_operand.vmem [shape: f32[3,3,16], index: 5, kind: input, shape index: {}]   ;;  %s15471_s6 = inlined_call_operand.vmem [shape: f32[13,16,16], index: 6, kind: input, shape index: {}]   ;;  %s15472_s7 = inlined_call_operand.vmem [shape: f32[27,16], index: 7, kind: input, shape index: {}]   ;;  %s15473_s8 = inlined_call_operand.hbm [shape: f32[2,64,64], index: 8, kind: input, shape index: {}]   ;;  %s15474_s9 = inlined_call_operand.hbm [shape: f32[4,64], index: 9, kind: input, shape index: {}]   ;;  %s15475_s10 = inlined_call_operand.vmem [shape: f32[64,32], index: 10, kind: input, shape index: {}]   ;;  %s15476_s11 = inlined_call_operand.vmem [shape: f32[3,32], index: 11, kind: input, shape index: {}]   ;;  %s15477_s12 = inlined_call_operand.hbm [shape: f32[8,32], index: 12, kind: output, shape index: {}]  }
   0x1   :  { %18 = vsyncpa [#allocation6], 0 }
   0x2   :  { %19 = vsyncpa [#allocation9], 0 }
   0x3   :  { %20 = vsyncpa [#allocation4], 0  ;;  %s11111_s21 = smov [#allocation5]   ;;  %s11112_s23 = smov [#allocation2]  }
   0x4   :  { %s43_s22 = sshll.u32 %s11111_s21, 4  ;;  %s33_s24 = sshll.u32 %s11112_s23, 4  ;;  %s44_s22 = int_to_ptr.vmem [resolvable:$true] %s43_s22  ;;  %s34_s24 = int_to_ptr.vmem [resolvable:$true] %s33_s24 }
   0x5   :  { %s11011_s25 = scalar_lea.vmem %s44_s22, 128  ;;  %p11016_p1 = scmp.lt.s32.totalorder %s44_s22, %s44_s22 }
   0x6   :  { %p11012_p0 = scmp.ne.s32.totalorder %s44_s22, %s11011_s25  ;;  %p11017_p2 = scmp.lt.s32.totalorder %s11011_s25, %s11011_s25 }
   0x8   :  { %p11018_p3 = por %p11017_p2, %p11016_p1 }
   0xa   :  { %p11019_p4 = pnand %p11018_p3, %p11012_p0 }
   0xc   :  { %11022 = shalt.err (!%p11019_p4)
}
   0xd   :  { %46 = dma.hbm_to_vmem [thread:$0]  %s15469_s4, 128, %s44_s22, [#allocation6]  }
   0xe   :  { %s11031_s28 = scalar_lea.vmem %s34_s24, 64  ;;  %p11036_p6 = scmp.lt.s32.totalorder %s34_s24, %s34_s24 }
   0xf   :  { %p11032_p5 = scmp.ne.s32.totalorder %s34_s24, %s11031_s28  ;;  %p11037_p7 = scmp.lt.s32.totalorder %s11031_s28, %s11031_s28 }
  0x11   :  { %p11038_p8 = por %p11037_p7, %p11036_p6 }
  0x13   :  { %p11039_p9 = pnand %p11038_p8, %p11032_p5 }
  0x15   :  { %11042 = shalt.err (!%p11039_p9)
}
  0x16   :  { %36 = dma.hbm_to_vmem [thread:$0]  %s15468_s3, 64, %s34_s24, [#allocation3]  }
  0x17   :  { %s11113_s13 = smov [#allocation7]  }
  0x18   :  { %s58_s14 = sshll.u32 %s11113_s13, 4  ;;  %s59_s14 = int_to_ptr.vmem [resolvable:$true] %s58_s14 }
  0x19   :  { %s11051_s15 = scalar_lea.vmem %s59_s14, 2048  ;;  %p11056_p11 = scmp.lt.s32.totalorder %s59_s14, %s59_s14 }
  0x1a   :  { %p11052_p10 = scmp.ne.s32.totalorder %s59_s14, %s11051_s15  ;;  %p11057_p12 = scmp.lt.s32.totalorder %s11051_s15, %s11051_s15 }
  0x1c   :  { %p11058_p13 = por %p11057_p12, %p11056_p11 }
  0x1e   :  { %p11059_p0 = pnand %p11058_p13, %p11052_p10 }
  0x20   :  { %11062 = shalt.err (!%p11059_p0)
}
  0x21   :  { %s11114_s4 = smov 128   ;;  %s11115_s16 = smov 8  }
  0x22   :  { %64 = dma.hbm_to_vmem [thread:$0]  %s15473_s8, 2048, %s59_s14, [#allocation6], %s11114_s4, %s11114_s4, %s11115_s16  }
  0x23   :  { %s11116_s19 = smov [#allocation8]  }
  0x24   :  { %s71_s20 = sshll.u32 %s11116_s19, 4  ;;  %s72_s20 = int_to_ptr.vmem [resolvable:$true] %s71_s20 }
  0x25   :  { %s11071_s3 = scalar_lea.vmem %s72_s20, 64  ;;  %p11076_p2 = scmp.lt.s32.totalorder %s72_s20, %s72_s20 }
  0x26   :  { %p11072_p1 = scmp.ne.s32.totalorder %s72_s20, %s11071_s3  ;;  %p11077_p3 = scmp.lt.s32.totalorder %s11071_s3, %s11071_s3 }
  0x28   :  { %p11078_p4 = por %p11077_p3, %p11076_p2 }
  0x2a   :  { %p11079_p5 = pnand %p11078_p4, %p11072_p1 }
  0x2c   :  { %11082 = shalt.err (!%p11079_p5)
}
  0x2d   :  { %74 = dma.hbm_to_vmem [thread:$0]  %s15474_s9, 64, %s72_s20, [#allocation9]  }
  0x2e   :  { %11103 = dma.done.wait [#allocation3], 64  }
  0x2f   :  { %11104 = vsyncadd [#allocation3], 4294967232 }
  0x30   :  { %11105 = dma.done.wait [#allocation6], 2176  }
  0x31   :  { %11106 = vsyncadd [#allocation6], 4294965120 }
  0x32   :  { %11107 = dma.done.wait [#allocation9], 64  }
  0x33   :  { %11108 = vsyncadd [#allocation9], 4294967232  ;;  %v15480_v0 = vmov 1   ;;  %v15484_v1 = vmov 0   ;;  %v15478_v2 = vmov 0.0   ;;  %vm11120_vm0 = vmmov 0  }
  0x34   :  { %10598 = vset.pattern.permute.xlu0 %v15480_v0  ;;  %10599 = vset.pattern.permute.xlu1 %v15484_v1  ;;  %v11211_v3 = vld [vmem:[%s15465_s0 + $0x8] sm:$0xff]  ;;  %v11216_v4 = vld [vmem:[%s15465_s0] sm:$0xff]  ;;  %vm108_vm1 = vcmask 64512   ;;  %v15489_v7 = vmov 2   ;;  %v11229_v8 = vld [vmem:[%s15465_s0 + $0x18] sm:$0xff]  ;;  %v104_v12 = vlaneseq  ;;  %vm354_vm2 = vcmask 130048  }
  0x35   :  { %9976 = vmatprep.subr.mxu1 %v15478_v2  ;;  %9978 = vmatprep.mubr.msk.f32.mxu1 %vm11120_vm0, %v15478_v2  ;;  %v95_v5 = vld [vmem:[#allocation5] sm:$0xff]  ;;  %v270_v6 = vld [vmem:[#allocation2] sm:$0xf]  ;;  %v11245_v10 = vld [vmem:[%s15465_s0 + $0x10] sm:$0xff]  ;;  %vm6944_vm3 = vcmask 1041409   ;;  %vm6946_vm4 = vcmask 1042434  }
  0x36   :  { %683 = vperm.xlu1 %10599, %v11211_v3   ;;  %729 = vperm.xlu0 %10598, %v11216_v4   ;;  %v11240_v9 = vld [vmem:[%s15465_s0 + $0x28] sm:$0xff]  ;;  %v11252_v11 = vld [vmem:[%s15465_s0 + $0x38] sm:$0xff]  ;;  %v11256_v13 = vshrl.u32 %v104_v12, 7  ;;  %v11284_v20 = vld [vmem:[%s15465_s0 + $0x20] sm:$0xff]  ;;  %vm6948_vm5 = vcmask 1043459   ;;  %vm6950_vm6 = vcmask 1044484  }
  0x37   :  { %9977 = vmatpush3.msra.mxu1 %v95_v5  ;;  %9962 = vmatprep.subr.mxu0 %v95_v5  ;;  %v11324_v34 = vld [vmem:[%s15465_s0 + $0x30] sm:$0xff]  ;;  %v9230_v57 = vld [vmem:[%s15471_s6 + $0x98] sm:$0xff]  ;;  %vm6952_vm7 = vcmask 1045509   ;;  %vm6954_vm8 = vcmask 1046534   ;;  %vm6956_vm9 = vcmask 1047559   ;;  %s11123_s23 = smov 48  }
  0x38   :  { %9979 = vmatmul.mubr.msk.f32.vlgmr.msra.gmra.mxu1 %vm108_vm1, %v270_v6  ;;  %9981 = vmatprep.subr.mxu1 %v15478_v2  ;;  %v11263_v14 = vsub.s32 1, %v11256_v13  ;;  %v11270_v16 = vsub.s32 3, %v11256_v13  ;;  %v11279_v19 = vsub.s32 5, %v11256_v13  ;;  %v11295_v24 = vsub.s32 7, %v11256_v13  ;;  %v9229_v58 = vld [vmem:[%s15471_s6 + $0x90] sm:$0xff]  ;;  %s11125_s22 = smov [#allocation10]  }
  0x39   :  { %9985 = vmatprep.mubr.msk.f32.mxu1 %vm11120_vm0, %v15478_v2  ;;  %9963 = vmatpush3.msra.mxu0 %v95_v5  ;;  %v11340_v41 = vsub.s32 0, %v11256_v13  ;;  %v11389_v62 = vsub.s32 2, %v11256_v13  ;;  %vm7668_vm10 = vcmask 1043456   ;;  %vm7643_vm11 = vcmask 31744   ;;  %s9209_s8 = sshll.u32 %s11125_s22, 4  ;;  %s9210_s8 = int_to_ptr.vmem [resolvable:$true] %s9209_s8 }
  0x3a   :  { %10600 = vset.pattern.permute.xlu1 %v15480_v0  ;;  %10602 = vset.pattern.permute.xlu0 %v15489_v7  ;;  %15605 = vst [vmem:[#allocation15_spill] sm:$0xff] %v11263_v14  ;;  %v1568_v15 = vrot.slane %v11216_v4, %v11263_v14  ;;  %15606 = vst [vmem:[#allocation16_spill] sm:$0xff] %v11270_v16  ;;  %v1744_v18 = vrot.slane %v11216_v4, %v11270_v16  ;;  %vm8543_vm12 = vcmask 523264   ;;  %vm9024_vm13 = vcmask 261120   ;;  %s11083_s9 = scalar_lea.vmem %s9210_s8, 128  ;;  %p11088_p7 = scmp.lt.s32.totalorder %s9210_s8, %s9210_s8 }
  0x3b   :  { %733 = vperm.xlu1 %10600, %v11211_v3   ;;  %785 = vperm.xlu0 %10602, %v11211_v3   ;;  %15607 = vst [vmem:[#allocation17_spill] sm:$0xff] %v11279_v19  ;;  %v1920_v23 = vrot.slane %v11216_v4, %v11279_v19  ;;  %15608 = vst [vmem:[#allocation18_spill] sm:$0xff] %v11295_v24  ;;  %v2096_v27 = vrot.slane %v11216_v4, %v11295_v24  ;;  %vm9026_vm14 = vcmask 392192   ;;  %p11084_p6 = scmp.ne.s32.totalorder %s9210_s8, %s11083_s9  ;;  %p11089_p8 = scmp.lt.s32.totalorder %s11083_s9, %s11083_s9 }
  0x3c   :  { %10002 = vmatprep.subr.mxu0 %v15478_v2  ;;  %v1597_v17 = vsub.f32 %v1568_v15, %v11216_v4  ;;  %v1773_v22 = vsub.f32 %v1744_v18, %v11216_v4  ;;  %v1572_v30 = vrot.slane %v11211_v3, %v11263_v14  ;;  %v1748_v33 = vrot.slane %v11211_v3, %v11270_v16 }
  0x3d   :  { %v1949_v26 = vsub.f32 %v1920_v23, %v11216_v4  ;;  %v2125_v29 = vsub.f32 %v2096_v27, %v11216_v4  ;;  %v1924_v37 = vrot.slane %v11211_v3, %v11279_v19  ;;  %v2100_v40 = vrot.slane %v11211_v3, %v11295_v24  ;;  %15609 = vst [vmem:[#allocation19_spill] sm:$0xff] %v11340_v41  ;;  %p11090_p9 = por %p11089_p8, %p11088_p7 }
  0x3e   :  { %v11289_v21 = vand.u32 2147483647, %v1597_v17  ;;  %v11299_v25 = vand.u32 2147483647, %v1773_v22  ;;  %v1598_v32 = vsub.f32 %v1572_v30, %v11211_v3  ;;  %v1774_v36 = vsub.f32 %v1748_v33, %v11211_v3  ;;  %9982 = vmatpush3.msra.mxu1 %v9230_v57  ;;  %15610 = vst [vmem:[#allocation20_spill] sm:$0xff] %v11389_v62 }
  0x3f   :  { %10601 = vset.pattern.permute.xlu1 %v15489_v7  ;;  %793 = vperm.xlu0 %10602, %v11229_v8   ;;  %v11306_v28 = vand.u32 2147483647, %v1949_v26  ;;  %v11313_v31 = vand.u32 2147483647, %v2125_v29  ;;  %v1950_v39 = vsub.f32 %v1924_v37, %v11211_v3  ;;  %v2126_v43 = vsub.f32 %v2100_v40, %v11211_v3  ;;  %v97_v37 = vld [vmem:[%s15466_s1 + $0x8] sm:$0xff]  ;;  %p11091_p10 = pnand %p11090_p9, %p11084_p6 }
  0x40   :  { %781 = vperm.xlu1 %10601, %v11216_v4   ;;  %v11326_v35 = vand.u32 2147483647, %v1598_v32  ;;  %v11334_v38 = vand.u32 2147483647, %v1774_v36  ;;  %v1576_v44 = vrot.slane %v11245_v10, %v11263_v14  ;;  %v1480_v45 = vrot.slane %v11216_v4, %v11340_v41  ;;  %9983 = vmatprep.subr.mxu1 %v15478_v2  ;;  %v96_v36 = vld [vmem:[%s15466_s1] sm:$0xff] }
  0x41   :  { %v11345_v42 = vand.u32 2147483647, %v1950_v39  ;;  %v11354_v46 = vand.u32 2147483647, %v2126_v43  ;;  %v1752_v48 = vrot.slane %v11245_v10, %v11270_v16  ;;  %v1928_v52 = vrot.slane %v11245_v10, %v11279_v19  ;;  %9984 = vmatpush3.msra.mxu1 %v9229_v58  ;;  %9964 = vmatprep.mubr.msk.f32.mxu0 %vm108_vm1, %v96_v36 }
  0x42   :  { %v1599_v47 = vsub.f32 %v1576_v44, %v11245_v10  ;;  %v1509_v49 = vsub.f32 %v1480_v45, %v11216_v4  ;;  %v2104_v56 = vrot.slane %v11245_v10, %v11295_v24  ;;  %v1580_v61 = vrot.slane %v11229_v8, %v11263_v14  ;;  %9988 = vmatprep.subr.mxu1 %v15478_v2  ;;  %v98_v45 = vld [vmem:[%s15466_s1 + $0x10] sm:$0xff] }
  0x43   :  { %801 = vperm.xlu0 %10602, %v11240_v9   ;;  %v1775_v51 = vsub.f32 %v1752_v48, %v11245_v10  ;;  %v1951_v55 = vsub.f32 %v1928_v52, %v11245_v10  ;;  %v1756_v6 = vrot.slane %v11229_v8, %v11270_v16  ;;  %v1656_v12 = vrot.slane %v11216_v4, %v11389_v62 }
  0x44   :  { %10603 = vset.pattern.permute.xlu1 %v15484_v1  ;;  %v11362_v50 = vand.u32 2147483647, %v1599_v47  ;;  %v1517_v53 = vand.u32 2147483647, %v1509_v49  ;;  %v2127_v60 = vsub.f32 %v2104_v56, %v11245_v10  ;;  %v1600_v5 = vsub.f32 %v1580_v61, %v11229_v8  ;;  %9965 = vmatmul.mubr.msk.f32.vlgmr.msra.gmra.mxu0 %vm108_vm1, %v97_v37  ;;  %v99_v47 = vld [vmem:[%s15466_s1 + $0x18] sm:$0xff]  ;;  %v102_v61 = vld [vmem:[%s15466_s1 + $0x30] sm:$0xff] }
  0x45   :  { %688 = vperm.xlu1 %10603, %v11245_v10   ;;  %v11369_v54 = vand.u32 2147483647, %v1775_v51  ;;  %v11383_v59 = vand.u32 2147483647, %v1951_v55  ;;  %v1776_v17 = vsub.f32 %v1756_v6, %v11229_v8  ;;  %v1932_v18 = vrot.slane %v11229_v8, %v11279_v19  ;;  %9967 = vmatprep.mubr.msk.f32.mxu0 %vm108_vm1, %v98_v45  ;;  %v101_v55 = vld [vmem:[%s15466_s1 + $0x28] sm:$0xff] }
  0x46   :  { %v11394_v63 = vand.u32 2147483647, %v2127_v60  ;;  %v11403_v15 = vand.u32 2147483647, %v1600_v5  ;;  %v1685_v22 = vsub.f32 %v1656_v12, %v11216_v4  ;;  %v2108_v27 = vrot.slane %v11229_v8, %v11295_v24  ;;  %v103_v5 = vld [vmem:[%s15466_s1 + $0x38] sm:$0xff] }
  0x47   :  { %809 = vperm.xlu0 %10602, %v11252_v11   ;;  %v11411_v23 = vand.u32 2147483647, %v1776_v17  ;;  %v1952_v26 = vsub.f32 %v1932_v18, %v11229_v8  ;;  %v1584_v33 = vrot.slane %v11284_v20, %v11263_v14  ;;  %v1760_v43 = vrot.slane %v11284_v20, %v11270_v16 }
  0x48   :  { %v1693_v29 = vand.u32 2147483647, %v1685_v22  ;;  %v2128_v32 = vsub.f32 %v2108_v27, %v11229_v8  ;;  %v11438_v44 = vsub.s32 4, %v11256_v13  ;;  %9968 = vmatmul.mubr.msk.f32.gmra.mxu0 %vm108_vm1, %v99_v47  ;;  %v1936_v51 = vrot.slane %v11284_v20, %v11279_v19 }
  0x49   :  { %10604 = vset.pattern.permute.xlu1 %v15480_v0  ;;  %v11418_v30 = vand.u32 2147483647, %v1952_v26  ;;  %v1601_v40 = vsub.f32 %v1584_v33, %v11284_v20  ;;  %v1777_v49 = vsub.f32 %v1760_v43, %v11284_v20  ;;  %v2112_v60 = vrot.slane %v11284_v20, %v11295_v24 }
  0x4a   :  { %737 = vperm.xlu1 %10604, %v11245_v10   ;;  %v11432_v39 = vand.u32 2147483647, %v2128_v32  ;;  %15611 = vst [vmem:[#allocation21_spill] sm:$0xff] %v11438_v44  ;;  %v1832_v52 = vrot.slane %v11216_v4, %v11438_v44  ;;  %v1953_v57 = vsub.f32 %v1936_v51, %v11284_v20  ;;  %v1588_v18 = vrot.slane %v11240_v9, %v11263_v14 }
  0x4b   :  { %10612 = vset.pattern.permute.xlu0 %v15484_v1  ;;  %v11450_v48 = vand.u32 2147483647, %v1601_v40  ;;  %v11467_v56 = vand.u32 2147483647, %v1777_v49  ;;  %v2129_v17 = vsub.f32 %v2112_v60, %v11284_v20  ;;  %v1764_v27 = vrot.slane %v11240_v9, %v11270_v16 }
  0x4c   :  { %678 = vperm.xlu0 %10612, %v11216_v4   ;;  %v1861_v58 = vsub.f32 %v1832_v52, %v11216_v4  ;;  %v11485_v6 = vand.u32 2147483647, %v1953_v57  ;;  %v1602_v26 = vsub.f32 %v1588_v18, %v11240_v9  ;;  %v1940_v36 = vrot.slane %v11240_v9, %v11279_v19 }
  0x4d   :  { %v11492_v22 = vand.u32 2147483647, %v2129_v17  ;;  %v1778_v33 = vsub.f32 %v1764_v27, %v11240_v9  ;;  %v2116_v43 = vrot.slane %v11240_v9, %v11295_v24  ;;  %v1592_v51 = vrot.slane %v11324_v34, %v11263_v14 }
  0x4e   :  { %741 = vperm.xlu1 %10604, %v11229_v8   ;;  %v1869_v12 = vand.u32 2147483647, %v1861_v58  ;;  %v11502_v32 = vand.u32 2147483647, %v1602_v26  ;;  %v1768_v57 = vrot.slane %v11324_v34, %v11270_v16  ;;  %v2120_v18 = vrot.slane %v11324_v34, %v11295_v24 }
  0x4f   :  { %15612 = vst [vmem:[#allocation22_spill] sm:$0xff] %v11492_v22  ;;  %v11510_v40 = vand.u32 2147483647, %v1778_v33  ;;  %v2130_v49 = vsub.f32 %v2116_v43, %v11240_v9  ;;  %v1484_v26 = vrot.slane %v11211_v3, %v11340_v41 }
  0x50   :  { %693 = vperm.xlu0 %10612, %v11229_v8   ;;  %15614 = vst [vmem:[#allocation24_spill] sm:$0xff] %v11502_v32  ;;  %v1779_v60 = vsub.f32 %v1768_v57, %v11324_v34 }
  0x51   :  { %15615 = vst [vmem:[#allocation25_spill] sm:$0xff] %v11510_v40 }
  0x52   :  { %10605 = vset.pattern.permute.xlu1 %v15489_v7 }
  0x53   :  { %789 = vperm.xlu1 %10605, %v11245_v10  }
  0x54   :  { %703 = vperm.xlu0 %10612, %v11240_v9  }
  0x57   :  { %10606 = vset.pattern.permute.xlu1 %v15484_v1 }
  0x58   :  { %698 = vperm.xlu1 %10606, %v11284_v20   ;;  %713 = vperm.xlu0 %10612, %v11252_v11  }
  0x5c   :  { %10607 = vset.pattern.permute.xlu1 %v15480_v0  ;;  %2190 = vperm.xlu0 %10612, %v11289_v21  }
  0x5d   :  { %745 = vperm.xlu1 %10607, %v11284_v20  }
  0x60   :  { %2200 = vperm.xlu0 %10612, %v11299_v25  }
  0x61   :  { %749 = vperm.xlu1 %10607, %v11240_v9  }
  0x64   :  { %2210 = vperm.xlu0 %10612, %v11306_v28  }
  0x65   :  { %10608 = vset.pattern.permute.xlu1 %v15489_v7 }
  0x66   :  { %797 = vperm.xlu1 %10608, %v11284_v20  }
  0x68   :  { %2220 = vperm.xlu0 %10612, %v11313_v31  }
  0x6a   :  { %10609 = vset.pattern.permute.xlu1 %v15484_v1 }
  0x6b   :  { %708 = vperm.xlu1 %10609, %v11324_v34  }
  0x6c   :  { %2230 = vperm.xlu0 %10612, %v11326_v35  }
  0x6f   :  { %10610 = vset.pattern.permute.xlu1 %v15480_v0 }
  0x70   :  { %753 = vperm.xlu1 %10610, %v11324_v34   ;;  %2240 = vperm.xlu0 %10612, %v11334_v38  }
  0x74   :  { %757 = vperm.xlu1 %10610, %v11252_v11   ;;  %2250 = vperm.xlu0 %10612, %v11345_v42  }
  0x78   :  { %10611 = vset.pattern.permute.xlu1 %v15489_v7  ;;  %2260 = vperm.xlu0 %10612, %v11354_v46  }
  0x79   :  { %805 = vperm.xlu1 %10611, %v11324_v34  }
  0x7c   :  { %2270 = vperm.xlu0 %10612, %v11362_v50  }
  0x7d   :  { %10613 = vset.pattern.permute.xlu1 %v15484_v1 }
  0x7e   :  { %2185 = vperm.xlu1 %10613, %v1517_v53  }
  0x80   :  { %2280 = vperm.xlu0 %10612, %v11369_v54  }
  0x82   :  { %10614 = vset.pattern.permute.xlu1 %v15480_v0 }
  0x83   :  { %2572 = vperm.xlu1 %10614, %v1517_v53  }
  0x84   :  { %2290 = vperm.xlu0 %10612, %v11383_v59  }
  0x87   :  { %2576 = vperm.xlu1 %10614, %v11289_v21  }
  0x88   :  { %2300 = vperm.xlu0 %10612, %v11394_v63  }
  0x8b   :  { %10615 = vset.pattern.permute.xlu1 %v15489_v7 }
  0x8c   :  { %2310 = vperm.xlu0 %10612, %v11403_v15   ;;  %2960 = vperm.xlu1 %10615, %v1517_v53   ;;  %v100_v53 = vld [vmem:[%s15466_s1 + $0x20] sm:$0xff] }
  0x8d   :  { %9970 = vmatprep.mubr.msk.f32.mxu0 %vm108_vm1, %v100_v53 }
  0x8e   :  { %9971 = vmatmul.mubr.msk.f32.gmra.mxu0 %vm108_vm1, %v101_v55  ;;  %v11527_v55 = vand.u32 2147483647, %v2130_v49  ;;  %v1772_v49 = vrot.slane %v11252_v11, %v11270_v16 }
  0x8f   :  { %9973 = vmatprep.mubr.msk.f32.mxu0 %vm108_vm1, %v102_v61  ;;  %v1944_v61 = vrot.slane %v11324_v34, %v11279_v19 }
  0x90   :  { %2320 = vperm.xlu0 %10612, %v11411_v23   ;;  %10616 = vset.pattern.permute.xlu1 %v15484_v1  ;;  %15618 = vst [vmem:[#allocation28_spill] sm:$0xff] %v11527_v55  ;;  %v1780_v57 = vsub.f32 %v1772_v49, %v11252_v11 }
  0x91   :  { %2195 = vperm.xlu1 %10616, %v1693_v29   ;;  %v1955_v17 = vsub.f32 %v1944_v61, %v11324_v34 }
  0x92   :  { %9974 = vmatmul.mubr.msk.f32.gmra.mxu0 %vm108_vm1, %v103_v5 }
  0x93   :  { %10006 = vmatprep.mubr.msk.f32.mxu0 %vm11120_vm0, %v15478_v2  ;;  %v11556_v33 = vand.u32 2147483647, %v1955_v17  ;;  %v11581_v17 = vand.u32 2147483647, %v1780_v57 }
  0x94   :  { %2330 = vperm.xlu0 %10612, %v11418_v30  }
  0x95   :  { %10617 = vset.pattern.permute.xlu1 %v15480_v0  ;;  %15624 = vst [vmem:[#allocation34_spill] sm:$0xff] %v11556_v33  ;;  %15629 = vst [vmem:[#allocation39_spill] sm:$0xff] %v11581_v17 }
  0x96   :  { %2580 = vperm.xlu1 %10617, %v1693_v29  }
  0x98   :  { %2340 = vperm.xlu0 %10612, %v11432_v39  }
  0x9a   :  { %2584 = vperm.xlu1 %10617, %v11299_v25  }
  0x9c   :  { %2350 = vperm.xlu0 %10612, %v11450_v48  }
  0x9e   :  { %10618 = vset.pattern.permute.xlu1 %v15489_v7 }
  0x9f   :  { %2968 = vperm.xlu1 %10618, %v1693_v29   ;;  %v11498_v29 = vsub.s32 6, %v11256_v13  ;;  %v1954_v13 = vsub.f32 %v1940_v36, %v11240_v9  ;;  %v2131_v36 = vsub.f32 %v2120_v18, %v11324_v34  ;;  %v2124_v18 = vrot.slane %v11252_v11, %v11295_v24 }
  0xa0   :  { %2360 = vperm.xlu0 %10612, %v11467_v56  }
  0xa1   :  { %15613 = vst [vmem:[#allocation23_spill] sm:$0xff] %v11498_v29  ;;  %v2008_v37 = vrot.slane %v11216_v4, %v11498_v29  ;;  %v11518_v47 = vand.u32 2147483647, %v1954_v13  ;;  %v1510_v13 = vsub.f32 %v1484_v26, %v11211_v3  ;;  %v11564_v43 = vand.u32 2147483647, %v2131_v36 }
  0xa3   :  { %10619 = vset.pattern.permute.xlu1 %v15484_v1  ;;  %v2037_v45 = vsub.f32 %v2008_v37, %v11216_v4  ;;  %15616 = vst [vmem:[#allocation26_spill] sm:$0xff] %v11518_v47  ;;  %v1603_v4 = vsub.f32 %v1592_v51, %v11324_v34  ;;  %v1596_v37 = vrot.slane %v11252_v11, %v11263_v14  ;;  %15625 = vst [vmem:[#allocation35_spill] sm:$0xff] %v11564_v43 }
  0xa4   :  { %2370 = vperm.xlu0 %10612, %v11485_v6   ;;  %2205 = vperm.xlu1 %10619, %v1869_v12   ;;  %v1518_v34 = vand.u32 2147483647, %v1510_v13  ;;  %v2132_v13 = vsub.f32 %v2124_v18, %v11252_v11 }
  0xa5   :  { %v2045_v53 = vand.u32 2147483647, %v2037_v45  ;;  %v11536_v9 = vand.u32 2147483647, %v1603_v4  ;;  %v1604_v45 = vsub.f32 %v1596_v37, %v11252_v11 }
  0xa6   :  { %v11601_v57 = vand.u32 2147483647, %v2132_v13 }
  0xa7   :  { %15620 = vst [vmem:[#allocation30_spill] sm:$0xff] %v11536_v9  ;;  %v11572_v4 = vand.u32 2147483647, %v1604_v45  ;;  %v1660_v45 = vrot.slane %v11211_v3, %v11389_v62 }
  0xa8   :  { %2380 = vperm.xlu0 %10612, %v11492_v22   ;;  %10620 = vset.pattern.permute.xlu1 %v15480_v0  ;;  %15634 = vst [vmem:[#allocation44_spill] sm:$0xff] %v11601_v57 }
  0xa9   :  { %2588 = vperm.xlu1 %10620, %v1869_v12   ;;  %15627 = vst [vmem:[#allocation37_spill] sm:$0xff] %v11572_v4 }
  0xac   :  { %2390 = vperm.xlu0 %10612, %v11502_v32  }
  0xad   :  { %2592 = vperm.xlu1 %10620, %v11306_v28  }
  0xb0   :  { %2400 = vperm.xlu0 %10612, %v11510_v40  }
  0xb1   :  { %v11523_v52 = vpop.permute.xlu1 %683  ;;  %10621 = vset.pattern.permute.xlu1 %v15489_v7  ;;  %v11589_v36 = vpop.permute.xlu0 %729 }
  0xb2   :  { %15617 = vst [vmem:[#allocation27_spill] sm:$0xff] %v11523_v52  ;;  %2976 = vperm.xlu1 %10621, %v1869_v12   ;;  %v11545_v12 = vand.u32 2147483647, %v1779_v60  ;;  %v1948_v60 = vrot.slane %v11252_v11, %v11279_v19  ;;  %15631 = vst [vmem:[#allocation41_spill] sm:$0xff] %v11589_v36 }
  0xb4   :  { %2410 = vperm.xlu0 %10612, %v11518_v47   ;;  %15622 = vst [vmem:[#allocation32_spill] sm:$0xff] %v11545_v12 }
  0xb6   :  { %v11532_v58 = vpop.permute.xlu1 %733  ;;  %10622 = vset.pattern.permute.xlu1 %v15484_v1  ;;  %v11604_v2 = vpop.permute.xlu0 %785 }
  0xb7   :  { %15619 = vst [vmem:[#allocation29_spill] sm:$0xff] %v11532_v58  ;;  %2215 = vperm.xlu1 %10622, %v2045_v53   ;;  %15635 = vst [vmem:[#allocation45_spill] sm:$0xff] %v11604_v2 }
  0xb8   :  { %2420 = vperm.xlu0 %10612, %v11527_v55  }
  0xba   :  { %v11610_v18 = vpop.permute.xlu0 %793 }
  0xbb   :  { %v11541_v5 = vpop.permute.xlu1 %781  ;;  %10623 = vset.pattern.permute.xlu1 %v15480_v0  ;;  %15637 = vst [vmem:[#allocation47_spill] sm:$0xff] %v11610_v18 }
  0xbc   :  { %15621 = vst [vmem:[#allocation31_spill] sm:$0xff] %v11541_v5  ;;  %2430 = vperm.xlu0 %10612, %v11536_v9   ;;  %2596 = vperm.xlu1 %10623, %v2045_v53  }
  0xbe   :  { %v11621_v19 = vpop.permute.xlu0 %801 }
  0xbf   :  { %15641 = vst [vmem:[#allocation50_spill] sm:$0xff] %v11621_v19 }
  0xc0   :  { %v11552_v27 = vpop.permute.xlu1 %688  ;;  %2440 = vperm.xlu0 %10612, %v11545_v12   ;;  %2600 = vperm.xlu1 %10623, %v11313_v31  }
  0xc1   :  { %15623 = vst [vmem:[#allocation33_spill] sm:$0xff] %v11552_v27 }
  0xc4   :  { %2450 = vperm.xlu0 %10612, %v11556_v33   ;;  %10624 = vset.pattern.permute.xlu1 %v15489_v7 }
  0xc5   :  { %v11569_v51 = vpop.permute.xlu1 %737  ;;  %2984 = vperm.xlu1 %10624, %v2045_v53   ;;  %v1956_v53 = vsub.f32 %v1948_v60, %v11252_v11  ;;  %v1686_v60 = vsub.f32 %v1660_v45, %v11211_v3  ;;  %v15640_v45 = vmov 1  }
  0xc6   :  { %15626 = vst [vmem:[#allocation36_spill] sm:$0xff] %v11569_v51 }
  0xc7   :  { %v11592_v37 = vand.u32 2147483647, %v1956_v53  ;;  %v1694_v11 = vand.u32 2147483647, %v1686_v60 }
  0xc8   :  { %2460 = vperm.xlu0 %10612, %v11564_v43  }
  0xc9   :  { %v11577_v61 = vpop.permute.xlu1 %741  ;;  %10625 = vset.pattern.permute.xlu1 %v15484_v1  ;;  %15632 = vst [vmem:[#allocation42_spill] sm:$0xff] %v11592_v37 }
  0xca   :  { %15628 = vst [vmem:[#allocation38_spill] sm:$0xff] %v11577_v61  ;;  %2225 = vperm.xlu1 %10625, %v1518_v34   ;;  %v15653_v61 = vmov 2  }
  0xcc   :  { %2470 = vperm.xlu0 %10612, %v11572_v4  }
  0xce   :  { %v11586_v26 = vpop.permute.xlu1 %789  ;;  %10626 = vset.pattern.permute.xlu1 %v15480_v0 }
  0xcf   :  { %15630 = vst [vmem:[#allocation40_spill] sm:$0xff] %v11586_v26  ;;  %2604 = vperm.xlu1 %10626, %v1518_v34  }
  0xd0   :  { %2480 = vperm.xlu0 %10612, %v11581_v17  }
  0xd3   :  { %v11597_v49 = vpop.permute.xlu1 %698  ;;  %2608 = vperm.xlu1 %10626, %v11326_v35  }
  0xd4   :  { %15633 = vst [vmem:[#allocation43_spill] sm:$0xff] %v11597_v49  ;;  %2490 = vperm.xlu0 %10612, %v11592_v37  }
  0xd7   :  { %10627 = vset.pattern.permute.xlu1 %v15489_v7 }
  0xd8   :  { %v11607_v53 = vpop.permute.xlu1 %745  ;;  %2500 = vperm.xlu0 %10612, %v11601_v57   ;;  %2992 = vperm.xlu1 %10627, %v1518_v34   ;;  %v1836_v34 = vrot.slane %v11211_v3, %v11438_v44 }
  0xd9   :  { %15636 = vst [vmem:[#allocation46_spill] sm:$0xff] %v11607_v53 }
  0xdc   :  { %v11612_v0 = vpop.permute.xlu1 %749  ;;  %10708 = vset.pattern.permute.xlu0 %v15489_v7  ;;  %10628 = vset.pattern.permute.xlu1 %v15484_v1  ;;  %v1862_v1 = vsub.f32 %v1836_v34, %v11211_v3 }
  0xdd   :  { %15638 = vst [vmem:[#allocation48_spill] sm:$0xff] %v11612_v0  ;;  %2964 = vperm.xlu0 %10708, %v11289_v21   ;;  %2235 = vperm.xlu1 %10628, %v1694_v11   ;;  %v11629_v21 = vpop.permute.xlu0 %809 }
  0xde   :  { %15643 = vst [vmem:[#allocation52_spill] sm:$0xff] %v11629_v21  ;;  %v1870_v19 = vand.u32 2147483647, %v1862_v1 }
  0xe1   :  { %v11617_v13 = vpop.permute.xlu1 %797  ;;  %2972 = vperm.xlu0 %10708, %v11299_v25   ;;  %10629 = vset.pattern.permute.xlu1 %v15640_v45 }
  0xe2   :  { %15639 = vst [vmem:[#allocation49_spill] sm:$0xff] %v11617_v13  ;;  %2612 = vperm.xlu1 %10629, %v1694_v11   ;;  %v11637_v13 = vpop.permute.xlu0 %678 }
  0xe3   :  { %15645 = vst [vmem:[#allocation54_spill] sm:$0xff] %v11637_v13 }
  0xe5   :  { %2980 = vperm.xlu0 %10708, %v11306_v28  }
  0xe6   :  { %v11626_v60 = vpop.permute.xlu1 %708  ;;  %2616 = vperm.xlu1 %10629, %v11334_v38   ;;  %v11648_v34 = vpop.permute.xlu0 %693 }
  0xe7   :  { %15642 = vst [vmem:[#allocation51_spill] sm:$0xff] %v11626_v60  ;;  %v15647_v60 = vmov 0   ;;  %15648 = vst [vmem:[#allocation56_spill] sm:$0xff] %v11648_v34 }
  0xe9   :  { %2988 = vperm.xlu0 %10708, %v11313_v31   ;;  %v11646_v31 = vld [vmem:[%s15472_s7] sm:$0xff] }
  0xea   :  { %10630 = vset.pattern.permute.xlu1 %v15489_v7  ;;  %v11655_v1 = vrot.slane %v11646_v31, %v11340_v41  ;;  %v11666_v21 = vrot.slane %v11646_v31, %v11389_v62 }
  0xeb   :  { %v11634_v25 = vpop.permute.xlu1 %753  ;;  %3000 = vperm.xlu1 %10630, %v1694_v11  }
  0xec   :  { %15644 = vst [vmem:[#allocation53_spill] sm:$0xff] %v11634_v25  ;;  %15650 = vst [vmem:[#allocation58_spill] sm:$0xff] %v11655_v1  ;;  %v11673_v25 = vpop.permute.xlu0 %703 }
  0xed   :  { %2996 = vperm.xlu0 %10708, %v11326_v35   ;;  %v11660_v35 = vrot.slane %v11646_v31, %v11263_v14  ;;  %15652 = vst [vmem:[#allocation60_spill] sm:$0xff] %v11673_v25 }
  0xef   :  { %v11639_v28 = vpop.permute.xlu1 %757  ;;  %10631 = vset.pattern.permute.xlu1 %v15647_v60 }
  0xf0   :  { %15646 = vst [vmem:[#allocation55_spill] sm:$0xff] %v11639_v28  ;;  %2245 = vperm.xlu1 %10631, %v1870_v19  }
  0xf1   :  { %3004 = vperm.xlu0 %10708, %v11334_v38   ;;  %v2012_v38 = vrot.slane %v11211_v3, %v11498_v29 }
  0xf3   :  { %v2038_v53 = vsub.f32 %v2012_v38, %v11211_v3  ;;  %v15656_v3 = vmov 0.0  }
  0xf4   :  { %v11650_v11 = vpop.permute.xlu1 %805  ;;  %10632 = vset.pattern.permute.xlu1 %v15640_v45 }
  0xf5   :  { %15649 = vst [vmem:[#allocation57_spill] sm:$0xff] %v11650_v11  ;;  %2620 = vperm.xlu1 %10632, %v1870_v19   ;;  %3012 = vperm.xlu0 %10708, %v11345_v42  }
  0xf8   :  { %v340_v7 = vpop.f32.mrf.mxu1 }
  0xf9   :  { %v341_v11 = vadd.f32 %v340_v7, %v11655_v1  ;;  %2624 = vperm.xlu1 %10632, %v11345_v42   ;;  %v11670_v28 = vpop.permute.xlu1 %2185  ;;  %3020 = vperm.xlu0 %10708, %v11354_v46   ;;  %v11685_v1 = vpop.permute.xlu0 %713 }
  0xfa   :  { %15651 = vst [vmem:[#allocation59_spill] sm:$0xff] %v11670_v28  ;;  %v9980_v49 = vpop.f32.mrf.mxu1  ;;  %v2046_v28 = vand.u32 2147483647, %v2038_v53  ;;  %15654 = vst [vmem:[#allocation61_spill] sm:$0xff] %v11685_v1  ;;  %v1488_v53 = vrot.slane %v11245_v10, %v11340_v41 }
  0xfb   :  { %v344_v0 = vmul.f32 %v341_v11, %v11660_v35 }
  0xfd   :  { %v11678_v18 = vadd.f32 %v344_v0, %v11666_v21  ;;  %10633 = vset.pattern.permute.xlu1 %v15653_v61  ;;  %3028 = vperm.xlu0 %10708, %v11362_v50  }
  0xfe   :  { %3008 = vperm.xlu1 %10633, %v1870_v19   ;;  %v11682_v7 = vpop.permute.xlu1 %2572  ;;  %v11697_v19 = vpop.permute.xlu0 %2190 }
  0xff   :  { %v15502_v42 = vmax.f32 %v11678_v18, 0.0  ;;  %15657 = vst [vmem:[#allocation63_spill] sm:$0xff] %v11697_v19 }
 0x101   :  { %9986 = vmatmul.mubr.msk.f32.vlgmr.msra.gmra.mxu1 %vm354_vm2, %v15502_v42  ;;  %3036 = vperm.xlu0 %10708, %v11369_v54   ;;  %v1511_v42 = vsub.f32 %v1488_v53, %v11245_v10  ;;  %v1664_v53 = vrot.slane %v11245_v10, %v11389_v62 }
 0x102   :  { %10634 = vset.pattern.permute.xlu1 %v15647_v60  ;;  %v11692_v0 = vpop.permute.xlu1 %2576  ;;  %9992 = vmatprep.mubr.msk.f32.mxu1 %vm11120_vm0, %v15656_v3  ;;  %v11705_v11 = vpop.permute.xlu0 %2200 }
 0x103   :  { %15655 = vst [vmem:[#allocation62_spill] sm:$0xff] %v11692_v0  ;;  %2255 = vperm.xlu1 %10634, %v2046_v28   ;;  %15659 = vst [vmem:[#allocation65_spill] sm:$0xff] %v11705_v11 }
 0x105   :  { %3044 = vperm.xlu0 %10708, %v11383_v59  }
 0x106   :  { %v11716_v19 = vpop.permute.xlu0 %2210 }
 0x107   :  { %10635 = vset.pattern.permute.xlu1 %v15640_v45  ;;  %v11700_v49 = vpop.permute.xlu1 %2960  ;;  %15661 = vst [vmem:[#allocation67_spill] sm:$0xff] %v11716_v19 }
 0x108   :  { %15658 = vst [vmem:[#allocation64_spill] sm:$0xff] %v11700_v49  ;;  %2628 = vperm.xlu1 %10635, %v2046_v28   ;;  %v1519_v49 = vand.u32 2147483647, %v1511_v42 }
 0x109   :  { %3052 = vperm.xlu0 %10708, %v11394_v63  }
 0x10c   :  { %2632 = vperm.xlu1 %10635, %v11354_v46   ;;  %v11708_v38 = vpop.permute.xlu1 %2195  ;;  %v11722_v46 = vpop.permute.xlu0 %2220 }
 0x10d   :  { %15660 = vst [vmem:[#allocation66_spill] sm:$0xff] %v11708_v38  ;;  %3060 = vperm.xlu0 %10708, %v11403_v15   ;;  %15663 = vst [vmem:[#allocation69_spill] sm:$0xff] %v11722_v46  ;;  %v1687_v46 = vsub.f32 %v1664_v53, %v11245_v10 }
 0x10f   :  { %v1695_v38 = vand.u32 2147483647, %v1687_v46  ;;  %v1840_v46 = vrot.slane %v11245_v10, %v11438_v44 }
 0x110   :  { %10636 = vset.pattern.permute.xlu1 %v15653_v61  ;;  %v11731_v42 = vpop.permute.xlu0 %2230 }
 0x111   :  { %3016 = vperm.xlu1 %10636, %v2046_v28   ;;  %v11713_v0 = vpop.permute.xlu1 %2580  ;;  %3068 = vperm.xlu0 %10708, %v11411_v23   ;;  %15665 = vst [vmem:[#allocation71_spill] sm:$0xff] %v11731_v42 }
 0x115   :  { %10637 = vset.pattern.permute.xlu1 %v15647_v60  ;;  %v11719_v11 = vpop.permute.xlu1 %2584  ;;  %3076 = vperm.xlu0 %10708, %v11418_v30  }
 0x116   :  { %15662 = vst [vmem:[#allocation68_spill] sm:$0xff] %v11719_v11  ;;  %2265 = vperm.xlu1 %10637, %v1519_v49   ;;  %v11739_v11 = vpop.permute.xlu0 %2240 }
 0x117   :  { %15666 = vst [vmem:[#allocation72_spill] sm:$0xff] %v11739_v11 }
 0x119   :  { %3084 = vperm.xlu0 %10708, %v11432_v39  }
 0x11a   :  { %10638 = vset.pattern.permute.xlu1 %v15640_v45  ;;  %v11726_v28 = vpop.permute.xlu1 %2968 }
 0x11b   :  { %15664 = vst [vmem:[#allocation70_spill] sm:$0xff] %v11726_v28  ;;  %2636 = vperm.xlu1 %10638, %v1519_v49  }
 0x11d   :  { %3092 = vperm.xlu0 %10708, %v11450_v48  }
 0x11f   :  { %2640 = vperm.xlu1 %10638, %v11362_v50   ;;  %v11734_v19 = vpop.permute.xlu1 %2205  ;;  %v11748_v50 = vpop.permute.xlu0 %2250 }
 0x120   :  { %15667 = vst [vmem:[#allocation73_spill] sm:$0xff] %v11748_v50  ;;  %v1863_v50 = vsub.f32 %v1840_v46, %v11245_v10 }
 0x121   :  { %3100 = vperm.xlu0 %10708, %v11467_v56  }
 0x123   :  { %10639 = vset.pattern.permute.xlu1 %v15653_v61 }
 0x124   :  { %3024 = vperm.xlu1 %10639, %v1519_v49   ;;  %v11741_v28 = vpop.permute.xlu1 %2588  ;;  %v11754_v49 = vpop.permute.xlu0 %2260 }
 0x125   :  { %3108 = vperm.xlu0 %10708, %v11485_v6   ;;  %15668 = vst [vmem:[#allocation74_spill] sm:$0xff] %v11754_v49  ;;  %v1871_v49 = vand.u32 2147483647, %v1863_v50  ;;  %v9233_v50 = vld [vmem:[%s15471_s6 + $0xa8] sm:$0xff] }
 0x126   :  { %9989 = vmatpush3.msra.mxu1 %v9233_v50 }
 0x127   :  { %9990 = vmatprep.subr.mxu1 %v15656_v3 }
 0x128   :  { %10640 = vset.pattern.permute.xlu1 %v15647_v60  ;;  %v11745_v42 = vpop.permute.xlu1 %2592 }
 0x129   :  { %2275 = vperm.xlu1 %10640, %v1695_v38   ;;  %3116 = vperm.xlu0 %10708, %v11492_v22   ;;  %v11764_v22 = vpop.permute.xlu0 %2270 }
 0x12a   :  { %15669 = vst [vmem:[#allocation75_spill] sm:$0xff] %v11764_v22 }
 0x12d   :  { %10641 = vset.pattern.permute.xlu1 %v15640_v45  ;;  %v11751_v53 = vpop.permute.xlu1 %2976  ;;  %3124 = vperm.xlu0 %10708, %v11502_v32  }
 0x12e   :  { %2644 = vperm.xlu1 %10641, %v1695_v38  }
 0x131   :  { %3132 = vperm.xlu0 %10708, %v11510_v40  }
 0x132   :  { %2648 = vperm.xlu1 %10641, %v11369_v54   ;;  %v11760_v11 = vpop.permute.xlu1 %2215  ;;  %v11773_v54 = vpop.permute.xlu0 %2280 }
 0x133   :  { %15670 = vst [vmem:[#allocation76_spill] sm:$0xff] %v11773_v54 }
 0x135   :  { %3140 = vperm.xlu0 %10708, %v11518_v47  }
 0x136   :  { %10642 = vset.pattern.permute.xlu1 %v15653_v61 }
 0x137   :  { %3032 = vperm.xlu1 %10642, %v1695_v38   ;;  %v11767_v32 = vpop.permute.xlu1 %2596  ;;  %v11780_v38 = vpop.permute.xlu0 %2290 }
 0x138   :  { %15671 = vst [vmem:[#allocation77_spill] sm:$0xff] %v11780_v38 }
 0x139   :  { %3148 = vperm.xlu0 %10708, %v11527_v55   ;;  %v2016_v55 = vrot.slane %v11245_v10, %v11498_v29 }
 0x13b   :  { %10643 = vset.pattern.permute.xlu1 %v15647_v60  ;;  %v11771_v40 = vpop.permute.xlu1 %2600  ;;  %v11797_v38 = vpop.permute.xlu0 %2300 }
 0x13c   :  { %2285 = vperm.xlu1 %10643, %v1871_v49   ;;  %15672 = vst [vmem:[#allocation78_spill] sm:$0xff] %v11797_v38 }
 0x13d   :  { %3156 = vperm.xlu0 %10708, %v11536_v9   ;;  %v9232_v9 = vld [vmem:[%s15471_s6 + $0xa0] sm:$0xff] }
 0x13e   :  { %9991 = vmatpush3.msra.mxu1 %v9232_v9 }
 0x13f   :  { %9995 = vmatprep.subr.mxu1 %v15656_v3 }
 0x140   :  { %10644 = vset.pattern.permute.xlu1 %v15640_v45  ;;  %v11777_v46 = vpop.permute.xlu1 %2984 }
 0x141   :  { %2652 = vperm.xlu1 %10644, %v1871_v49   ;;  %3164 = vperm.xlu0 %10708, %v11545_v12   ;;  %v2039_v12 = vsub.f32 %v2016_v55, %v11245_v10 }
 0x143   :  { %v2047_v54 = vand.u32 2147483647, %v2039_v12  ;;  %v1492_v12 = vrot.slane %v11229_v8, %v11340_v41 }
 0x145   :  { %2656 = vperm.xlu1 %10644, %v11383_v59   ;;  %v11792_v47 = vpop.permute.xlu1 %2225  ;;  %3172 = vperm.xlu0 %10708, %v11556_v33   ;;  %v11803_v59 = vpop.permute.xlu0 %2310 }
 0x146   :  { %15673 = vst [vmem:[#allocation79_spill] sm:$0xff] %v11803_v59 }
 0x149   :  { %10645 = vset.pattern.permute.xlu1 %v15653_v61  ;;  %3180 = vperm.xlu0 %10708, %v11564_v43   ;;  %v11813_v55 = vpop.permute.xlu0 %2320 }
 0x14a   :  { %3040 = vperm.xlu1 %10645, %v1871_v49   ;;  %v11800_v50 = vpop.permute.xlu1 %2604  ;;  %15676 = vst [vmem:[#allocation82_spill] sm:$0xff] %v11813_v55 }
 0x14d   :  { %3188 = vperm.xlu0 %10708, %v11572_v4   ;;  %v11821_v4 = vpop.permute.xlu0 %2330 }
 0x14e   :  { %10646 = vset.pattern.permute.xlu1 %v15647_v60  ;;  %v11806_v9 = vpop.permute.xlu1 %2608  ;;  %15678 = vst [vmem:[#allocation84_spill] sm:$0xff] %v11821_v4 }
 0x14f   :  { %15674 = vst [vmem:[#allocation80_spill] sm:$0xff] %v11806_v9  ;;  %2295 = vperm.xlu1 %10646, %v2047_v54  }
 0x151   :  { %3196 = vperm.xlu0 %10708, %v11581_v17   ;;  %v1512_v17 = vsub.f32 %v1492_v12, %v11229_v8  ;;  %v1668_v12 = vrot.slane %v11229_v8, %v11389_v62 }
 0x153   :  { %10647 = vset.pattern.permute.xlu1 %v15640_v45  ;;  %v11811_v10 = vpop.permute.xlu1 %2992  ;;  %v1520_v33 = vand.u32 2147483647, %v1512_v17 }
 0x154   :  { %15675 = vst [vmem:[#allocation81_spill] sm:$0xff] %v11811_v10  ;;  %2660 = vperm.xlu1 %10647, %v2047_v54  }
 0x155   :  { %3204 = vperm.xlu0 %10708, %v11592_v37  }
 0x158   :  { %2664 = vperm.xlu1 %10647, %v11394_v63   ;;  %v11819_v49 = vpop.permute.xlu1 %2235 }
 0x159   :  { %15677 = vst [vmem:[#allocation83_spill] sm:$0xff] %v11819_v49  ;;  %3212 = vperm.xlu0 %10708, %v11601_v57   ;;  %v11837_v57 = vpop.permute.xlu0 %2340 }
 0x15a   :  { %15682 = vst [vmem:[#allocation88_spill] sm:$0xff] %v11837_v57 }
 0x15c   :  { %10648 = vset.pattern.permute.xlu1 %v15653_v61 }
 0x15d   :  { %3048 = vperm.xlu1 %10648, %v2047_v54   ;;  %v11826_v43 = vpop.permute.xlu1 %2612  ;;  %10711 = vset.pattern.permute.xlu0 %v15647_v60  ;;  %v1688_v54 = vsub.f32 %v1668_v12, %v11229_v8  ;;  %v11844_v4 = vpop.permute.xlu0 %2350 }
 0x15e   :  { %15679 = vst [vmem:[#allocation85_spill] sm:$0xff] %v11826_v43  ;;  %15684 = vst [vmem:[#allocation90_spill] sm:$0xff] %v11844_v4 }
 0x15f   :  { %v1696_v59 = vand.u32 2147483647, %v1688_v54 }
 0x161   :  { %10649 = vset.pattern.permute.xlu1 %v15647_v60  ;;  %v11830_v37 = vpop.permute.xlu1 %2616  ;;  %v11851_v57 = vpop.permute.xlu0 %2360 }
 0x162   :  { %15680 = vst [vmem:[#allocation86_spill] sm:$0xff] %v11830_v37  ;;  %2305 = vperm.xlu1 %10649, %v1520_v33   ;;  %15687 = vst [vmem:[#allocation93_spill] sm:$0xff] %v11851_v57 }
 0x165   :  { %v11856_v12 = vpop.permute.xlu0 %2370 }
 0x166   :  { %10650 = vset.pattern.permute.xlu1 %v15640_v45  ;;  %v11833_v63 = vpop.permute.xlu1 %3000  ;;  %15689 = vst [vmem:[#allocation95_spill] sm:$0xff] %v11856_v12 }
 0x167   :  { %15681 = vst [vmem:[#allocation87_spill] sm:$0xff] %v11833_v63  ;;  %2668 = vperm.xlu1 %10650, %v1520_v33   ;;  %v15718_v63 = vld [vmem:[#allocation46_spill] sm:$0xff] }
 0x169   :  { %v11864_v22 = vpop.permute.xlu0 %2380 }
 0x16a   :  { %15691 = vst [vmem:[#allocation97_spill] sm:$0xff] %v11864_v22 }
 0x16b   :  { %2672 = vperm.xlu1 %10650, %v11403_v15   ;;  %v11840_v17 = vpop.permute.xlu1 %2245 }
 0x16c   :  { %15683 = vst [vmem:[#allocation89_spill] sm:$0xff] %v11840_v17 }
 0x16d   :  { %v11872_v17 = vpop.permute.xlu0 %2390 }
 0x16e   :  { %15694 = vst [vmem:[#allocation100_spill] sm:$0xff] %v11872_v17 }
 0x16f   :  { %10651 = vset.pattern.permute.xlu1 %v15653_v61 }
 0x170   :  { %3056 = vperm.xlu1 %10651, %v1520_v33   ;;  %v11846_v55 = vpop.permute.xlu1 %2620  ;;  %v1844_v33 = vrot.slane %v11229_v8, %v11438_v44 }
 0x171   :  { %15685 = vst [vmem:[#allocation91_spill] sm:$0xff] %v11846_v55 }
 0x172   :  { %v1864_v4 = vsub.f32 %v1844_v33, %v11229_v8  ;;  %v11877_v33 = vpop.permute.xlu0 %2400 }
 0x173   :  { %15696 = vst [vmem:[#allocation102_spill] sm:$0xff] %v11877_v33 }
 0x174   :  { %10652 = vset.pattern.permute.xlu1 %v15647_v60  ;;  %v11849_v38 = vpop.permute.xlu1 %2624 }
 0x175   :  { %15686 = vst [vmem:[#allocation92_spill] sm:$0xff] %v11849_v38  ;;  %2315 = vperm.xlu1 %10652, %v1696_v59  }
 0x179   :  { %10653 = vset.pattern.permute.xlu1 %v15640_v45  ;;  %v11854_v15 = vpop.permute.xlu1 %3008 }
 0x17a   :  { %15688 = vst [vmem:[#allocation94_spill] sm:$0xff] %v11854_v15  ;;  %2676 = vperm.xlu1 %10653, %v1696_v59   ;;  %v1872_v15 = vand.u32 2147483647, %v1864_v4 }
 0x17e   :  { %2680 = vperm.xlu1 %10653, %v11411_v23   ;;  %v11861_v54 = vpop.permute.xlu1 %2255 }
 0x17f   :  { %15690 = vst [vmem:[#allocation96_spill] sm:$0xff] %v11861_v54  ;;  %v11885_v54 = vpop.permute.xlu0 %2410 }
 0x180   :  { %15698 = vst [vmem:[#allocation104_spill] sm:$0xff] %v11885_v54 }
 0x182   :  { %10654 = vset.pattern.permute.xlu1 %v15653_v61 }
 0x183   :  { %3064 = vperm.xlu1 %10654, %v1696_v59   ;;  %v11867_v57 = vpop.permute.xlu1 %2628  ;;  %v2020_v59 = vrot.slane %v11229_v8, %v11498_v29 }
 0x184   :  { %15692 = vst [vmem:[#allocation98_spill] sm:$0xff] %v11867_v57 }
 0x185   :  { %v2040_v22 = vsub.f32 %v2020_v59, %v11229_v8 }
 0x187   :  { %10655 = vset.pattern.permute.xlu1 %v15647_v60  ;;  %v11870_v12 = vpop.permute.xlu1 %2632 }
 0x188   :  { %15693 = vst [vmem:[#allocation99_spill] sm:$0xff] %v11870_v12  ;;  %2325 = vperm.xlu1 %10655, %v1872_v15   ;;  %v11890_v12 = vpop.permute.xlu0 %2420 }
 0x189   :  { %15700 = vst [vmem:[#allocation106_spill] sm:$0xff] %v11890_v12 }
 0x18c   :  { %10656 = vset.pattern.permute.xlu1 %v15640_v45  ;;  %v11875_v23 = vpop.permute.xlu1 %3016  ;;  %v11898_v8 = vpop.permute.xlu0 %2430 }
 0x18d   :  { %15695 = vst [vmem:[#allocation101_spill] sm:$0xff] %v11875_v23  ;;  %2684 = vperm.xlu1 %10656, %v1872_v15   ;;  %v2048_v23 = vand.u32 2147483647, %v2040_v22  ;;  %15703 = vst [vmem:[#allocation109_spill] sm:$0xff] %v11898_v8 }
 0x190   :  { %v11905_v59 = vpop.permute.xlu0 %2440 }
 0x191   :  { %2688 = vperm.xlu1 %10656, %v11418_v30   ;;  %v11882_v4 = vpop.permute.xlu1 %2265  ;;  %15705 = vst [vmem:[#allocation111_spill] sm:$0xff] %v11905_v59 }
 0x192   :  { %15697 = vst [vmem:[#allocation103_spill] sm:$0xff] %v11882_v4 }
 0x194   :  { %v11911_v4 = vpop.permute.xlu0 %2450 }
 0x195   :  { %10657 = vset.pattern.permute.xlu1 %v15653_v61  ;;  %15707 = vst [vmem:[#allocation113_spill] sm:$0xff] %v11911_v4 }
 0x196   :  { %3072 = vperm.xlu1 %10657, %v1872_v15   ;;  %v11888_v17 = vpop.permute.xlu1 %2636  ;;  %v1496_v15 = vrot.slane %v11284_v20, %v11340_v41 }
 0x197   :  { %15699 = vst [vmem:[#allocation105_spill] sm:$0xff] %v11888_v17 }
 0x198   :  { %v1513_v12 = vsub.f32 %v1496_v15, %v11284_v20 }
 0x19a   :  { %10658 = vset.pattern.permute.xlu1 %v15647_v60  ;;  %v11893_v33 = vpop.permute.xlu1 %2640 }
 0x19b   :  { %15701 = vst [vmem:[#allocation107_spill] sm:$0xff] %v11893_v33  ;;  %2335 = vperm.xlu1 %10658, %v2048_v23  }
 0x19f   :  { %10659 = vset.pattern.permute.xlu1 %v15640_v45  ;;  %v11896_v30 = vpop.permute.xlu1 %3024 }
 0x1a0   :  { %15702 = vst [vmem:[#allocation108_spill] sm:$0xff] %v11896_v30  ;;  %2692 = vperm.xlu1 %10659, %v2048_v23   ;;  %v1521_v30 = vand.u32 2147483647, %v1513_v12  ;;  %v1672_v12 = vrot.slane %v11284_v20, %v11389_v62 }
 0x1a4   :  { %2696 = vperm.xlu1 %10659, %v11432_v39   ;;  %v11903_v22 = vpop.permute.xlu1 %2275  ;;  %v11916_v39 = vpop.permute.xlu0 %2460 }
 0x1a5   :  { %15704 = vst [vmem:[#allocation110_spill] sm:$0xff] %v11903_v22  ;;  %15709 = vst [vmem:[#allocation115_spill] sm:$0xff] %v11916_v39 }
 0x1a8   :  { %10660 = vset.pattern.permute.xlu1 %v15653_v61  ;;  %v11935_v22 = vpop.permute.xlu0 %2470 }
 0x1a9   :  { %3080 = vperm.xlu1 %10660, %v2048_v23   ;;  %v11909_v54 = vpop.permute.xlu1 %2644  ;;  %v675_v23 = vld [vmem:[%s15470_s5] sm:$0x7]  ;;  %15712 = vst [vmem:[#allocation118_spill] sm:$0xff] %v11935_v22  ;;  %v92_v22 = vld [vmem:[%s15472_s7 + $0x8] sm:$0xff] }
 0x1aa   :  { %15706 = vst [vmem:[#allocation112_spill] sm:$0xff] %v11909_v54  ;;  %v11927_v15 = vrot.slane %v675_v23, %v11263_v14  ;;  %v11933_v39 = vrot.slane %v675_v23, %v11340_v41  ;;  %v1689_v54 = vsub.f32 %v1672_v12, %v11284_v20  ;;  %v353_v38 = vrot.slane %v92_v22, %v11295_v24  ;;  %v15716_v22 = vld [vmem:[#allocation38_spill] sm:$0xff] }
 0x1ac   :  { %v764_v33 = vmul.f32 %v11927_v15, %v11589_v36  ;;  %v766_v17 = vmul.f32 %v11927_v15, %v11569_v51  ;;  %v11965_v55 = vpop.permute.xlu0 %2480  ;;  %v15717_v51 = vld [vmem:[#allocation47_spill] sm:$0xff]  ;;  %v768_v49 = vmul.f32 %v11927_v15, %v15718_v63  ;;  %v725_v43 = vmul.f32 %v11933_v39, %v11673_v25 }
 0x1ad   :  { %10661 = vset.pattern.permute.xlu1 %v15647_v60  ;;  %v11914_v8 = vpop.permute.xlu1 %2648  ;;  %15714 = vst [vmem:[#allocation120_spill] sm:$0xff] %v11965_v55 }
 0x1ae   :  { %15708 = vst [vmem:[#allocation114_spill] sm:$0xff] %v11914_v8  ;;  %2345 = vperm.xlu1 %10661, %v1521_v30   ;;  %v11940_v8 = vrot.slane %v675_v23, %v11389_v62  ;;  %v721_v23 = vmul.f32 %v11933_v39, %v11523_v52 }
 0x1b0   :  { %v817_v36 = vmul.f32 %v11940_v8, %v11604_v2  ;;  %v816_v52 = vmul.f32 %v11940_v8, %v11541_v5  ;;  %v722_v2 = vmul.f32 %v11933_v39, %v11552_v27  ;;  %v11996_v10 = vpop.permute.xlu0 %2490 }
 0x1b1   :  { %15720 = vst [vmem:[#allocation47_spill] sm:$0xff] %v11996_v10 }
 0x1b2   :  { %10662 = vset.pattern.permute.xlu1 %v15640_v45  ;;  %v11919_v59 = vpop.permute.xlu1 %3032  ;;  %v774_v5 = vadd.f32 %v766_v17, %v722_v2  ;;  %v15723_v17 = vld [vmem:[#allocation50_spill] sm:$0xff] }
 0x1b3   :  { %15710 = vst [vmem:[#allocation116_spill] sm:$0xff] %v11919_v59  ;;  %2700 = vperm.xlu1 %10662, %v1521_v30   ;;  %v11937_v59 = vpop.f32.mrf.mxu0 }
 0x1b5   :  { %v11957_v12 = vpop.f32.mrf.mxu0 }
 0x1b7   :  { %2704 = vperm.xlu1 %10662, %v11450_v48   ;;  %v11930_v4 = vpop.permute.xlu1 %2285  ;;  %v765_v48 = vmul.f32 %v11927_v15, %v11532_v58  ;;  %v11961_v58 = vand.u32 2147483647, %v1689_v54  ;;  %v818_v54 = vmul.f32 %v11940_v8, %v11586_v26 }
 0x1b8   :  { %15711 = vst [vmem:[#allocation117_spill] sm:$0xff] %v11930_v4  ;;  %v720_v4 = vmul.f32 %v11933_v39, %v11637_v13 }
 0x1b9   :  { %v773_v13 = vadd.f32 %v765_v48, %v721_v23  ;;  %v767_v23 = vmul.f32 %v11927_v15, %v15716_v22  ;;  %v15719_v22 = vld [vmem:[#allocation48_spill] sm:$0xff] }
 0x1ba   :  { %v772_v57 = vadd.f32 %v764_v33, %v720_v4  ;;  %v11979_v33 = vpop.f32.mrf.mxu0  ;;  %v11983_v4 = vrot.slane %v11646_v31, %v11270_v16  ;;  %v826_v16 = vadd.f32 %v818_v54, %v774_v5  ;;  %v769_v9 = vmul.f32 %v11927_v15, %v15719_v22 }
 0x1bb   :  { %10663 = vset.pattern.permute.xlu1 %v15653_v61  ;;  %v825_v27 = vadd.f32 %v817_v36, %v773_v13 }
 0x1bc   :  { %3088 = vperm.xlu1 %10663, %v1521_v30   ;;  %v11955_v20 = vpop.permute.xlu1 %2652  ;;  %v723_v30 = vmul.f32 %v11933_v39, %v11648_v34  ;;  %v824_v34 = vadd.f32 %v816_v52, %v772_v57  ;;  %v9236_v52 = vld [vmem:[%s15471_s6 + $0xb8] sm:$0xff]  ;;  %v209_v36 = vpop.f32.mrf.mxu0  ;;  %v777_v22 = vadd.f32 %v769_v9, %v725_v43  ;;  %v12042_v43 = vld [vmem:[%s15465_s0 + $0x20] sm:$0xff] }
 0x1bd   :  { %15713 = vst [vmem:[#allocation119_spill] sm:$0xff] %v11955_v20  ;;  %v819_v20 = vmul.f32 %v11940_v8, %v15717_v51  ;;  %v15721_v57 = vld [vmem:[#allocation43_spill] sm:$0xff]  ;;  %v1848_v9 = vrot.slane %v12042_v43, %v11438_v44 }
 0x1be   :  { %v724_v13 = vmul.f32 %v11933_v39, %v15721_v57  ;;  %v836_v54 = vadd.f32 %v11983_v4, %v824_v34  ;;  %v15725_v34 = vld [vmem:[#allocation55_spill] sm:$0xff] }
 0x1c0   :  { %10664 = vset.pattern.permute.xlu1 %v15647_v60  ;;  %v11977_v48 = vpop.permute.xlu1 %2656  ;;  %v776_v10 = vadd.f32 %v768_v49, %v724_v13  ;;  %v771_v49 = vmul.f32 %v11927_v15, %v15725_v34  ;;  %v15731_v34 = vld [vmem:[#allocation58_spill] sm:$0xff] }
 0x1c1   :  { %15715 = vst [vmem:[#allocation121_spill] sm:$0xff] %v11977_v48  ;;  %v424_v55 = vpop.f32.mrf.mxu1  ;;  %2355 = vperm.xlu1 %10664, %v11961_v58   ;;  %v775_v48 = vadd.f32 %v767_v23, %v723_v30  ;;  %v9235_v30 = vld [vmem:[%s15471_s6 + $0xb0] sm:$0xff] }
 0x1c2   :  { %v425_v26 = vadd.f32 %v424_v55, %v353_v38  ;;  %v15722_v38 = vld [vmem:[#allocation49_spill] sm:$0xff]  ;;  %v837_v55 = vadd.f32 %v11983_v4, %v825_v27 }
 0x1c3   :  { %v9987_v37 = vpop.f32.mrf.mxu1  ;;  %v820_v5 = vmul.f32 %v11940_v8, %v15722_v38  ;;  %v827_v23 = vadd.f32 %v819_v20, %v775_v48  ;;  %v15724_v38 = vld [vmem:[#allocation53_spill] sm:$0xff]  ;;  %v12030_v20 = vpop.f32.mrf.mxu0 }
 0x1c4   :  { %v428_v2 = vmax.f32 %v425_v26, 0.0  ;;  %v821_v26 = vmul.f32 %v11940_v8, %v15723_v17  ;;  %v770_v57 = vmul.f32 %v11927_v15, %v15724_v38  ;;  %v853_v27 = vld [vmem:[%s15471_s6 + $0x8] sm:$0xff]  ;;  %v727_v17 = vmul.f32 %v11933_v39, %v11685_v1 }
 0x1c5   :  { %10665 = vset.pattern.permute.xlu1 %v15640_v45  ;;  %v12006_v37 = vpop.permute.xlu1 %3040  ;;  %v828_v48 = vadd.f32 %v820_v5, %v776_v10  ;;  %v15727_v38 = vld [vmem:[#allocation57_spill] sm:$0xff]  ;;  %v12046_v10 = vpop.permute.xlu0 %2500  ;;  %v844_v5 = vmax.f32 %v836_v54, 0.0  ;;  %v200_v1 = vadd.f32 %v11957_v12, %v15731_v34  ;;  %v839_v54 = vadd.f32 %v11983_v4, %v827_v23 }
 0x1c6   :  { %9993 = vmatmul.mubr.msk.f32.vlgmr.msra.gmra.mxu1 %vm354_vm2, %v428_v2  ;;  %2708 = vperm.xlu1 %10665, %v11961_v58   ;;  %v838_v2 = vadd.f32 %v11983_v4, %v826_v16  ;;  %v822_v25 = vmul.f32 %v11940_v8, %v15727_v38  ;;  %v852_v16 = vld [vmem:[%s15471_s6] sm:$0xff]  ;;  %15728 = vst [vmem:[#allocation122_spill] sm:$0xff] %v12046_v10  ;;  %v845_v10 = vmax.f32 %v837_v55, 0.0 }
 0x1c7   :  { %9996 = vmatpush3.msra.mxu1 %v9236_v52  ;;  %9999 = vmatprep.mubr.msk.f32.mxu1 %vm11120_vm0, %v15656_v3  ;;  %v15726_v52 = vld [vmem:[#allocation51_spill] sm:$0xff]  ;;  %v779_v63 = vadd.f32 %v771_v49, %v727_v17  ;;  %v1865_v12 = vsub.f32 %v1848_v9, %v12042_v43  ;;  %v205_v55 = vadd.f32 %v11937_v59, %v15731_v34  ;;  %v847_v59 = vmax.f32 %v839_v54, 0.0 }
 0x1c8   :  { %9997 = vmatprep.subr.mxu1 %v15656_v3  ;;  %v726_v13 = vmul.f32 %v11933_v39, %v15726_v52  ;;  %v15729_v39 = vmax.f32 %v11678_v18, 0.0  ;;  %v9261_v18 = vld [vmem:[%s15471_s6 + $0x58] sm:$0xff] }
 0x1c9   :  { %9998 = vmatpush3.msra.mxu1 %v9235_v30  ;;  %v15730_v30 = vld [vmem:[#allocation52_spill] sm:$0xff] }
 0x1ca   :  { %10000 = vmatmul.mubr.msk.f32.vlgmr.msra.gmra.mxu1 %vm354_vm2, %v15729_v39  ;;  %10009 = vmatprep.subr.mxu1 %v853_v27  ;;  %v12051_v15 = vpop.permute.xlu1 %2295  ;;  %v823_v38 = vmul.f32 %v11940_v8, %v15730_v30  ;;  %v778_v52 = vadd.f32 %v770_v57, %v726_v13  ;;  %v829_v39 = vadd.f32 %v821_v26, %v777_v22  ;;  %v219_v8 = vpop.f32.mrf.mxu0  ;;  %v9260_v22 = vld [vmem:[%s15471_s6 + $0x50] sm:$0xff] }
 0x1cb   :  { %2712 = vperm.xlu1 %10665, %v11467_v56   ;;  %10010 = vmatpush3.msra.mxu1 %v853_v27  ;;  %v840_v57 = vadd.f32 %v11983_v4, %v828_v48  ;;  %v846_v27 = vmax.f32 %v838_v2, 0.0  ;;  %v210_v26 = vadd.f32 %v209_v36, %v15731_v34  ;;  %v12077_v2 = vpop.permute.xlu0 %2964  ;;  %v215_v36 = vadd.f32 %v11979_v33, %v15731_v34 }
 0x1cc   :  { %10013 = vmatprep.mubr.msk.f32.mxu1 %vm354_vm2, %v844_v5  ;;  %10011 = vmatprep.subr.mxu1 %v852_v16  ;;  %v830_v56 = vadd.f32 %v822_v25, %v778_v52  ;;  %v242_v25 = vmul.f32 %v11660_v35, %v200_v1  ;;  %v831_v23 = vadd.f32 %v823_v38, %v779_v63  ;;  %v9975_v48 = vpop.f32.mrf.mxu0  ;;  %v12087_v1 = vld [vmem:[%s15471_s6 + $0x28] sm:$0xff]  ;;  %v7779_v38 = vld [vmem:[%s15467_s2 + $0x10] sm:$0xff] }
 0x1cd   :  { %10012 = vmatpush3.msra.mxu1 %v852_v16  ;;  %v841_v49 = vadd.f32 %v11983_v4, %v829_v39  ;;  %v848_v13 = vmax.f32 %v840_v57, 0.0  ;;  %v12082_v16 = vand.u32 2147483647, %v1865_v12  ;;  %v243_v63 = vmul.f32 %v11660_v35, %v205_v55  ;;  %7861 = vperm.xlu0 %10711, %v7779_v38  }
 0x1ce   :  { %10014 = vmatmul.mubr.msk.f32.vlgmr.msra.gmra.mxu1 %vm354_vm2, %v845_v10  ;;  %10041 = vmatprep.subr.mxu1 %v9261_v18  ;;  %v842_v52 = vadd.f32 %v11983_v4, %v830_v56  ;;  %v254_v10 = vadd.f32 %v11666_v21, %v242_v25  ;;  %v244_v5 = vmul.f32 %v11660_v35, %v210_v26  ;;  %v229_v54 = vpop.f32.mrf.mxu0  ;;  %v7782_v25 = vld [vmem:[%s15467_s2 + $0x28] sm:$0xff] }
 0x1cf   :  { %10666 = vset.pattern.permute.xlu1 %v15653_v61  ;;  %10016 = vmatprep.mubr.msk.f32.mxu1 %vm354_vm2, %v846_v27  ;;  %v12073_v17 = vpop.permute.xlu1 %2660  ;;  %v849_v39 = vmax.f32 %v841_v49, 0.0  ;;  %v843_v33 = vadd.f32 %v11983_v4, %v831_v23  ;;  %v12118_v12 = vpop.permute.xlu0 %2972  ;;  %v255_v4 = vadd.f32 %v11666_v21, %v243_v63  ;;  %v245_v55 = vmul.f32 %v11660_v35, %v215_v36 }
 0x1d0   :  { %3096 = vperm.xlu1 %10666, %v11961_v58   ;;  %10042 = vmatpush3.msra.mxu1 %v9261_v18  ;;  %v9280_v58 = vld [vmem:[%s15470_s5 + $0x8] sm:$0x7]  ;;  %v220_v18 = vadd.f32 %v219_v8, %v15731_v34  ;;  %v850_v27 = vmax.f32 %v842_v52, 0.0  ;;  %v12128_v26 = vmax.f32 %v254_v10, 0.0  ;;  %v256_v23 = vadd.f32 %v11666_v21, %v244_v5 }
 0x1d1   :  { %10043 = vmatprep.subr.mxu1 %v9260_v22  ;;  %v12109_v57 = vrot.slane %v9280_v58, %v11340_v41  ;;  %v12112_v56 = vrot.slane %v9280_v58, %v11263_v14  ;;  %v12116_v8 = vrot.slane %v9280_v58, %v11389_v62  ;;  %v230_v49 = vadd.f32 %v229_v54, %v15731_v34  ;;  %v15732_v58 = vld [vmem:[#allocation59_spill] sm:$0xff] }
 0x1d2   :  { %10017 = vmatmul.mubr.msk.f32.gmra.mxu1 %vm354_vm2, %v847_v59  ;;  %v246_v59 = vmul.f32 %v11660_v35, %v220_v18  ;;  %7876 = vperm.xlu0 %10711, %v7782_v25   ;;  %v12141_v36 = vmax.f32 %v255_v4, 0.0  ;;  %v257_v38 = vadd.f32 %v11666_v21, %v245_v55  ;;  %v235_v5 = vadd.f32 %v9975_v48, %v15731_v34  ;;  %v7784_v18 = vld [vmem:[%s15467_s2 + $0x38] sm:$0xff] }
 0x1d3   :  { %10019 = vmatprep.mubr.msk.f32.mxu1 %vm354_vm2, %v848_v13  ;;  %v12100_v9 = vpop.permute.xlu1 %2664  ;;  %10044 = vmatpush3.msra.mxu1 %v9260_v22  ;;  %v225_v22 = vadd.f32 %v12030_v20, %v15731_v34  ;;  %v851_v13 = vmax.f32 %v843_v33, 0.0  ;;  %v2507_v20 = vmul.f32 %v12109_v57, %v15732_v58  ;;  %v2831_v63 = vmul.f32 %v12112_v56, %v11682_v7  ;;  %v15733_v7 = vld [vmem:[#allocation64_spill] sm:$0xff]  ;;  %v2981_v4 = vpop.permute.xlu0 %2980  ;;  %v15735_v55 = vld [vmem:[#allocation63_spill] sm:$0xff] }
 0x1d4   :  { %10667 = vset.pattern.permute.xlu1 %v15647_v60  ;;  %10073 = vmatprep.subr.mxu1 %v12087_v1  ;;  %v12153_v33 = vmax.f32 %v256_v23, 0.0  ;;  %v258_v54 = vadd.f32 %v11666_v21, %v246_v59  ;;  %v2024_v34 = vrot.slane %v12042_v43, %v11498_v29  ;;  %v12163_v48 = vrot.slane %v11646_v31, %v11295_v24  ;;  %v9281_v59 = vld [vmem:[%s15471_s6 + $0x20] sm:$0xff] }
 0x1d5   :  { %2365 = vperm.xlu1 %10667, %v12082_v16   ;;  %v247_v10 = vmul.f32 %v11660_v35, %v225_v22  ;;  %v2508_v22 = vmul.f32 %v12109_v57, %v15735_v55  ;;  %v2895_v25 = vadd.f32 %v2831_v63, %v2507_v20  ;;  %v12174_v58 = vmax.f32 %v257_v38, 0.0  ;;  %v15739_v38 = vld [vmem:[#allocation65_spill] sm:$0xff] }
 0x1d6   :  { %10020 = vmatmul.mubr.msk.f32.gmra.mxu1 %vm354_vm2, %v849_v39  ;;  %v3219_v39 = vmul.f32 %v12116_v8, %v15733_v7  ;;  %15734 = vst [vmem:[#allocation52_spill] sm:$0xff] %v12153_v33  ;;  %7886 = vperm.xlu0 %10711, %v7784_v18   ;;  %v249_v31 = vmul.f32 %v11660_v35, %v235_v5  ;;  %v12183_v55 = vmax.f32 %v258_v54, 0.0  ;;  %v15740_v5 = vld [vmem:[#allocation66_spill] sm:$0xff] }
 0x1d7   :  { %10022 = vmatprep.mubr.msk.f32.mxu1 %vm354_vm2, %v850_v27  ;;  %v248_v27 = vmul.f32 %v11660_v35, %v230_v49  ;;  %v15736_v49 = vld [vmem:[#allocation62_spill] sm:$0xff]  ;;  %15737 = vst [vmem:[#allocation58_spill] sm:$0xff] %v12174_v58  ;;  %v259_v7 = vadd.f32 %v11666_v21, %v247_v10  ;;  %v2833_v63 = vmul.f32 %v12112_v56, %v11713_v0  ;;  %v2989_v24 = vpop.permute.xlu0 %2988 }
 0x1d8   :  { %v12134_v52 = vpop.permute.xlu1 %3048  ;;  %v3283_v20 = vadd.f32 %v3219_v39, %v2895_v25  ;;  %15738 = vst [vmem:[#allocation59_spill] sm:$0xff] %v12183_v55  ;;  %v2041_v35 = vsub.f32 %v2024_v34, %v12042_v43  ;;  %v2510_v10 = vmul.f32 %v12109_v57, %v15739_v38  ;;  %v2509_v0 = vmul.f32 %v12109_v57, %v15740_v5  ;;  %v15741_v39 = vld [vmem:[#allocation68_spill] sm:$0xff] }
 0x1d9   :  { %10668 = vset.pattern.permute.xlu1 %v15640_v45  ;;  %v260_v18 = vadd.f32 %v11666_v21, %v248_v27  ;;  %v2834_v54 = vmul.f32 %v12112_v56, %v15741_v39  ;;  %v15742_v27 = vld [vmem:[#allocation70_spill] sm:$0xff]  ;;  %v12202_v43 = vmax.f32 %v259_v7, 0.0  ;;  %v261_v34 = vadd.f32 %v11666_v21, %v249_v31 }
 0x1da   :  { %2716 = vperm.xlu1 %10668, %v12082_v16   ;;  %10023 = vmatmul.mubr.msk.f32.gmra.mxu1 %vm354_vm2, %v851_v13  ;;  %v2832_v13 = vmul.f32 %v12112_v56, %v15736_v49  ;;  %v3221_v25 = vmul.f32 %v12116_v8, %v15742_v27  ;;  %v3351_v5 = vadd.f32 %v12163_v48, %v3283_v20  ;;  %v12222_v7 = vand.u32 2147483647, %v2041_v35 }
 0x1db   :  { %10045 = vmatprep.mubr.msk.f32.mxu1 %vm354_vm2, %v12128_v26  ;;  %15744 = vst [vmem:[#allocation64_spill] sm:$0xff] %v12202_v43  ;;  %v2897_v39 = vadd.f32 %v2833_v63, %v2509_v0  ;;  %v12213_v27 = vmax.f32 %v260_v18, 0.0  ;;  %v2837_v21 = vmul.f32 %v12112_v56, %v11767_v32  ;;  %v2898_v31 = vadd.f32 %v2834_v54, %v2510_v10 }
 0x1dc   :  { %v2836_v63 = vmul.f32 %v12112_v56, %v11745_v42  ;;  %v2513_v32 = vmul.f32 %v12109_v57, %v11760_v11  ;;  %v3225_v18 = vmul.f32 %v12116_v8, %v11777_v46  ;;  %v3224_v35 = vmul.f32 %v12116_v8, %v2981_v4  ;;  %v2997_v46 = vpop.permute.xlu0 %2996 }
 0x1dd   :  { %v12167_v23 = vpop.permute.xlu1 %2305  ;;  %15745 = vst [vmem:[#allocation63_spill] sm:$0xff] %v12213_v27  ;;  %v3285_v20 = vadd.f32 %v3221_v25, %v2897_v39  ;;  %v3415_v10 = vmax.f32 %v3351_v5, 0.0  ;;  %v2839_v25 = vmul.f32 %v12112_v56, %v11800_v50  ;;  %v2838_v39 = vmul.f32 %v12112_v56, %v11771_v40  ;;  %v15748_v5 = vld [vmem:[#allocation81_spill] sm:$0xff] }
 0x1de   :  { %2720 = vperm.xlu1 %10668, %v11485_v6   ;;  %10046 = vmatmul.mubr.msk.f32.vlgmr.msra.gmra.mxu1 %vm354_vm2, %v12141_v36  ;;  %v3220_v6 = vmul.f32 %v12116_v8, %v12077_v2  ;;  %v2896_v2 = vadd.f32 %v2832_v13, %v2508_v22  ;;  %v3222_v13 = vmul.f32 %v12116_v8, %v12118_v12  ;;  %v12234_v12 = vmax.f32 %v261_v34, 0.0 }
 0x1df   :  { %10048 = vmatprep.mubr.msk.f32.mxu1 %vm354_vm2, %v12153_v33  ;;  %10074 = vmatpush3.msra.mxu1 %v12087_v1  ;;  %v15743_v1 = vld [vmem:[#allocation67_spill] sm:$0xff]  ;;  %v2901_v42 = vadd.f32 %v2837_v21, %v2513_v32  ;;  %v3353_v0 = vadd.f32 %v12163_v48, %v3285_v20  ;;  %v2515_v4 = vmul.f32 %v12109_v57, %v11792_v47 }
 0x1e0   :  { %10075 = vmatprep.subr.mxu1 %v9281_v59  ;;  %v2512_v49 = vmul.f32 %v12109_v57, %v15743_v1  ;;  %v3284_v22 = vadd.f32 %v3220_v6, %v2896_v2  ;;  %15746 = vst [vmem:[#allocation62_spill] sm:$0xff] %v12234_v12  ;;  %v3286_v11 = vadd.f32 %v3222_v13, %v2898_v31  ;;  %v15747_v1 = vld [vmem:[#allocation69_spill] sm:$0xff]  ;;  %v15749_v31 = vld [vmem:[#allocation71_spill] sm:$0xff] }
 0x1e1   :  { %10076 = vmatpush3.msra.mxu1 %v9281_v59  ;;  %v2835_v59 = vmul.f32 %v12112_v56, %v11741_v28  ;;  %v2511_v28 = vmul.f32 %v12109_v57, %v11734_v19  ;;  %v2514_v2 = vmul.f32 %v12109_v57, %v15747_v1  ;;  %v3227_v21 = vmul.f32 %v12116_v8, %v15748_v5 }
 0x1e2   :  { %10669 = vset.pattern.permute.xlu1 %v15653_v61  ;;  %10049 = vmatmul.mubr.msk.f32.gmra.mxu1 %vm354_vm2, %v12174_v58  ;;  %v12208_v38 = vpop.permute.xlu1 %2668  ;;  %v2900_v34 = vadd.f32 %v2836_v63, %v2512_v49  ;;  %v3354_v49 = vadd.f32 %v12163_v48, %v3286_v11  ;;  %v3226_v40 = vmul.f32 %v12116_v8, %v2989_v24  ;;  %v15750_v63 = vld [vmem:[#allocation72_spill] sm:$0xff] }
 0x1e3   :  { %3104 = vperm.xlu1 %10669, %v12082_v16   ;;  %10051 = vmatprep.mubr.msk.f32.mxu1 %vm354_vm2, %v12183_v55  ;;  %v3223_v16 = vmul.f32 %v12116_v8, %v11751_v53  ;;  %v2899_v19 = vadd.f32 %v2835_v59, %v2511_v28  ;;  %v3352_v53 = vadd.f32 %v12163_v48, %v3284_v22  ;;  %v3417_v28 = vmax.f32 %v3353_v0, 0.0  ;;  %v15753_v0 = vld [vmem:[#allocation86_spill] sm:$0xff] }
 0x1e4   :  { %v3289_v59 = vadd.f32 %v3225_v18, %v2901_v42  ;;  %v3288_v13 = vadd.f32 %v3224_v35, %v2900_v34  ;;  %v2516_v20 = vmul.f32 %v12109_v57, %v15749_v31  ;;  %v2518_v32 = vmul.f32 %v12109_v57, %v15750_v63  ;;  %v15751_v42 = vld [vmem:[#allocation80_spill] sm:$0xff]  ;;  %v15752_v35 = vld [vmem:[#allocation85_spill] sm:$0xff]  ;;  %v15755_v31 = vld [vmem:[#allocation87_spill] sm:$0xff] }
 0x1e5   :  { %v3287_v54 = vadd.f32 %v3223_v16, %v2899_v19  ;;  %v3416_v22 = vmax.f32 %v3352_v53, 0.0  ;;  %v2903_v16 = vadd.f32 %v2839_v25, %v2515_v4  ;;  %v2902_v18 = vadd.f32 %v2838_v39, %v2514_v2  ;;  %v3005_v53 = vpop.permute.xlu0 %3004  ;;  %v12283_v25 = vld [vmem:[%s15465_s0 + $0x28] sm:$0xff]  ;;  %v15756_v63 = vld [vmem:[#allocation22_spill] sm:$0xff] }
 0x1e6   :  { %10052 = vmatmul.mubr.msk.f32.gmra.mxu1 %vm354_vm2, %v12202_v43  ;;  %v12238_v6 = vpop.permute.xlu1 %2672  ;;  %v3357_v19 = vadd.f32 %v12163_v48, %v3289_v59  ;;  %v2840_v24 = vmul.f32 %v12112_v56, %v15751_v42  ;;  %v1500_v1 = vrot.slane %v12283_v25, %v11340_v41  ;;  %v3418_v2 = vmax.f32 %v3354_v49, 0.0  ;;  %v15757_v42 = vld [vmem:[#allocation73_spill] sm:$0xff] }
 0x1e7   :  { %10670 = vset.pattern.permute.xlu1 %v15647_v60  ;;  %10054 = vmatprep.mubr.msk.f32.mxu1 %vm354_vm2, %v12213_v27  ;;  %v3355_v47 = vadd.f32 %v12163_v48, %v3287_v54  ;;  %v3291_v11 = vadd.f32 %v3227_v21, %v2903_v16  ;;  %v2842_v54 = vmul.f32 %v12112_v56, %v15753_v0  ;;  %v15754_v21 = vld [vmem:[#allocation83_spill] sm:$0xff]  ;;  %v15780_v27 = vld [vmem:[#allocation24_spill] sm:$0xff] }
 0x1e8   :  { %2375 = vperm.xlu1 %10670, %v12222_v7   ;;  %v3356_v34 = vadd.f32 %v12163_v48, %v3288_v13  ;;  %v3290_v39 = vadd.f32 %v3226_v40, %v2902_v18  ;;  %v3228_v59 = vmul.f32 %v12116_v8, %v2997_v46  ;;  %v3230_v16 = vmul.f32 %v12116_v8, %v3005_v53  ;;  %v15758_v18 = vld [vmem:[#allocation92_spill] sm:$0xff]  ;;  %v15759_v0 = vld [vmem:[#allocation91_spill] sm:$0xff] }
 0x1e9   :  { %v3419_v5 = vmax.f32 %v3355_v47, 0.0  ;;  %v2520_v49 = vmul.f32 %v12109_v57, %v15757_v42  ;;  %v3421_v13 = vmax.f32 %v3357_v19, 0.0  ;;  %v2904_v40 = vadd.f32 %v2840_v24, %v2516_v20 }
 0x1ea   :  { %10055 = vmatmul.mubr.msk.f32.gmra.mxu1 %vm354_vm2, %v12234_v12  ;;  %v2844_v46 = vmul.f32 %v12112_v56, %v15758_v18  ;;  %v1514_v53 = vsub.f32 %v1500_v1, %v12283_v25  ;;  %v3420_v42 = vmax.f32 %v3356_v34, 0.0  ;;  %v3358_v20 = vadd.f32 %v12163_v48, %v3290_v39  ;;  %v15760_v18 = vld [vmem:[#allocation89_spill] sm:$0xff]  ;;  %v15763_v39 = vld [vmem:[#allocation74_spill] sm:$0xff] }
 0x1eb   :  { %10077 = vmatprep.mubr.msk.f32.mxu1 %vm354_vm2, %v3415_v10  ;;  %v12260_v50 = vpop.permute.xlu1 %3056  ;;  %v2841_v10 = vmul.f32 %v12112_v56, %v15752_v35  ;;  %v2906_v35 = vadd.f32 %v2842_v54, %v2518_v32  ;;  %v3292_v19 = vadd.f32 %v3228_v59, %v2904_v40  ;;  %v15761_v32 = vld [vmem:[#allocation94_spill] sm:$0xff]  ;;  %v2522_v59 = vmul.f32 %v12109_v57, %v15763_v39  ;;  %v15767_v39 = vld [vmem:[#allocation105_spill] sm:$0xff] }
 0x1ec   :  { %10671 = vset.pattern.permute.xlu1 %v15640_v45  ;;  %v3231_v54 = vmul.f32 %v12116_v8, %v15761_v32 }
 0x1ed   :  { %2724 = vperm.xlu1 %10671, %v12222_v7  }
 0x1ee   :  { %10078 = vmatmul.mubr.msk.f32.vlgmr.msra.gmra.mxu1 %vm354_vm2, %v3416_v22  ;;  %v2517_v22 = vmul.f32 %v12109_v57, %v15754_v21  ;;  %v2843_v21 = vmul.f32 %v12112_v56, %v15759_v0  ;;  %v15765_v0 = vld [vmem:[#allocation96_spill] sm:$0xff] }
 0x1ef   :  { %10080 = vmatprep.mubr.msk.f32.mxu1 %vm354_vm2, %v3417_v28  ;;  %v3229_v28 = vmul.f32 %v12116_v8, %v15755_v31  ;;  %v3013_v31 = vpop.permute.xlu0 %3012 }
 0x1f0   :  { %v12289_v4 = vpop.permute.xlu1 %2315  ;;  %v2905_v47 = vadd.f32 %v2841_v10, %v2517_v22  ;;  %v3294_v10 = vadd.f32 %v3230_v16, %v2906_v35  ;;  %v3232_v1 = vmul.f32 %v12116_v8, %v3013_v31  ;;  %v15764_v16 = vld [vmem:[#allocation99_spill] sm:$0xff]  ;;  %v3360_v35 = vadd.f32 %v12163_v48, %v3292_v19  ;;  %v15766_v31 = vld [vmem:[#allocation101_spill] sm:$0xff] }
 0x1f1   :  { %2728 = vperm.xlu1 %10671, %v15756_v63   ;;  %v3359_v63 = vadd.f32 %v12163_v48, %v3291_v11  ;;  %v15762_v11 = vld [vmem:[#allocation98_spill] sm:$0xff]  ;;  %v2846_v40 = vmul.f32 %v12112_v56, %v15764_v16  ;;  %v2847_v16 = vmul.f32 %v12112_v56, %v15767_v39  ;;  %v15773_v39 = vld [vmem:[#allocation112_spill] sm:$0xff] }
 0x1f2   :  { %10081 = vmatmul.mubr.msk.f32.gmra.mxu1 %vm354_vm2, %v3418_v2  ;;  %v3293_v24 = vadd.f32 %v3229_v28, %v2905_v47  ;;  %v2519_v2 = vmul.f32 %v12109_v57, %v15760_v18  ;;  %v2845_v34 = vmul.f32 %v12112_v56, %v15762_v11  ;;  %v3362_v11 = vadd.f32 %v12163_v48, %v3294_v10 }
 0x1f3   :  { %10083 = vmatprep.mubr.msk.f32.mxu1 %vm354_vm2, %v3419_v5  ;;  %v2908_v5 = vadd.f32 %v2844_v46, %v2520_v49  ;;  %v3021_v47 = vpop.permute.xlu0 %3020  ;;  %v12325_v49 = vand.u32 2147483647, %v1514_v53  ;;  %v3422_v46 = vmax.f32 %v3358_v20, 0.0  ;;  %v3423_v18 = vmax.f32 %v3359_v63, 0.0 }
 0x1f4   :  { %v2907_v28 = vadd.f32 %v2843_v21, %v2519_v2  ;;  %v3361_v21 = vadd.f32 %v12163_v48, %v3293_v24  ;;  %v2910_v20 = vadd.f32 %v2846_v40, %v2522_v59  ;;  %v3234_v19 = vmul.f32 %v12116_v8, %v3021_v47  ;;  %v15768_v24 = vld [vmem:[#allocation75_spill] sm:$0xff] }
 0x1f5   :  { %10672 = vset.pattern.permute.xlu1 %v15653_v61  ;;  %v12313_v22 = vpop.permute.xlu1 %2676  ;;  %v2524_v10 = vmul.f32 %v12109_v57, %v15768_v24  ;;  %v15770_v40 = vld [vmem:[#allocation103_spill] sm:$0xff] }
 0x1f6   :  { %3112 = vperm.xlu1 %10672, %v12222_v7   ;;  %10084 = vmatmul.mubr.msk.f32.gmra.mxu1 %vm354_vm2, %v3420_v42  ;;  %v2521_v7 = vmul.f32 %v12109_v57, %v15765_v0  ;;  %v3233_v42 = vmul.f32 %v12116_v8, %v15766_v31  ;;  %v3295_v2 = vadd.f32 %v3231_v54, %v2907_v28  ;;  %v3424_v54 = vmax.f32 %v3360_v35, 0.0 }
 0x1f7   :  { %10086 = vmatprep.mubr.msk.f32.mxu1 %vm354_vm2, %v3421_v13  ;;  %v3296_v13 = vadd.f32 %v3232_v1, %v2908_v5  ;;  %v3029_v63 = vpop.permute.xlu0 %3028  ;;  %v15769_v1 = vld [vmem:[#allocation107_spill] sm:$0xff]  ;;  %v3425_v28 = vmax.f32 %v3361_v21, 0.0  ;;  %v2523_v47 = vmul.f32 %v12109_v57, %v15770_v40 }
 0x1f8   :  { %v2909_v53 = vadd.f32 %v2845_v34, %v2521_v7  ;;  %v2848_v34 = vmul.f32 %v12112_v56, %v15769_v1  ;;  %v3363_v59 = vadd.f32 %v12163_v48, %v3295_v2  ;;  %v15772_v7 = vld [vmem:[#allocation76_spill] sm:$0xff]  ;;  %v2849_v2 = vmul.f32 %v12112_v56, %v15773_v39  ;;  %v15777_v39 = vld [vmem:[#allocation77_spill] sm:$0xff] }
 0x1f9   :  { %v12333_v32 = vpop.permute.xlu1 %2680  ;;  %v2526_v31 = vmul.f32 %v12109_v57, %v15772_v7  ;;  %v2911_v21 = vadd.f32 %v2847_v16, %v2523_v47  ;;  %v15776_v47 = vld [vmem:[#allocation116_spill] sm:$0xff] }
 0x1fa   :  { %10673 = vset.pattern.permute.xlu1 %v15647_v60  ;;  %10087 = vmatmul.mubr.msk.f32.gmra.mxu1 %vm354_vm2, %v3422_v46  ;;  %v3297_v5 = vadd.f32 %v3233_v42, %v2909_v53  ;;  %v15771_v46 = vld [vmem:[#allocation108_spill] sm:$0xff]  ;;  %v3426_v42 = vmax.f32 %v3362_v11, 0.0  ;;  %v3298_v53 = vadd.f32 %v3234_v19, %v2910_v20  ;;  %v2912_v40 = vadd.f32 %v2848_v34, %v2524_v10  ;;  %v15775_v19 = vld [vmem:[#allocation110_spill] sm:$0xff] }
 0x1fb   :  { %2385 = vperm.xlu1 %10673, %v12325_v49   ;;  %10089 = vmatprep.mubr.msk.f32.mxu1 %vm354_vm2, %v3423_v18  ;;  %v3235_v0 = vmul.f32 %v12116_v8, %v15771_v46  ;;  %v3364_v18 = vadd.f32 %v12163_v48, %v3296_v13  ;;  %v3037_v24 = vpop.permute.xlu0 %3036  ;;  %v3236_v13 = vmul.f32 %v12116_v8, %v3029_v63  ;;  %v15774_v46 = vld [vmem:[#allocation114_spill] sm:$0xff]  ;;  %v3427_v11 = vmax.f32 %v3363_v59, 0.0 }
 0x1fc   :  { %v3365_v1 = vadd.f32 %v12163_v48, %v3297_v5  ;;  %v2525_v16 = vmul.f32 %v12109_v57, %v15775_v19  ;;  %v3237_v7 = vmul.f32 %v12116_v8, %v15776_v47  ;;  %v15778_v5 = vld [vmem:[#allocation121_spill] sm:$0xff]  ;;  %v1676_v63 = vrot.slane %v12283_v25, %v11389_v62 }
 0x1fd   :  { %v3299_v20 = vadd.f32 %v3235_v0, %v2911_v21  ;;  %v2852_v10 = vmul.f32 %v12112_v56, %v15778_v5  ;;  %v3428_v34 = vmax.f32 %v3364_v18, 0.0  ;;  %v3366_v59 = vadd.f32 %v12163_v48, %v3298_v53  ;;  %v15779_v21 = vld [vmem:[#allocation119_spill] sm:$0xff]  ;;  %v15781_v53 = vld [vmem:[#allocation117_spill] sm:$0xff] }
 0x1fe   :  { %10090 = vmatmul.mubr.msk.f32.gmra.mxu1 %vm354_vm2, %v3424_v54  ;;  %v12356_v35 = vpop.permute.xlu1 %3064  ;;  %v2850_v54 = vmul.f32 %v12112_v56, %v15774_v46  ;;  %v2913_v0 = vadd.f32 %v2849_v2, %v2525_v16  ;;  %v2851_v46 = vmul.f32 %v12112_v56, %v15779_v21  ;;  %v3300_v12 = vadd.f32 %v3236_v13, %v2912_v40 }
 0x1ff   :  { %10674 = vset.pattern.permute.xlu1 %v15640_v45  ;;  %10092 = vmatprep.mubr.msk.f32.mxu1 %vm354_vm2, %v3425_v28  ;;  %v2528_v28 = vmul.f32 %v12109_v57, %v15777_v39  ;;  %v3045_v19 = vpop.permute.xlu0 %3044  ;;  %v3429_v39 = vmax.f32 %v3365_v1, 0.0  ;;  %v3367_v18 = vadd.f32 %v12163_v48, %v3299_v20  ;;  %v2527_v2 = vmul.f32 %v12109_v57, %v15781_v53 }
 0x200   :  { %2732 = vperm.xlu1 %10674, %v12325_v49   ;;  %v2914_v5 = vadd.f32 %v2850_v54, %v2526_v31  ;;  %v3301_v43 = vadd.f32 %v3237_v7, %v2913_v0  ;;  %v3239_v16 = vmul.f32 %v12116_v8, %v12006_v37  ;;  %v2853_v1 = vmul.f32 %v12112_v56, %v12073_v17 }
 0x201   :  { %v2916_v21 = vadd.f32 %v2852_v10, %v2528_v28  ;;  %v1690_v31 = vsub.f32 %v1676_v63, %v12283_v25  ;;  %v3430_v40 = vmax.f32 %v3366_v59, 0.0  ;;  %v2915_v13 = vadd.f32 %v2851_v46, %v2527_v2  ;;  %v15783_v46 = vld [vmem:[#allocation79_spill] sm:$0xff]  ;;  %v9239_v2 = vld [vmem:[%s15471_s6 + $0xc8] sm:$0xff] }
 0x202   :  { %10093 = vmatmul.mubr.msk.f32.gmra.mxu1 %vm354_vm2, %v3426_v42  ;;  %v3238_v42 = vmul.f32 %v12116_v8, %v3037_v24  ;;  %v2854_v54 = vmul.f32 %v12112_v56, %v12100_v9  ;;  %v3368_v37 = vadd.f32 %v12163_v48, %v3300_v12  ;;  %v2529_v17 = vmul.f32 %v12109_v57, %v12051_v15 }
 0x203   :  { %10095 = vmatprep.mubr.msk.f32.mxu1 %vm354_vm2, %v3427_v11  ;;  %v12382_v47 = vpop.permute.xlu1 %2325  ;;  %v3240_v11 = vmul.f32 %v12116_v8, %v3045_v19  ;;  %v3053_v20 = vpop.permute.xlu0 %3052  ;;  %v3241_v28 = vmul.f32 %v12116_v8, %v12134_v52  ;;  %v3431_v63 = vmax.f32 %v3367_v18, 0.0  ;;  %v3303_v59 = vadd.f32 %v3239_v16, %v2915_v13  ;;  %10003 = vmatpush3.msra.mxu0 %v9239_v2 }
 0x204   :  { %2736 = vperm.xlu1 %10674, %v15780_v27   ;;  %v15782_v27 = vld [vmem:[#allocation78_spill] sm:$0xff]  ;;  %v3302_v7 = vadd.f32 %v3238_v42, %v2914_v5  ;;  %v2917_v0 = vadd.f32 %v2853_v1, %v2529_v17  ;;  %v12410_v12 = vand.u32 2147483647, %v1690_v31  ;;  %v2532_v15 = vmul.f32 %v12109_v57, %v15783_v46  ;;  %10004 = vmatprep.subr.mxu0 %v15656_v3 }
 0x205   :  { %v2530_v24 = vmul.f32 %v12109_v57, %v15782_v27  ;;  %v3304_v9 = vadd.f32 %v3240_v11, %v2916_v21  ;;  %v3242_v52 = vmul.f32 %v12116_v8, %v3053_v20  ;;  %v2856_v18 = vmul.f32 %v12112_v56, %v12238_v6  ;;  %v15784_v1 = vld [vmem:[#allocation82_spill] sm:$0xff] }
 0x206   :  { %10096 = vmatmul.mubr.msk.f32.gmra.mxu1 %vm354_vm2, %v3428_v34  ;;  %v3369_v34 = vadd.f32 %v12163_v48, %v3301_v43  ;;  %v3432_v43 = vmax.f32 %v3368_v37, 0.0  ;;  %v3305_v42 = vadd.f32 %v3241_v28, %v2917_v0  ;;  %v3371_v21 = vadd.f32 %v12163_v48, %v3303_v59 }
 0x207   :  { %10098 = vmatprep.mubr.msk.f32.mxu1 %vm354_vm2, %v3429_v39  ;;  %v2918_v19 = vadd.f32 %v2854_v54, %v2530_v24  ;;  %v2855_v39 = vmul.f32 %v12112_v56, %v12208_v38  ;;  %v3061_v5 = vpop.permute.xlu0 %3060  ;;  %v2531_v38 = vmul.f32 %v12109_v57, %v12167_v23  ;;  %v3243_v11 = vmul.f32 %v12116_v8, %v12260_v50  ;;  %v9238_v23 = vld [vmem:[%s15471_s6 + $0xc0] sm:$0xff]  ;;  %v12446_v54 = vld [vmem:[%s15471_s6 + $0x18] sm:$0xff] }
 0x208   :  { %10675 = vset.pattern.permute.xlu1 %v15653_v61  ;;  %v2685_v10 = vpop.permute.xlu1 %2684  ;;  %v3433_v16 = vmax.f32 %v3369_v34, 0.0  ;;  %v2534_v6 = vmul.f32 %v12109_v57, %v15784_v1  ;;  %v3372_v31 = vadd.f32 %v12163_v48, %v3304_v9  ;;  %v3244_v27 = vmul.f32 %v12116_v8, %v3061_v5  ;;  %10005 = vmatpush3.msra.mxu0 %v9238_v23  ;;  %v15785_v9 = vld [vmem:[#allocation84_spill] sm:$0xff] }
 0x209   :  { %3120 = vperm.xlu1 %10675, %v12325_v49   ;;  %v3370_v49 = vadd.f32 %v12163_v48, %v3302_v7  ;;  %v3306_v24 = vadd.f32 %v3242_v52, %v2918_v19  ;;  %v2919_v50 = vadd.f32 %v2855_v39, %v2531_v38  ;;  %v3373_v37 = vadd.f32 %v12163_v48, %v3305_v42 }
 0x20a   :  { %10099 = vmatmul.mubr.msk.f32.gmra.mxu1 %vm354_vm2, %v3430_v40  ;;  %v2857_v40 = vmul.f32 %v12112_v56, %v12313_v22  ;;  %v2920_v7 = vadd.f32 %v2856_v18, %v2532_v15  ;;  %v2858_v17 = vmul.f32 %v12112_v56, %v12333_v32  ;;  %v3435_v28 = vmax.f32 %v3371_v21, 0.0  ;;  %10025 = vmatprep.subr.mxu0 %v12446_v54 }
 0x20b   :  { %10101 = vmatprep.mubr.msk.f32.mxu1 %vm354_vm2, %v3431_v63  ;;  %v3069_v13 = vpop.permute.xlu0 %3068  ;;  %v3434_v20 = vmax.f32 %v3370_v49, 0.0  ;;  %v3307_v22 = vadd.f32 %v3243_v11, %v2919_v50  ;;  %v2533_v63 = vmul.f32 %v12109_v57, %v12289_v4  ;;  %v3245_v34 = vmul.f32 %v12116_v8, %v12356_v35  ;;  %v15786_v11 = vld [vmem:[#allocation25_spill] sm:$0xff] }
 0x20c   :  { %v2689_v53 = vpop.permute.xlu1 %2688  ;;  %v2536_v0 = vmul.f32 %v12109_v57, %v15785_v9  ;;  %v3246_v46 = vmul.f32 %v12116_v8, %v3069_v13  ;;  %v1852_v32 = vrot.slane %v12283_v25, %v11438_v44  ;;  %v3436_v15 = vmax.f32 %v3372_v31, 0.0 }
 0x20d   :  { %10676 = vset.pattern.permute.xlu1 %v15647_v60  ;;  %v3374_v4 = vadd.f32 %v12163_v48, %v3306_v24  ;;  %v2921_v19 = vadd.f32 %v2857_v40, %v2533_v63  ;;  %v2859_v35 = vmul.f32 %v12112_v56, %v2685_v10  ;;  %v3437_v52 = vmax.f32 %v3373_v37, 0.0 }
 0x20e   :  { %2395 = vperm.xlu1 %10676, %v12410_v12   ;;  %10102 = vmatmul.mubr.msk.f32.gmra.mxu1 %vm354_vm2, %v3432_v43  ;;  %v3308_v39 = vadd.f32 %v3244_v27, %v2920_v7  ;;  %v2922_v5 = vadd.f32 %v2858_v17, %v2534_v6  ;;  %v2860_v43 = vmul.f32 %v12112_v56, %v2689_v53 }
 0x20f   :  { %10104 = vmatprep.mubr.msk.f32.mxu1 %vm354_vm2, %v3433_v16  ;;  %v3077_v49 = vpop.permute.xlu0 %3076  ;;  %v3375_v42 = vadd.f32 %v12163_v48, %v3307_v22  ;;  %v3309_v18 = vadd.f32 %v3245_v34, %v2921_v19  ;;  %v2535_v2 = vmul.f32 %v12109_v57, %v12382_v47  ;;  %v3438_v53 = vmax.f32 %v3374_v4, 0.0  ;;  %v15787_v22 = vld [vmem:[#allocation88_spill] sm:$0xff] }
 0x210   :  { %v3248_v38 = vmul.f32 %v12116_v8, %v3077_v49  ;;  %v3376_v1 = vadd.f32 %v12163_v48, %v3308_v39  ;;  %v3310_v6 = vadd.f32 %v3246_v46, %v2922_v5  ;;  %v2924_v31 = vadd.f32 %v2860_v43, %v2536_v0 }
 0x211   :  { %v3073_v59 = vpop.permute.xlu1 %3072  ;;  %v2923_v21 = vadd.f32 %v2859_v35, %v2535_v2  ;;  %v3439_v27 = vmax.f32 %v3375_v42, 0.0  ;;  %v3377_v47 = vadd.f32 %v12163_v48, %v3309_v18  ;;  %v1866_v24 = vsub.f32 %v1852_v32, %v12283_v25 }
 0x212   :  { %10677 = vset.pattern.permute.xlu1 %v15640_v45  ;;  %10105 = vmatmul.mubr.msk.f32.gmra.mxu1 %vm354_vm2, %v3434_v20  ;;  %v3247_v16 = vmul.f32 %v12116_v8, %v3073_v59  ;;  %v3440_v40 = vmax.f32 %v3376_v1, 0.0  ;;  %v3378_v13 = vadd.f32 %v12163_v48, %v3310_v6  ;;  %v3312_v20 = vadd.f32 %v3248_v38, %v2924_v31  ;;  %v15789_v6 = vld [vmem:[#allocation90_spill] sm:$0xff] }
 0x213   :  { %2740 = vperm.xlu1 %10677, %v12410_v12   ;;  %10107 = vmatprep.mubr.msk.f32.mxu1 %vm354_vm2, %v3435_v28  ;;  %v3441_v37 = vmax.f32 %v3377_v47, 0.0  ;;  %v1874_v17 = vand.u32 2147483647, %v1866_v24  ;;  %v3085_v28 = vpop.permute.xlu0 %3084  ;;  %v2538_v63 = vmul.f32 %v12109_v57, %v15787_v22  ;;  %v2028_v42 = vrot.slane %v12283_v25, %v11498_v29 }
 0x214   :  { %v3311_v23 = vadd.f32 %v3247_v16, %v2923_v21  ;;  %v3442_v59 = vmax.f32 %v3378_v13, 0.0  ;;  %v3380_v9 = vadd.f32 %v12163_v48, %v3312_v20  ;;  %v3250_v0 = vmul.f32 %v12116_v8, %v3085_v28  ;;  %v15788_v16 = vld [vmem:[#allocation26_spill] sm:$0xff] }
 0x215   :  { %v2042_v38 = vsub.f32 %v2028_v42, %v12283_v25  ;;  %v2540_v31 = vmul.f32 %v12109_v57, %v15789_v6  ;;  %v12522_v28 = vld [vmem:[%s15465_s0 + $0x30] sm:$0xff] }
 0x216   :  { %10108 = vmatmul.mubr.msk.f32.gmra.mxu1 %vm354_vm2, %v3436_v15  ;;  %v2336_v10 = vpop.permute.xlu1 %2335  ;;  %v3379_v7 = vadd.f32 %v12163_v48, %v3311_v23  ;;  %v3444_v19 = vmax.f32 %v3380_v9, 0.0  ;;  %v1504_v22 = vrot.slane %v12522_v28, %v11340_v41 }
 0x217   :  { %2744 = vperm.xlu1 %10677, %v15786_v11   ;;  %10110 = vmatprep.mubr.msk.f32.mxu1 %vm354_vm2, %v3437_v52  ;;  %v2537_v4 = vmul.f32 %v12109_v57, %v2336_v10  ;;  %v3093_v1 = vpop.permute.xlu0 %3092 }
 0x218   :  { %v3443_v46 = vmax.f32 %v3379_v7, 0.0  ;;  %v3252_v25 = vmul.f32 %v12116_v8, %v3093_v1 }
 0x21a   :  { %10111 = vmatmul.mubr.msk.f32.gmra.mxu1 %vm354_vm2, %v3438_v53  ;;  %v2050_v53 = vand.u32 2147483647, %v2042_v38 }
 0x21b   :  { %10678 = vset.pattern.permute.xlu1 %v15653_v61  ;;  %10113 = vmatprep.mubr.msk.f32.mxu1 %vm354_vm2, %v3439_v27  ;;  %v2693_v50 = vpop.permute.xlu1 %2692 }
 0x21c   :  { %3128 = vperm.xlu1 %10678, %v12410_v12   ;;  %v2861_v32 = vmul.f32 %v12112_v56, %v2693_v50 }
 0x21e   :  { %10114 = vmatmul.mubr.msk.f32.gmra.mxu1 %vm354_vm2, %v3440_v40  ;;  %v2925_v39 = vadd.f32 %v2861_v32, %v2537_v4  ;;  %v15791_v4 = vld [vmem:[#allocation93_spill] sm:$0xff] }
 0x21f   :  { %10116 = vmatprep.mubr.msk.f32.mxu1 %vm354_vm2, %v3441_v37  ;;  %v2697_v34 = vpop.permute.xlu1 %2696 }
 0x220   :  { %10679 = vset.pattern.permute.xlu1 %v15647_v60  ;;  %v2862_v12 = vmul.f32 %v12112_v56, %v2697_v34 }
 0x221   :  { %2405 = vperm.xlu1 %10679, %v1874_v17  }
 0x222   :  { %v2926_v15 = vadd.f32 %v2862_v12, %v2538_v63  ;;  %10117 = vmatmul.mubr.msk.f32.gmra.mxu1 %vm354_vm2, %v3442_v59  ;;  %v15790_v59 = vld [vmem:[#allocation28_spill] sm:$0xff] }
 0x223   :  { %10119 = vmatprep.mubr.msk.f32.mxu1 %vm354_vm2, %v3443_v46 }
 0x224   :  { %v3314_v35 = vadd.f32 %v3250_v0, %v2926_v15  ;;  %v3081_v52 = vpop.permute.xlu1 %3080  ;;  %v1515_v0 = vsub.f32 %v1504_v22, %v12522_v28  ;;  %v3101_v15 = vpop.permute.xlu0 %3100 }
 0x225   :  { %10680 = vset.pattern.permute.xlu1 %v15640_v45  ;;  %v3249_v5 = vmul.f32 %v12116_v8, %v3081_v52 }
 0x226   :  { %2748 = vperm.xlu1 %10680, %v1874_v17   ;;  %10120 = vmatmul.mubr.msk.f32.gmra.mxu1 %vm354_vm2, %v3444_v19  ;;  %v3382_v49 = vadd.f32 %v12163_v48, %v3314_v35  ;;  %v1523_v32 = vand.u32 2147483647, %v1515_v0  ;;  %v2542_v19 = vmul.f32 %v12109_v57, %v15791_v4 }
 0x227   :  { %v3313_v43 = vadd.f32 %v3249_v5, %v2925_v39  ;;  %v3254_v39 = vmul.f32 %v12116_v8, %v3101_v15 }
 0x228   :  { %v3446_v21 = vmax.f32 %v3382_v49, 0.0 }
 0x229   :  { %v3381_v18 = vadd.f32 %v12163_v48, %v3313_v43  ;;  %v2346_v2 = vpop.permute.xlu1 %2345 }
 0x22a   :  { %2752 = vperm.xlu1 %10680, %v15788_v16   ;;  %v2539_v50 = vmul.f32 %v12109_v57, %v2346_v2 }
 0x22b   :  { %v3445_v10 = vmax.f32 %v3381_v18, 0.0 }
 0x22d   :  { %10122 = vmatprep.mubr.msk.f32.mxu1 %vm354_vm2, %v3445_v10 }
 0x22e   :  { %10681 = vset.pattern.permute.xlu1 %v15653_v61  ;;  %v2701_v11 = vpop.permute.xlu1 %2700  ;;  %10123 = vmatmul.mubr.msk.f32.gmra.mxu1 %vm354_vm2, %v3446_v21  ;;  %v1680_v21 = vrot.slane %v12522_v28, %v11389_v62 }
 0x22f   :  { %3136 = vperm.xlu1 %10681, %v1874_v17   ;;  %v2863_v23 = vmul.f32 %v12112_v56, %v2701_v11 }
 0x231   :  { %v2927_v20 = vadd.f32 %v2863_v23, %v2539_v50  ;;  %v3109_v23 = vpop.permute.xlu0 %3108  ;;  %v15793_v50 = vld [vmem:[#allocation95_spill] sm:$0xff] }
 0x232   :  { %v2705_v27 = vpop.permute.xlu1 %2704 }
 0x233   :  { %10682 = vset.pattern.permute.xlu1 %v15647_v60  ;;  %v2864_v47 = vmul.f32 %v12112_v56, %v2705_v27 }
 0x234   :  { %2415 = vperm.xlu1 %10682, %v2050_v53  }
 0x235   :  { %v2928_v24 = vadd.f32 %v2864_v47, %v2540_v31  ;;  %v1691_v31 = vsub.f32 %v1680_v21, %v12522_v28 }
 0x237   :  { %v3316_v40 = vadd.f32 %v3252_v25, %v2928_v24  ;;  %v3089_v13 = vpop.permute.xlu1 %3088  ;;  %v1699_v25 = vand.u32 2147483647, %v1691_v31  ;;  %v2032_v31 = vrot.slane %v12522_v28, %v11498_v29 }
 0x238   :  { %10683 = vset.pattern.permute.xlu1 %v15640_v45  ;;  %v3251_v37 = vmul.f32 %v12116_v8, %v3089_v13 }
 0x239   :  { %2756 = vperm.xlu1 %10683, %v2050_v53   ;;  %v3384_v17 = vadd.f32 %v12163_v48, %v3316_v40  ;;  %v2544_v40 = vmul.f32 %v12109_v57, %v15793_v50 }
 0x23a   :  { %v3315_v7 = vadd.f32 %v3251_v37, %v2927_v20  ;;  %v3256_v20 = vmul.f32 %v12116_v8, %v3109_v23 }
 0x23b   :  { %v3448_v12 = vmax.f32 %v3384_v17, 0.0 }
 0x23c   :  { %v3383_v63 = vadd.f32 %v12163_v48, %v3315_v7  ;;  %v2356_v34 = vpop.permute.xlu1 %2355 }
 0x23d   :  { %2760 = vperm.xlu1 %10683, %v15790_v59   ;;  %v2541_v49 = vmul.f32 %v12109_v57, %v2356_v34 }
 0x23e   :  { %v3447_v9 = vmax.f32 %v3383_v63, 0.0 }
 0x240   :  { %10125 = vmatprep.mubr.msk.f32.mxu1 %vm354_vm2, %v3447_v9 }
 0x241   :  { %10684 = vset.pattern.permute.xlu1 %v15653_v61  ;;  %v2709_v46 = vpop.permute.xlu1 %2708  ;;  %10126 = vmatmul.mubr.msk.f32.gmra.mxu1 %vm354_vm2, %v3448_v12  ;;  %v1856_v12 = vrot.slane %v12522_v28, %v11438_v44 }
 0x242   :  { %3144 = vperm.xlu1 %10684, %v2050_v53   ;;  %v2865_v5 = vmul.f32 %v12112_v56, %v2709_v46  ;;  %v15792_v53 = vld [vmem:[#allocation30_spill] sm:$0xff] }
 0x244   :  { %v2929_v2 = vadd.f32 %v2865_v5, %v2541_v49  ;;  %v3117_v5 = vpop.permute.xlu0 %3116  ;;  %v15795_v49 = vld [vmem:[#allocation97_spill] sm:$0xff] }
 0x246   :  { %10685 = vset.pattern.permute.xlu1 %v15647_v60  ;;  %v2713_v35 = vpop.permute.xlu1 %2712 }
 0x247   :  { %v2866_v52 = vmul.f32 %v12112_v56, %v2713_v35  ;;  %2425 = vperm.xlu1 %10685, %v1523_v32  }
 0x249   :  { %v2930_v43 = vadd.f32 %v2866_v52, %v2542_v19  ;;  %v1867_v19 = vsub.f32 %v1856_v12, %v12522_v28  ;;  %v15799_v12 = vld [vmem:[#allocation54_spill] sm:$0xff] }
 0x24b   :  { %v3318_v42 = vadd.f32 %v3254_v39, %v2930_v43  ;;  %10686 = vset.pattern.permute.xlu1 %v15640_v45  ;;  %v3097_v18 = vpop.permute.xlu1 %3096  ;;  %v1875_v39 = vand.u32 2147483647, %v1867_v19 }
 0x24c   :  { %v3253_v16 = vmul.f32 %v12116_v8, %v3097_v18  ;;  %2764 = vperm.xlu1 %10686, %v1523_v32  }
 0x24d   :  { %v3386_v38 = vadd.f32 %v12163_v48, %v3318_v42  ;;  %v2546_v42 = vmul.f32 %v12109_v57, %v15795_v49 }
 0x24e   :  { %v3317_v10 = vadd.f32 %v3253_v16, %v2929_v2  ;;  %v3258_v2 = vmul.f32 %v12116_v8, %v3117_v5  ;;  %v15802_v5 = vld [vmem:[#allocation45_spill] sm:$0xff] }
 0x24f   :  { %v3450_v27 = vmax.f32 %v3386_v38, 0.0 }
 0x250   :  { %v3385_v11 = vadd.f32 %v12163_v48, %v3317_v10  ;;  %2768 = vperm.xlu1 %10686, %v15792_v53   ;;  %v2366_v1 = vpop.permute.xlu1 %2365 }
 0x251   :  { %v2543_v17 = vmul.f32 %v12109_v57, %v2366_v1 }
 0x252   :  { %v3449_v6 = vmax.f32 %v3385_v11, 0.0 }
 0x254   :  { %10687 = vset.pattern.permute.xlu1 %v15653_v61  ;;  %10128 = vmatprep.mubr.msk.f32.mxu1 %vm354_vm2, %v3449_v6 }
 0x255   :  { %3152 = vperm.xlu1 %10687, %v1523_v32   ;;  %v2717_v47 = vpop.permute.xlu1 %2716  ;;  %10129 = vmatmul.mubr.msk.f32.gmra.mxu1 %vm354_vm2, %v3450_v27  ;;  %v15794_v32 = vld [vmem:[#allocation32_spill] sm:$0xff] }
 0x256   :  { %v2867_v37 = vmul.f32 %v12112_v56, %v2717_v47 }
 0x258   :  { %v2931_v34 = vadd.f32 %v2867_v37, %v2543_v17 }
 0x259   :  { %10688 = vset.pattern.permute.xlu1 %v15647_v60  ;;  %v2721_v24 = vpop.permute.xlu1 %2720 }
 0x25a   :  { %v2868_v13 = vmul.f32 %v12112_v56, %v2721_v24  ;;  %2435 = vperm.xlu1 %10688, %v1699_v25   ;;  %v9249_v24 = vld [vmem:[%s15470_s5 + $0x4] sm:$0x7] }
 0x25b   :  { %v12592_v37 = vrot.slane %v9249_v24, %v11340_v41 }
 0x25c   :  { %v2932_v7 = vadd.f32 %v2868_v13, %v2544_v40  ;;  %v2043_v40 = vsub.f32 %v2032_v31, %v12522_v28  ;;  %v12587_v13 = vrot.slane %v9249_v24, %v11263_v14 }
 0x25e   :  { %v3320_v22 = vadd.f32 %v3256_v20, %v2932_v7  ;;  %10689 = vset.pattern.permute.xlu1 %v15640_v45  ;;  %v3105_v63 = vpop.permute.xlu1 %3104  ;;  %v12595_v17 = vand.u32 2147483647, %v2043_v40 }
 0x25f   :  { %v3255_v59 = vmul.f32 %v12116_v8, %v3105_v63  ;;  %2772 = vperm.xlu1 %10689, %v1699_v25   ;;  %v12600_v63 = vrot.slane %v9249_v24, %v11389_v62 }
 0x260   :  { %v3388_v0 = vadd.f32 %v12163_v48, %v3320_v22  ;;  %v15797_v22 = vld [vmem:[#allocation29_spill] sm:$0xff] }
 0x261   :  { %v3319_v9 = vadd.f32 %v3255_v59, %v2931_v34  ;;  %v1006_v28 = vmul.f32 %v12587_v13, %v15797_v22  ;;  %v3125_v34 = vpop.permute.xlu0 %3124  ;;  %v15798_v59 = vld [vmem:[#allocation41_spill] sm:$0xff] }
 0x262   :  { %v3452_v35 = vmax.f32 %v3388_v0, 0.0  ;;  %v993_v0 = vmul.f32 %v12592_v37, %v15799_v12 }
 0x263   :  { %v3387_v46 = vadd.f32 %v12163_v48, %v3319_v9  ;;  %2776 = vperm.xlu1 %10689, %v15794_v32   ;;  %v2376_v15 = vpop.permute.xlu1 %2375  ;;  %v1005_v9 = vmul.f32 %v12587_v13, %v15798_v59  ;;  %v1028_v59 = vmul.f32 %v12600_v63, %v15717_v51 }
 0x264   :  { %v2545_v21 = vmul.f32 %v12109_v57, %v2376_v15 }
 0x265   :  { %v3451_v4 = vmax.f32 %v3387_v46, 0.0  ;;  %v15800_v46 = vld [vmem:[#allocation27_spill] sm:$0xff] }
 0x266   :  { %v994_v32 = vmul.f32 %v12592_v37, %v15800_v46 }
 0x267   :  { %10690 = vset.pattern.permute.xlu1 %v15653_v61  ;;  %10131 = vmatprep.mubr.msk.f32.mxu1 %vm354_vm2, %v3451_v4  ;;  %v15801_v4 = vld [vmem:[#allocation100_spill] sm:$0xff] }
 0x268   :  { %3160 = vperm.xlu1 %10690, %v1699_v25   ;;  %v2725_v52 = vpop.permute.xlu1 %2724  ;;  %10132 = vmatmul.mubr.msk.f32.gmra.mxu1 %vm354_vm2, %v3452_v35  ;;  %v15796_v25 = vld [vmem:[#allocation34_spill] sm:$0xff]  ;;  %v2548_v19 = vmul.f32 %v12109_v57, %v15801_v4  ;;  %v12656_v4 = vld [vmem:[%s15465_s0 + $0x38] sm:$0xff] }
 0x269   :  { %v2869_v16 = vmul.f32 %v12112_v56, %v2725_v52  ;;  %v3260_v52 = vmul.f32 %v12116_v8, %v3125_v34 }
 0x26b   :  { %v2933_v53 = vadd.f32 %v2869_v16, %v2545_v21  ;;  %v15804_v21 = vld [vmem:[#allocation17_spill] sm:$0xff] }
 0x26c   :  { %10691 = vset.pattern.permute.xlu1 %v15647_v60  ;;  %v2729_v43 = vpop.permute.xlu1 %2728 }
 0x26d   :  { %v2870_v18 = vmul.f32 %v12112_v56, %v2729_v43  ;;  %2445 = vperm.xlu1 %10691, %v1875_v39   ;;  %v1026_v43 = vmul.f32 %v12600_v63, %v15802_v5 }
 0x26f   :  { %v2934_v10 = vadd.f32 %v2870_v18, %v2546_v42  ;;  %v15803_v42 = vld [vmem:[#allocation36_spill] sm:$0xff] }
 0x270   :  { %v1007_v18 = vmul.f32 %v12587_v13, %v15803_v42 }
 0x271   :  { %v3322_v38 = vadd.f32 %v3258_v2, %v2934_v10  ;;  %10692 = vset.pattern.permute.xlu1 %v15640_v45  ;;  %v3113_v11 = vpop.permute.xlu1 %3112  ;;  %v1013_v2 = vadd.f32 %v1005_v9, %v993_v0  ;;  %v12622_v10 = vld [vmem:[%s15472_s7] sm:$0xff] }
 0x272   :  { %v3257_v1 = vmul.f32 %v12116_v8, %v3113_v11  ;;  %2780 = vperm.xlu1 %10692, %v1875_v39   ;;  %v15805_v11 = vld [vmem:[#allocation56_spill] sm:$0xff] }
 0x273   :  { %v3390_v27 = vadd.f32 %v12163_v48, %v3322_v38  ;;  %v12626_v38 = vrot.slane %v12622_v10, %v15804_v21 }
 0x274   :  { %v3321_v6 = vadd.f32 %v3257_v1, %v2933_v53  ;;  %v996_v53 = vmul.f32 %v12592_v37, %v15805_v11  ;;  %v15814_v11 = vld [vmem:[#allocation35_spill] sm:$0xff] }
 0x275   :  { %v3454_v20 = vmax.f32 %v3390_v27, 0.0  ;;  %v15807_v27 = vld [vmem:[#allocation33_spill] sm:$0xff] }
 0x276   :  { %v3389_v47 = vadd.f32 %v12163_v48, %v3321_v6  ;;  %2784 = vperm.xlu1 %10692, %v15796_v25   ;;  %v2386_v23 = vpop.permute.xlu1 %2385  ;;  %v15806_v6 = vld [vmem:[#allocation31_spill] sm:$0xff]  ;;  %v15808_v25 = vld [vmem:[#allocation40_spill] sm:$0xff] }
 0x277   :  { %v2547_v1 = vmul.f32 %v12109_v57, %v2386_v23  ;;  %v1025_v31 = vmul.f32 %v12600_v63, %v15806_v6  ;;  %v1027_v24 = vmul.f32 %v12600_v63, %v15808_v25  ;;  %v15809_v23 = vld [vmem:[#allocation38_spill] sm:$0xff] }
 0x278   :  { %v3453_v50 = vmax.f32 %v3389_v47, 0.0  ;;  %v995_v47 = vmul.f32 %v12592_v37, %v15807_v27  ;;  %v1008_v22 = vmul.f32 %v12587_v13, %v15809_v23 }
 0x279   :  { %v1033_v12 = vadd.f32 %v1025_v31, %v1013_v2  ;;  %v15816_v31 = vld [vmem:[#allocation43_spill] sm:$0xff] }
 0x27a   :  { %10693 = vset.pattern.permute.xlu1 %v15653_v61  ;;  %10134 = vmatprep.mubr.msk.f32.mxu1 %vm354_vm2, %v3453_v50  ;;  %v12640_v50 = vld [vmem:[%s15472_s7 + $0x10] sm:$0xff]  ;;  %v1015_v9 = vadd.f32 %v1007_v18, %v995_v47  ;;  %v1016_v46 = vadd.f32 %v1008_v22, %v996_v53  ;;  %v15813_v18 = vld [vmem:[#allocation48_spill] sm:$0xff]  ;;  %v997_v27 = vmul.f32 %v12592_v37, %v15816_v31  ;;  %v15817_v47 = vld [vmem:[#allocation49_spill] sm:$0xff] }
 0x27b   :  { %3168 = vperm.xlu1 %10693, %v1875_v39   ;;  %v2733_v7 = vpop.permute.xlu1 %2732  ;;  %10135 = vmatmul.mubr.msk.f32.gmra.mxu1 %vm354_vm2, %v3454_v20  ;;  %v1014_v39 = vadd.f32 %v1006_v28, %v994_v32  ;;  %v1010_v2 = vmul.f32 %v12587_v13, %v15813_v18  ;;  %v1029_v25 = vmul.f32 %v12600_v63, %v15817_v47 }
 0x27c   :  { %v2871_v49 = vmul.f32 %v12112_v56, %v2733_v7 }
 0x27d   :  { %v1034_v7 = vadd.f32 %v1026_v43, %v1014_v39 }
 0x27e   :  { %v2935_v28 = vadd.f32 %v2871_v49, %v2547_v1  ;;  %v15812_v49 = vld [vmem:[#allocation60_spill] sm:$0xff]  ;;  %v15815_v1 = vld [vmem:[#allocation50_spill] sm:$0xff] }
 0x27f   :  { %10694 = vset.pattern.permute.xlu1 %v15647_v60  ;;  %v2737_v15 = vpop.permute.xlu1 %2736  ;;  %v1046_v43 = vadd.f32 %v12626_v38, %v1034_v7  ;;  %v998_v42 = vmul.f32 %v12592_v37, %v15812_v49  ;;  %v1030_v6 = vmul.f32 %v12600_v63, %v15815_v1  ;;  %v15819_v49 = vld [vmem:[#allocation61_spill] sm:$0xff]  ;;  %v15820_v1 = vld [vmem:[#allocation55_spill] sm:$0xff] }
 0x280   :  { %v2872_v35 = vmul.f32 %v12112_v56, %v2737_v15  ;;  %2455 = vperm.xlu1 %10694, %v12595_v17   ;;  %v515_v15 = vrot.slane %v12640_v50, %v11263_v14  ;;  %v1000_v18 = vmul.f32 %v12592_v37, %v15819_v49 }
 0x281   :  { %v1054_v47 = vmax.f32 %v1046_v43, 0.0 }
 0x282   :  { %v2936_v16 = vadd.f32 %v2872_v35, %v2548_v19  ;;  %v1508_v19 = vrot.slane %v12656_v4, %v11340_v41  ;;  %v1035_v35 = vadd.f32 %v1027_v24, %v1015_v9  ;;  %v15818_v9 = vld [vmem:[#allocation53_spill] sm:$0xff] }
 0x284   :  { %v3324_v40 = vadd.f32 %v3260_v52, %v2936_v16  ;;  %10695 = vset.pattern.permute.xlu1 %v15640_v45  ;;  %v3121_v20 = vpop.permute.xlu1 %3120  ;;  %v15811_v52 = vld [vmem:[#allocation46_spill] sm:$0xff]  ;;  %v1516_v22 = vsub.f32 %v1508_v19, %v12656_v4 }
 0x285   :  { %v3259_v34 = vmul.f32 %v12116_v8, %v3121_v20  ;;  %2788 = vperm.xlu1 %10695, %v12595_v17   ;;  %v1009_v51 = vmul.f32 %v12587_v13, %v15811_v52  ;;  %v1036_v20 = vadd.f32 %v1028_v59, %v1016_v46 }
 0x286   :  { %v12649_v0 = vpop.f32.mrf.mxu1  ;;  %v3392_v39 = vadd.f32 %v12163_v48, %v3324_v40  ;;  %v1045_v40 = vadd.f32 %v12626_v38, %v1033_v12  ;;  %v1012_v12 = vmul.f32 %v12587_v13, %v15820_v1 }
 0x287   :  { %15810 = vst [vmem:[#allocation65_spill] sm:$0xff] %v12649_v0  ;;  %v3323_v32 = vadd.f32 %v3259_v34, %v2935_v28  ;;  %v1047_v28 = vadd.f32 %v12626_v38, %v1035_v35  ;;  %v1017_v34 = vadd.f32 %v1009_v51, %v997_v27  ;;  %v15822_v35 = vld [vmem:[#allocation57_spill] sm:$0xff]  ;;  %v1048_v27 = vadd.f32 %v12626_v38, %v1036_v20 }
 0x288   :  { %v9994_v5 = vpop.f32.mrf.mxu1  ;;  %v3456_v52 = vmax.f32 %v3392_v39, 0.0  ;;  %v1031_v51 = vmul.f32 %v12600_v63, %v15822_v35 }
 0x289   :  { %v3391_v16 = vadd.f32 %v12163_v48, %v3323_v32  ;;  %2792 = vperm.xlu1 %10695, %v15814_v11   ;;  %v12670_v53 = vpop.permute.xlu1 %2395  ;;  %v1011_v32 = vmul.f32 %v12587_v13, %v15818_v9  ;;  %v1018_v11 = vadd.f32 %v1010_v2, %v998_v42  ;;  %v1037_v46 = vadd.f32 %v1029_v25, %v1017_v34  ;;  %v9250_v42 = vld [vmem:[%s15471_s6 + $0x10] sm:$0xff] }
 0x28a   :  { %v582_v24 = vpop.f32.mrf.mxu1  ;;  %v1053_v13 = vmax.f32 %v1045_v40, 0.0  ;;  %v12701_v2 = vand.u32 2147483647, %v1516_v22  ;;  %v1032_v25 = vmul.f32 %v12600_v63, %v15730_v30  ;;  %v1020_v40 = vadd.f32 %v1012_v12, %v1000_v18  ;;  %v15824_v9 = vld [vmem:[#allocation102_spill] sm:$0xff] }
 0x28b   :  { %v3455_v7 = vmax.f32 %v3391_v16, 0.0  ;;  %v583_v23 = vadd.f32 %v582_v24, %v515_v15  ;;  %v15821_v15 = vld [vmem:[#allocation51_spill] sm:$0xff]  ;;  %v1038_v24 = vadd.f32 %v1030_v6, %v1018_v11  ;;  %v2550_v20 = vmul.f32 %v12109_v57, %v15824_v9 }
 0x28c   :  { %v10001_v5 = vpop.f32.mrf.mxu1  ;;  %v999_v19 = vmul.f32 %v12592_v37, %v15821_v15  ;;  %v2549_v11 = vmul.f32 %v12109_v57, %v12670_v53 }
 0x28d   :  { %v586_v59 = vmax.f32 %v583_v23, 0.0  ;;  %10696 = vset.pattern.permute.xlu1 %v15653_v61  ;;  %10137 = vmatprep.mubr.msk.f32.mxu1 %vm354_vm2, %v3455_v7  ;;  %v1049_v7 = vadd.f32 %v12626_v38, %v1037_v46  ;;  %v1050_v49 = vadd.f32 %v12626_v38, %v1038_v24 }
 0x28e   :  { %3176 = vperm.xlu1 %10696, %v12595_v17   ;;  %v2741_v39 = vpop.permute.xlu1 %2740  ;;  %v12694_v16 = vpop.f32.mrf.mxu1  ;;  %10138 = vmatmul.mubr.msk.f32.gmra.mxu1 %vm354_vm2, %v3456_v52  ;;  %v1019_v37 = vadd.f32 %v1011_v32, %v999_v19  ;;  %v1056_v32 = vmax.f32 %v1048_v27, 0.0  ;;  %v1040_v52 = vadd.f32 %v1032_v25, %v1020_v40  ;;  %v15829_v25 = vld [vmem:[#allocation37_spill] sm:$0xff] }
 0x28f   :  { %10007 = vmatmul.mubr.msk.f32.vlgmr.msra.gmra.mxu0 %vm354_vm2, %v586_v59  ;;  %v3133_v17 = vpop.permute.xlu0 %3132  ;;  %v2873_v63 = vmul.f32 %v12112_v56, %v2741_v39  ;;  %v1057_v12 = vmax.f32 %v1049_v7, 0.0  ;;  %v1058_v53 = vmax.f32 %v1050_v49, 0.0  ;;  %v15831_v7 = vld [vmem:[#allocation16_spill] sm:$0xff] }
 0x290   :  { %v12703_v31 = vpop.f32.mrf.mxu1  ;;  %10026 = vmatpush3.msra.mxu0 %v12446_v54  ;;  %10029 = vmatprep.mubr.msk.f32.mxu0 %vm354_vm2, %v1053_v13  ;;  %v1039_v23 = vadd.f32 %v1031_v51, %v1019_v37  ;;  %v1055_v54 = vmax.f32 %v1047_v28, 0.0  ;;  %v3262_v30 = vmul.f32 %v12116_v8, %v3133_v17  ;;  %v12726_v28 = vrot.slane %v12622_v10, %v11438_v44 }
 0x291   :  { %10027 = vmatprep.subr.mxu0 %v9250_v42  ;;  %v2937_v10 = vadd.f32 %v2873_v63, %v2549_v11  ;;  %v1052_v51 = vadd.f32 %v12626_v38, %v1040_v52  ;;  %v1684_v37 = vrot.slane %v12656_v4, %v11389_v62  ;;  %v15832_v11 = vld [vmem:[#allocation104_spill] sm:$0xff] }
 0x292   :  { %10697 = vset.pattern.permute.xlu1 %v15647_v60  ;;  %v2745_v22 = vpop.permute.xlu1 %2744  ;;  %v12712_v34 = vpop.f32.mrf.mxu1  ;;  %10028 = vmatpush3.msra.mxu0 %v9250_v42  ;;  %15825 = vst [vmem:[#allocation68_spill] sm:$0xff] %v12726_v28  ;;  %v1051_v18 = vadd.f32 %v12626_v38, %v1039_v23  ;;  %v12758_v38 = vld [vmem:[%s15472_s7 + $0x8] sm:$0xff] }
 0x293   :  { %15823 = vst [vmem:[#allocation66_spill] sm:$0xff] %v12712_v34  ;;  %v2874_v43 = vmul.f32 %v12112_v56, %v2745_v22  ;;  %2465 = vperm.xlu1 %10697, %v12701_v2   ;;  %10030 = vmatmul.mubr.msk.f32.vlgmr.msra.gmra.mxu0 %vm354_vm2, %v1054_v47  ;;  %v12762_v23 = vrot.slane %v12758_v38, %v15831_v7  ;;  %v1060_v22 = vmax.f32 %v1052_v51, 0.0  ;;  %v3141_v49 = vpop.permute.xlu0 %3140 }
 0x294   :  { %v12721_v6 = vpop.f32.mrf.mxu1  ;;  %10032 = vmatprep.mubr.msk.f32.mxu0 %vm354_vm2, %v1055_v54  ;;  %v1059_v42 = vmax.f32 %v1051_v18, 0.0 }
 0x295   :  { %v2938_v5 = vadd.f32 %v2874_v43, %v2550_v20  ;;  %v1692_v20 = vsub.f32 %v1684_v37, %v12656_v4 }
 0x296   :  { %v10021_v1 = vpop.f32.mrf.mxu1 }
 0x297   :  { %v3326_v59 = vadd.f32 %v3262_v30, %v2938_v5  ;;  %v12733_v46 = vadd.f32 %v10021_v1, %v12726_v28  ;;  %10698 = vset.pattern.permute.xlu1 %v15640_v45  ;;  %v3129_v15 = vpop.permute.xlu1 %3128  ;;  %10033 = vmatmul.mubr.msk.f32.gmra.mxu0 %vm354_vm2, %v1056_v32  ;;  %v1700_v52 = vand.u32 2147483647, %v1692_v20  ;;  %v2552_v1 = vmul.f32 %v12109_v57, %v15832_v11  ;;  %v15835_v11 = vld [vmem:[#allocation106_spill] sm:$0xff] }
 0x298   :  { %v3261_v19 = vmul.f32 %v12116_v8, %v3129_v15  ;;  %2796 = vperm.xlu1 %10698, %v12701_v2   ;;  %v12739_v35 = vpop.f32.mrf.mxu1  ;;  %10035 = vmatprep.mubr.msk.f32.mxu0 %vm354_vm2, %v1057_v12  ;;  %v3264_v12 = vmul.f32 %v12116_v8, %v3141_v49 }
 0x299   :  { %15826 = vst [vmem:[#allocation70_spill] sm:$0xff] %v12733_v46  ;;  %15827 = vst [vmem:[#allocation67_spill] sm:$0xff] %v12739_v35  ;;  %v3394_v17 = vadd.f32 %v12163_v48, %v3326_v59 }
 0x29a   :  { %v3325_v39 = vadd.f32 %v3261_v19, %v2937_v10  ;;  %v10024_v13 = vpop.f32.mrf.mxu1 }
 0x29b   :  { %v12747_v27 = vadd.f32 %v10024_v13, %v12726_v28  ;;  %10036 = vmatmul.mubr.msk.f32.gmra.mxu0 %vm354_vm2, %v1058_v53  ;;  %v3458_v43 = vmax.f32 %v3394_v17, 0.0  ;;  %v12788_v17 = vrot.slane %v12640_v50, %v11438_v44 }
 0x29c   :  { %v3393_v47 = vadd.f32 %v12163_v48, %v3325_v39  ;;  %2800 = vperm.xlu1 %10698, %v15829_v25   ;;  %v2406_v24 = vpop.permute.xlu1 %2405  ;;  %v12752_v40 = vpop.f32.mrf.mxu1  ;;  %10038 = vmatprep.mubr.msk.f32.mxu0 %vm354_vm2, %v1059_v42  ;;  %v1860_v42 = vrot.slane %v12656_v4, %v11438_v44  ;;  %v15833_v25 = vld [vmem:[#allocation39_spill] sm:$0xff] }
 0x29d   :  { %15828 = vst [vmem:[#allocation69_spill] sm:$0xff] %v12747_v27  ;;  %15830 = vst [vmem:[#allocation81_spill] sm:$0xff] %v12752_v40  ;;  %v2551_v10 = vmul.f32 %v12109_v57, %v2406_v24  ;;  %v7821_v49 = vmul.f32 %v12788_v17, %v12128_v26 }
 0x29e   :  { %v3457_v54 = vmax.f32 %v3393_v47, 0.0  ;;  %v12764_v9 = vpop.f32.mrf.mxu1 }
 0x29f   :  { %10039 = vmatmul.mubr.msk.f32.gmra.mxu0 %vm354_vm2, %v1060_v22 }
 0x2a0   :  { %10699 = vset.pattern.permute.xlu1 %v15653_v61  ;;  %v1294_v30 = vpop.f32.mrf.mxu1  ;;  %10140 = vmatprep.mubr.msk.f32.mxu1 %vm354_vm2, %v3457_v54  ;;  %v1868_v54 = vsub.f32 %v1860_v42, %v12656_v4 }
 0x2a1   :  { %v1295_v63 = vadd.f32 %v1294_v30, %v12762_v23  ;;  %3184 = vperm.xlu1 %10699, %v12701_v2   ;;  %v2749_v32 = vpop.permute.xlu1 %2748  ;;  %10141 = vmatmul.mubr.msk.f32.gmra.mxu1 %vm354_vm2, %v3458_v43  ;;  %v7822_v43 = vmul.f32 %v12788_v17, %v12141_v36  ;;  %v12797_v30 = vrot.slane %v12640_v50, %v11498_v29 }
 0x2a2   :  { %v2875_v2 = vmul.f32 %v12112_v56, %v2749_v32  ;;  %v1876_v32 = vand.u32 2147483647, %v1868_v54 }
 0x2a3   :  { %v1333_v5 = vmax.f32 %v1295_v63, 0.0 }
 0x2a4   :  { %v2939_v51 = vadd.f32 %v2875_v2, %v2551_v10  ;;  %v7823_v10 = vmul.f32 %v12788_v17, %v12153_v33 }
 0x2a5   :  { %10700 = vset.pattern.permute.xlu1 %v15647_v60  ;;  %v2753_v18 = vpop.permute.xlu1 %2752  ;;  %10061 = vmatprep.mubr.msk.f32.mxu0 %vm354_vm2, %v1333_v5  ;;  %v12803_v5 = vadd.f32 %v12797_v30, %v7822_v43  ;;  %v7825_v43 = vmul.f32 %v12788_v17, %v12183_v55 }
 0x2a6   :  { %v2876_v59 = vmul.f32 %v12112_v56, %v2753_v18  ;;  %2475 = vperm.xlu1 %10700, %v1700_v52   ;;  %v3149_v18 = vpop.permute.xlu0 %3148 }
 0x2a7   :  { %15834 = vst [vmem:[#allocation71_spill] sm:$0xff] %v12803_v5  ;;  %v15538_v2 = vmax.f32 %v12803_v5, 0.0 }
 0x2a8   :  { %v2940_v15 = vadd.f32 %v2876_v59, %v2552_v1  ;;  %v2554_v1 = vmul.f32 %v12109_v57, %v15835_v11  ;;  %v15838_v11 = vld [vmem:[#allocation42_spill] sm:$0xff] }
 0x2aa   :  { %v3328_v19 = vadd.f32 %v3264_v12, %v2940_v15  ;;  %10701 = vset.pattern.permute.xlu1 %v15640_v45  ;;  %v3137_v53 = vpop.permute.xlu1 %3136  ;;  %v3266_v12 = vmul.f32 %v12116_v8, %v3149_v18  ;;  %v12815_v15 = vadd.f32 %v12797_v30, %v7821_v49  ;;  %v3157_v0 = vpop.permute.xlu0 %3156 }
 0x2ab   :  { %v3263_v39 = vmul.f32 %v12116_v8, %v3137_v53  ;;  %2804 = vperm.xlu1 %10701, %v1700_v52  }
 0x2ac   :  { %v3396_v37 = vadd.f32 %v12163_v48, %v3328_v19  ;;  %15836 = vst [vmem:[#allocation72_spill] sm:$0xff] %v12815_v15 }
 0x2ad   :  { %v3327_v13 = vadd.f32 %v3263_v39, %v2939_v51 }
 0x2ae   :  { %v3460_v20 = vmax.f32 %v3396_v37, 0.0 }
 0x2af   :  { %v3395_v47 = vadd.f32 %v12163_v48, %v3327_v13  ;;  %2808 = vperm.xlu1 %10701, %v15833_v25   ;;  %v2416_v24 = vpop.permute.xlu1 %2415  ;;  %v10050_v13 = vpop.f32.mrf.mxu1  ;;  %v15540_v25 = vmax.f32 %v12815_v15, 0.0 }
 0x2b0   :  { %v2553_v53 = vmul.f32 %v12109_v57, %v2416_v24  ;;  %v12829_v24 = vadd.f32 %v12797_v30, %v7823_v10  ;;  %v15840_v10 = vld [vmem:[#allocation64_spill] sm:$0xff] }
 0x2b1   :  { %v3459_v22 = vmax.f32 %v3395_v47, 0.0  ;;  %v8792_v47 = vsel %vm354_vm2, %v15538_v2, -inf  ;;  %v1304_v18 = vpop.f32.mrf.mxu1 }
 0x2b2   :  { %15837 = vst [vmem:[#allocation80_spill] sm:$0xff] %v12829_v24  ;;  %v8793_v49 = vrot.slane %v8792_v47, 4  ;;  %v1305_v2 = vadd.f32 %v1304_v18, %v12762_v23  ;;  %v15846_v18 = vld [vmem:[#allocation62_spill] sm:$0xff] }
 0x2b3   :  { %10702 = vset.pattern.permute.xlu1 %v15653_v61  ;;  %10143 = vmatprep.mubr.msk.f32.mxu1 %vm354_vm2, %v3459_v22  ;;  %v7824_v22 = vmul.f32 %v12788_v17, %v12174_v58  ;;  %v7828_v5 = vmul.f32 %v12788_v17, %v15846_v18 }
 0x2b4   :  { %3192 = vperm.xlu1 %10702, %v1700_v52   ;;  %v2757_v63 = vpop.permute.xlu1 %2756  ;;  %10144 = vmatmul.mubr.msk.f32.gmra.mxu1 %vm354_vm2, %v3460_v20  ;;  %v2036_v20 = vrot.slane %v12656_v4, %v11498_v29 }
 0x2b5   :  { %v2877_v59 = vmul.f32 %v12112_v56, %v2757_v63  ;;  %v12900_v35 = vadd.f32 %v12797_v30, %v7828_v5 }
 0x2b7   :  { %v2941_v42 = vadd.f32 %v2877_v59, %v2553_v53  ;;  %v15539_v59 = vmax.f32 %v12829_v24, 0.0  ;;  %15849 = vst [vmem:[#allocation22_spill] sm:$0xff] %v12900_v35 }
 0x2b8   :  { %10703 = vset.pattern.permute.xlu1 %v15647_v60  ;;  %v2761_v50 = vpop.permute.xlu1 %2760 }
 0x2b9   :  { %v2878_v52 = vmul.f32 %v12112_v56, %v2761_v50  ;;  %2485 = vperm.xlu1 %10703, %v1876_v32  }
 0x2bb   :  { %v2942_v19 = vadd.f32 %v2878_v52, %v2554_v1  ;;  %v12842_v52 = vadd.f32 %v12797_v30, %v7824_v22 }
 0x2bd   :  { %v3330_v51 = vadd.f32 %v3266_v12, %v2942_v19  ;;  %10704 = vset.pattern.permute.xlu1 %v15640_v45  ;;  %v3145_v39 = vpop.permute.xlu1 %3144  ;;  %v8785_v12 = vsel %vm354_vm2, %v15540_v25, -inf  ;;  %15839 = vst [vmem:[#allocation85_spill] sm:$0xff] %v12842_v52  ;;  %v7826_v19 = vmul.f32 %v12788_v17, %v15840_v10 }
 0x2be   :  { %v3265_v37 = vmul.f32 %v12116_v8, %v3145_v39  ;;  %2812 = vperm.xlu1 %10704, %v1876_v32   ;;  %v12849_v39 = vadd.f32 %v12797_v30, %v7825_v43 }
 0x2bf   :  { %v3398_v63 = vadd.f32 %v12163_v48, %v3330_v51  ;;  %v2044_v51 = vsub.f32 %v2036_v20, %v12656_v4  ;;  %v12860_v4 = vadd.f32 %v12797_v30, %v7826_v19  ;;  %v15843_v20 = vld [vmem:[#allocation63_spill] sm:$0xff]  ;;  %v9271_v19 = vld [vmem:[%s15471_s6 + $0x68] sm:$0xff] }
 0x2c0   :  { %v3329_v54 = vadd.f32 %v3265_v37, %v2941_v42  ;;  %15841 = vst [vmem:[#allocation86_spill] sm:$0xff] %v12849_v39  ;;  %v12851_v37 = vmax.f32 %v8792_v47, %v8793_v49  ;;  %v7827_v43 = vmul.f32 %v12788_v17, %v15843_v20  ;;  %10057 = vmatprep.subr.mxu0 %v9271_v19 }
 0x2c1   :  { %v3462_v42 = vmax.f32 %v3398_v63, 0.0  ;;  %15842 = vst [vmem:[#allocation83_spill] sm:$0xff] %v12860_v4  ;;  %v1300_v63 = vadd.f32 %v12764_v9, %v12762_v23  ;;  %v12867_v49 = vand.u32 2147483647, %v2044_v51  ;;  %v15845_v9 = vmax.f32 %v12842_v52, 0.0  ;;  %10058 = vmatpush3.msra.mxu0 %v9271_v19 }
 0x2c2   :  { %v3397_v50 = vadd.f32 %v12163_v48, %v3329_v54  ;;  %2816 = vperm.xlu1 %10704, %v15838_v11   ;;  %v2426_v1 = vpop.permute.xlu1 %2425  ;;  %v8786_v54 = vrot.slane %v8785_v12, 4  ;;  %v10053_v11 = vpop.f32.mrf.mxu1  ;;  %v12884_v15 = vadd.f32 %v12797_v30, %v7827_v43  ;;  %v3268_v52 = vmul.f32 %v12116_v8, %v3157_v0 }
 0x2c3   :  { %v8806_v51 = vsel %vm354_vm2, %v15845_v9, -inf  ;;  %v1335_v43 = vmax.f32 %v1305_v2, 0.0  ;;  %v2555_v2 = vmul.f32 %v12109_v57, %v2426_v1  ;;  %v15850_v5 = vmax.f32 %v12860_v4, 0.0 }
 0x2c4   :  { %v3461_v53 = vmax.f32 %v3397_v50, 0.0  ;;  %v8799_v50 = vsel %vm354_vm2, %v15539_v59, -inf  ;;  %v15844_v59 = vld [vmem:[#allocation109_spill] sm:$0xff]  ;;  %v8787_v22 = vmax.f32 %v8785_v12, %v8786_v54  ;;  %v1314_v24 = vpop.f32.mrf.mxu1  ;;  %15847 = vst [vmem:[#allocation87_spill] sm:$0xff] %v12884_v15  ;;  %v1334_v12 = vmax.f32 %v1300_v63, 0.0  ;;  %v9270_v63 = vld [vmem:[%s15471_s6 + $0x60] sm:$0xff] }
 0x2c5   :  { %v2556_v25 = vmul.f32 %v12109_v57, %v15844_v59  ;;  %v1310_v54 = vadd.f32 %v10050_v13, %v12762_v23  ;;  %v1315_v27 = vadd.f32 %v1314_v24, %v12762_v23  ;;  %v8807_v19 = vrot.slane %v8806_v51, 4  ;;  %10059 = vmatprep.subr.mxu0 %v9270_v63 }
 0x2c6   :  { %10705 = vset.pattern.permute.xlu1 %v15653_v61  ;;  %10146 = vmatprep.mubr.msk.f32.mxu1 %vm354_vm2, %v3461_v53  ;;  %v15848_v53 = vmax.f32 %v12849_v39, 0.0  ;;  %v8788_v13 = vrot.slane %v8787_v22, 2  ;;  %v10056_v46 = vpop.f32.mrf.mxu1  ;;  %v1320_v39 = vadd.f32 %v10053_v11, %v12762_v23  ;;  %v8820_v1 = vsel %vm354_vm2, %v15850_v5, -inf }
 0x2c7   :  { %3200 = vperm.xlu1 %10705, %v1876_v32   ;;  %v2765_v47 = vpop.permute.xlu1 %2764  ;;  %10147 = vmatmul.mubr.msk.f32.gmra.mxu1 %vm354_vm2, %v3462_v42  ;;  %v8795_v32 = vrot.slane %v12851_v37, 2  ;;  %v8800_v42 = vrot.slane %v8799_v50, 4 }
 0x2c8   :  { %v8813_v17 = vsel %vm354_vm2, %v15848_v53, -inf  ;;  %v2879_v40 = vmul.f32 %v12112_v56, %v2765_v47  ;;  %v15549_v53 = vmax.f32 %v12884_v15, 0.0  ;;  %10060 = vmatpush3.msra.mxu0 %v9270_v63  ;;  %v1336_v47 = vmax.f32 %v1310_v54, 0.0  ;;  %v1324_v54 = vpop.f32.mrf.mxu1 }
 0x2c9   :  { %v8801_v0 = vmax.f32 %v8799_v50, %v8800_v42  ;;  %v8814_v24 = vrot.slane %v8813_v17, 4  ;;  %10062 = vmatmul.mubr.msk.f32.vlgmr.msra.gmra.mxu0 %vm354_vm2, %v1334_v12  ;;  %v8796_v11 = vmax.f32 %v12851_v37, %v8795_v32  ;;  %v8808_v42 = vmax.f32 %v8806_v51, %v8807_v19 }
 0x2ca   :  { %v2943_v50 = vadd.f32 %v2879_v40, %v2555_v2  ;;  %10064 = vmatprep.mubr.msk.f32.mxu0 %vm354_vm2, %v1335_v43  ;;  %v1325_v12 = vadd.f32 %v1324_v54, %v12762_v23  ;;  %v15548_v40 = vmax.f32 %v12900_v35, 0.0  ;;  %v1330_v63 = vadd.f32 %v10056_v46, %v12762_v23 }
 0x2cb   :  { %10706 = vset.pattern.permute.xlu1 %v15647_v60  ;;  %v2769_v59 = vpop.permute.xlu1 %2768  ;;  %v8815_v51 = vmax.f32 %v8813_v17, %v8814_v24  ;;  %v8809_v19 = vrot.slane %v8808_v42, 2 }
 0x2cc   :  { %v2880_v9 = vmul.f32 %v12112_v56, %v2769_v59  ;;  %2495 = vperm.xlu1 %10706, %v12867_v49   ;;  %v1340_v46 = vmax.f32 %v1330_v63, 0.0 }
 0x2cd   :  { %10065 = vmatmul.mubr.msk.f32.gmra.mxu0 %vm354_vm2, %v1336_v47  ;;  %v8816_v17 = vrot.slane %v8815_v51, 2 }
 0x2ce   :  { %v2944_v59 = vadd.f32 %v2880_v9, %v2556_v25  ;;  %v1337_v25 = vmax.f32 %v1315_v27, 0.0  ;;  %v1338_v9 = vmax.f32 %v1320_v39, 0.0 }
 0x2d0   :  { %v3332_v34 = vadd.f32 %v3268_v52, %v2944_v59  ;;  %10707 = vset.pattern.permute.xlu1 %v15640_v45  ;;  %v3153_v20 = vpop.permute.xlu1 %3152  ;;  %v8789_v52 = vmax.f32 %v8787_v22, %v8788_v13  ;;  %v8802_v45 = vrot.slane %v8801_v0, 2  ;;  %v8821_v59 = vrot.slane %v8820_v1, 4  ;;  %v15851_v22 = vld [vmem:[#allocation44_spill] sm:$0xff]  ;;  %10067 = vmatprep.mubr.msk.f32.mxu0 %vm354_vm2, %v1337_v25 }
 0x2d1   :  { %v3267_v30 = vmul.f32 %v12116_v8, %v3153_v20  ;;  %2820 = vperm.xlu1 %10707, %v12867_v49   ;;  %v8827_v20 = vsel %vm354_vm2, %v15549_v53, -inf  ;;  %v8797_v13 = vrot.slane %v8796_v11, 1  ;;  %10068 = vmatmul.mubr.msk.f32.gmra.mxu0 %vm354_vm2, %v1338_v9 }
 0x2d2   :  { %v3400_v43 = vadd.f32 %v12163_v48, %v3332_v34  ;;  %v8828_v2 = vrot.slane %v8827_v20, 4  ;;  %v8834_v34 = vsel %vm354_vm2, %v15548_v40, -inf  ;;  %v8790_v47 = vrot.slane %v8789_v52, 1 }
 0x2d3   :  { %v3331_v27 = vadd.f32 %v3267_v30, %v2943_v50  ;;  %v1339_v50 = vmax.f32 %v1325_v12, 0.0  ;;  %v8803_v30 = vmax.f32 %v8801_v0, %v8802_v45  ;;  %v8822_v5 = vmax.f32 %v8820_v1, %v8821_v59  ;;  %v12937_v1 = vld [vmem:[%s15471_s6 + $0x38] sm:$0xff] }
 0x2d4   :  { %v3464_v23 = vmax.f32 %v3400_v43, 0.0  ;;  %v8810_v0 = vmax.f32 %v8808_v42, %v8809_v19  ;;  %v8835_v25 = vrot.slane %v8834_v34, 4  ;;  %v8829_v54 = vmax.f32 %v8827_v20, %v8828_v2  ;;  %10173 = vmatprep.subr.mxu0 %v12937_v1  ;;  %v9347_v20 = vld [vmem:[%s15471_s6 + $0x30] sm:$0xff] }
 0x2d5   :  { %v3399_v37 = vadd.f32 %v12163_v48, %v3331_v27  ;;  %2824 = vperm.xlu1 %10707, %v15851_v22   ;;  %v2436_v32 = vpop.permute.xlu1 %2435  ;;  %v8804_v45 = vrot.slane %v8803_v30, 1  ;;  %10070 = vmatprep.mubr.msk.f32.mxu0 %vm354_vm2, %v1339_v50  ;;  %v8791_v12 = vmax.f32 %v8789_v52, %v8790_v47  ;;  %v8823_v27 = vrot.slane %v8822_v5, 2 }
 0x2d6   :  { %10071 = vmatmul.mubr.msk.f32.gmra.mxu0 %vm354_vm2, %v1340_v46  ;;  %v8817_v42 = vmax.f32 %v8815_v51, %v8816_v17  ;;  %v8811_v63 = vrot.slane %v8810_v0, 1  ;;  %v8836_v43 = vmax.f32 %v8834_v34, %v8835_v25  ;;  %v8830_v22 = vrot.slane %v8829_v54, 2  ;;  %v3165_v51 = vpop.permute.xlu0 %3164 }
 0x2d7   :  { %v3463_v39 = vmax.f32 %v3399_v37, 0.0  ;;  %10174 = vmatpush3.msra.mxu0 %v12937_v1  ;;  %v8805_v37 = vmax.f32 %v8803_v30, %v8804_v45  ;;  %v8824_v19 = vmax.f32 %v8822_v5, %v8823_v27  ;;  %v3270_v50 = vmul.f32 %v12116_v8, %v3165_v51  ;;  %v7783_v51 = vld [vmem:[%s15467_s2 + $0x30] sm:$0xff] }
 0x2d8   :  { %10175 = vmatprep.subr.mxu0 %v9347_v20  ;;  %v8818_v34 = vrot.slane %v8817_v42, 1  ;;  %v2557_v30 = vmul.f32 %v12109_v57, %v2436_v32  ;;  %v8812_v46 = vmax.f32 %v8810_v0, %v8811_v63 }
 0x2d9   :  { %10709 = vset.pattern.permute.xlu1 %v15653_v61  ;;  %10149 = vmatprep.mubr.msk.f32.mxu1 %vm354_vm2, %v3463_v39  ;;  %v7777_v61 = vld [vmem:[%s15467_s2] sm:$0xff] }
 0x2da   :  { %3208 = vperm.xlu1 %10709, %v12867_v49   ;;  %v2773_v24 = vpop.permute.xlu1 %2772  ;;  %10150 = vmatmul.mubr.msk.f32.gmra.mxu1 %vm354_vm2, %v3464_v23  ;;  %v8798_v49 = vmax.f32 %v8796_v11, %v8797_v13  ;;  %v15852_v11 = vld [vmem:[#allocation111_spill] sm:$0xff]  ;;  %v8837_v23 = vrot.slane %v8836_v43, 2 }
 0x2db   :  { %v2558_v52 = vmul.f32 %v12109_v57, %v15852_v11  ;;  %10176 = vmatpush3.msra.mxu0 %v9347_v20  ;;  %v2881_v13 = vmul.f32 %v12112_v56, %v2773_v24  ;;  %v8831_v24 = vmax.f32 %v8829_v54, %v8830_v22  ;;  %v7781_v11 = vld [vmem:[%s15467_s2 + $0x20] sm:$0xff] }
 0x2dc   :  { %v8977_v2 = vsel %vm6944_vm3, %v8798_v49, %v8791_v12  ;;  %10373 = vmatprep.subr.mxu0 %v15656_v3  ;;  %v8825_v12 = vrot.slane %v8824_v19, 1  ;;  %v8819_v49 = vmax.f32 %v8817_v42, %v8818_v34  ;;  %v8838_v32 = vmax.f32 %v8836_v43, %v8837_v23  ;;  %v3173_v23 = vpop.permute.xlu0 %3172 }
 0x2dd   :  { %v8978_v25 = vsel %vm6946_vm4, %v8805_v37, %v8977_v2  ;;  %v2945_v5 = vadd.f32 %v2881_v13, %v2557_v30  ;;  %v8832_v54 = vrot.slane %v8831_v24, 1 }
 0x2de   :  { %10710 = vset.pattern.permute.xlu1 %v15647_v60  ;;  %v2777_v9 = vpop.permute.xlu1 %2776  ;;  %v7778_v60 = vld [vmem:[%s15467_s2 + $0x8] sm:$0xff]  ;;  %v8979_v0 = vsel %vm6948_vm5, %v8812_v46, %v8978_v25  ;;  %v8839_v37 = vrot.slane %v8838_v32, 1 }
 0x2df   :  { %v2882_v59 = vmul.f32 %v12112_v56, %v2777_v9  ;;  %7851 = vperm.xlu1 %10710, %v7777_v61   ;;  %v7780_v61 = vld [vmem:[%s15467_s2 + $0x18] sm:$0xff]  ;;  %v8980_v42 = vsel %vm6950_vm6, %v8819_v49, %v8979_v0  ;;  %v8833_v22 = vmax.f32 %v8831_v24, %v8832_v54  ;;  %s11122_s2 = smov 16  }
 0x2e1   :  { %v2946_v39 = vadd.f32 %v2882_v59, %v2558_v52  ;;  %v8826_v52 = vmax.f32 %v8824_v19, %v8825_v12  ;;  %v8840_v19 = vmax.f32 %v8838_v32, %v8839_v37  ;;  %v15854_v37 = vld [vmem:[#allocation115_spill] sm:$0xff] }
 0x2e3   :  { %v3334_v47 = vadd.f32 %v3270_v50, %v2946_v39  ;;  %7856 = vperm.xlu1 %10710, %v7778_v60   ;;  %v3161_v17 = vpop.permute.xlu1 %3160  ;;  %v8981_v13 = vsel %vm6952_vm7, %v8826_v52, %v8980_v42  ;;  %v15853_v39 = vld [vmem:[#allocation113_spill] sm:$0xff]  ;;  %v3181_v52 = vpop.permute.xlu0 %3180 }
 0x2e4   :  { %v3269_v45 = vmul.f32 %v12116_v8, %v3161_v17  ;;  %v8982_v2 = vsel %vm6954_vm8, %v8833_v22, %v8981_v13  ;;  %v2560_v34 = vmul.f32 %v12109_v57, %v15853_v39  ;;  %v3272_v17 = vmul.f32 %v12116_v8, %v3173_v23 }
 0x2e5   :  { %v3402_v20 = vadd.f32 %v12163_v48, %v3334_v47  ;;  %v8983_v46 = vsel %vm6956_vm9, %v8840_v19, %v8982_v2  ;;  %v3274_v13 = vmul.f32 %v12116_v8, %v3181_v52 }
 0x2e6   :  { %v3333_v27 = vadd.f32 %v3269_v45, %v2945_v5 }
 0x2e7   :  { %7866 = vperm.xlu1 %10710, %v7780_v61   ;;  %v3466_v43 = vmax.f32 %v3402_v20, 0.0  ;;  %v12989_v20 = vpop.f32.mrf.mxu1  ;;  %v3189_v2 = vpop.permute.xlu0 %3188 }
 0x2e8   :  { %v3401_v9 = vadd.f32 %v12163_v48, %v3333_v27  ;;  %v2446_v63 = vpop.permute.xlu1 %2445 }
 0x2e9   :  { %v2559_v25 = vmul.f32 %v12109_v57, %v2446_v63 }
 0x2ea   :  { %v3465_v59 = vmax.f32 %v3401_v9, 0.0 }
 0x2eb   :  { %7871 = vperm.xlu1 %10710, %v7781_v11   ;;  %v12992_v11 = vpop.f32.mrf.mxu1 }
 0x2ec   :  { %10152 = vmatprep.mubr.msk.f32.mxu1 %vm354_vm2, %v3465_v59 }
 0x2ed   :  { %v2781_v60 = vpop.permute.xlu1 %2780  ;;  %10153 = vmatmul.mubr.msk.f32.gmra.mxu1 %vm354_vm2, %v3466_v43  ;;  %v12995_v42 = vpop.f32.mrf.mxu1  ;;  %v2562_v43 = vmul.f32 %v12109_v57, %v15854_v37  ;;  %v3276_v37 = vmul.f32 %v12116_v8, %v3189_v2 }
 0x2ee   :  { %v2883_v47 = vmul.f32 %v12112_v56, %v2781_v60 }
 0x2ef   :  { %7881 = vperm.xlu1 %10710, %v7783_v51   ;;  %v13002_v19 = vpop.f32.mrf.mxu1 }
 0x2f0   :  { %v2947_v61 = vadd.f32 %v2883_v47, %v2559_v25 }
 0x2f1   :  { %v2785_v50 = vpop.permute.xlu1 %2784  ;;  %v13006_v23 = vpop.f32.mrf.mxu1 }
 0x2f2   :  { %v2884_v30 = vmul.f32 %v12112_v56, %v2785_v50 }
 0x2f3   :  { %8984 = vrot.lane.b32.xlu1 %v8983_v46, %s11122_s2 }
 0x2f4   :  { %v2948_v24 = vadd.f32 %v2884_v30, %v2560_v34 }
 0x2f6   :  { %v3336_v5 = vadd.f32 %v3272_v17, %v2948_v24  ;;  %v3169_v45 = vpop.permute.xlu1 %3168  ;;  %v3197_v24 = vpop.permute.xlu0 %3196 }
 0x2f7   :  { %v3271_v12 = vmul.f32 %v12116_v8, %v3169_v45  ;;  %v13010_v45 = vpop.f32.mrf.mxu1 }
 0x2f8   :  { %v3404_v27 = vadd.f32 %v12163_v48, %v3336_v5 }
 0x2f9   :  { %v3335_v49 = vadd.f32 %v3271_v12, %v2947_v61 }
 0x2fa   :  { %v3468_v9 = vmax.f32 %v3404_v27, 0.0  ;;  %v13014_v27 = vpop.f32.mrf.mxu1 }
 0x2fb   :  { %v3403_v32 = vadd.f32 %v12163_v48, %v3335_v49  ;;  %v2456_v0 = vpop.permute.xlu1 %2455 }
 0x2fc   :  { %v2561_v50 = vmul.f32 %v12109_v57, %v2456_v0 }
 0x2fd   :  { %v3467_v54 = vmax.f32 %v3403_v32, 0.0  ;;  %v13016_v32 = vpop.permute.xlu0 %3204 }
 0x2ff   :  { %10155 = vmatprep.mubr.msk.f32.mxu1 %vm354_vm2, %v3467_v54  ;;  %v15855_v54 = vld [vmem:[#allocation118_spill] sm:$0xff] }
 0x300   :  { %v2789_v63 = vpop.permute.xlu1 %2788  ;;  %10156 = vmatmul.mubr.msk.f32.gmra.mxu1 %vm354_vm2, %v3468_v9  ;;  %v2564_v9 = vmul.f32 %v12109_v57, %v15855_v54 }
 0x301   :  { %v2885_v51 = vmul.f32 %v12112_v56, %v2789_v63  ;;  %v13020_v63 = vpop.f32.mrf.mxu1 }
 0x303   :  { %v2949_v30 = vadd.f32 %v2885_v51, %v2561_v50 }
 0x304   :  { %v2793_v59 = vpop.permute.xlu1 %2792 }
 0x305   :  { %v2886_v22 = vmul.f32 %v12112_v56, %v2793_v59 }
 0x307   :  { %v2950_v60 = vadd.f32 %v2886_v22, %v2562_v43  ;;  %v13025_v43 = vpop.permute.xlu0 %3212 }
 0x309   :  { %v3338_v39 = vadd.f32 %v3274_v13, %v2950_v60  ;;  %v3177_v34 = vpop.permute.xlu1 %3176  ;;  %v13028_v13 = vpop.f32.mrf.mxu1 }
 0x30a   :  { %v3273_v46 = vmul.f32 %v12116_v8, %v3177_v34 }
 0x30b   :  { %v3406_v17 = vadd.f32 %v12163_v48, %v3338_v39 }
 0x30c   :  { %v3337_v47 = vadd.f32 %v3273_v46, %v2949_v30  ;;  %v13031_v46 = vpop.f32.mrf.mxu1 }
 0x30d   :  { %v3470_v12 = vmax.f32 %v3406_v17, 0.0 }
 0x30e   :  { %v3405_v25 = vadd.f32 %v12163_v48, %v3337_v47  ;;  %v2466_v5 = vpop.permute.xlu1 %2465  ;;  %v13033_v47 = vpop.permute.xlu0 %7861 }
 0x30f   :  { %v2563_v51 = vmul.f32 %v12109_v57, %v2466_v5  ;;  %15856 = vst [vmem:[#allocation73_spill] sm:$0xff] %v13033_v47 }
 0x310   :  { %v3469_v61 = vmax.f32 %v3405_v25, 0.0 }
 0x312   :  { %10158 = vmatprep.mubr.msk.f32.mxu1 %vm354_vm2, %v3469_v61 }
 0x313   :  { %v2797_v49 = vpop.permute.xlu1 %2796  ;;  %10159 = vmatmul.mubr.msk.f32.gmra.mxu1 %vm354_vm2, %v3470_v12  ;;  %v13037_v12 = vpop.f32.mrf.mxu1 }
 0x314   :  { %v2887_v59 = vmul.f32 %v12112_v56, %v2797_v49  ;;  %v94_v49 = vld [vmem:[%s15472_s7 + $0x18] sm:$0x7] }
 0x316   :  { %v2951_v39 = vadd.f32 %v2887_v59, %v2563_v51  ;;  %v13051_v59 = vrot.slane %v94_v49, %v11340_v41  ;;  %v15858_v51 = vld [vmem:[#allocation120_spill] sm:$0xff] }
 0x317   :  { %v2801_v0 = vpop.permute.xlu1 %2800 }
 0x318   :  { %v2888_v52 = vmul.f32 %v12112_v56, %v2801_v0  ;;  %v13043_v0 = vpop.permute.xlu0 %7876 }
 0x319   :  { %15857 = vst [vmem:[#allocation92_spill] sm:$0xff] %v13043_v0 }
 0x31a   :  { %v2952_v22 = vadd.f32 %v2888_v52, %v2564_v9  ;;  %v13046_v9 = vpop.f32.mrf.mxu1  ;;  %v7931_v52 = vmul.f32 %v13033_v47, %v12153_v33 }
 0x31c   :  { %v3340_v60 = vadd.f32 %v3276_v37, %v2952_v22  ;;  %v3185_v50 = vpop.permute.xlu1 %3184  ;;  %v7934_v37 = vmul.f32 %v13043_v0, %v15840_v10  ;;  %v13067_v40 = vpop.permute.xlu0 %7886 }
 0x31d   :  { %v3275_v34 = vmul.f32 %v12116_v8, %v3185_v50  ;;  %15859 = vst [vmem:[#allocation91_spill] sm:$0xff] %v13067_v40 }
 0x31e   :  { %v3408_v17 = vadd.f32 %v12163_v48, %v3340_v60  ;;  %v2566_v60 = vmul.f32 %v12109_v57, %v15858_v51 }
 0x31f   :  { %v3339_v30 = vadd.f32 %v3275_v34, %v2951_v39  ;;  %v13058_v39 = vpop.f32.mrf.mxu1  ;;  %v7943_v34 = vmul.f32 %v13051_v59, %v7931_v52 }
 0x320   :  { %v3472_v5 = vmax.f32 %v3408_v17, 0.0 }
 0x321   :  { %v3407_v2 = vadd.f32 %v12163_v48, %v3339_v30  ;;  %v2476_v25 = vpop.permute.xlu1 %2475  ;;  %v13062_v30 = vrot.slane %v94_v49, %v11389_v62  ;;  %v13070_v0 = vpop.f32.mrf.mxu1 }
 0x322   :  { %v2565_v51 = vmul.f32 %v12109_v57, %v2476_v25 }
 0x323   :  { %v3471_v61 = vmax.f32 %v3407_v2, 0.0  ;;  %v3278_v2 = vmul.f32 %v12116_v8, %v3197_v24  ;;  %v13073_v52 = vadd.f32 %v13062_v30, %v7943_v34  ;;  %v7936_v24 = vmul.f32 %v13067_v40, %v15846_v18  ;;  %v13082_v25 = vpop.f32.mrf.mxu1 }
 0x325   :  { %10161 = vmatprep.mubr.msk.f32.mxu1 %vm354_vm2, %v3471_v61  ;;  %v7946_v61 = vmul.f32 %v13051_v59, %v7934_v37  ;;  %15860 = vst [vmem:[#allocation89_spill] sm:$0xff] %v13073_v52 }
 0x326   :  { %v2805_v54 = vpop.permute.xlu1 %2804  ;;  %10162 = vmatmul.mubr.msk.f32.gmra.mxu1 %vm354_vm2, %v3472_v5 }
 0x327   :  { %v2889_v17 = vmul.f32 %v12112_v56, %v2805_v54  ;;  %v13077_v54 = vadd.f32 %v13062_v30, %v7946_v61 }
 0x329   :  { %v2953_v49 = vadd.f32 %v2889_v17, %v2565_v51  ;;  %15861 = vst [vmem:[#allocation94_spill] sm:$0xff] %v13077_v54  ;;  %v15557_v17 = vmax.f32 %v13077_v54, 0.0 }
 0x32a   :  { %v2809_v22 = vpop.permute.xlu1 %2808 }
 0x32b   :  { %v2890_v50 = vmul.f32 %v12112_v56, %v2809_v22 }
 0x32d   :  { %v2954_v5 = vadd.f32 %v2890_v50, %v2566_v60  ;;  %v15554_v50 = vmax.f32 %v13073_v52, 0.0 }
 0x32f   :  { %v3342_v53 = vadd.f32 %v3278_v2, %v2954_v5  ;;  %v3193_v22 = vpop.permute.xlu1 %3192  ;;  %v7948_v5 = vmul.f32 %v13051_v59, %v7936_v24 }
 0x330   :  { %v3277_v47 = vmul.f32 %v12116_v8, %v3193_v22  ;;  %v13088_v22 = vpop.f32.mrf.mxu1 }
 0x331   :  { %v3410_v60 = vadd.f32 %v12163_v48, %v3342_v53  ;;  %15862 = vst [vmem:[#allocation98_spill] sm:$0xff] %v13088_v22  ;;  %v8932_v53 = vsel %vm354_vm2, %v15557_v17, -inf }
 0x332   :  { %v3341_v37 = vadd.f32 %v3277_v47, %v2953_v49  ;;  %v8911_v47 = vsel %vm354_vm2, %v15554_v50, -inf  ;;  %v13098_v49 = vadd.f32 %v13062_v30, %v7948_v5  ;;  %v15865_v50 = vld [vmem:[#allocation47_spill] sm:$0xff]  ;;  %v3280_v5 = vmul.f32 %v12116_v8, %v13016_v32 }
 0x333   :  { %v3474_v61 = vmax.f32 %v3410_v60, 0.0  ;;  %v8912_v24 = vrot.slane %v8911_v47, 4  ;;  %v13101_v60 = vpop.f32.mrf.mxu1 }
 0x334   :  { %v3409_v2 = vadd.f32 %v12163_v48, %v3341_v37  ;;  %v2486_v34 = vpop.permute.xlu1 %2485  ;;  %15863 = vst [vmem:[#allocation74_spill] sm:$0xff] %v13098_v49  ;;  %15864 = vst [vmem:[#allocation99_spill] sm:$0xff] %v13101_v60  ;;  %v15563_v40 = vmax.f32 %v13098_v49, 0.0 }
 0x335   :  { %v8913_v35 = vmax.f32 %v8911_v47, %v8912_v24  ;;  %v13110_v15 = vpop.f32.mrf.mxu1  ;;  %v2567_v10 = vmul.f32 %v12109_v57, %v2486_v34 }
 0x336   :  { %v3473_v51 = vmax.f32 %v3409_v2, 0.0  ;;  %v8933_v2 = vrot.slane %v8932_v53, 4  ;;  %v8946_v18 = vsel %vm354_vm2, %v15563_v40, -inf }
 0x337   :  { %v8914_v60 = vrot.slane %v8913_v35, 2  ;;  %v13117_v24 = vpop.f32.mrf.mxu1  ;;  %v8947_v32 = vrot.slane %v8946_v18, 4 }
 0x338   :  { %10164 = vmatprep.mubr.msk.f32.mxu1 %vm354_vm2, %v3473_v51  ;;  %v2568_v51 = vmul.f32 %v12109_v57, %v15865_v50  ;;  %15866 = vst [vmem:[#allocation96_spill] sm:$0xff] %v13117_v24 }
 0x339   :  { %v2813_v37 = vpop.permute.xlu1 %2812  ;;  %10165 = vmatmul.mubr.msk.f32.gmra.mxu1 %vm354_vm2, %v3474_v61  ;;  %v8934_v61 = vmax.f32 %v8932_v53, %v8933_v2  ;;  %v13121_v49 = vpop.f32.mrf.mxu1 }
 0x33a   :  { %v2891_v17 = vmul.f32 %v12112_v56, %v2813_v37 }
 0x33b   :  { %v8935_v37 = vrot.slane %v8934_v61, 2 }
 0x33d   :  { %v2817_v52 = vpop.permute.xlu1 %2816  ;;  %v8936_v40 = vmax.f32 %v8934_v61, %v8935_v37  ;;  %v13139_v61 = vrot.slane %v12758_v38, %v11340_v41 }
 0x33e   :  { %v2892_v54 = vmul.f32 %v12112_v56, %v2817_v52  ;;  %v2955_v52 = vadd.f32 %v2891_v17, %v2567_v10  ;;  %v13126_v17 = vadd.f32 %v12694_v16, %v12726_v28  ;;  %v3282_v16 = vmul.f32 %v12116_v8, %v13025_v43 }
 0x340   :  { %v2956_v4 = vadd.f32 %v2892_v54, %v2568_v51  ;;  %v8915_v54 = vmax.f32 %v8913_v35, %v8914_v60 }
 0x342   :  { %v3344_v33 = vadd.f32 %v3280_v5, %v2956_v4  ;;  %v3201_v50 = vpop.permute.xlu1 %3200  ;;  %v8948_v4 = vmax.f32 %v8946_v18, %v8947_v32  ;;  %v8916_v10 = vrot.slane %v8915_v54, 1  ;;  %v15869_v18 = vld [vmem:[#allocation122_spill] sm:$0xff] }
 0x343   :  { %v3279_v47 = vmul.f32 %v12116_v8, %v3201_v50  ;;  %v8937_v50 = vrot.slane %v8936_v40, 1  ;;  %v2570_v60 = vmul.f32 %v12109_v57, %v15869_v18 }
 0x344   :  { %v3412_v53 = vadd.f32 %v12163_v48, %v3344_v33  ;;  %v13128_v33 = vpop.f32.mrf.mxu1 }
 0x345   :  { %v3343_v22 = vadd.f32 %v3279_v47, %v2955_v52  ;;  %v8949_v52 = vrot.slane %v8948_v4, 2  ;;  %15867 = vst [vmem:[#allocation101_spill] sm:$0xff] %v13128_v33  ;;  %v13143_v47 = vmax.f32 %v8915_v54, %v8916_v10  ;;  %v10990_v54 = vld [vmem:[%s15472_s7] sm:$0xff]  ;;  %v15874_v33 = vld [vmem:[#allocation18_spill] sm:$0xff] }
 0x346   :  { %v3476_v5 = vmax.f32 %v3412_v53, 0.0  ;;  %v13147_v32 = vpop.f32.mrf.mxu1 }
 0x347   :  { %v3411_v2 = vadd.f32 %v12163_v48, %v3343_v22  ;;  %v2496_v51 = vpop.permute.xlu1 %2495  ;;  %v13133_v22 = vadd.f32 %v12703_v31, %v12726_v28  ;;  %15871 = vst [vmem:[#allocation107_spill] sm:$0xff] %v13147_v32  ;;  %v13155_v38 = vmax.f32 %v8948_v4, %v8949_v52  ;;  %v13173_v52 = vadd.f32 %v12721_v6, %v12726_v28 }
 0x348   :  { %v2569_v10 = vmul.f32 %v12109_v57, %v2496_v51 }
 0x349   :  { %v3475_v34 = vmax.f32 %v3411_v2, 0.0  ;;  %15868 = vst [vmem:[#allocation105_spill] sm:$0xff] %v13133_v22  ;;  %v1616_v4 = vrot.slane %v13133_v22, %v11263_v14  ;;  %v1792_v18 = vrot.slane %v13133_v22, %v15831_v7  ;;  %v13186_v2 = vrot.slane %v10990_v54, %v11498_v29 }
 0x34a   :  { %v1968_v6 = vrot.slane %v13133_v22, %v15804_v21 }
 0x34b   :  { %10167 = vmatprep.mubr.msk.f32.mxu1 %vm354_vm2, %v3475_v34  ;;  %v13153_v34 = vmax.f32 %v8936_v40, %v8937_v50  ;;  %v1528_v40 = vrot.slane %v13133_v22, %v11340_v41  ;;  %v1704_v50 = vrot.slane %v13133_v22, %v11389_v62 }
 0x34c   :  { %v2821_v35 = vpop.permute.xlu1 %2820  ;;  %10168 = vmatmul.mubr.msk.f32.gmra.mxu1 %vm354_vm2, %v3476_v5 }
 0x34d   :  { %15872 = vst [vmem:[#allocation103_spill] sm:$0xff] %v13153_v34  ;;  %v2893_v31 = vmul.f32 %v12112_v56, %v2821_v35  ;;  %v13179_v35 = vpop.f32.mrf.mxu1 }
 0x34e   :  { %15873 = vst [vmem:[#allocation108_spill] sm:$0xff] %v13179_v35  ;;  %v2144_v35 = vrot.slane %v13133_v22, %v15874_v33 }
 0x34f   :  { %v13145_v37 = vpop.f32.mrf.mxu0  ;;  %v2957_v54 = vadd.f32 %v2893_v31, %v2569_v10 }
 0x350   :  { %15870 = vst [vmem:[#allocation75_spill] sm:$0xff] %v13145_v37  ;;  %v2825_v53 = vpop.permute.xlu1 %2824 }
 0x351   :  { %v2894_v5 = vmul.f32 %v12112_v56, %v2825_v53  ;;  %v10008_v43 = vpop.f32.mrf.mxu0  ;;  %v1880_v56 = vrot.slane %v13133_v22, %v11438_v44 }
 0x353   :  { %v2958_v53 = vadd.f32 %v2894_v5, %v2570_v60  ;;  %v10031_v43 = vpop.f32.mrf.mxu0  ;;  %v2056_v60 = vrot.slane %v13133_v22, %v11498_v29  ;;  %v3745_v22 = vadd.f32 %v12992_v11, %v13139_v61 }
 0x355   :  { %v3346_v5 = vadd.f32 %v3282_v16, %v2958_v53  ;;  %v3209_v37 = vpop.permute.xlu1 %3208  ;;  %v1158_v34 = vpop.f32.mrf.mxu0  ;;  %v3750_v53 = vadd.f32 %v12989_v20, %v13139_v61  ;;  %v3755_v20 = vadd.f32 %v13002_v19, %v13139_v61 }
 0x356   :  { %v3281_v32 = vmul.f32 %v12116_v8, %v3209_v37  ;;  %v13200_v24 = vadd.f32 %v1158_v34, %v13186_v2  ;;  %v3760_v8 = vadd.f32 %v12995_v42, %v13139_v61  ;;  %v13218_v16 = vpop.f32.mrf.mxu1 }
 0x357   :  { %15875 = vst [vmem:[#allocation76_spill] sm:$0xff] %v13218_v16  ;;  %v3414_v11 = vadd.f32 %v12163_v48, %v3346_v5 }
 0x358   :  { %v3345_v37 = vadd.f32 %v3281_v32, %v2957_v54  ;;  %v1557_v34 = vsub.f32 %v1528_v40, %v13200_v24  ;;  %v1645_v10 = vsub.f32 %v1616_v4, %v13200_v24  ;;  %v1733_v57 = vsub.f32 %v1704_v50, %v13200_v24 }
 0x359   :  { %v1821_v51 = vsub.f32 %v1792_v18, %v13200_v24  ;;  %v1909_v40 = vsub.f32 %v1880_v56, %v13200_v24  ;;  %v3765_v4 = vadd.f32 %v13010_v45, %v13139_v61  ;;  %v3780_v56 = vadd.f32 %v13014_v27, %v13139_v61 }
 0x35a   :  { %v3413_v31 = vadd.f32 %v12163_v48, %v3345_v37  ;;  %v13224_v28 = vpop.permute.xlu1 %7851  ;;  %v4063_v42 = vadd.f32 %v3745_v22, %v1557_v34  ;;  %v4064_v32 = vadd.f32 %v3750_v53, %v1645_v10  ;;  %v4065_v54 = vadd.f32 %v3755_v20, %v1733_v57  ;;  %v13237_v53 = vpop.f32.mrf.mxu1 }
 0x35b   :  { %15876 = vst [vmem:[#allocation112_spill] sm:$0xff] %v13224_v28  ;;  %v7929_v19 = vmul.f32 %v13224_v28, %v12128_v26  ;;  %v4066_v48 = vadd.f32 %v3760_v8, %v1821_v51  ;;  %v3770_v22 = vadd.f32 %v13006_v23, %v13139_v61  ;;  %v3478_v45 = vmax.f32 %v3414_v11, 0.0 }
 0x35c   :  { %v3477_v5 = vmax.f32 %v3413_v31, 0.0  ;;  %v4127_v18 = vmul.f32 0.25, %v4063_v42  ;;  %v4128_v16 = vmul.f32 0.25, %v4064_v32  ;;  %v3775_v57 = vadd.f32 %v13020_v63, %v13139_v61  ;;  %v13264_v32 = vpop.f32.mrf.mxu1 }
 0x35d   :  { %v7941_v37 = vmul.f32 %v13051_v59, %v7929_v19  ;;  %v13243_v34 = vadd.f32 %v10031_v43, %v13186_v2  ;;  %v4129_v23 = vmul.f32 0.25, %v4065_v54  ;;  %v4067_v51 = vadd.f32 %v3765_v4, %v1909_v40 }
 0x35e   :  { %v13245_v31 = vpop.permute.xlu1 %7856  ;;  %10170 = vmatprep.mubr.msk.f32.mxu1 %vm354_vm2, %v3477_v5  ;;  %10177 = vmatprep.mubr.msk.f32.mxu0 %vm354_vm2, %v4127_v18  ;;  %v1997_v63 = vsub.f32 %v1968_v6, %v13200_v24  ;;  %v3790_v10 = vadd.f32 %v13028_v13, %v13139_v61  ;;  %v3785_v20 = vadd.f32 %v13031_v46, %v13139_v61  ;;  %v4130_v11 = vmul.f32 0.25, %v4066_v48  ;;  %v10991_v13 = vld [vmem:[%s15471_s6 + $0x28] sm:$0xff]  ;;  %v13283_v48 = vpop.f32.mrf.mxu0 }
 0x35f   :  { %15877 = vst [vmem:[#allocation114_spill] sm:$0xff] %v13245_v31  ;;  %v13250_v27 = vadd.f32 %v13062_v30, %v7941_v37  ;;  %v7930_v8 = vmul.f32 %v13245_v31, %v12141_v36  ;;  %10171 = vmatmul.mubr.msk.f32.gmra.mxu1 %vm354_vm2, %v3478_v45  ;;  %10178 = vmatmul.mubr.msk.f32.vlgmr.msra.gmra.mxu0 %vm354_vm2, %v4128_v16 }
 0x360   :  { %10180 = vmatprep.mubr.msk.f32.mxu0 %vm354_vm2, %v4129_v23  ;;  %v2085_v42 = vsub.f32 %v2056_v60, %v13200_v24  ;;  %v4068_v6 = vadd.f32 %v3770_v22, %v1997_v63  ;;  %v2173_v4 = vsub.f32 %v2144_v35, %v13200_v24  ;;  %10374 = vmatpush3.msra.mxu0 %v10991_v13  ;;  %v4131_v60 = vmul.f32 0.25, %v4067_v51  ;;  %v10992_v63 = vld [vmem:[%s15471_s6 + $0x20] sm:$0xff]  ;;  %v1168_v43 = vpop.f32.mrf.mxu0 }
 0x361   :  { %15878 = vst [vmem:[#allocation110_spill] sm:$0xff] %v13250_v27  ;;  %v15568_v40 = vmax.f32 %v13250_v27, 0.0  ;;  %v7942_v16 = vmul.f32 %v13051_v59, %v7930_v8  ;;  %v3800_v46 = vadd.f32 %v13037_v12, %v13139_v61  ;;  %v15880_v5 = vrot.slane %v13126_v17, %v11340_v41  ;;  %10375 = vmatprep.subr.mxu0 %v15656_v3 }
 0x362   :  { %v13274_v19 = vpop.permute.xlu1 %7866  ;;  %v4069_v54 = vadd.f32 %v3775_v57, %v2085_v42  ;;  %v3795_v35 = vadd.f32 %v13046_v9, %v13139_v61  ;;  %v13296_v37 = vadd.f32 %v13058_v39, %v13139_v61  ;;  %v15882_v9 = vrot.slane %v13126_v17, %v11263_v14  ;;  %10376 = vmatpush3.msra.mxu0 %v10992_v63  ;;  %v13310_v39 = vpop.f32.mrf.mxu1 }
 0x363   :  { %15879 = vst [vmem:[#allocation116_spill] sm:$0xff] %v13274_v19  ;;  %v1558_v18 = vsub.f32 %v15880_v5, %v13243_v34  ;;  %v8897_v12 = vsel %vm354_vm2, %v15568_v40, -inf  ;;  %v13289_v22 = vadd.f32 %v13062_v30, %v7942_v16  ;;  %v7932_v45 = vmul.f32 %v13274_v19, %v12174_v58  ;;  %10181 = vmatmul.mubr.msk.f32.gmra.mxu0 %vm354_vm2, %v4130_v11 }
 0x364   :  { %v8898_v57 = vrot.slane %v8897_v12, 4  ;;  %10183 = vmatprep.mubr.msk.f32.mxu0 %vm354_vm2, %v4131_v60  ;;  %v1646_v23 = vsub.f32 %v15882_v9, %v13243_v34  ;;  %v15883_v51 = vrot.slane %v13126_v17, %v11389_v62  ;;  %v4132_v16 = vmul.f32 0.25, %v4068_v6  ;;  %10380 = vmatprep.subr.mxu0 %v12937_v1 }
 0x365   :  { %15881 = vst [vmem:[#allocation77_spill] sm:$0xff] %v13289_v22  ;;  %v15569_v11 = vmax.f32 %v13289_v22, 0.0  ;;  %v7944_v42 = vmul.f32 %v13051_v59, %v7932_v45  ;;  %v4070_v13 = vadd.f32 %v3780_v56, %v2173_v4  ;;  %v3805_v60 = vadd.f32 %v13070_v0, %v13139_v61 }
 0x366   :  { %v1734_v8 = vsub.f32 %v15883_v51, %v13243_v34  ;;  %v8899_v5 = vmax.f32 %v8897_v12, %v8898_v57  ;;  %v13317_v9 = vpop.permute.xlu1 %7871  ;;  %v4133_v51 = vmul.f32 0.25, %v4069_v54  ;;  %v4071_v40 = vadd.f32 %v3785_v20, %v1558_v18  ;;  %v13337_v18 = vpop.f32.mrf.mxu1 }
 0x367   :  { %15884 = vst [vmem:[#allocation121_spill] sm:$0xff] %v13317_v9  ;;  %v13321_v63 = vadd.f32 %v13082_v25, %v13139_v61  ;;  %v8904_v6 = vsel %vm354_vm2, %v15569_v11, -inf  ;;  %v13327_v56 = vadd.f32 %v13062_v30, %v7944_v42  ;;  %v7933_v1 = vmul.f32 %v13317_v9, %v12183_v55  ;;  %10184 = vmatmul.mubr.msk.f32.gmra.mxu0 %vm354_vm2, %v4132_v16 }
 0x368   :  { %v8900_v0 = vrot.slane %v8899_v5, 2  ;;  %v8905_v4 = vrot.slane %v8904_v6, 4  ;;  %10186 = vmatprep.mubr.msk.f32.mxu0 %vm354_vm2, %v4133_v51  ;;  %v4072_v20 = vadd.f32 %v3790_v10, %v1646_v23  ;;  %v15886_v25 = vrot.slane %v13126_v17, %v15831_v7 }
 0x369   :  { %15885 = vst [vmem:[#allocation119_spill] sm:$0xff] %v13327_v56  ;;  %v15571_v12 = vmax.f32 %v13327_v56, 0.0  ;;  %v7945_v45 = vmul.f32 %v13051_v59, %v7933_v1  ;;  %v4134_v57 = vmul.f32 0.25, %v4070_v13  ;;  %v4073_v42 = vadd.f32 %v3795_v35, %v1734_v8  ;;  %v15890_v35 = vld [vmem:[#allocation63_spill] sm:$0xff] }
 0x36a   :  { %v1822_v54 = vsub.f32 %v15886_v25, %v13243_v34  ;;  %v13342_v16 = vadd.f32 %v1168_v43, %v13186_v2  ;;  %v8906_v11 = vmax.f32 %v8904_v6, %v8905_v4  ;;  %v13344_v50 = vpop.permute.xlu1 %7881  ;;  %v4135_v10 = vmul.f32 0.25, %v4071_v40  ;;  %v13360_v4 = vpop.f32.mrf.mxu1 }
 0x36b   :  { %15887 = vst [vmem:[#allocation24_spill] sm:$0xff] %v13344_v50  ;;  %v15888_v23 = vrot.slane %v13126_v17, %v11438_v44  ;;  %v8901_v25 = vmax.f32 %v8899_v5, %v8900_v0  ;;  %v8918_v9 = vsel %vm354_vm2, %v15571_v12, -inf  ;;  %v13354_v13 = vadd.f32 %v13062_v30, %v7945_v45  ;;  %10187 = vmatmul.mubr.msk.f32.gmra.mxu0 %vm354_vm2, %v4134_v57 }
 0x36c   :  { %v7935_v43 = vmul.f32 %v13344_v50, %v15890_v35  ;;  %v8907_v8 = vrot.slane %v8906_v11, 2  ;;  %v8919_v40 = vrot.slane %v8918_v9, 4  ;;  %10189 = vmatprep.mubr.msk.f32.mxu0 %vm354_vm2, %v4135_v10  ;;  %v4136_v6 = vmul.f32 0.25, %v4072_v20 }
 0x36d   :  { %v1910_v51 = vsub.f32 %v15888_v23, %v13243_v34  ;;  %15889 = vst [vmem:[#allocation117_spill] sm:$0xff] %v13354_v13  ;;  %v4074_v1 = vadd.f32 %v3800_v46, %v1822_v54  ;;  %v4137_v23 = vmul.f32 0.25, %v4073_v42  ;;  %v15891_v45 = vrot.slane %v13126_v17, %v15804_v21  ;;  %v15893_v54 = vld [vmem:[#allocation98_spill] sm:$0xff] }
 0x36e   :  { %v7947_v0 = vmul.f32 %v13051_v59, %v7935_v43  ;;  %v8908_v50 = vmax.f32 %v8906_v11, %v8907_v8  ;;  %v8920_v57 = vmax.f32 %v8918_v9, %v8919_v40  ;;  %v15892_v20 = vrot.slane %v13126_v17, %v11498_v29  ;;  %v13386_v40 = vpop.f32.mrf.mxu1 }
 0x36f   :  { %v1998_v12 = vsub.f32 %v15891_v45, %v13243_v34  ;;  %v4075_v19 = vadd.f32 %v3805_v60, %v1910_v51  ;;  %v3815_v10 = vadd.f32 %v15893_v54, %v13139_v61  ;;  %v8902_v5 = vrot.slane %v8901_v25, 1  ;;  %10190 = vmatmul.mubr.msk.f32.gmra.mxu0 %vm354_vm2, %v4136_v6 }
 0x370   :  { %v2086_v46 = vsub.f32 %v15892_v20, %v13243_v34  ;;  %v15894_v59 = vmax.f32 %v13354_v13, 0.0  ;;  %v13378_v43 = vadd.f32 %v13062_v30, %v7947_v0  ;;  %v8909_v11 = vrot.slane %v8908_v50, 1  ;;  %10192 = vmatprep.mubr.msk.f32.mxu0 %vm354_vm2, %v4137_v23 }
 0x371   :  { %v8921_v60 = vrot.slane %v8920_v57, 2  ;;  %v15896_v51 = vrot.slane %v13126_v17, %v15874_v33  ;;  %v4138_v20 = vmul.f32 0.25, %v4074_v1  ;;  %v4076_v30 = vadd.f32 %v13296_v37, %v1998_v12 }
 0x372   :  { %v8925_v42 = vsel %vm354_vm2, %v15894_v59, -inf  ;;  %15895 = vst [vmem:[#allocation78_spill] sm:$0xff] %v13378_v43  ;;  %v15578_v45 = vmax.f32 %v13378_v43, 0.0  ;;  %v15897_v6 = vrot.slane %v13173_v52, %v11340_v41  ;;  %v4139_v23 = vmul.f32 0.25, %v4075_v19 }
 0x373   :  { %v8926_v9 = vrot.slane %v8925_v42, 4  ;;  %v2174_v8 = vsub.f32 %v15896_v51, %v13243_v34  ;;  %v8922_v54 = vmax.f32 %v8920_v57, %v8921_v60  ;;  %v4077_v28 = vadd.f32 %v3815_v10, %v2086_v46  ;;  %v13396_v51 = vpop.f32.mrf.mxu1  ;;  %10193 = vmatmul.mubr.msk.f32.gmra.mxu0 %vm354_vm2, %v4138_v20 }
 0x374   :  { %v1559_v0 = vsub.f32 %v15897_v6, %v13342_v16  ;;  %v3825_v31 = vadd.f32 %v13110_v15, %v13139_v61  ;;  %v8903_v13 = vmax.f32 %v8901_v25, %v8902_v5  ;;  %v8910_v56 = vmax.f32 %v8908_v50, %v8909_v11  ;;  %10195 = vmatprep.mubr.msk.f32.mxu0 %vm354_vm2, %v4139_v23 }
 0x375   :  { %v8927_v59 = vmax.f32 %v8925_v42, %v8926_v9  ;;  %v8939_v37 = vsel %vm354_vm2, %v15578_v45, -inf  ;;  %v8923_v12 = vrot.slane %v8922_v54, 1  ;;  %v4078_v19 = vadd.f32 %v13321_v63, %v2174_v8  ;;  %v15900_v63 = vld [vmem:[#allocation99_spill] sm:$0xff]  ;;  %v13418_v8 = vpop.f32.mrf.mxu1 }
 0x376   :  { %v8940_v6 = vrot.slane %v8939_v37, 4  ;;  %v4140_v57 = vmul.f32 0.25, %v4076_v30  ;;  %v4079_v46 = vadd.f32 %v3825_v31, %v1559_v0  ;;  %v15898_v15 = vrot.slane %v13173_v52, %v11263_v14 }
 0x377   :  { %v8928_v1 = vrot.slane %v8927_v59, 2  ;;  %v15899_v25 = vrot.slane %v13173_v52, %v11389_v62  ;;  %v4141_v11 = vmul.f32 0.25, %v4077_v28  ;;  %v1800_v60 = vrot.slane %v13173_v52, %v15831_v7 }
 0x378   :  { %v1647_v50 = vsub.f32 %v15898_v15, %v13342_v16  ;;  %v8941_v42 = vmax.f32 %v8939_v37, %v8940_v6  ;;  %v3830_v9 = vadd.f32 %v15900_v63, %v13139_v61  ;;  %v3835_v31 = vadd.f32 %v13121_v49, %v13139_v61  ;;  %10196 = vmatmul.mubr.msk.f32.gmra.mxu0 %vm354_vm2, %v4140_v57  ;;  %v13425_v37 = vpop.f32.mrf.mxu1  ;;  %v15901_v57 = vld [vmem:[#allocation68_spill] sm:$0xff] }
 0x379   :  { %v1735_v5 = vsub.f32 %v15899_v25, %v13342_v16  ;;  %v8929_v10 = vmax.f32 %v8927_v59, %v8928_v1  ;;  %v8924_v20 = vmax.f32 %v8922_v54, %v8923_v12  ;;  %v9013_v30 = vsel %vm6944_vm3, %v8910_v56, %v8903_v13  ;;  %10198 = vmatprep.mubr.msk.f32.mxu0 %vm354_vm2, %v4141_v11  ;;  %v15902_v25 = vld [vmem:[#allocation66_spill] sm:$0xff]  ;;  %v15903_v11 = vld [vmem:[#allocation96_spill] sm:$0xff] }
 0x37a   :  { %v8942_v59 = vrot.slane %v8941_v42, 2  ;;  %v4142_v28 = vmul.f32 0.25, %v4078_v19  ;;  %v1888_v23 = vrot.slane %v13173_v52, %v11438_v44  ;;  %v4143_v1 = vmul.f32 0.25, %v4079_v46 }
 0x37b   :  { %v8930_v0 = vrot.slane %v8929_v10, 1  ;;  %v4080_v6 = vadd.f32 %v3830_v9, %v1647_v50  ;;  %v4081_v49 = vadd.f32 %v3835_v31, %v1735_v5  ;;  %v1823_v15 = vsub.f32 %v1800_v60, %v13342_v16  ;;  %v15904_v5 = vld [vmem:[#allocation107_spill] sm:$0xff]  ;;  %v13447_v9 = vpop.f32.mrf.mxu1 }
 0x37c   :  { %v8943_v12 = vmax.f32 %v8941_v42, %v8942_v59  ;;  %v9014_v56 = vsel %vm6946_vm4, %v13143_v47, %v9013_v30  ;;  %v1911_v13 = vsub.f32 %v1888_v23, %v13342_v16  ;;  %v13433_v19 = vadd.f32 %v15902_v25, %v15901_v57  ;;  %10199 = vmatmul.mubr.msk.f32.gmra.mxu0 %vm354_vm2, %v4142_v28 }
 0x37d   :  { %v8931_v54 = vmax.f32 %v8929_v10, %v8930_v0  ;;  %v3840_v63 = vadd.f32 %v15903_v11, %v13139_v61  ;;  %v9015_v46 = vsel %vm6948_vm5, %v8924_v20, %v9014_v56  ;;  %v1976_v50 = vrot.slane %v13173_v52, %v15804_v21  ;;  %10201 = vmatprep.mubr.msk.f32.mxu0 %vm354_vm2, %v4143_v1  ;;  %v13457_v25 = vpop.f32.mrf.mxu1 }
 0x37e   :  { %v3845_v10 = vadd.f32 %v15904_v5, %v13139_v61  ;;  %v8944_v47 = vrot.slane %v8943_v12, 1  ;;  %v2064_v60 = vrot.slane %v13173_v52, %v11498_v29  ;;  %v13451_v31 = vadd.f32 %v13283_v48, %v13186_v2 }
 0x37f   :  { %v9016_v42 = vsel %vm6950_vm6, %v8931_v54, %v9015_v46  ;;  %v4144_v20 = vmul.f32 0.25, %v4080_v6  ;;  %v4082_v30 = vadd.f32 %v3840_v63, %v1823_v15  ;;  %v1999_v0 = vsub.f32 %v1976_v50, %v13342_v16  ;;  %v15905_v54 = vld [vmem:[#allocation101_spill] sm:$0xff]  ;;  %v15907_v6 = vld [vmem:[#allocation103_spill] sm:$0xff] }
 0x380   :  { %v4145_v59 = vmul.f32 0.25, %v4081_v49  ;;  %v8945_v28 = vmax.f32 %v8943_v12, %v8944_v47  ;;  %v4083_v23 = vadd.f32 %v3845_v10, %v1911_v13  ;;  %v2087_v1 = vsub.f32 %v2064_v60, %v13342_v16  ;;  %v15908_v12 = vld [vmem:[#allocation76_spill] sm:$0xff] }
 0x381   :  { %v3850_v56 = vadd.f32 %v15905_v54, %v13139_v61  ;;  %10202 = vmatmul.mubr.msk.f32.gmra.mxu0 %vm354_vm2, %v4144_v20  ;;  %v15906_v11 = vrot.slane %v13155_v38, 1  ;;  %v9017_v15 = vsel %vm6952_vm7, %v15907_v6, %v9016_v42  ;;  %v2152_v49 = vrot.slane %v13173_v52, %v15874_v33  ;;  %v15909_v20 = vld [vmem:[#allocation108_spill] sm:$0xff]  ;;  %v13478_v54 = vpop.f32.mrf.mxu1 }
 0x382   :  { %v3855_v13 = vadd.f32 %v15908_v12, %v13139_v61  ;;  %10204 = vmatprep.mubr.msk.f32.mxu0 %vm354_vm2, %v4145_v59  ;;  %v9018_v63 = vsel %vm6954_vm8, %v8945_v28, %v9017_v15  ;;  %v1540_v46 = vrot.slane %v13433_v19, %v11340_v41  ;;  %v4146_v5 = vmul.f32 0.25, %v4082_v30  ;;  %v13494_v12 = vpop.f32.mrf.mxu0 }
 0x383   :  { %v8952_v48 = vmax.f32 %v13155_v38, %v15906_v11  ;;  %v4084_v38 = vadd.f32 %v3850_v56, %v1999_v0  ;;  %v2175_v10 = vsub.f32 %v2152_v49, %v13342_v16  ;;  %v4147_v47 = vmul.f32 0.25, %v4083_v23  ;;  %v13488_v23 = vpop.f32.mrf.mxu1 }
 0x384   :  { %v4085_v42 = vadd.f32 %v3855_v13, %v2087_v1  ;;  %v1560_v60 = vsub.f32 %v1540_v46, %v13451_v31  ;;  %v3860_v59 = vadd.f32 %v15909_v20, %v13139_v61  ;;  %v1628_v28 = vrot.slane %v13433_v19, %v11263_v14 }
 0x385   :  { %v9019_v50 = vsel %vm6956_vm9, %v8952_v48, %v9018_v63  ;;  %10205 = vmatmul.mubr.msk.f32.gmra.mxu0 %vm354_vm2, %v4146_v5  ;;  %v3865_v30 = vadd.f32 %v13264_v32, %v13139_v61  ;;  %v1716_v0 = vrot.slane %v13433_v19, %v11389_v62  ;;  %v4148_v1 = vmul.f32 0.25, %v4084_v38  ;;  %v13504_v46 = vpop.f32.mrf.mxu1 }
 0x386   :  { %9020 = vrot.lane.b32.xlu1 %v9019_v50, %s11123_s23  ;;  %10207 = vmatprep.mubr.msk.f32.mxu0 %vm354_vm2, %v4147_v47  ;;  %v4086_v56 = vadd.f32 %v3860_v59, %v2175_v10  ;;  %v1648_v11 = vsub.f32 %v1628_v28, %v13451_v31  ;;  %v4149_v48 = vmul.f32 0.25, %v4085_v42  ;;  %v3870_v49 = vadd.f32 %v13237_v53, %v13139_v61  ;;  %v15910_v59 = vld [vmem:[#allocation67_spill] sm:$0xff] }
 0x387   :  { %v4087_v6 = vadd.f32 %v3865_v30, %v1560_v60  ;;  %v1736_v15 = vsub.f32 %v1716_v0, %v13451_v31  ;;  %v1804_v32 = vrot.slane %v13433_v19, %v15831_v7  ;;  %v3875_v13 = vadd.f32 %v13337_v18, %v13139_v61  ;;  %v13510_v60 = vpop.f32.mrf.mxu1  ;;  %v1178_v18 = vpop.f32.mrf.mxu0 }
 0x388   :  { %v1892_v63 = vrot.slane %v13433_v19, %v11438_v44  ;;  %v4150_v50 = vmul.f32 0.25, %v4086_v56  ;;  %v4088_v5 = vadd.f32 %v3870_v49, %v1648_v11  ;;  %v3880_v42 = vadd.f32 %v13310_v39, %v13139_v61 }
 0x389   :  { %10208 = vmatmul.mubr.msk.f32.gmra.mxu0 %vm354_vm2, %v4148_v1  ;;  %v1824_v53 = vsub.f32 %v1804_v32, %v13451_v31  ;;  %v4151_v38 = vmul.f32 0.25, %v4087_v6  ;;  %v4089_v10 = vadd.f32 %v3875_v13, %v1736_v15  ;;  %v1980_v20 = vrot.slane %v13433_v19, %v15804_v21 }
 0x38a   :  { %10210 = vmatprep.mubr.msk.f32.mxu0 %vm354_vm2, %v4149_v48  ;;  %v1912_v47 = vsub.f32 %v1892_v63, %v13451_v31  ;;  %v13517_v28 = vadd.f32 %v15910_v59, %v15901_v57  ;;  %v3885_v30 = vadd.f32 %v13386_v40, %v13139_v61  ;;  %v2068_v39 = vrot.slane %v13433_v19, %v11498_v29  ;;  %v3934_v40 = vpop.f32.mrf.mxu1 }
 0x38b   :  { %v4152_v0 = vmul.f32 0.25, %v4088_v5  ;;  %v4090_v1 = vadd.f32 %v3880_v42, %v1824_v53  ;;  %v2000_v56 = vsub.f32 %v1980_v20, %v13451_v31  ;;  %v13526_v11 = vadd.f32 %v1178_v18, %v13186_v2 }
 0x38c   :  { %v4153_v48 = vmul.f32 0.25, %v4089_v10  ;;  %v4091_v6 = vadd.f32 %v3885_v30, %v1912_v47  ;;  %v2088_v15 = vsub.f32 %v2068_v39, %v13451_v31  ;;  %v3890_v49 = vadd.f32 %v13360_v4, %v13139_v61 }
 0x38d   :  { %10211 = vmatmul.mubr.msk.f32.gmra.mxu0 %vm354_vm2, %v4150_v50  ;;  %v2156_v32 = vrot.slane %v13433_v19, %v15874_v33  ;;  %v3895_v13 = vadd.f32 %v13418_v8, %v13139_v61  ;;  %v1544_v63 = vrot.slane %v13517_v28, %v11340_v41  ;;  %v13539_v50 = vpop.f32.mrf.mxu1  ;;  %v4154_v5 = vmul.f32 0.25, %v4090_v1 }
 0x38e   :  { %10213 = vmatprep.mubr.msk.f32.mxu0 %vm354_vm2, %v4151_v38  ;;  %v4092_v53 = vadd.f32 %v3890_v49, %v2000_v56  ;;  %v4155_v38 = vmul.f32 0.25, %v4091_v6  ;;  %v3900_v42 = vadd.f32 %v13396_v51, %v13139_v61  ;;  %v1632_v8 = vrot.slane %v13517_v28, %v11263_v14 }
 0x38f   :  { %v2176_v4 = vsub.f32 %v2156_v32, %v13451_v31  ;;  %v4093_v10 = vadd.f32 %v3895_v13, %v2088_v15  ;;  %v1561_v47 = vsub.f32 %v1544_v63, %v13526_v11  ;;  %v3905_v18 = vadd.f32 %v13447_v9, %v13139_v61  ;;  %v3944_v59 = vpop.f32.mrf.mxu1 }
 0x390   :  { %v1720_v20 = vrot.slane %v13517_v28, %v11389_v62  ;;  %v4156_v30 = vmul.f32 0.25, %v4092_v53  ;;  %v1808_v9 = vrot.slane %v13517_v28, %v15831_v7  ;;  %v3915_v15 = vadd.f32 %v13478_v54, %v13139_v61 }
 0x391   :  { %10214 = vmatmul.mubr.msk.f32.gmra.mxu0 %vm354_vm2, %v4152_v0  ;;  %v4094_v39 = vadd.f32 %v3900_v42, %v2176_v4  ;;  %v1649_v0 = vsub.f32 %v1632_v8, %v13526_v11  ;;  %v4157_v1 = vmul.f32 0.25, %v4093_v10  ;;  %v4095_v51 = vadd.f32 %v3905_v18, %v1561_v47  ;;  %v13557_v6 = vpop.f32.mrf.mxu1 }
 0x392   :  { %10216 = vmatprep.mubr.msk.f32.mxu0 %vm354_vm2, %v4153_v48  ;;  %v1737_v56 = vsub.f32 %v1720_v20, %v13526_v11  ;;  %v3910_v48 = vadd.f32 %v13425_v37, %v13139_v61  ;;  %v1896_v49 = vrot.slane %v13517_v28, %v11438_v44  ;;  %v1825_v63 = vsub.f32 %v1808_v9, %v13526_v11 }
 0x393   :  { %v4158_v32 = vmul.f32 0.25, %v4094_v39  ;;  %v4159_v37 = vmul.f32 0.25, %v4095_v51  ;;  %v3920_v4 = vadd.f32 %v13457_v25, %v13139_v61  ;;  %v1984_v54 = vrot.slane %v13517_v28, %v15804_v21 }
 0x394   :  { %v4096_v13 = vadd.f32 %v3910_v48, %v1649_v0  ;;  %v1913_v53 = vsub.f32 %v1896_v49, %v13526_v11  ;;  %v3925_v10 = vadd.f32 %v13504_v46, %v13139_v61  ;;  %v2072_v47 = vrot.slane %v13517_v28, %v11498_v29 }
 0x395   :  { %10217 = vmatmul.mubr.msk.f32.gmra.mxu0 %vm354_vm2, %v4154_v5  ;;  %v4097_v5 = vadd.f32 %v3915_v15, %v1737_v56  ;;  %v4098_v18 = vadd.f32 %v3920_v4, %v1825_v63  ;;  %v2001_v25 = vsub.f32 %v1984_v54, %v13526_v11  ;;  %v13584_v20 = vadd.f32 %v13494_v12, %v13186_v2  ;;  %v15911_v56 = vld [vmem:[#allocation70_spill] sm:$0xff] }
 0x396   :  { %10219 = vmatprep.mubr.msk.f32.mxu0 %vm354_vm2, %v4155_v38  ;;  %v3954_v38 = vpop.f32.mrf.mxu1  ;;  %v4160_v8 = vmul.f32 0.25, %v4096_v13  ;;  %v4099_v39 = vadd.f32 %v3925_v10, %v1913_v53  ;;  %v2089_v0 = vsub.f32 %v2072_v47, %v13526_v11  ;;  %v3930_v46 = vadd.f32 %v13488_v23, %v13139_v61 }
 0x397   :  { %v3935_v51 = vadd.f32 %v3934_v40, %v13139_v61  ;;  %v1548_v12 = vrot.slane %v15911_v56, %v11340_v41  ;;  %v4162_v9 = vmul.f32 0.25, %v4098_v18  ;;  %v3940_v63 = vadd.f32 %v13510_v60, %v13139_v61  ;;  %v13612_v18 = vld [vmem:[%s15471_s6 + $0x48] sm:$0xff] }
 0x398   :  { %v13579_v42 = vpop.f32.mrf.mxu1  ;;  %v4100_v15 = vadd.f32 %v3930_v46, %v2001_v25  ;;  %v1636_v40 = vrot.slane %v15911_v56, %v11263_v14  ;;  %v1724_v10 = vrot.slane %v15911_v56, %v11389_v62  ;;  %v3955_v47 = vadd.f32 %v3954_v38, %v13139_v61  ;;  %10273 = vmatprep.subr.mxu1 %v13612_v18  ;;  %v13624_v38 = vld [vmem:[%s15471_s6 + $0x40] sm:$0xff] }
 0x399   :  { %10220 = vmatmul.mubr.msk.f32.gmra.mxu0 %vm354_vm2, %v4156_v30  ;;  %v4161_v30 = vmul.f32 0.25, %v4097_v5  ;;  %v4101_v13 = vadd.f32 %v3935_v51, %v2089_v0  ;;  %v1562_v23 = vsub.f32 %v1548_v12, %v13584_v20  ;;  %v3945_v5 = vadd.f32 %v3944_v59, %v13139_v61  ;;  %10274 = vmatpush3.msra.mxu1 %v13612_v18 }
 0x39a   :  { %10222 = vmatprep.mubr.msk.f32.mxu0 %vm354_vm2, %v4157_v1  ;;  %v2160_v1 = vrot.slane %v13517_v28, %v15874_v33  ;;  %v3964_v48 = vpop.f32.mrf.mxu1  ;;  %v4164_v53 = vmul.f32 0.25, %v4100_v15  ;;  %v1650_v54 = vsub.f32 %v1636_v40, %v13584_v20  ;;  %v3950_v59 = vadd.f32 %v13539_v50, %v13139_v61  ;;  %10275 = vmatprep.subr.mxu1 %v13624_v38 }
 0x39b   :  { %v4165_v60 = vmul.f32 0.25, %v4101_v13  ;;  %v1812_v50 = vrot.slane %v15911_v56, %v15831_v7  ;;  %v3960_v0 = vadd.f32 %v13557_v6, %v13139_v61  ;;  %v3965_v15 = vadd.f32 %v3964_v48, %v13139_v61  ;;  %10276 = vmatpush3.msra.mxu1 %v13624_v38 }
 0x39c   :  { %v2177_v49 = vsub.f32 %v2160_v1, %v13526_v11  ;;  %v4104_v51 = vadd.f32 %v3950_v59, %v1650_v54  ;;  %v1988_v6 = vrot.slane %v15911_v56, %v15804_v21 }
 0x39d   :  { %10223 = vmatmul.mubr.msk.f32.gmra.mxu0 %vm354_vm2, %v4158_v32  ;;  %v4163_v32 = vmul.f32 0.25, %v4099_v39  ;;  %v13626_v39 = vpop.f32.mrf.mxu0 }
 0x39e   :  { %10225 = vmatprep.mubr.msk.f32.mxu0 %vm354_vm2, %v4159_v37  ;;  %v10148_v37 = vpop.f32.mrf.mxu1  ;;  %v4102_v4 = vadd.f32 %v3940_v63, %v2177_v49 }
 0x39f   :  { %v1188_v40 = vpop.f32.mrf.mxu0 }
 0x3a0   :  { %v3974_v25 = vpop.f32.mrf.mxu1  ;;  %v4166_v1 = vmul.f32 0.25, %v4102_v4  ;;  %v4168_v4 = vmul.f32 0.25, %v4104_v51 }
 0x3a1   :  { %10226 = vmatmul.mubr.msk.f32.gmra.mxu0 %vm354_vm2, %v4160_v8  ;;  %v4103_v8 = vadd.f32 %v3945_v5, %v1562_v23  ;;  %v15912_v23 = vld [vmem:[#allocation81_spill] sm:$0xff]  ;;  %v3970_v5 = vadd.f32 %v13579_v42, %v13139_v61 }
 0x3a2   :  { %10228 = vmatprep.mubr.msk.f32.mxu0 %vm354_vm2, %v4161_v30  ;;  %v1738_v30 = vsub.f32 %v1724_v10, %v13584_v20  ;;  %v10151_v46 = vpop.f32.mrf.mxu1  ;;  %v13645_v63 = vadd.f32 %v15912_v23, %v15901_v57  ;;  %v13655_v57 = vadd.f32 %v1188_v40, %v13186_v2 }
 0x3a3   :  { %v4167_v49 = vmul.f32 0.25, %v4103_v8  ;;  %v2002_v8 = vsub.f32 %v1988_v6, %v13584_v20  ;;  %v3990_v23 = vadd.f32 %v10151_v46, %v13139_v61 }
 0x3a4   :  { %v4105_v12 = vadd.f32 %v3955_v47, %v1738_v30  ;;  %v2076_v47 = vrot.slane %v15911_v56, %v11498_v29  ;;  %v1816_v46 = vrot.slane %v13645_v63, %v15831_v7 }
 0x3a5   :  { %10229 = vmatmul.mubr.msk.f32.gmra.mxu0 %vm354_vm2, %v4162_v9  ;;  %v1900_v9 = vrot.slane %v15911_v56, %v11438_v44 }
 0x3a6   :  { %10231 = vmatprep.mubr.msk.f32.mxu0 %vm354_vm2, %v4163_v32  ;;  %v1826_v32 = vsub.f32 %v1812_v50, %v13584_v20  ;;  %v4169_v54 = vmul.f32 0.25, %v4105_v12  ;;  %v2090_v30 = vsub.f32 %v2076_v47, %v13584_v20  ;;  %v4108_v50 = vadd.f32 %v3970_v5, %v2002_v8 }
 0x3a7   :  { %v1914_v13 = vsub.f32 %v1900_v9, %v13584_v20  ;;  %v1552_v12 = vrot.slane %v13645_v63, %v11340_v41  ;;  %v1728_v5 = vrot.slane %v13645_v63, %v11389_v62 }
 0x3a8   :  { %v4106_v48 = vadd.f32 %v3960_v0, %v1826_v32  ;;  %v2164_v0 = vrot.slane %v15911_v56, %v15874_v33  ;;  %v4172_v6 = vmul.f32 0.25, %v4108_v50 }
 0x3a9   :  { %10232 = vmatmul.mubr.msk.f32.gmra.mxu0 %vm354_vm2, %v4164_v53  ;;  %v3984_v53 = vpop.f32.mrf.mxu1  ;;  %v4107_v10 = vadd.f32 %v3965_v15, %v1914_v13  ;;  %v1563_v32 = vsub.f32 %v1552_v12, %v13655_v57 }
 0x3aa   :  { %10234 = vmatprep.mubr.msk.f32.mxu0 %vm354_vm2, %v4165_v60  ;;  %v3975_v60 = vadd.f32 %v3974_v25, %v13139_v61  ;;  %v4170_v42 = vmul.f32 0.25, %v4106_v48  ;;  %v3985_v9 = vadd.f32 %v3984_v53, %v13139_v61  ;;  %v2178_v15 = vsub.f32 %v2164_v0, %v13584_v20 }
 0x3ab   :  { %v4171_v25 = vmul.f32 0.25, %v4107_v10 }
 0x3ac   :  { %v4109_v51 = vadd.f32 %v3975_v60, %v2090_v30  ;;  %v4111_v48 = vadd.f32 %v3985_v9, %v1563_v32  ;;  %v1904_v9 = vrot.slane %v13645_v63, %v11438_v44 }
 0x3ad   :  { %10235 = vmatmul.mubr.msk.f32.gmra.mxu0 %vm354_vm2, %v4166_v1  ;;  %v10154_v59 = vpop.f32.mrf.mxu1  ;;  %v3980_v1 = vadd.f32 %v10148_v37, %v13139_v61  ;;  %v1640_v37 = vrot.slane %v13645_v63, %v11263_v14 }
 0x3ae   :  { %10237 = vmatprep.mubr.msk.f32.mxu0 %vm354_vm2, %v4167_v49  ;;  %v4173_v40 = vmul.f32 0.25, %v4109_v51  ;;  %v4000_v60 = vadd.f32 %v10154_v59, %v13139_v61  ;;  %v4175_v8 = vmul.f32 0.25, %v4111_v48  ;;  %v1915_v32 = vsub.f32 %v1904_v9, %v13655_v57 }
 0x3af   :  { %v3994_v49 = vpop.f32.mrf.mxu1  ;;  %v4110_v13 = vadd.f32 %v3980_v1, %v2178_v15  ;;  %v2168_v48 = vrot.slane %v13645_v63, %v15874_v33 }
 0x3b0   :  { %v3995_v53 = vadd.f32 %v3994_v49, %v13139_v61 }
 0x3b1   :  { %10238 = vmatmul.mubr.msk.f32.gmra.mxu0 %vm354_vm2, %v4168_v4  ;;  %v1651_v4 = vsub.f32 %v1640_v37, %v13655_v57  ;;  %v4174_v10 = vmul.f32 0.25, %v4110_v13 }
 0x3b2   :  { %10240 = vmatprep.mubr.msk.f32.mxu0 %vm354_vm2, %v4169_v54  ;;  %v1739_v54 = vsub.f32 %v1728_v5, %v13655_v57 }
 0x3b3   :  { %v4112_v47 = vadd.f32 %v3990_v23, %v1651_v4  ;;  %v2080_v4 = vrot.slane %v13645_v63, %v11498_v29 }
 0x3b4   :  { %v4113_v30 = vadd.f32 %v3995_v53, %v1739_v54  ;;  %v2179_v54 = vsub.f32 %v2168_v48, %v13655_v57 }
 0x3b5   :  { %10241 = vmatmul.mubr.msk.f32.gmra.mxu0 %vm354_vm2, %v4170_v42  ;;  %v1827_v42 = vsub.f32 %v1816_v46, %v13655_v57  ;;  %v4176_v50 = vmul.f32 0.25, %v4112_v47  ;;  %v2091_v47 = vsub.f32 %v2080_v4, %v13655_v57 }
 0x3b6   :  { %10243 = vmatprep.mubr.msk.f32.mxu0 %vm354_vm2, %v4171_v25  ;;  %v4177_v1 = vmul.f32 0.25, %v4113_v30  ;;  %v1992_v25 = vrot.slane %v13645_v63, %v15804_v21 }
 0x3b7   :  { %v4114_v0 = vadd.f32 %v4000_v60, %v1827_v42 }
 0x3b8   :  { %v2003_v15 = vsub.f32 %v1992_v25, %v13655_v57 }
 0x3b9   :  { %10244 = vmatmul.mubr.msk.f32.gmra.mxu0 %vm354_vm2, %v4172_v6  ;;  %v4178_v59 = vmul.f32 0.25, %v4114_v0  ;;  %v15913_v0 = vld [vmem:[#allocation69_spill] sm:$0xff] }
 0x3ba   :  { %10246 = vmatprep.mubr.msk.f32.mxu0 %vm354_vm2, %v4173_v40 }
 0x3bd   :  { %10247 = vmatmul.mubr.msk.f32.gmra.mxu0 %vm354_vm2, %v4174_v10 }
 0x3be   :  { %10249 = vmatprep.mubr.msk.f32.mxu0 %vm354_vm2, %v4175_v8 }
 0x3c0   :  { %v10157_v51 = vpop.f32.mrf.mxu1 }
 0x3c1   :  { %10250 = vmatmul.mubr.msk.f32.gmra.mxu0 %vm354_vm2, %v4176_v50  ;;  %v4010_v12 = vadd.f32 %v10157_v51, %v13139_v61  ;;  %v13710_v50 = vadd.f32 %v13626_v39, %v13186_v2 }
 0x3c2   :  { %10252 = vmatprep.mubr.msk.f32.mxu0 %vm354_vm2, %v4177_v1  ;;  %v4004_v49 = vpop.f32.mrf.mxu1  ;;  %v1644_v1 = vrot.slane %v15913_v0, %v11263_v14 }
 0x3c3   :  { %v4005_v6 = vadd.f32 %v4004_v49, %v13139_v61  ;;  %v4116_v13 = vadd.f32 %v4010_v12, %v2003_v15 }
 0x3c4   :  { %v1652_v12 = vsub.f32 %v1644_v1, %v13710_v50  ;;  %v1996_v1 = vrot.slane %v15913_v0, %v15804_v21 }
 0x3c5   :  { %10253 = vmatmul.mubr.msk.f32.gmra.mxu0 %vm354_vm2, %v4178_v59  ;;  %v4115_v37 = vadd.f32 %v4005_v6, %v1915_v32  ;;  %v4180_v40 = vmul.f32 0.25, %v4116_v13  ;;  %v1556_v59 = vrot.slane %v15913_v0, %v11340_v41  ;;  %v1820_v13 = vrot.slane %v15913_v0, %v15831_v7 }
 0x3c7   :  { %v4179_v23 = vmul.f32 0.25, %v4115_v37  ;;  %v1564_v15 = vsub.f32 %v1556_v59, %v13710_v50  ;;  %v1828_v48 = vsub.f32 %v1820_v13, %v13710_v50  ;;  %v1908_v59 = vrot.slane %v15913_v0, %v11438_v44 }
 0x3c9   :  { %10255 = vmatprep.mubr.msk.f32.mxu0 %vm354_vm2, %v4179_v23 }
 0x3ca   :  { %10256 = vmatmul.mubr.msk.f32.gmra.mxu0 %vm354_vm2, %v4180_v40  ;;  %v1732_v40 = vrot.slane %v15913_v0, %v11389_v62 }
 0x3d3   :  { %v10160_v5 = vpop.f32.mrf.mxu1 }
 0x3d4   :  { %v4020_v53 = vadd.f32 %v10160_v5, %v13139_v61 }
 0x3d5   :  { %v4014_v10 = vpop.f32.mrf.mxu1 }
 0x3d6   :  { %v4015_v46 = vadd.f32 %v4014_v10, %v13139_v61  ;;  %v4118_v60 = vadd.f32 %v4020_v53, %v2179_v54  ;;  %v1740_v53 = vsub.f32 %v1732_v40, %v13710_v50 }
 0x3d8   :  { %v4117_v8 = vadd.f32 %v4015_v46, %v2091_v47  ;;  %v4182_v42 = vmul.f32 0.25, %v4118_v60  ;;  %v13730_v47 = vpop.f32.mrf.mxu0 }
 0x3d9   :  { %15914 = vst [vmem:[#allocation79_spill] sm:$0xff] %v13730_v47 }
 0x3da   :  { %v4181_v30 = vmul.f32 0.25, %v4117_v8  ;;  %v13734_v8 = vpop.f32.mrf.mxu0 }
 0x3db   :  { %15915 = vst [vmem:[#allocation82_spill] sm:$0xff] %v13734_v8 }
 0x3dc   :  { %10258 = vmatprep.mubr.msk.f32.mxu0 %vm354_vm2, %v4181_v30  ;;  %v13736_v30 = vpop.f32.mrf.mxu0 }
 0x3dd   :  { %10259 = vmatmul.mubr.msk.f32.gmra.mxu0 %vm354_vm2, %v4182_v42  ;;  %15916 = vst [vmem:[#allocation84_spill] sm:$0xff] %v13736_v30 }
 0x3de   :  { %v13738_v42 = vpop.f32.mrf.mxu0 }
 0x3df   :  { %15917 = vst [vmem:[#allocation25_spill] sm:$0xff] %v13738_v42 }
 0x3e6   :  { %v10163_v25 = vpop.f32.mrf.mxu1 }
 0x3e7   :  { %v4030_v51 = vadd.f32 %v10163_v25, %v13139_v61 }
 0x3e8   :  { %v4024_v9 = vpop.f32.mrf.mxu1 }
 0x3e9   :  { %v4025_v49 = vadd.f32 %v4024_v9, %v13139_v61  ;;  %v4120_v32 = vadd.f32 %v4030_v51, %v1652_v12  ;;  %v2004_v12 = vsub.f32 %v1996_v1, %v13710_v50 }
 0x3eb   :  { %v4119_v6 = vadd.f32 %v4025_v49, %v1564_v15  ;;  %v4184_v39 = vmul.f32 0.25, %v4120_v32  ;;  %v1916_v15 = vsub.f32 %v1908_v59, %v13710_v50  ;;  %v13748_v32 = vpop.f32.mrf.mxu0 }
 0x3ec   :  { %15918 = vst [vmem:[#allocation88_spill] sm:$0xff] %v13748_v32 }
 0x3ed   :  { %v4183_v2 = vmul.f32 0.25, %v4119_v6  ;;  %v13750_v13 = vpop.f32.mrf.mxu0 }
 0x3ee   :  { %15919 = vst [vmem:[#allocation26_spill] sm:$0xff] %v13750_v13 }
 0x3ef   :  { %10261 = vmatprep.mubr.msk.f32.mxu0 %vm354_vm2, %v4183_v2 }
 0x3f0   :  { %10262 = vmatmul.mubr.msk.f32.gmra.mxu0 %vm354_vm2, %v4184_v39 }
 0x3f9   :  { %v10166_v37 = vpop.f32.mrf.mxu1 }
 0x3fa   :  { %v4040_v23 = vadd.f32 %v10166_v37, %v13139_v61 }
 0x3fb   :  { %v4034_v5 = vpop.f32.mrf.mxu1 }
 0x3fc   :  { %v4035_v4 = vadd.f32 %v4034_v5, %v13139_v61  ;;  %v4122_v54 = vadd.f32 %v4040_v23, %v1828_v48  ;;  %v13754_v23 = vpop.f32.mrf.mxu0  ;;  %v13761_v48 = vld [vmem:[%s15472_s7 + $0x8] sm:$0xff] }
 0x3fd   :  { %15920 = vst [vmem:[#allocation90_spill] sm:$0xff] %v13754_v23  ;;  %v13765_v5 = vrot.slane %v13761_v48, %v11263_v14 }
 0x3fe   :  { %v4121_v10 = vadd.f32 %v4035_v4, %v1740_v53  ;;  %v4186_v60 = vmul.f32 0.25, %v4122_v54  ;;  %v13756_v40 = vpop.f32.mrf.mxu0  ;;  %v2172_v53 = vrot.slane %v15913_v0, %v15874_v33 }
 0x3ff   :  { %15921 = vst [vmem:[#allocation28_spill] sm:$0xff] %v13756_v40 }
 0x400   :  { %v4185_v46 = vmul.f32 0.25, %v4121_v10 }
 0x402   :  { %10264 = vmatprep.mubr.msk.f32.mxu0 %vm354_vm2, %v4185_v46  ;;  %v2084_v46 = vrot.slane %v15913_v0, %v11498_v29 }
 0x403   :  { %10265 = vmatmul.mubr.msk.f32.gmra.mxu0 %vm354_vm2, %v4186_v60  ;;  %v2180_v60 = vsub.f32 %v2172_v53, %v13710_v50  ;;  %v10994_v53 = vld [vmem:[%s15472_s7] sm:$0xff] }
 0x404   :  { %v2092_v59 = vsub.f32 %v2084_v46, %v13710_v50 }
 0x40c   :  { %v10169_v25 = vpop.f32.mrf.mxu1 }
 0x40d   :  { %v4050_v51 = vadd.f32 %v10169_v25, %v13139_v61 }
 0x40e   :  { %v4044_v9 = vpop.f32.mrf.mxu1 }
 0x40f   :  { %v4045_v49 = vadd.f32 %v4044_v9, %v13139_v61  ;;  %v4124_v6 = vadd.f32 %v4050_v51, %v2004_v12 }
 0x411   :  { %v4123_v2 = vadd.f32 %v4045_v49, %v1916_v15  ;;  %v4188_v37 = vmul.f32 0.25, %v4124_v6 }
 0x413   :  { %v4187_v39 = vmul.f32 0.25, %v4123_v2 }
 0x415   :  { %10267 = vmatprep.mubr.msk.f32.mxu0 %vm354_vm2, %v4187_v39 }
 0x416   :  { %10268 = vmatmul.mubr.msk.f32.gmra.mxu0 %vm354_vm2, %v4188_v37 }
 0x41f   :  { %v10172_v4 = vpop.f32.mrf.mxu1  ;;  %v10179_v54 = vpop.f32.mrf.mxu0 }
 0x420   :  { %v4060_v10 = vadd.f32 %v10172_v4, %v13139_v61  ;;  %v4462_v1 = vadd.f32 %v10179_v54, %v13765_v5  ;;  %v5423_v54 = vmax.f32 %v10994_v53, 0.0 }
 0x421   :  { %v4054_v25 = vpop.f32.mrf.mxu1  ;;  %v4456_v51 = vpop.f32.mrf.mxu0 }
 0x422   :  { %v4055_v12 = vadd.f32 %v4054_v25, %v13139_v61  ;;  %v4457_v9 = vadd.f32 %v4456_v51, %v13765_v5  ;;  %v4126_v15 = vadd.f32 %v4060_v10, %v2180_v60  ;;  %v4776_v39 = vmax.f32 %v4462_v1, 0.0 }
 0x423   :  { %v10182_v49 = vpop.f32.mrf.mxu0 }
 0x424   :  { %v4125_v6 = vadd.f32 %v4055_v12, %v2092_v59  ;;  %v4775_v2 = vmax.f32 %v4457_v9, 0.0  ;;  %v4472_v37 = vadd.f32 %v10182_v49, %v13765_v5  ;;  %v4190_v61 = vmul.f32 0.25, %v4126_v15 }
 0x425   :  { %v4466_v4 = vpop.f32.mrf.mxu0  ;;  %v5425_v59 = vrot.slane %v5423_v54, 7 }
 0x426   :  { %v4189_v45 = vmul.f32 0.25, %v4125_v6  ;;  %v4467_v46 = vadd.f32 %v4466_v4, %v13765_v5  ;;  %10277 = vmatprep.mubr.msk.f32.mxu1 %vm354_vm2, %v4775_v2  ;;  %v4778_v60 = vmax.f32 %v4472_v37, 0.0  ;;  %v10996_v4 = vld [vmem:[%s15471_s6 + $0x30] sm:$0xff] }
 0x427   :  { %v10185_v25 = vpop.f32.mrf.mxu0  ;;  %10278 = vmatmul.mubr.msk.f32.vlgmr.msra.gmra.mxu1 %vm354_vm2, %v4776_v39  ;;  %v10995_v39 = vld [vmem:[%s15471_s6 + $0x38] sm:$0xff] }
 0x428   :  { %v4777_v10 = vmax.f32 %v4467_v46, 0.0  ;;  %10270 = vmatprep.mubr.msk.f32.mxu0 %vm354_vm2, %v4189_v45  ;;  %v4482_v1 = vadd.f32 %v10185_v25, %v13765_v5 }
 0x429   :  { %v4476_v51 = vpop.f32.mrf.mxu0  ;;  %10271 = vmatmul.mubr.msk.f32.gmra.mxu0 %vm354_vm2, %v4190_v61 }
 0x42a   :  { %v4477_v12 = vadd.f32 %v4476_v51, %v13765_v5  ;;  %10280 = vmatprep.mubr.msk.f32.mxu1 %vm354_vm2, %v4777_v10  ;;  %10377 = vmatprep.mubr.msk.f32.mxu0 %vm11120_vm0, %v15656_v3  ;;  %v4780_v49 = vmax.f32 %v4482_v1, 0.0 }
 0x42b   :  { %v10188_v9 = vpop.f32.mrf.mxu0  ;;  %10281 = vmatmul.mubr.msk.f32.gmra.mxu1 %vm354_vm2, %v4778_v60 }
 0x42c   :  { %v4779_v15 = vmax.f32 %v4477_v12, 0.0  ;;  %v4492_v45 = vadd.f32 %v10188_v9, %v13765_v5 }
 0x42d   :  { %v4486_v6 = vpop.f32.mrf.mxu0  ;;  %10378 = vmatmul.mubr.msk.f32.vlgmr.msra.gmra.mxu0 %vm354_vm2, %v5425_v59 }
 0x42e   :  { %v4487_v2 = vadd.f32 %v4486_v6, %v13765_v5  ;;  %10283 = vmatprep.mubr.msk.f32.mxu1 %vm354_vm2, %v4779_v15  ;;  %10381 = vmatpush3.msra.mxu0 %v10995_v39  ;;  %v4782_v54 = vmax.f32 %v4492_v45, 0.0 }
 0x42f   :  { %v10191_v37 = vpop.f32.mrf.mxu0  ;;  %10284 = vmatmul.mubr.msk.f32.gmra.mxu1 %vm354_vm2, %v4780_v49  ;;  %10382 = vmatprep.subr.mxu0 %v10996_v4 }
 0x430   :  { %v4781_v53 = vmax.f32 %v4487_v2, 0.0  ;;  %10383 = vmatpush3.msra.mxu0 %v10996_v4  ;;  %v4502_v46 = vadd.f32 %v10191_v37, %v13765_v5 }
 0x431   :  { %v4496_v61 = vpop.f32.mrf.mxu0  ;;  %10396 = vmatprep.subr.mxu0 %v13612_v18 }
 0x432   :  { %v4497_v25 = vadd.f32 %v4496_v61, %v13765_v5  ;;  %10286 = vmatprep.mubr.msk.f32.mxu1 %vm354_vm2, %v4781_v53  ;;  %v4784_v1 = vmax.f32 %v4502_v46, 0.0 }
 0x433   :  { %v10194_v10 = vpop.f32.mrf.mxu0  ;;  %10287 = vmatmul.mubr.msk.f32.gmra.mxu1 %vm354_vm2, %v4782_v54 }
 0x434   :  { %v4783_v60 = vmax.f32 %v4497_v25, 0.0  ;;  %v4512_v51 = vadd.f32 %v10194_v10, %v13765_v5 }
 0x435   :  { %v4506_v59 = vpop.f32.mrf.mxu0 }
 0x436   :  { %v4507_v12 = vadd.f32 %v4506_v59, %v13765_v5  ;;  %10289 = vmatprep.mubr.msk.f32.mxu1 %vm354_vm2, %v4783_v60  ;;  %v4786_v15 = vmax.f32 %v4512_v51, 0.0 }
 0x437   :  { %10290 = vmatmul.mubr.msk.f32.gmra.mxu1 %vm354_vm2, %v4784_v1 }
 0x438   :  { %v10197_v9 = vpop.f32.mrf.mxu0  ;;  %v4785_v18 = vmax.f32 %v4507_v12, 0.0 }
 0x439   :  { %v4522_v49 = vadd.f32 %v10197_v9, %v13765_v5 }
 0x43a   :  { %v4516_v45 = vpop.f32.mrf.mxu0  ;;  %10292 = vmatprep.mubr.msk.f32.mxu1 %vm354_vm2, %v4785_v18 }
 0x43b   :  { %v4517_v6 = vadd.f32 %v4516_v45, %v13765_v5  ;;  %10293 = vmatmul.mubr.msk.f32.gmra.mxu1 %vm354_vm2, %v4786_v15  ;;  %v4788_v37 = vmax.f32 %v4522_v49, 0.0 }
 0x43c   :  { %v10200_v2 = vpop.f32.mrf.mxu0 }
 0x43d   :  { %v4787_v39 = vmax.f32 %v4517_v6, 0.0  ;;  %v4532_v4 = vadd.f32 %v10200_v2, %v13765_v5 }
 0x43e   :  { %v4526_v53 = vpop.f32.mrf.mxu0 }
 0x43f   :  { %v4527_v54 = vadd.f32 %v4526_v53, %v13765_v5  ;;  %10295 = vmatprep.mubr.msk.f32.mxu1 %vm354_vm2, %v4787_v39  ;;  %v4790_v25 = vmax.f32 %v4532_v4, 0.0 }
 0x440   :  { %10296 = vmatmul.mubr.msk.f32.gmra.mxu1 %vm354_vm2, %v4788_v37 }
 0x441   :  { %v10203_v46 = vpop.f32.mrf.mxu0  ;;  %v4789_v61 = vmax.f32 %v4527_v54, 0.0 }
 0x442   :  { %v4542_v10 = vadd.f32 %v10203_v46, %v13765_v5 }
 0x443   :  { %v4536_v60 = vpop.f32.mrf.mxu0  ;;  %10298 = vmatprep.mubr.msk.f32.mxu1 %vm354_vm2, %v4789_v61 }
 0x444   :  { %v4537_v1 = vadd.f32 %v4536_v60, %v13765_v5  ;;  %10299 = vmatmul.mubr.msk.f32.gmra.mxu1 %vm354_vm2, %v4790_v25  ;;  %v4792_v12 = vmax.f32 %v4542_v10, 0.0 }
 0x445   :  { %v10206_v51 = vpop.f32.mrf.mxu0 }
 0x446   :  { %v4791_v59 = vmax.f32 %v4537_v1, 0.0  ;;  %v4552_v9 = vadd.f32 %v10206_v51, %v13765_v5 }
 0x447   :  { %v4546_v18 = vpop.f32.mrf.mxu0 }
 0x448   :  { %v4547_v15 = vadd.f32 %v4546_v18, %v13765_v5  ;;  %10301 = vmatprep.mubr.msk.f32.mxu1 %vm354_vm2, %v4791_v59  ;;  %v4794_v6 = vmax.f32 %v4552_v9, 0.0 }
 0x449   :  { %v10209_v49 = vpop.f32.mrf.mxu0  ;;  %10302 = vmatmul.mubr.msk.f32.gmra.mxu1 %vm354_vm2, %v4792_v12 }
 0x44a   :  { %v4793_v45 = vmax.f32 %v4547_v15, 0.0  ;;  %v4562_v2 = vadd.f32 %v10209_v49, %v13765_v5 }
 0x44b   :  { %v4556_v39 = vpop.f32.mrf.mxu0 }
 0x44c   :  { %v4557_v37 = vadd.f32 %v4556_v39, %v13765_v5  ;;  %10304 = vmatprep.mubr.msk.f32.mxu1 %vm354_vm2, %v4793_v45  ;;  %v4796_v54 = vmax.f32 %v4562_v2, 0.0 }
 0x44d   :  { %v10212_v4 = vpop.f32.mrf.mxu0  ;;  %10305 = vmatmul.mubr.msk.f32.gmra.mxu1 %vm354_vm2, %v4794_v6 }
 0x44e   :  { %v4795_v53 = vmax.f32 %v4557_v37, 0.0  ;;  %v4572_v46 = vadd.f32 %v10212_v4, %v13765_v5 }
 0x44f   :  { %v4566_v61 = vpop.f32.mrf.mxu0 }
 0x450   :  { %v4567_v25 = vadd.f32 %v4566_v61, %v13765_v5  ;;  %10307 = vmatprep.mubr.msk.f32.mxu1 %vm354_vm2, %v4795_v53  ;;  %v4798_v1 = vmax.f32 %v4572_v46, 0.0 }
 0x451   :  { %v10215_v10 = vpop.f32.mrf.mxu0  ;;  %10308 = vmatmul.mubr.msk.f32.gmra.mxu1 %vm354_vm2, %v4796_v54 }
 0x452   :  { %v4797_v60 = vmax.f32 %v4567_v25, 0.0  ;;  %v4582_v51 = vadd.f32 %v10215_v10, %v13765_v5 }
 0x453   :  { %v4576_v59 = vpop.f32.mrf.mxu0 }
 0x454   :  { %v4577_v12 = vadd.f32 %v4576_v59, %v13765_v5  ;;  %10310 = vmatprep.mubr.msk.f32.mxu1 %vm354_vm2, %v4797_v60  ;;  %v4800_v15 = vmax.f32 %v4582_v51, 0.0 }
 0x455   :  { %v10218_v9 = vpop.f32.mrf.mxu0  ;;  %10311 = vmatmul.mubr.msk.f32.gmra.mxu1 %vm354_vm2, %v4798_v1 }
 0x456   :  { %v4799_v18 = vmax.f32 %v4577_v12, 0.0  ;;  %v4592_v49 = vadd.f32 %v10218_v9, %v13765_v5 }
 0x457   :  { %v4586_v45 = vpop.f32.mrf.mxu0 }
 0x458   :  { %v4587_v6 = vadd.f32 %v4586_v45, %v13765_v5  ;;  %10313 = vmatprep.mubr.msk.f32.mxu1 %vm354_vm2, %v4799_v18  ;;  %v4802_v37 = vmax.f32 %v4592_v49, 0.0 }
 0x459   :  { %v10221_v2 = vpop.f32.mrf.mxu0  ;;  %10314 = vmatmul.mubr.msk.f32.gmra.mxu1 %vm354_vm2, %v4800_v15 }
 0x45a   :  { %v4801_v39 = vmax.f32 %v4587_v6, 0.0  ;;  %v4602_v4 = vadd.f32 %v10221_v2, %v13765_v5 }
 0x45b   :  { %v4596_v53 = vpop.f32.mrf.mxu0 }
 0x45c   :  { %v4597_v54 = vadd.f32 %v4596_v53, %v13765_v5  ;;  %10316 = vmatprep.mubr.msk.f32.mxu1 %vm354_vm2, %v4801_v39  ;;  %v4804_v25 = vmax.f32 %v4602_v4, 0.0 }
 0x45d   :  { %v10224_v46 = vpop.f32.mrf.mxu0  ;;  %10317 = vmatmul.mubr.msk.f32.gmra.mxu1 %vm354_vm2, %v4802_v37 }
 0x45e   :  { %v4803_v61 = vmax.f32 %v4597_v54, 0.0  ;;  %v4612_v10 = vadd.f32 %v10224_v46, %v13765_v5 }
 0x45f   :  { %v4606_v60 = vpop.f32.mrf.mxu0 }
 0x460   :  { %v4607_v1 = vadd.f32 %v4606_v60, %v13765_v5  ;;  %10319 = vmatprep.mubr.msk.f32.mxu1 %vm354_vm2, %v4803_v61  ;;  %v4806_v12 = vmax.f32 %v4612_v10, 0.0 }
 0x461   :  { %v10227_v51 = vpop.f32.mrf.mxu0  ;;  %10320 = vmatmul.mubr.msk.f32.gmra.mxu1 %vm354_vm2, %v4804_v25 }
 0x462   :  { %v4805_v59 = vmax.f32 %v4607_v1, 0.0  ;;  %v4622_v9 = vadd.f32 %v10227_v51, %v13765_v5 }
 0x463   :  { %v4616_v18 = vpop.f32.mrf.mxu0 }
 0x464   :  { %v4617_v15 = vadd.f32 %v4616_v18, %v13765_v5  ;;  %10322 = vmatprep.mubr.msk.f32.mxu1 %vm354_vm2, %v4805_v59  ;;  %v4808_v6 = vmax.f32 %v4622_v9, 0.0 }
 0x465   :  { %v10230_v49 = vpop.f32.mrf.mxu0  ;;  %10323 = vmatmul.mubr.msk.f32.gmra.mxu1 %vm354_vm2, %v4806_v12 }
 0x466   :  { %v4807_v45 = vmax.f32 %v4617_v15, 0.0  ;;  %v4632_v2 = vadd.f32 %v10230_v49, %v13765_v5 }
 0x467   :  { %v4626_v39 = vpop.f32.mrf.mxu0 }
 0x468   :  { %v4627_v37 = vadd.f32 %v4626_v39, %v13765_v5  ;;  %10325 = vmatprep.mubr.msk.f32.mxu1 %vm354_vm2, %v4807_v45  ;;  %v4810_v54 = vmax.f32 %v4632_v2, 0.0 }
 0x469   :  { %v10233_v4 = vpop.f32.mrf.mxu0  ;;  %10326 = vmatmul.mubr.msk.f32.gmra.mxu1 %vm354_vm2, %v4808_v6 }
 0x46a   :  { %v4809_v53 = vmax.f32 %v4627_v37, 0.0  ;;  %v4642_v46 = vadd.f32 %v10233_v4, %v13765_v5 }
 0x46b   :  { %v4636_v61 = vpop.f32.mrf.mxu0 }
 0x46c   :  { %v4637_v25 = vadd.f32 %v4636_v61, %v13765_v5  ;;  %10328 = vmatprep.mubr.msk.f32.mxu1 %vm354_vm2, %v4809_v53  ;;  %v4812_v1 = vmax.f32 %v4642_v46, 0.0 }
 0x46d   :  { %v10236_v10 = vpop.f32.mrf.mxu0  ;;  %10329 = vmatmul.mubr.msk.f32.gmra.mxu1 %vm354_vm2, %v4810_v54 }
 0x46e   :  { %v4811_v60 = vmax.f32 %v4637_v25, 0.0  ;;  %v4652_v51 = vadd.f32 %v10236_v10, %v13765_v5 }
 0x46f   :  { %v4646_v59 = vpop.f32.mrf.mxu0 }
 0x470   :  { %v4647_v12 = vadd.f32 %v4646_v59, %v13765_v5  ;;  %10331 = vmatprep.mubr.msk.f32.mxu1 %vm354_vm2, %v4811_v60  ;;  %v4814_v15 = vmax.f32 %v4652_v51, 0.0 }
 0x471   :  { %v10239_v9 = vpop.f32.mrf.mxu0  ;;  %10332 = vmatmul.mubr.msk.f32.gmra.mxu1 %vm354_vm2, %v4812_v1 }
 0x472   :  { %v4813_v18 = vmax.f32 %v4647_v12, 0.0  ;;  %v4662_v49 = vadd.f32 %v10239_v9, %v13765_v5 }
 0x473   :  { %v4656_v45 = vpop.f32.mrf.mxu0 }
 0x474   :  { %v4657_v6 = vadd.f32 %v4656_v45, %v13765_v5  ;;  %10334 = vmatprep.mubr.msk.f32.mxu1 %vm354_vm2, %v4813_v18  ;;  %v4816_v37 = vmax.f32 %v4662_v49, 0.0 }
 0x475   :  { %v10242_v2 = vpop.f32.mrf.mxu0  ;;  %10335 = vmatmul.mubr.msk.f32.gmra.mxu1 %vm354_vm2, %v4814_v15 }
 0x476   :  { %v4815_v39 = vmax.f32 %v4657_v6, 0.0  ;;  %v4672_v4 = vadd.f32 %v10242_v2, %v13765_v5 }
 0x477   :  { %v4666_v53 = vpop.f32.mrf.mxu0 }
 0x478   :  { %v4667_v54 = vadd.f32 %v4666_v53, %v13765_v5  ;;  %10337 = vmatprep.mubr.msk.f32.mxu1 %vm354_vm2, %v4815_v39  ;;  %v4818_v25 = vmax.f32 %v4672_v4, 0.0 }
 0x479   :  { %v10245_v46 = vpop.f32.mrf.mxu0  ;;  %10338 = vmatmul.mubr.msk.f32.gmra.mxu1 %vm354_vm2, %v4816_v37 }
 0x47a   :  { %v4817_v61 = vmax.f32 %v4667_v54, 0.0  ;;  %v4682_v10 = vadd.f32 %v10245_v46, %v13765_v5 }
 0x47b   :  { %v4676_v60 = vpop.f32.mrf.mxu0 }
 0x47c   :  { %v4677_v1 = vadd.f32 %v4676_v60, %v13765_v5  ;;  %10340 = vmatprep.mubr.msk.f32.mxu1 %vm354_vm2, %v4817_v61  ;;  %v4820_v12 = vmax.f32 %v4682_v10, 0.0 }
 0x47d   :  { %v10248_v51 = vpop.f32.mrf.mxu0  ;;  %10341 = vmatmul.mubr.msk.f32.gmra.mxu1 %vm354_vm2, %v4818_v25 }
 0x47e   :  { %v4819_v59 = vmax.f32 %v4677_v1, 0.0  ;;  %v4692_v9 = vadd.f32 %v10248_v51, %v13765_v5 }
 0x47f   :  { %v4686_v18 = vpop.f32.mrf.mxu0 }
 0x480   :  { %v4687_v15 = vadd.f32 %v4686_v18, %v13765_v5  ;;  %10343 = vmatprep.mubr.msk.f32.mxu1 %vm354_vm2, %v4819_v59  ;;  %v4822_v6 = vmax.f32 %v4692_v9, 0.0 }
 0x481   :  { %v10251_v49 = vpop.f32.mrf.mxu0  ;;  %10344 = vmatmul.mubr.msk.f32.gmra.mxu1 %vm354_vm2, %v4820_v12 }
 0x482   :  { %v4821_v45 = vmax.f32 %v4687_v15, 0.0  ;;  %v4702_v2 = vadd.f32 %v10251_v49, %v13765_v5 }
 0x483   :  { %v4696_v39 = vpop.f32.mrf.mxu0 }
 0x484   :  { %v4697_v37 = vadd.f32 %v4696_v39, %v13765_v5  ;;  %10346 = vmatprep.mubr.msk.f32.mxu1 %vm354_vm2, %v4821_v45  ;;  %v4824_v54 = vmax.f32 %v4702_v2, 0.0 }
 0x485   :  { %v10254_v4 = vpop.f32.mrf.mxu0  ;;  %10347 = vmatmul.mubr.msk.f32.gmra.mxu1 %vm354_vm2, %v4822_v6 }
 0x486   :  { %v4823_v53 = vmax.f32 %v4697_v37, 0.0  ;;  %v4712_v46 = vadd.f32 %v10254_v4, %v13765_v5 }
 0x487   :  { %v4706_v61 = vpop.f32.mrf.mxu0 }
 0x488   :  { %v4707_v25 = vadd.f32 %v4706_v61, %v13765_v5  ;;  %10349 = vmatprep.mubr.msk.f32.mxu1 %vm354_vm2, %v4823_v53  ;;  %v4826_v60 = vmax.f32 %v4712_v46, 0.0 }
 0x489   :  { %10350 = vmatmul.mubr.msk.f32.gmra.mxu1 %vm354_vm2, %v4824_v54 }
 0x48a   :  { %v4825_v10 = vmax.f32 %v4707_v25, 0.0  ;;  %v10257_v1 = vpop.f32.mrf.mxu0 }
 0x48b   :  { %v4722_v51 = vadd.f32 %v10257_v1, %v13765_v5 }
 0x48c   :  { %10352 = vmatprep.mubr.msk.f32.mxu1 %vm354_vm2, %v4825_v10  ;;  %v4716_v59 = vpop.f32.mrf.mxu0 }
 0x48d   :  { %10353 = vmatmul.mubr.msk.f32.gmra.mxu1 %vm354_vm2, %v4826_v60  ;;  %v4717_v12 = vadd.f32 %v4716_v59, %v13765_v5  ;;  %v4828_v18 = vmax.f32 %v4722_v51, 0.0 }
 0x48f   :  { %v4827_v9 = vmax.f32 %v4717_v12, 0.0 }
 0x491   :  { %10355 = vmatprep.mubr.msk.f32.mxu1 %vm354_vm2, %v4827_v9 }
 0x492   :  { %10356 = vmatmul.mubr.msk.f32.gmra.mxu1 %vm354_vm2, %v4828_v18 }
 0x49d   :  { %v10260_v15 = vpop.f32.mrf.mxu0 }
 0x49e   :  { %v4732_v49 = vadd.f32 %v10260_v15, %v13765_v5 }
 0x49f   :  { %v4726_v45 = vpop.f32.mrf.mxu0 }
 0x4a0   :  { %v4727_v6 = vadd.f32 %v4726_v45, %v13765_v5  ;;  %v4830_v39 = vmax.f32 %v4732_v49, 0.0 }
 0x4a2   :  { %v4829_v2 = vmax.f32 %v4727_v6, 0.0  ;;  %v13916_v6 = vrot.slane %v13761_v48, %v11389_v62 }
 0x4a4   :  { %10358 = vmatprep.mubr.msk.f32.mxu1 %vm354_vm2, %v4829_v2  ;;  %15922 = vst [vmem:[#allocation93_spill] sm:$0xff] %v13916_v6 }
 0x4a5   :  { %10359 = vmatmul.mubr.msk.f32.gmra.mxu1 %vm354_vm2, %v4830_v39 }
 0x4b0   :  { %v10263_v37 = vpop.f32.mrf.mxu0 }
 0x4b1   :  { %v4742_v4 = vadd.f32 %v10263_v37, %v13765_v5 }
 0x4b2   :  { %v4736_v53 = vpop.f32.mrf.mxu0 }
 0x4b3   :  { %v4737_v54 = vadd.f32 %v4736_v53, %v13765_v5  ;;  %v4832_v61 = vmax.f32 %v4742_v4, 0.0 }
 0x4b5   :  { %v4831_v46 = vmax.f32 %v4737_v54, 0.0 }
 0x4b7   :  { %10361 = vmatprep.mubr.msk.f32.mxu1 %vm354_vm2, %v4831_v46 }
 0x4b8   :  { %10362 = vmatmul.mubr.msk.f32.gmra.mxu1 %vm354_vm2, %v4832_v61 }
 0x4c3   :  { %v10266_v25 = vpop.f32.mrf.mxu0 }
 0x4c4   :  { %v4752_v10 = vadd.f32 %v10266_v25, %v13765_v5 }
 0x4c5   :  { %v4746_v60 = vpop.f32.mrf.mxu0 }
 0x4c6   :  { %v4747_v1 = vadd.f32 %v4746_v60, %v13765_v5  ;;  %v4834_v59 = vmax.f32 %v4752_v10, 0.0 }
 0x4c8   :  { %v4833_v51 = vmax.f32 %v4747_v1, 0.0 }
 0x4ca   :  { %10364 = vmatprep.mubr.msk.f32.mxu1 %vm354_vm2, %v4833_v51 }
 0x4cb   :  { %10365 = vmatmul.mubr.msk.f32.gmra.mxu1 %vm354_vm2, %v4834_v59 }
 0x4d6   :  { %v10269_v12 = vpop.f32.mrf.mxu0 }
 0x4d7   :  { %v4762_v9 = vadd.f32 %v10269_v12, %v13765_v5 }
 0x4d8   :  { %v4756_v18 = vpop.f32.mrf.mxu0 }
 0x4d9   :  { %v4757_v15 = vadd.f32 %v4756_v18, %v13765_v5  ;;  %v4836_v45 = vmax.f32 %v4762_v9, 0.0 }
 0x4db   :  { %v4835_v49 = vmax.f32 %v4757_v15, 0.0 }
 0x4dd   :  { %10367 = vmatprep.mubr.msk.f32.mxu1 %vm354_vm2, %v4835_v49 }
 0x4de   :  { %10368 = vmatmul.mubr.msk.f32.gmra.mxu1 %vm354_vm2, %v4836_v45 }
 0x4e7   :  { %v10279_v2 = vpop.f32.mrf.mxu1 }
 0x4e8   :  { %v13919_v39 = vadd.f32 %v10279_v2, %v13916_v6 }
 0x4e9   :  { %v10272_v37 = vpop.f32.mrf.mxu0  ;;  %v5104_v4 = vpop.f32.mrf.mxu1 }
 0x4ea   :  { %v5799_v53 = vsel %vm354_vm2, %v13919_v39, -inf  ;;  %v13924_v54 = vadd.f32 %v5104_v4, %v13916_v6  ;;  %v4772_v61 = vadd.f32 %v10272_v37, %v13765_v5 }
 0x4eb   :  { %v5800_v46 = vrot.slane %v5799_v53, 4  ;;  %v4766_v25 = vpop.f32.mrf.mxu0  ;;  %v10282_v10 = vpop.f32.mrf.mxu1 }
 0x4ec   :  { %v5792_v60 = vsel %vm354_vm2, %v13924_v54, -inf  ;;  %v4767_v1 = vadd.f32 %v4766_v25, %v13765_v5  ;;  %v13931_v51 = vadd.f32 %v10282_v10, %v13916_v6  ;;  %v4838_v4 = vmax.f32 %v4772_v61, 0.0 }
 0x4ed   :  { %v5801_v59 = vmax.f32 %v5799_v53, %v5800_v46  ;;  %v5793_v12 = vrot.slane %v5792_v60, 4  ;;  %v5114_v9 = vpop.f32.mrf.mxu1  ;;  %v5494_v18 = vpop.f32.mrf.mxu0 }
 0x4ee   :  { %v4837_v15 = vmax.f32 %v4767_v1, 0.0  ;;  %v5813_v49 = vsel %vm354_vm2, %v13931_v51, -inf  ;;  %v13936_v45 = vadd.f32 %v5114_v9, %v13916_v6  ;;  %v5495_v2 = vadd.f32 %v13761_v48, %v5494_v18  ;;  %v15923_v1 = vld [vmem:[#allocation105_spill] sm:$0xff] }
 0x4ef   :  { %v5802_v37 = vrot.slane %v5801_v59, 2  ;;  %v5794_v14 = vmax.f32 %v5792_v60, %v5793_v12  ;;  %v5814_v25 = vrot.slane %v5813_v49, 4  ;;  %v13939_v33 = vpop.f32.mrf.mxu1  ;;  %v10379_v10 = vpop.f32.mrf.mxu0  ;;  %v5498_v9 = vsub.f32 %v15923_v1, %v13200_v24 }
 0x4f0   :  { %v5806_v53 = vsel %vm354_vm2, %v13936_v45, -inf  ;;  %v13944_v46 = vrot.slane %v5495_v2, %v11340_v41  ;;  %10370 = vmatprep.mubr.msk.f32.mxu1 %vm354_vm2, %v4837_v15 }
 0x4f1   :  { %v5803_v43 = vmax.f32 %v5801_v59, %v5802_v37  ;;  %v5795_v48 = vrot.slane %v5794_v14, 2  ;;  %v5815_v18 = vmax.f32 %v5813_v49, %v5814_v25  ;;  %v5807_v61 = vrot.slane %v5806_v53, 4  ;;  %v5124_v60 = vpop.f32.mrf.mxu1  ;;  %10371 = vmatmul.mubr.msk.f32.gmra.mxu1 %vm354_vm2, %v4838_v4 }
 0x4f2   :  { %v13951_v12 = vadd.f32 %v5124_v60, %v13916_v6  ;;  %v5510_v10 = vadd.f32 %v13944_v46, %v5498_v9 }
 0x4f3   :  { %v5804_v22 = vrot.slane %v5803_v43, 1  ;;  %v5796_v2 = vmax.f32 %v5794_v14, %v5795_v48  ;;  %v5816_v27 = vrot.slane %v5815_v18, 2  ;;  %v5808_v3 = vmax.f32 %v5806_v53, %v5807_v61  ;;  %v13954_v15 = vpop.f32.mrf.mxu1 }
 0x4f4   :  { %v5820_v24 = vsel %vm354_vm2, %v13951_v12, -inf  ;;  %v5518_v59 = vmul.f32 0.25, %v5510_v10 }
 0x4f5   :  { %v5797_v49 = vrot.slane %v5796_v2, 1  ;;  %v5817_v37 = vmax.f32 %v5815_v18, %v5816_v27  ;;  %v5809_v25 = vrot.slane %v5808_v3, 2  ;;  %v5821_v1 = vrot.slane %v5820_v24, 4  ;;  %v13958_v4 = vpop.f32.mrf.mxu1 }
 0x4f6   :  { %10384 = vmatprep.mubr.msk.f32.mxu0 %vm354_vm2, %v5518_v59  ;;  %v13961_v60 = vmax.f32 %v5803_v43, %v5804_v22  ;;  %v5499_v18 = vsub.f32 %v13126_v17, %v13243_v34 }
 0x4f7   :  { %v13963_v9 = vmax.f32 %v5796_v2, %v5797_v49  ;;  %v5810_v14 = vmax.f32 %v5808_v3, %v5809_v25  ;;  %v5822_v53 = vmax.f32 %v5820_v24, %v5821_v1  ;;  %v5818_v61 = vrot.slane %v5817_v37, 1  ;;  %v10291_v27 = vpop.f32.mrf.mxu1 }
 0x4f8   :  { %v13975_v43 = vadd.f32 %v10291_v27, %v13916_v6  ;;  %v5511_v3 = vadd.f32 %v13944_v46, %v5499_v18 }
 0x4f9   :  { %v6945_v48 = vsel %vm6944_vm3, %v13961_v60, %v13963_v9  ;;  %v5811_v10 = vrot.slane %v5810_v14, 1  ;;  %v5823_v40 = vrot.slane %v5822_v53, 2  ;;  %v13972_v22 = vmax.f32 %v5817_v37, %v5818_v61  ;;  %v5144_v1 = vpop.f32.mrf.mxu1 }
 0x4fa   :  { %v5855_v17 = vsel %vm354_vm2, %v13975_v43, -inf  ;;  %v5500_v37 = vsub.f32 %v13173_v52, %v13342_v16  ;;  %v13995_v61 = vadd.f32 %v5144_v1, %v13916_v6  ;;  %v10997_v52 = vld [vmem:[%s15471_s6 + $0x48] sm:$0xff] }
 0x4fb   :  { %v13970_v13 = vmax.f32 %v5810_v14, %v5811_v10  ;;  %v5824_v59 = vmax.f32 %v5822_v53, %v5823_v40  ;;  %v5856_v34 = vrot.slane %v5855_v17, 4  ;;  %v5519_v40 = vmul.f32 0.25, %v5511_v3  ;;  %v10294_v18 = vpop.f32.mrf.mxu1 }
 0x4fc   :  { %v5512_v53 = vadd.f32 %v13944_v46, %v5500_v37  ;;  %v5501_v10 = vsub.f32 %v13433_v19, %v13451_v31  ;;  %v5848_v27 = vsel %vm354_vm2, %v13995_v61, -inf  ;;  %v5502_v3 = vsub.f32 %v13517_v28, %v13526_v11  ;;  %v10998_v19 = vld [vmem:[%s15471_s6 + $0x40] sm:$0xff] }
 0x4fd   :  { %v6947_v2 = vsel %vm6946_vm4, %v13970_v13, %v6945_v48  ;;  %v5825_v24 = vrot.slane %v5824_v59, 1  ;;  %10385 = vmatmul.mubr.msk.f32.vlgmr.msra.gmra.mxu0 %vm354_vm2, %v5519_v40  ;;  %v5857_v48 = vmax.f32 %v5855_v17, %v5856_v34  ;;  %v5849_v31 = vrot.slane %v5848_v27, 4  ;;  %v5154_v28 = vpop.f32.mrf.mxu1 }
 0x4fe   :  { %v6949_v49 = vsel %vm6948_vm5, %v13972_v22, %v6947_v2  ;;  %10397 = vmatpush3.msra.mxu0 %v10997_v52  ;;  %v5520_v16 = vmul.f32 0.25, %v5512_v53  ;;  %v14014_v17 = vadd.f32 %v10294_v18, %v13916_v6  ;;  %v14019_v37 = vadd.f32 %v5154_v28, %v13916_v6 }
 0x4ff   :  { %v13982_v25 = vmax.f32 %v5824_v59, %v5825_v24  ;;  %10398 = vmatprep.subr.mxu0 %v13624_v38  ;;  %v5513_v59 = vadd.f32 %v13944_v46, %v5501_v10  ;;  %v5858_v2 = vrot.slane %v5857_v48, 2  ;;  %v5514_v38 = vadd.f32 %v13944_v46, %v5502_v3 }
 0x500   :  { %10399 = vmatpush3.msra.mxu0 %v10998_v19  ;;  %10387 = vmatprep.mubr.msk.f32.mxu0 %vm354_vm2, %v5520_v16  ;;  %v5869_v53 = vsel %vm354_vm2, %v14014_v17, -inf  ;;  %v14029_v3 = vpop.f32.mrf.mxu1 }
 0x501   :  { %v13990_v14 = vsel %vm6950_vm6, %v13982_v25, %v6949_v49  ;;  %v5521_v24 = vmul.f32 0.25, %v5513_v59  ;;  %v5850_v49 = vmax.f32 %v5848_v27, %v5849_v31  ;;  %v5522_v34 = vmul.f32 0.25, %v5514_v38 }
 0x502   :  { %v5859_v11 = vmax.f32 %v5857_v48, %v5858_v2  ;;  %v5870_v16 = vrot.slane %v5869_v53, 4  ;;  %v5862_v27 = vsel %vm354_vm2, %v14019_v37, -inf }
 0x503   :  { %10388 = vmatmul.mubr.msk.f32.gmra.mxu0 %vm354_vm2, %v5521_v24  ;;  %v5851_v40 = vrot.slane %v5850_v49, 2  ;;  %v5863_v48 = vrot.slane %v5862_v27, 4  ;;  %v5164_v24 = vpop.f32.mrf.mxu1 }
 0x504   :  { %10390 = vmatprep.mubr.msk.f32.mxu0 %vm354_vm2, %v5522_v34  ;;  %v5860_v10 = vrot.slane %v5859_v11, 1  ;;  %v5871_v19 = vmax.f32 %v5869_v53, %v5870_v16 }
 0x505   :  { %v5852_v1 = vmax.f32 %v5850_v49, %v5851_v40  ;;  %v5864_v2 = vmax.f32 %v5862_v27, %v5863_v48  ;;  %v14034_v34 = vpop.f32.mrf.mxu1 }
 0x506   :  { %v14027_v59 = vmax.f32 %v5859_v11, %v5860_v10  ;;  %v5872_v38 = vrot.slane %v5871_v19, 2  ;;  %v5503_v11 = vsub.f32 %v15911_v56, %v13584_v20 }
 0x507   :  { %v5853_v52 = vrot.slane %v5852_v1, 1  ;;  %v5865_v49 = vrot.slane %v5864_v2, 2  ;;  %v14040_v53 = vpop.f32.mrf.mxu1 }
 0x508   :  { %v5873_v28 = vmax.f32 %v5871_v19, %v5872_v38  ;;  %v5515_v16 = vadd.f32 %v13944_v46, %v5503_v11  ;;  %v14047_v19 = vadd.f32 %v5164_v24, %v13916_v6 }
 0x509   :  { %v14025_v18 = vmax.f32 %v5852_v1, %v5853_v52  ;;  %v5866_v40 = vmax.f32 %v5864_v2, %v5865_v49  ;;  %v5504_v1 = vsub.f32 %v13645_v63, %v13655_v57  ;;  %v10303_v38 = vpop.f32.mrf.mxu1  ;;  %v5505_v57 = vsub.f32 %v15913_v0, %v13710_v50 }
 0x50a   :  { %v5874_v52 = vrot.slane %v5873_v28, 1  ;;  %v5523_v7 = vmul.f32 0.25, %v5515_v16  ;;  %v5876_v63 = vsel %vm354_vm2, %v14047_v19, -inf }
 0x50b   :  { %v6958_v31 = vsel %vm6944_vm3, %v14027_v59, %v14025_v18  ;;  %v5867_v10 = vrot.slane %v5866_v40, 1  ;;  %v5516_v27 = vadd.f32 %v13944_v46, %v5504_v1  ;;  %v5877_v49 = vrot.slane %v5876_v63, 4  ;;  %v5184_v11 = vpop.f32.mrf.mxu1 }
 0x50c   :  { %v14049_v20 = vmax.f32 %v5873_v28, %v5874_v52  ;;  %10391 = vmatmul.mubr.msk.f32.gmra.mxu0 %vm354_vm2, %v5523_v7  ;;  %v5517_v28 = vadd.f32 %v13944_v46, %v5505_v57  ;;  %v14064_v7 = vadd.f32 %v10303_v38, %v13916_v6 }
 0x50d   :  { %v14044_v48 = vmax.f32 %v5866_v40, %v5867_v10  ;;  %v5524_v2 = vmul.f32 0.25, %v5516_v27  ;;  %v5878_v40 = vmax.f32 %v5876_v63, %v5877_v49  ;;  %v14067_v10 = vadd.f32 %v5184_v11, %v13916_v6  ;;  %v10306_v0 = vpop.f32.mrf.mxu1 }
 0x50e   :  { %v5525_v1 = vmul.f32 0.25, %v5517_v28  ;;  %v5911_v16 = vsel %vm354_vm2, %v14064_v7, -inf  ;;  %v14076_v63 = vadd.f32 %v10306_v0, %v13916_v6 }
 0x50f   :  { %v6959_v56 = vsel %vm6946_vm4, %v14044_v48, %v6958_v31  ;;  %10393 = vmatprep.mubr.msk.f32.mxu0 %vm354_vm2, %v5524_v2  ;;  %v5879_v31 = vrot.slane %v5878_v40, 2  ;;  %v5904_v46 = vsel %vm354_vm2, %v14067_v10, -inf  ;;  %v5912_v27 = vrot.slane %v5911_v16, 4 }
 0x510   :  { %v6960_v24 = vsel %vm6948_vm5, %v14049_v20, %v6959_v56  ;;  %10394 = vmatmul.mubr.msk.f32.gmra.mxu0 %vm354_vm2, %v5525_v1  ;;  %v5905_v56 = vrot.slane %v5904_v46, 4  ;;  %v5925_v11 = vsel %vm354_vm2, %v14076_v63, -inf }
 0x511   :  { %v5880_v50 = vmax.f32 %v5878_v40, %v5879_v31  ;;  %v5913_v38 = vmax.f32 %v5911_v16, %v5912_v27  ;;  %v5194_v31 = vpop.f32.mrf.mxu1 }
 0x512   :  { %v5906_v49 = vmax.f32 %v5904_v46, %v5905_v56  ;;  %v14085_v0 = vadd.f32 %v5194_v31, %v13916_v6 }
 0x513   :  { %v5881_v52 = vrot.slane %v5880_v50, 1  ;;  %v5914_v28 = vrot.slane %v5913_v38, 2  ;;  %v14087_v16 = vpop.f32.mrf.mxu1 }
 0x514   :  { %v5907_v40 = vrot.slane %v5906_v49, 2  ;;  %v5918_v27 = vsel %vm354_vm2, %v14085_v0, -inf }
 0x515   :  { %v14073_v2 = vmax.f32 %v5880_v50, %v5881_v52  ;;  %v5915_v1 = vmax.f32 %v5913_v38, %v5914_v28  ;;  %v5926_v50 = vrot.slane %v5925_v11, 4  ;;  %v5204_v28 = vpop.f32.mrf.mxu1 }
 0x516   :  { %v5908_v42 = vmax.f32 %v5906_v49, %v5907_v40  ;;  %v5919_v49 = vrot.slane %v5918_v27, 4  ;;  %v14099_v31 = vadd.f32 %v5204_v28, %v13916_v6 }
 0x517   :  { %v14080_v57 = vsel %vm6950_vm6, %v14073_v2, %v6960_v24  ;;  %v5916_v52 = vrot.slane %v5915_v1, 1  ;;  %v5927_v29 = vmax.f32 %v5925_v11, %v5926_v50 }
 0x518   :  { %v5909_v8 = vrot.slane %v5908_v42, 1  ;;  %v5920_v40 = vmax.f32 %v5918_v27, %v5919_v49 }
 0x519   :  { %v14091_v46 = vmax.f32 %v5915_v1, %v5916_v52  ;;  %v5928_v56 = vrot.slane %v5927_v29, 2 }
 0x51a   :  { %v14089_v24 = vmax.f32 %v5908_v42, %v5909_v8  ;;  %v5921_v50 = vrot.slane %v5920_v40, 2  ;;  %v5932_v8 = vsel %vm354_vm2, %v14099_v31, -inf }
 0x51b   :  { %v5929_v11 = vmax.f32 %v5927_v29, %v5928_v56  ;;  %v5933_v1 = vrot.slane %v5932_v8, 4 }
 0x51c   :  { %v6965_v38 = vsel %vm6944_vm3, %v14091_v46, %v14089_v24  ;;  %v5922_v42 = vmax.f32 %v5920_v40, %v5921_v50 }
 0x51d   :  { %v5930_v52 = vrot.slane %v5929_v11, 1  ;;  %v5934_v32 = vmax.f32 %v5932_v8, %v5933_v1  ;;  %v14129_v8 = vld [vmem:[%s15471_s6 + $0x78] sm:$0xff] }
 0x51e   :  { %v5923_v23 = vrot.slane %v5922_v42, 1  ;;  %10412 = vmatprep.subr.mxu0 %v14129_v8 }
 0x51f   :  { %v5935_v21 = vrot.slane %v5934_v32, 2  ;;  %v14105_v47 = vmax.f32 %v5929_v11, %v5930_v52 }
 0x520   :  { %v14103_v30 = vmax.f32 %v5922_v42, %v5923_v23  ;;  %v5130_v23 = vadd.f32 %v13939_v33, %v13916_v6  ;;  %v14136_v33 = vadd.f32 %v14029_v3, %v13916_v6 }
 0x521   :  { %v5936_v27 = vmax.f32 %v5934_v32, %v5935_v21  ;;  %v6241_v32 = vsub.f32 %v13919_v39, %v13961_v60  ;;  %v14140_v39 = vadd.f32 %v13958_v4, %v13916_v6  ;;  %v6240_v60 = vsub.f32 %v13924_v54, %v13963_v9 }
 0x522   :  { %v6966_v29 = vsel %vm6946_vm4, %v14103_v30, %v6965_v38  ;;  %v5827_v11 = vsel %vm354_vm2, %v5130_v23, -inf  ;;  %v14122_v38 = vadd.f32 %v13954_v15, %v13916_v6  ;;  %v6243_v4 = vsub.f32 %v13931_v51, %v13972_v22 }
 0x523   :  { %v6967_v56 = vsel %vm6948_vm5, %v14105_v47, %v6966_v29  ;;  %v5937_v49 = vrot.slane %v5936_v27, 1  ;;  %v5828_v50 = vrot.slane %v5827_v11, 4  ;;  %v6306_v1 = vmul.f32 1.442695, %v6241_v32 }
 0x524   :  { %v5841_v42 = vsel %vm354_vm2, %v14122_v38, -inf  ;;  %v5883_v29 = vsel %vm354_vm2, %v14136_v33, -inf  ;;  %v5834_v3 = vsel %vm354_vm2, %v14140_v39, -inf  ;;  %v14156_v9 = vadd.f32 %v14034_v34, %v13916_v6  ;;  %v10312_v34 = vpop.f32.mrf.mxu1 }
 0x525   :  { %v14111_v28 = vmax.f32 %v5936_v27, %v5937_v49  ;;  %v5829_v21 = vmax.f32 %v5827_v11, %v5828_v50  ;;  %v5842_v52 = vrot.slane %v5841_v42, 4  ;;  %10712 = vpow2.f32 %v6306_v1 }
 0x526   :  { %v14150_v49 = vadd.f32 %v14040_v53, %v13916_v6  ;;  %v6304_v11 = vmul.f32 1.442695, %v6240_v60  ;;  %v5884_v50 = vrot.slane %v5883_v29, 4  ;;  %v5835_v54 = vrot.slane %v5834_v3, 4  ;;  %v5214_v58 = vpop.f32.mrf.mxu1 }
 0x527   :  { %v14115_v40 = vsel %vm6950_vm6, %v14111_v28, %v6967_v56  ;;  %v5830_v15 = vrot.slane %v5829_v21, 2  ;;  %v5843_v56 = vmax.f32 %v5841_v42, %v5842_v52  ;;  %v6242_v53 = vsub.f32 %v13936_v45, %v13970_v13 }
 0x528   :  { %v5890_v42 = vsel %vm354_vm2, %v14150_v49, -inf  ;;  %10714 = vpow2.f32 %v6304_v11  ;;  %v5885_v1 = vmax.f32 %v5883_v29, %v5884_v50  ;;  %v5836_v51 = vmax.f32 %v5834_v3, %v5835_v54 }
 0x529   :  { %v5831_v27 = vmax.f32 %v5829_v21, %v5830_v15  ;;  %v5844_v21 = vrot.slane %v5843_v56, 2  ;;  %v6310_v15 = vmul.f32 1.442695, %v6243_v4  ;;  %v5897_v22 = vsel %vm354_vm2, %v14156_v9, -inf }
 0x52a   :  { %v5891_v60 = vrot.slane %v5890_v42, 4  ;;  %v5886_v62 = vrot.slane %v5885_v1, 2  ;;  %v6308_v35 = vmul.f32 1.442695, %v6242_v53  ;;  %v5898_v55 = vrot.slane %v5897_v22, 4 }
 0x52b   :  { %v5832_v32 = vrot.slane %v5831_v27, 1  ;;  %v5845_v44 = vmax.f32 %v5843_v56, %v5844_v21  ;;  %10716 = vpow2.f32 %v6310_v15  ;;  %v5837_v4 = vrot.slane %v5836_v51, 2 }
 0x52c   :  { %v5892_v29 = vmax.f32 %v5890_v42, %v5891_v60  ;;  %v6249_v45 = vsub.f32 %v13975_v43, %v14027_v59  ;;  %10718 = vpow2.f32 %v6308_v35  ;;  %v5899_v3 = vmax.f32 %v5897_v22, %v5898_v55 }
 0x52d   :  { %v14162_v52 = vmax.f32 %v5831_v27, %v5832_v32  ;;  %v5846_v50 = vrot.slane %v5845_v44, 1  ;;  %v5887_v27 = vmax.f32 %v5885_v1, %v5886_v62  ;;  %v5838_v56 = vmax.f32 %v5836_v51, %v5837_v4 }
 0x52e   :  { %v5893_v54 = vrot.slane %v5892_v29, 2  ;;  %v14170_v21 = vadd.f32 %v5214_v58, %v13916_v6  ;;  %v14179_v53 = vadd.f32 %v14087_v16, %v13916_v6  ;;  %v6322_v62 = vmul.f32 1.442695, %v6249_v45 }
 0x52f   :  { %v6245_v11 = vsub.f32 %v5130_v23, %v14162_v52  ;;  %v6244_v23 = vsub.f32 %v13951_v12, %v13982_v25  ;;  %v14175_v42 = vmax.f32 %v5845_v44, %v5846_v50  ;;  %v5888_v35 = vrot.slane %v5887_v27, 1 }
 0x530   :  { %v6248_v43 = vsub.f32 %v13995_v61, %v14025_v18  ;;  %v5900_v59 = vrot.slane %v5899_v3, 2  ;;  %v14184_v58 = vadd.f32 %v10312_v34, %v13916_v6  ;;  %v5839_v51 = vrot.slane %v5838_v56, 1 }
 0x531   :  { %v6314_v32 = vmul.f32 1.442695, %v6245_v11  ;;  %v5894_v22 = vmax.f32 %v5892_v29, %v5893_v54  ;;  %v5946_v44 = vsel %vm354_vm2, %v14170_v21, -inf  ;;  %v6312_v12 = vmul.f32 1.442695, %v6244_v23 }
 0x532   :  { %v10713_v13 = vpop.eup %10712  ;;  %v6247_v25 = vsub.f32 %v14122_v38, %v14175_v42  ;;  %v5939_v16 = vsel %vm354_vm2, %v14179_v53, -inf  ;;  %v6250_v18 = vsub.f32 %v14019_v37, %v14044_v48  ;;  %v14195_v60 = vmax.f32 %v5887_v27, %v5888_v35 }
 0x533   :  { %v6439_v15 = vsel %vm354_vm2, %v10713_v13, 0.0  ;;  %10720 = vpow2.f32 %v6314_v32  ;;  %v6320_v11 = vmul.f32 1.442695, %v6248_v43  ;;  %v5901_v4 = vmax.f32 %v5899_v3, %v5900_v59 }
 0x534   :  { %v6440_v1 = vrot.slane %v6439_v15, 4  ;;  %10722 = vpow2.f32 %v6322_v62  ;;  %v5953_v29 = vsel %vm354_vm2, %v14184_v58, -inf  ;;  %v5947_v50 = vrot.slane %v5946_v44, 4 }
 0x535   :  { %v10715_v55 = vpop.eup %10714  ;;  %v5895_v38 = vrot.slane %v5894_v22, 1  ;;  %v5940_v45 = vrot.slane %v5939_v16, 4  ;;  %10724 = vpow2.f32 %v6312_v12  ;;  %v14199_v54 = vmax.f32 %v5838_v56, %v5839_v51 }
 0x536   :  { %v6432_v61 = vsel %vm354_vm2, %v10715_v55, 0.0  ;;  %v6441_v13 = vadd.f32 %v6440_v1, %v6439_v15  ;;  %v6251_v23 = vsub.f32 %v14014_v17, %v14049_v20  ;;  %v6324_v48 = vmul.f32 1.442695, %v6250_v18 }
 0x537   :  { %v6433_v32 = vrot.slane %v6432_v61, 4  ;;  %v6253_v27 = vsub.f32 %v14136_v33, %v14195_v60  ;;  %v5954_v3 = vrot.slane %v5953_v29, 4  ;;  %v6318_v62 = vmul.f32 1.442695, %v6247_v25 }
 0x538   :  { %v10717_v34 = vpop.eup %10716  ;;  %10726 = vpow2.f32 %v6320_v11  ;;  %v5902_v35 = vrot.slane %v5901_v4, 1  ;;  %v5948_v15 = vmax.f32 %v5946_v44, %v5947_v50  ;;  %v6442_v43 = vrot.slane %v6441_v13, 2 }
 0x539   :  { %v6453_v37 = vsel %vm354_vm2, %v10717_v34, 0.0  ;;  %v10719_v55 = vpop.eup %10718  ;;  %v6252_v56 = vsub.f32 %v14047_v19, %v14073_v2  ;;  %v14208_v59 = vmax.f32 %v5894_v22, %v5895_v38  ;;  %v5941_v1 = vmax.f32 %v5939_v16, %v5940_v45 }
 0x53a   :  { %v6434_v17 = vadd.f32 %v6433_v32, %v6432_v61  ;;  %v6454_v20 = vrot.slane %v6453_v37, 4  ;;  %v6326_v51 = vmul.f32 1.442695, %v6251_v23  ;;  %v6246_v12 = vsub.f32 %v14140_v39, %v14199_v54 }
 0x53b   :  { %10728 = vpow2.f32 %v6324_v48  ;;  %v6330_v33 = vmul.f32 1.442695, %v6253_v27  ;;  %v5955_v25 = vmax.f32 %v5953_v29, %v5954_v3  ;;  %v6446_v18 = vsel %vm354_vm2, %v10719_v55, 0.0 }
 0x53c   :  { %10730 = vpow2.f32 %v6318_v62  ;;  %v14213_v44 = vmax.f32 %v5901_v4, %v5902_v35  ;;  %v5949_v34 = vrot.slane %v5948_v15, 2  ;;  %v6443_v11 = vadd.f32 %v6442_v43, %v6441_v13 }
 0x53d   :  { %v6328_v19 = vmul.f32 1.442695, %v6252_v56  ;;  %v6254_v2 = vsub.f32 %v14150_v49, %v14208_v59  ;;  %v5942_v22 = vrot.slane %v5941_v1, 2  ;;  %v6435_v16 = vrot.slane %v6434_v17, 2 }
 0x53e   :  { %v6455_v61 = vadd.f32 %v6454_v20, %v6453_v37  ;;  %10732 = vpow2.f32 %v6326_v51  ;;  %v6447_v39 = vrot.slane %v6446_v18, 4  ;;  %v5956_v38 = vrot.slane %v5955_v25, 2 }
 0x53f   :  { %10734 = vpow2.f32 %v6330_v33  ;;  %v6316_v45 = vmul.f32 1.442695, %v6246_v12  ;;  %v6255_v4 = vsub.f32 %v14156_v9, %v14213_v44  ;;  %v5950_v32 = vmax.f32 %v5948_v15, %v5949_v34 }
 0x540   :  { %v10721_v50 = vpop.eup %10720  ;;  %v6444_v23 = vrot.slane %v6443_v11, 1  ;;  %10736 = vpow2.f32 %v6328_v19  ;;  %v6332_v13 = vmul.f32 1.442695, %v6254_v2  ;;  %v5943_v48 = vmax.f32 %v5941_v1, %v5942_v22 }
 0x541   :  { %v10723_v29 = vpop.eup %10722  ;;  %v6436_v27 = vadd.f32 %v6435_v16, %v6434_v17  ;;  %v6456_v49 = vrot.slane %v6455_v61, 2  ;;  %v6256_v37 = vsub.f32 %v14067_v10, %v14089_v24  ;;  %v6448_v62 = vadd.f32 %v6447_v39, %v6446_v18 }
 0x542   :  { %v10725_v3 = vpop.eup %10724  ;;  %v6467_v35 = vsel %vm354_vm2, %v10721_v50, 0.0  ;;  %v5957_v55 = vmax.f32 %v5955_v25, %v5956_v38  ;;  %10738 = vpow2.f32 %v6316_v45  ;;  %v6495_v43 = vsel %vm354_vm2, %v10723_v29, 0.0 }
 0x543   :  { %v6334_v56 = vmul.f32 1.442695, %v6255_v4  ;;  %v5951_v9 = vrot.slane %v5950_v32, 1  ;;  %v6445_v20 = vadd.f32 %v6444_v23, %v6443_v11  ;;  %10740 = vpow2.f32 %v6332_v13 }
 0x544   :  { %v6257_v1 = vsub.f32 %v14064_v7, %v14091_v46  ;;  %v5944_v17 = vrot.slane %v5943_v48, 1  ;;  %v6437_v51 = vrot.slane %v6436_v27, 1  ;;  %v14225_v12 = vadd.f32 %v6456_v49, %v6455_v61 }
 0x545   :  { %v10727_v15 = vpop.eup %10726  ;;  %v6468_v10 = vrot.slane %v6467_v35, 4  ;;  %v6336_v24 = vmul.f32 1.442695, %v6256_v37  ;;  %v6449_v33 = vrot.slane %v6448_v62, 2  ;;  %v6460_v25 = vsel %vm354_vm2, %v10725_v3, 0.0 }
 0x546   :  { %v6496_v18 = vrot.slane %v6495_v43, 4  ;;  %v5958_v34 = vrot.slane %v5957_v55, 1  ;;  %v6488_v2 = vsel %vm354_vm2, %v10727_v15, 0.0  ;;  %10742 = vpow2.f32 %v6334_v56 }
 0x547   :  { %v6258_v11 = vsub.f32 %v14085_v0, %v14103_v30  ;;  %v14231_v22 = vmax.f32 %v5950_v32, %v5951_v9  ;;  %10744 = vrcp.f32 %v6445_v20  ;;  %v6338_v46 = vmul.f32 1.442695, %v6257_v1 }
 0x548   :  { %v10729_v19 = vpop.eup %10728  ;;  %v6259_v16 = vsub.f32 %v14076_v63, %v14105_v47  ;;  %v14235_v61 = vmax.f32 %v5943_v48, %v5944_v17  ;;  %v6469_v50 = vadd.f32 %v6468_v10, %v6467_v35  ;;  %v6461_v39 = vrot.slane %v6460_v25, 4 }
 0x549   :  { %v10731_v7 = vpop.eup %10730  ;;  %10746 = vpow2.f32 %v6336_v24  ;;  %v6260_v38 = vsub.f32 %v14099_v31, %v14111_v28  ;;  %v14239_v45 = vadd.f32 %v6437_v51, %v6436_v27  ;;  %v6489_v30 = vrot.slane %v6488_v2, 4 }
 0x54a   :  { %v6502_v0 = vsel %vm354_vm2, %v10729_v19, 0.0  ;;  %v14242_v4 = vmax.f32 %v5957_v55, %v5958_v34  ;;  %v6458_v23 = vrot.slane %v14225_v12, 1  ;;  %v6497_v47 = vadd.f32 %v6496_v18, %v6495_v43 }
 0x54b   :  { %v10733_v29 = vpop.eup %10732  ;;  %v6340_v63 = vmul.f32 1.442695, %v6258_v11  ;;  %v6262_v13 = vsub.f32 %v14170_v21, %v14231_v22  ;;  %v6450_v48 = vadd.f32 %v6449_v33, %v6448_v62  ;;  %10748 = vpow2.f32 %v6338_v46 }
 0x54c   :  { %15924 = vst [vmem:[#allocation30_spill] sm:$0xff] %v14242_v4  ;;  %v10735_v32 = vpop.eup %10734  ;;  %v6342_v49 = vmul.f32 1.442695, %v6259_v16  ;;  %v6261_v31 = vsub.f32 %v14179_v53, %v14235_v61  ;;  %v6470_v27 = vrot.slane %v6469_v50, 2  ;;  %v6509_v37 = vsel %vm354_vm2, %v10733_v29, 0.0 }
 0x54d   :  { %v10737_v28 = vpop.eup %10736  ;;  %v6503_v3 = vrot.slane %v6502_v0, 4  ;;  %v6344_v35 = vmul.f32 1.442695, %v6260_v38  ;;  %v6481_v55 = vsel %vm354_vm2, %v10731_v7, 0.0  ;;  %v6490_v56 = vadd.f32 %v6489_v30, %v6488_v2 }
 0x54e   :  { %v6523_v43 = vsel %vm354_vm2, %v10735_v32, 0.0  ;;  %v6263_v21 = vsub.f32 %v14184_v58, %v14242_v4  ;;  %v6462_v62 = vadd.f32 %v6461_v39, %v6460_v25  ;;  %v6498_v9 = vrot.slane %v6497_v47, 2 }
 0x54f   :  { %10750 = vpow2.f32 %v6340_v63  ;;  %v6348_v15 = vmul.f32 1.442695, %v6262_v13  ;;  %v10739_v20 = vpop.eup %10738  ;;  %v6510_v53 = vrot.slane %v6509_v37, 4  ;;  %v6516_v1 = vsel %vm354_vm2, %v10737_v28, 0.0 }
 0x550   :  { %10752 = vpow2.f32 %v6342_v49  ;;  %v6346_v17 = vmul.f32 1.442695, %v6261_v31  ;;  %v10741_v51 = vpop.eup %10740  ;;  %v6482_v10 = vrot.slane %v6481_v55, 4  ;;  %v6504_v24 = vadd.f32 %v6503_v3, %v6502_v0 }
 0x551   :  { %v6524_v33 = vrot.slane %v6523_v43, 4  ;;  %10754 = vpow2.f32 %v6344_v35  ;;  %v6451_v34 = vrot.slane %v6450_v48, 1  ;;  %v6471_v19 = vadd.f32 %v6470_v27, %v6469_v50 }
 0x552   :  { %v6491_v58 = vrot.slane %v6490_v56, 2  ;;  %v6350_v25 = vmul.f32 1.442695, %v6263_v21  ;;  %v6463_v2 = vrot.slane %v6462_v62, 2  ;;  %v6474_v11 = vsel %vm354_vm2, %v10739_v20, 0.0 }
 0x553   :  { %v6517_v7 = vrot.slane %v6516_v1, 4  ;;  %10756 = vpow2.f32 %v6348_v15  ;;  %v10743_v46 = vpop.eup %10742  ;;  %v6499_v16 = vadd.f32 %v6498_v9, %v6497_v47  ;;  %v6511_v39 = vadd.f32 %v6510_v53, %v6509_v37 }
 0x554   :  { %v6530_v38 = vsel %vm354_vm2, %v10741_v51, 0.0  ;;  %10758 = vpow2.f32 %v6346_v17  ;;  %v14259_v29 = vpop.eup %10744  ;;  %v6459_v30 = vadd.f32 %v6458_v23, %v14225_v12  ;;  %v6483_v0 = vadd.f32 %v6482_v10, %v6481_v55 }
 0x555   :  { %15925 = vst [vmem:[#allocation95_spill] sm:$0xff] %v14259_v29  ;;  %v6505_v32 = vrot.slane %v6504_v24, 2  ;;  %v6525_v50 = vadd.f32 %v6524_v33, %v6523_v43  ;;  %v6472_v49 = vrot.slane %v6471_v19, 1  ;;  %v6475_v31 = vrot.slane %v6474_v11, 4 }
 0x556   :  { %v10747_v13 = vpop.eup %10746  ;;  %v6492_v28 = vadd.f32 %v6491_v58, %v6490_v56  ;;  %10760 = vpow2.f32 %v6350_v25  ;;  %v6464_v27 = vadd.f32 %v6463_v2, %v6462_v62  ;;  %v6518_v47 = vadd.f32 %v6517_v7, %v6516_v1 }
 0x557   :  { %v6537_v37 = vsel %vm354_vm2, %v10743_v46, 0.0  ;;  %v6531_v3 = vrot.slane %v6530_v38, 4  ;;  %10762 = vrcp.f32 %v14239_v45  ;;  %v6452_v35 = vadd.f32 %v6451_v34, %v6450_v48 }
 0x558   :  { %v6500_v21 = vrot.slane %v6499_v16, 1  ;;  %v6512_v12 = vrot.slane %v6511_v39, 2  ;;  %v10749_v23 = vpop.eup %10748  ;;  %v6484_v55 = vrot.slane %v6483_v0, 2  ;;  %v6506_v43 = vadd.f32 %v6505_v32, %v6504_v24 }
 0x559   :  { %v6526_v9 = vrot.slane %v6525_v50, 2  ;;  %v6544_v15 = vsel %vm354_vm2, %v10747_v13, 0.0  ;;  %v6473_v56 = vadd.f32 %v6472_v49, %v6471_v19  ;;  %v6476_v53 = vadd.f32 %v6475_v31, %v6474_v11 }
 0x55a   :  { %v6493_v62 = vrot.slane %v6492_v28, 1  ;;  %v6538_v1 = vrot.slane %v6537_v37, 4  ;;  %10764 = vrcp.f32 %v6459_v30  ;;  %v6465_v17 = vrot.slane %v6464_v27, 1 }
 0x55b   :  { %v6519_v51 = vrot.slane %v6518_v47, 2  ;;  %v6532_v10 = vadd.f32 %v6531_v3, %v6530_v38  ;;  %v6501_v48 = vadd.f32 %v6500_v21, %v6499_v16  ;;  %v6513_v33 = vadd.f32 %v6512_v12, %v6511_v39 }
 0x55c   :  { %v10751_v45 = vpop.eup %10750  ;;  %v6551_v34 = vsel %vm354_vm2, %v10749_v23, 0.0  ;;  %v6545_v58 = vrot.slane %v6544_v15, 4  ;;  %10766 = vrcp.f32 %v6452_v35  ;;  %v6485_v25 = vadd.f32 %v6484_v55, %v6483_v0 }
 0x55d   :  { %v10753_v24 = vpop.eup %10752  ;;  %v6507_v2 = vrot.slane %v6506_v43, 1  ;;  %v6527_v7 = vadd.f32 %v6526_v9, %v6525_v50  ;;  %10768 = vrcp.f32 %v6473_v56  ;;  %v6477_v11 = vrot.slane %v6476_v53, 2 }
 0x55e   :  { %v10755_v19 = vpop.eup %10754  ;;  %v6494_v30 = vadd.f32 %v6493_v62, %v6492_v28  ;;  %v6539_v32 = vadd.f32 %v6538_v1, %v6537_v37  ;;  %v6520_v13 = vadd.f32 %v6519_v51, %v6518_v47  ;;  %v6533_v38 = vrot.slane %v6532_v10, 2 }
 0x55f   :  { %v6552_v49 = vrot.slane %v6551_v34, 4  ;;  %v6558_v16 = vsel %vm354_vm2, %v10751_v45, 0.0  ;;  %v14273_v31 = vadd.f32 %v6465_v17, %v6464_v27  ;;  %10770 = vrcp.f32 %v6501_v48 }
 0x560   :  { %v10757_v39 = vpop.eup %10756  ;;  %v6514_v3 = vrot.slane %v6513_v33, 1  ;;  %v6546_v0 = vadd.f32 %v6545_v58, %v6544_v15  ;;  %v6508_v50 = vadd.f32 %v6507_v2, %v6506_v43  ;;  %v6528_v21 = vrot.slane %v6527_v7, 1 }
 0x561   :  { %v10759_v35 = vpop.eup %10758  ;;  %v6565_v12 = vsel %vm354_vm2, %v10753_v24, 0.0  ;;  %v6572_v23 = vsel %vm354_vm2, %v10755_v19, 0.0  ;;  %v6486_v47 = vrot.slane %v6485_v25, 1  ;;  %10772 = vrcp.f32 %v6494_v30 }
 0x562   :  { %v6540_v37 = vrot.slane %v6539_v32, 2  ;;  %v6559_v55 = vrot.slane %v6558_v16, 4  ;;  %v6521_v56 = vrot.slane %v6520_v13, 1  ;;  %v6534_v27 = vadd.f32 %v6533_v38, %v6532_v10 }
 0x563   :  { %v10761_v9 = vpop.eup %10760  ;;  %v6553_v62 = vadd.f32 %v6552_v49, %v6551_v34  ;;  %v6586_v1 = vsel %vm354_vm2, %v10757_v39, 0.0  ;;  %v6547_v15 = vrot.slane %v6546_v0, 2  ;;  %v6566_v17 = vrot.slane %v6565_v12, 4 }
 0x564   :  { %v6579_v43 = vsel %vm354_vm2, %v10759_v35, 0.0  ;;  %v6573_v51 = vrot.slane %v6572_v23, 4  ;;  %v14281_v45 = vpop.eup %10762  ;;  %v14283_v48 = vadd.f32 %v6477_v11, %v6476_v53  ;;  %v6515_v58 = vadd.f32 %v6514_v3, %v6513_v33 }
 0x565   :  { %15926 = vst [vmem:[#allocation32_spill] sm:$0xff] %v14281_v45  ;;  %10774 = vrcp.f32 %v6508_v50  ;;  %v6529_v24 = vadd.f32 %v6528_v21, %v6527_v7  ;;  %v6541_v19 = vadd.f32 %v6540_v37, %v6539_v32  ;;  %v6560_v30 = vadd.f32 %v6559_v55, %v6558_v16 }
 0x566   :  { %v6593_v10 = vsel %vm354_vm2, %v10761_v9, 0.0  ;;  %v6587_v34 = vrot.slane %v6586_v1, 4  ;;  %v6522_v38 = vadd.f32 %v6521_v56, %v6520_v13  ;;  %v6535_v49 = vrot.slane %v6534_v27, 1 }
 0x567   :  { %v6554_v39 = vrot.slane %v6553_v62, 2  ;;  %v6580_v6 = vrot.slane %v6579_v43, 4  ;;  %v14286_v29 = vpop.eup %10764  ;;  %v6548_v35 = vadd.f32 %v6547_v15, %v6546_v0  ;;  %v6567_v4 = vadd.f32 %v6566_v17, %v6565_v12 }
 0x568   :  { %v6574_v45 = vadd.f32 %v6573_v51, %v6572_v23  ;;  %v14290_v33 = vadd.f32 %v6486_v47, %v6485_v25  ;;  %10776 = vrcp.f32 %v6515_v58  ;;  %v6594_v7 = vrot.slane %v6593_v10, 4 }
 0x569   :  { %v14296_v13 = vpop.eup %10766  ;;  %10778 = vrcp.f32 %v6529_v24  ;;  %v6542_v16 = vrot.slane %v6541_v19, 1  ;;  %v6561_v3 = vrot.slane %v6560_v30, 2  ;;  %v6588_v0 = vadd.f32 %v6587_v34, %v6586_v1 }
 0x56a   :  { %v14298_v50 = vpop.eup %10768  ;;  %10780 = vrcp.f32 %v6522_v38  ;;  %v6536_v21 = vadd.f32 %v6535_v49, %v6534_v27  ;;  %v6581_v25 = vadd.f32 %v6580_v6, %v6579_v43  ;;  %v6549_v12 = vrot.slane %v6548_v35, 1  ;;  %v9496_v27 = vld [vmem:[%s15471_s6 + $0x70] sm:$0xff] }
 0x56b   :  { %v6568_v23 = vrot.slane %v6567_v4, 2  ;;  %v6575_v47 = vrot.slane %v6574_v45, 2  ;;  %v6543_v17 = vadd.f32 %v6542_v16, %v6541_v19  ;;  %v6562_v51 = vadd.f32 %v6561_v3, %v6560_v30 }
 0x56c   :  { %v10771_v55 = vpop.eup %10770  ;;  %v6589_v58 = vrot.slane %v6588_v0, 2  ;;  %10782 = vrcp.f32 %v6536_v21  ;;  %v6582_v24 = vrot.slane %v6581_v25, 2 }
 0x56d   :  { %v6569_v34 = vadd.f32 %v6568_v23, %v6567_v4  ;;  %10784 = vrcp.f32 %v6543_v17 }
 0x5bd   :  { %v14255_v18 = vpop.f32.mrf.mxu0 }
 0x5be   :  { %v5622_v11 = vadd.f32 %v14255_v18, %v13765_v5  ;;  %v6595_v18 = vadd.f32 %v6594_v7, %v6593_v10  ;;  %v6576_v10 = vadd.f32 %v6575_v47, %v6574_v45  ;;  %v6479_v7 = vrot.slane %v14283_v48, 1 }
 0x5bf   :  { %v14262_v63 = vpop.f32.mrf.mxu0  ;;  %v6953_v47 = vsel %vm6952_vm7, %v14162_v52, %v13990_v14 }
 0x5c0   :  { %v5617_v53 = vadd.f32 %v14262_v63, %v13765_v5  ;;  %v6555_v63 = vadd.f32 %v6554_v39, %v6553_v62  ;;  %v5656_v9 = vmax.f32 %v5622_v11, 0.0  ;;  %v10773_v62 = vpop.eup %10772  ;;  %v6596_v38 = vrot.slane %v6595_v18, 2 }
 0x5c1   :  { %v10775_v45 = vpop.eup %10774  ;;  %v6583_v11 = vadd.f32 %v6582_v24, %v6581_v25  ;;  %v6577_v16 = vrot.slane %v6576_v10, 1  ;;  %v15929_v24 = vld [vmem:[#allocation30_spill] sm:$0xff] }
 0x5c2   :  { %v5655_v37 = vmax.f32 %v5617_v53, 0.0  ;;  %v6556_v43 = vrot.slane %v6555_v63, 1  ;;  %v6962_v53 = vsel %vm6952_vm7, %v14195_v60, %v14080_v57  ;;  %v6570_v57 = vrot.slane %v6569_v34, 1  ;;  %v10777_v25 = vpop.eup %10776 }
 0x5c3   :  { %v14267_v20 = vpop.f32.mrf.mxu0  ;;  %v6597_v60 = vadd.f32 %v6596_v38, %v6595_v18  ;;  %v15933_v38 = vld [vmem:[#allocation32_spill] sm:$0xff] }
 0x5c4   :  { %v5632_v56 = vadd.f32 %v14267_v20, %v13765_v5  ;;  %10400 = vmatprep.mubr.msk.f32.mxu0 %vm354_vm2, %v5655_v37  ;;  %v6557_v4 = vadd.f32 %v6556_v43, %v6555_v63  ;;  %v10779_v37 = vpop.eup %10778  ;;  %v6571_v14 = vadd.f32 %v6570_v57, %v6569_v34 }
 0x5c5   :  { %v14270_v46 = vpop.f32.mrf.mxu0  ;;  %10401 = vmatmul.mubr.msk.f32.vlgmr.msra.gmra.mxu0 %vm354_vm2, %v5656_v9  ;;  %v6584_v9 = vrot.slane %v6583_v11, 1  ;;  %v10781_v18 = vpop.eup %10780  ;;  %v6598_v52 = vrot.slane %v6597_v60, 1 }
 0x5c6   :  { %v5627_v15 = vadd.f32 %v14270_v46, %v13765_v5  ;;  %v6550_v46 = vadd.f32 %v6549_v12, %v6548_v35  ;;  %10413 = vmatpush3.msra.mxu0 %v14129_v8  ;;  %v5658_v49 = vmax.f32 %v5632_v56, 0.0  ;;  %v6563_v8 = vrot.slane %v6562_v51, 1  ;;  %v10783_v17 = vpop.eup %10782 }
 0x5c7   :  { %10414 = vmatprep.subr.mxu0 %v9496_v27  ;;  %v6590_v35 = vadd.f32 %v6589_v58, %v6588_v0  ;;  %v6599_v58 = vadd.f32 %v6598_v52, %v6597_v60 }
 0x5c8   :  { %v5657_v20 = vmax.f32 %v5627_v15, 0.0  ;;  %10415 = vmatpush3.msra.mxu0 %v9496_v27  ;;  %10786 = vrcp.f32 %v6550_v46  ;;  %v6564_v12 = vadd.f32 %v6563_v8, %v6562_v51  ;;  %v15930_v46 = vld [vmem:[#allocation65_spill] sm:$0xff] }
 0x5c9   :  { %v6591_v23 = vrot.slane %v6590_v35, 1  ;;  %10788 = vrcp.f32 %v14273_v31 }
 0x5ca   :  { %10403 = vmatprep.mubr.msk.f32.mxu0 %vm354_vm2, %v5657_v20  ;;  %10790 = vrcp.f32 %v6557_v4  ;;  %v15936_v4 = vld [vmem:[#allocation63_spill] sm:$0xff] }
 0x5cb   :  { %10404 = vmatmul.mubr.msk.f32.gmra.mxu0 %vm354_vm2, %v5658_v49  ;;  %10792 = vrcp.f32 %v14290_v33  ;;  %v6969_v33 = vsel %vm6952_vm7, %v14235_v61, %v14115_v40  ;;  %v10785_v61 = vpop.eup %10784  ;;  %v15934_v49 = vld [vmem:[#allocation95_spill] sm:$0xff] }
 0x5cc   :  { %v14277_v28 = vpop.f32.mrf.mxu0  ;;  %10794 = vrcp.f32 %v6564_v12  ;;  %v6970_v40 = vsel %vm6954_vm8, %v14231_v22, %v6969_v33 }
 0x5cd   :  { %v5642_v39 = vadd.f32 %v14277_v28, %v13765_v5  ;;  %v6963_v28 = vsel %vm6954_vm8, %v14208_v59, %v6962_v53  ;;  %v7174_v59 = vsel %vm6944_vm3, %v10771_v55, %v10773_v62  ;;  %v6955_v55 = vsel %vm6954_vm8, %v14199_v54, %v6953_v47  ;;  %v15928_v62 = vld [vmem:[#allocation52_spill] sm:$0xff] }
 0x5ce   :  { %v5636_v2 = vpop.f32.mrf.mxu0  ;;  %v14331_v0 = vsel %vm6956_vm9, %v14213_v44, %v6963_v28  ;;  %v6480_v44 = vadd.f32 %v6479_v7, %v14283_v48  ;;  %v6592_v48 = vadd.f32 %v6591_v23, %v6590_v35  ;;  %v14350_v15 = vsel %vm6956_vm9, %v14175_v42, %v6955_v55  ;;  %v14362_v42 = vld [vmem:[%s15472_s7 + $0x10] sm:$0xff]  ;;  %v15935_v35 = vld [vmem:[#allocation64_spill] sm:$0xff] }
 0x5cf   :  { %v5637_v6 = vadd.f32 %v5636_v2, %v13765_v5  ;;  %v14315_v2 = vld [vmem:[%s15471_s6 + $0x88] sm:$0xff]  ;;  %v5660_v21 = vmax.f32 %v5642_v39, 0.0  ;;  %15927 = vst [vmem:[#allocation97_spill] sm:$0xff] %v14350_v15  ;;  %v435_v51 = vrot.slane %v14362_v42, %v11340_v41  ;;  %v14383_v20 = vsel %vm6956_vm9, %v15929_v24, %v6970_v40 }
 0x5d0   :  { %v14294_v32 = vpop.f32.mrf.mxu0  ;;  %10428 = vmatprep.subr.mxu0 %v14315_v2  ;;  %10796 = vrcp.f32 %v6480_v44  ;;  %v7167_v39 = vsel %vm6944_vm3, %v15934_v49, %v15933_v38  ;;  %v10315_v44 = vpop.f32.mrf.mxu1 }
 0x5d1   :  { %v5659_v19 = vmax.f32 %v5637_v6, 0.0  ;;  %v5652_v63 = vadd.f32 %v14294_v32, %v13765_v5  ;;  %v7175_v32 = vsel %vm6946_vm4, %v10775_v45, %v7174_v59  ;;  %v7168_v53 = vsel %vm6946_vm4, %v14296_v13, %v7167_v39 }
 0x5d2   :  { %v5646_v1 = vpop.f32.mrf.mxu0  ;;  %v7176_v56 = vsel %vm6948_vm5, %v10777_v25, %v7175_v32 }
 0x5d3   :  { %v5647_v30 = vadd.f32 %v5646_v1, %v13765_v5  ;;  %10406 = vmatprep.mubr.msk.f32.mxu0 %vm354_vm2, %v5659_v19  ;;  %v6578_v5 = vadd.f32 %v6577_v16, %v6576_v10  ;;  %v5662_v31 = vmax.f32 %v5652_v63, 0.0  ;;  %v6585_v1 = vadd.f32 %v6584_v9, %v6583_v11  ;;  %v15937_v63 = vld [vmem:[#allocation62_spill] sm:$0xff]  ;;  %v5224_v9 = vpop.f32.mrf.mxu1 }
 0x5d4   :  { %10407 = vmatmul.mubr.msk.f32.gmra.mxu0 %vm354_vm2, %v5660_v21  ;;  %v7177_v54 = vsel %vm6950_vm6, %v10781_v18, %v7176_v56  ;;  %v14386_v10 = vadd.f32 %v15930_v46, %v435_v51  ;;  %v7169_v11 = vsel %vm6948_vm5, %v14286_v29, %v7168_v53 }
 0x5d5   :  { %v5661_v3 = vmax.f32 %v5647_v30, 0.0  ;;  %10798 = vrcp.f32 %v6578_v5  ;;  %v7178_v6 = vsel %vm6952_vm7, %v10779_v37, %v7177_v54  ;;  %v10787_v22 = vpop.eup %10786  ;;  %v15932_v30 = vld [vmem:[#allocation59_spill] sm:$0xff]  ;;  %v10318_v18 = vpop.f32.mrf.mxu1 }
 0x5d6   :  { %10800 = vrcp.f32 %v6571_v14  ;;  %v7179_v27 = vsel %vm6954_vm8, %v10783_v17, %v7178_v6  ;;  %v10789_v19 = vpop.eup %10788  ;;  %v15944_v17 = vld [vmem:[#allocation93_spill] sm:$0xff] }
 0x5d7   :  { %10409 = vmatprep.mubr.msk.f32.mxu0 %vm354_vm2, %v5661_v3  ;;  %10802 = vrcp.f32 %v6592_v48  ;;  %v14379_v43 = vsel %vm6956_vm9, %v10785_v61, %v7179_v27  ;;  %v7170_v16 = vsel %vm6950_vm6, %v10789_v19, %v7169_v11  ;;  %v5234_v5 = vpop.f32.mrf.mxu1  ;;  %v14432_v54 = vadd.f32 %v10315_v44, %v15944_v17 }
 0x5d8   :  { %10410 = vmatmul.mubr.msk.f32.gmra.mxu0 %vm354_vm2, %v5662_v31  ;;  %10804 = vrcp.f32 %v6585_v1  ;;  %v7171_v57 = vsel %vm6952_vm7, %v14298_v50, %v7170_v16  ;;  %v14437_v51 = vadd.f32 %v5224_v9, %v15944_v17  ;;  %v14445_v6 = vadd.f32 %v5234_v5, %v15944_v17 }
 0x5d9   :  { %10416 = vmatprep.mubr.msk.f32.mxu0 %vm354_vm2, %v12128_v26  ;;  %v9506_v26 = vld [vmem:[%s15471_s6 + $0x80] sm:$0xff]  ;;  %10806 = vrcp.f32 %v6599_v58  ;;  %v10321_v32 = vpop.f32.mrf.mxu1  ;;  %v14440_v58 = vadd.f32 %v10318_v18, %v15944_v17 }
 0x5da   :  { %v5960_v61 = vsel %vm354_vm2, %v14437_v51, -inf  ;;  %v14454_v24 = vadd.f32 %v10321_v32, %v15944_v17  ;;  %v5974_v46 = vsel %vm354_vm2, %v14445_v6, -inf }
 0x5db   :  { %v5244_v55 = vpop.f32.mrf.mxu1 }
 0x5dc   :  { %10417 = vmatmul.mubr.msk.f32.vlgmr.msra.gmra.mxu0 %vm354_vm2, %v12141_v36  ;;  %v15931_v36 = vld [vmem:[#allocation58_spill] sm:$0xff]  ;;  %v5995_v38 = vsel %vm354_vm2, %v14454_v24, -inf }
 0x5dd   :  { %10429 = vmatpush3.msra.mxu0 %v14315_v2  ;;  %10419 = vmatprep.mubr.msk.f32.mxu0 %vm354_vm2, %v15928_v62  ;;  %v10791_v2 = vpop.eup %10790  ;;  %v10324_v14 = vpop.f32.mrf.mxu1  ;;  %v5981_v62 = vsel %vm354_vm2, %v14440_v58, -inf }
 0x5de   :  { %10430 = vmatprep.subr.mxu0 %v9506_v26  ;;  %v10793_v34 = vpop.eup %10792  ;;  %v7181_v45 = vsel %vm6944_vm3, %v10791_v2, %v10787_v22  ;;  %v5961_v22 = vrot.slane %v5960_v61, 4  ;;  %v14466_v49 = vadd.f32 %v10324_v14, %v15944_v17 }
 0x5df   :  { %10431 = vmatpush3.msra.mxu0 %v9506_v26  ;;  %v10795_v8 = vpop.eup %10794  ;;  %v5254_v52 = vpop.f32.mrf.mxu1  ;;  %v5967_v26 = vsel %vm354_vm2, %v14432_v54, -inf }
 0x5e0   :  { %10444 = vmatprep.subr.msk.mxu0 %vm354_vm2, %v14386_v10  ;;  %10420 = vmatmul.mubr.msk.f32.gmra.mxu0 %vm354_vm2, %v15931_v36  ;;  %v10797_v7 = vpop.eup %10796  ;;  %v7182_v60 = vsel %vm6946_vm4, %v10795_v8, %v7181_v45  ;;  %v5968_v27 = vrot.slane %v5967_v26, 4  ;;  %v14459_v36 = vadd.f32 %v5244_v55, %v15944_v17  ;;  %v5962_v39 = vmax.f32 %v5960_v61, %v5961_v22 }
 0x5e1   :  { %10422 = vmatprep.mubr.msk.f32.mxu0 %vm354_vm2, %v15932_v30  ;;  %v7172_v13 = vsel %vm6954_vm8, %v10797_v7, %v7171_v57  ;;  %v14423_v31 = vpop.f32.mrf.mxu1  ;;  %v5982_v30 = vrot.slane %v5981_v62, 4  ;;  %v14473_v53 = vadd.f32 %v5254_v52, %v15944_v17  ;;  %v6009_v16 = vsel %vm354_vm2, %v14466_v49, -inf }
 0x5e2   :  { %v10799_v28 = vpop.eup %10798  ;;  %v14415_v29 = vsel %vm6956_vm9, %v10793_v34, %v7172_v13  ;;  %15940 = vst [vmem:[#allocation41_spill] sm:$0xff] %v14423_v31  ;;  %v5969_v2 = vmax.f32 %v5967_v26, %v5968_v27  ;;  %v5975_v34 = vrot.slane %v5974_v46, 4  ;;  %v5988_v45 = vsel %vm354_vm2, %v14459_v36, -inf }
 0x5e3   :  { %v10801_v3 = vpop.eup %10800  ;;  %15938 = vst [vmem:[#allocation34_spill] sm:$0xff] %v14415_v29  ;;  %v14425_v48 = vpop.f32.mrf.mxu1 }
 0x5e4   :  { %10423 = vmatmul.mubr.msk.f32.gmra.mxu0 %vm354_vm2, %v15935_v35  ;;  %v10803_v21 = vpop.eup %10802  ;;  %v7183_v25 = vsel %vm6948_vm5, %v10801_v3, %v7182_v60  ;;  %15941 = vst [vmem:[#allocation54_spill] sm:$0xff] %v14425_v48  ;;  %v5983_v35 = vmax.f32 %v5981_v62, %v5982_v30  ;;  %v5970_v7 = vrot.slane %v5969_v2, 2  ;;  %v5976_v11 = vmax.f32 %v5974_v46, %v5975_v34 }
 0x5e5   :  { %10425 = vmatprep.mubr.msk.f32.mxu0 %vm354_vm2, %v15936_v4  ;;  %v10805_v12 = vpop.eup %10804  ;;  %v7184_v23 = vsel %vm6950_vm6, %v10799_v28, %v7183_v25  ;;  %v14427_v56 = vpop.f32.mrf.mxu1  ;;  %v5996_v4 = vrot.slane %v5995_v38, 4  ;;  %v5989_v28 = vrot.slane %v5988_v45, 4  ;;  %v5963_v3 = vrot.slane %v5962_v39, 2 }
 0x5e6   :  { %v7185_v59 = vsel %vm6952_vm7, %v10805_v12, %v7184_v23  ;;  %v10807_v47 = vpop.eup %10806  ;;  %15942 = vst [vmem:[#allocation27_spill] sm:$0xff] %v14427_v56  ;;  %v5984_v60 = vrot.slane %v5983_v35, 2  ;;  %v6010_v25 = vrot.slane %v6009_v16, 4  ;;  %v5977_v12 = vrot.slane %v5976_v11, 2 }
 0x5e7   :  { %v7186_v50 = vsel %vm6954_vm8, %v10803_v21, %v7185_v59  ;;  %v14429_v1 = vpop.f32.mrf.mxu1  ;;  %v6002_v21 = vsel %vm354_vm2, %v14473_v53, -inf  ;;  %v5997_v13 = vmax.f32 %v5995_v38, %v5996_v4  ;;  %v5990_v23 = vmax.f32 %v5988_v45, %v5989_v28 }
 0x5e8   :  { %10426 = vmatmul.mubr.msk.f32.gmra.mxu0 %vm354_vm2, %v15937_v63  ;;  %v14421_v37 = vsel %vm6956_vm9, %v10807_v47, %v7186_v50  ;;  %15943 = vst [vmem:[#allocation100_spill] sm:$0xff] %v14429_v1  ;;  %v5971_v63 = vmax.f32 %v5969_v2, %v5970_v7  ;;  %v5964_v59 = vmax.f32 %v5962_v39, %v5963_v3  ;;  %v6003_v47 = vrot.slane %v6002_v21, 4 }
 0x5e9   :  { %15939 = vst [vmem:[#allocation29_spill] sm:$0xff] %v14421_v37  ;;  %v14434_v33 = vpop.f32.mrf.mxu1  ;;  %v5985_v44 = vmax.f32 %v5983_v35, %v5984_v60  ;;  %v5998_v18 = vrot.slane %v5997_v13, 2  ;;  %v6011_v5 = vmax.f32 %v6009_v16, %v6010_v25  ;;  %v5978_v32 = vmax.f32 %v5976_v11, %v5977_v12 }
 0x5ea   :  { %15945 = vst [vmem:[#allocation45_spill] sm:$0xff] %v14434_v33  ;;  %v5972_v9 = vrot.slane %v5971_v63, 1  ;;  %v5991_v55 = vrot.slane %v5990_v23, 2  ;;  %v5965_v14 = vrot.slane %v5964_v59, 1  ;;  %v6004_v52 = vmax.f32 %v6002_v21, %v6003_v47  ;;  %v15956_v33 = vld [vmem:[#allocation20_spill] sm:$0xff] }
 0x5eb   :  { %v14447_v40 = vpop.f32.mrf.mxu1  ;;  %v5986_v61 = vrot.slane %v5985_v44, 1  ;;  %v5999_v62 = vmax.f32 %v5997_v13, %v5998_v18  ;;  %v6012_v22 = vrot.slane %v6011_v5, 2  ;;  %v5979_v46 = vrot.slane %v5978_v32, 1 }
 0x5ec   :  { %15946 = vst [vmem:[#allocation36_spill] sm:$0xff] %v14447_v40  ;;  %v14485_v27 = vmax.f32 %v5971_v63, %v5972_v9  ;;  %v5992_v30 = vmax.f32 %v5990_v23, %v5991_v55  ;;  %v14487_v2 = vmax.f32 %v5964_v59, %v5965_v14  ;;  %v6005_v34 = vrot.slane %v6004_v52, 2 }
 0x5ed   :  { %v14461_v19 = vpop.f32.mrf.mxu1  ;;  %v14491_v39 = vmax.f32 %v5985_v44, %v5986_v61  ;;  %v6000_v35 = vrot.slane %v5999_v62, 1  ;;  %v6013_v7 = vmax.f32 %v6011_v5, %v6012_v22  ;;  %v14495_v4 = vmax.f32 %v5978_v32, %v5979_v46 }
 0x5ee   :  { %15947 = vst [vmem:[#allocation56_spill] sm:$0xff] %v14461_v19  ;;  %v6265_v45 = vsub.f32 %v14432_v54, %v14485_v27  ;;  %v5993_v11 = vrot.slane %v5992_v30, 1  ;;  %v6264_v28 = vsub.f32 %v14437_v51, %v14487_v2  ;;  %v6006_v16 = vmax.f32 %v6004_v52, %v6005_v34 }
 0x5ef   :  { %v14470_v8 = vpop.f32.mrf.mxu1  ;;  %v6267_v60 = vsub.f32 %v14440_v58, %v14491_v39  ;;  %v14503_v63 = vmax.f32 %v5999_v62, %v6000_v35  ;;  %v6014_v13 = vrot.slane %v6013_v7, 1  ;;  %v6266_v54 = vsub.f32 %v14445_v6, %v14495_v4 }
 0x5f0   :  { %15948 = vst [vmem:[#allocation31_spill] sm:$0xff] %v14470_v8  ;;  %v6354_v21 = vmul.f32 1.442695, %v6265_v45  ;;  %v14507_v25 = vmax.f32 %v5992_v30, %v5993_v11  ;;  %v6352_v12 = vmul.f32 1.442695, %v6264_v28  ;;  %v6007_v23 = vrot.slane %v6006_v16, 1 }
 0x5f1   :  { %v14477_v57 = vpop.f32.mrf.mxu1  ;;  %v6358_v51 = vmul.f32 1.442695, %v6267_v60  ;;  %v6269_v47 = vsub.f32 %v14454_v24, %v14503_v63  ;;  %v14513_v44 = vmax.f32 %v6013_v7, %v6014_v13  ;;  %v6356_v58 = vmul.f32 1.442695, %v6266_v54 }
 0x5f2   :  { %10808 = vpow2.f32 %v6354_v21  ;;  %v6268_v9 = vsub.f32 %v14459_v36, %v14507_v25  ;;  %v14517_v18 = vmax.f32 %v6006_v16, %v6007_v23  ;;  %v14538_v11 = vadd.f32 %v14477_v57, %v15944_v17 }
 0x5f3   :  { %v14481_v50 = vpop.f32.mrf.mxu1  ;;  %10810 = vpow2.f32 %v6352_v12  ;;  %v6362_v5 = vmul.f32 1.442695, %v6269_v47  ;;  %v6271_v32 = vsub.f32 %v14466_v49, %v14513_v44 }
 0x5f4   :  { %10812 = vpow2.f32 %v6358_v51  ;;  %v6360_v55 = vmul.f32 1.442695, %v6268_v9  ;;  %v6270_v24 = vsub.f32 %v14473_v53, %v14517_v18  ;;  %v14543_v60 = vadd.f32 %v14481_v50, %v15944_v17 }
 0x5f5   :  { %v14483_v26 = vpop.f32.mrf.mxu1  ;;  %10814 = vpow2.f32 %v6356_v58  ;;  %v6366_v52 = vmul.f32 1.442695, %v6271_v32  ;;  %v6079_v57 = vsel %vm354_vm2, %v14538_v11, -inf }
 0x5f6   :  { %10816 = vpow2.f32 %v6362_v5  ;;  %v6364_v36 = vmul.f32 1.442695, %v6270_v24  ;;  %v14547_v12 = vadd.f32 %v14483_v26, %v15944_v17  ;;  %v6072_v32 = vsel %vm354_vm2, %v14543_v60, -inf }
 0x5f7   :  { %v14489_v38 = vpop.f32.mrf.mxu1  ;;  %10818 = vpow2.f32 %v6360_v55  ;;  %v6080_v24 = vrot.slane %v6079_v57, 4 }
 0x5f8   :  { %10820 = vpow2.f32 %v6366_v52  ;;  %v6093_v52 = vsel %vm354_vm2, %v14547_v12, -inf }
 0x5f9   :  { %v14499_v3 = vpop.f32.mrf.mxu1  ;;  %10822 = vpow2.f32 %v6364_v36  ;;  %v6081_v41 = vmax.f32 %v6079_v57, %v6080_v24  ;;  %v14582_v57 = vld [vmem:[%s15472_s7 + $0x8] sm:$0xff] }
 0x5fb   :  { %v14509_v59 = vpop.f32.mrf.mxu1 }
 0x5fd   :  { %v14519_v6 = vpop.f32.mrf.mxu1 }
 0x5ff   :  { %v14525_v14 = vpop.f32.mrf.mxu1  ;;  %v10809_v62 = vpop.eup %10808 }
 0x600   :  { %v10811_v46 = vpop.eup %10810  ;;  %v6607_v30 = vsel %vm354_vm2, %v10809_v62, 0.0 }
 0x601   :  { %v14527_v61 = vpop.f32.mrf.mxu1  ;;  %v10813_v49 = vpop.eup %10812  ;;  %v6608_v53 = vrot.slane %v6607_v30, 4  ;;  %v6600_v35 = vsel %vm354_vm2, %v10811_v46, 0.0 }
 0x602   :  { %15949 = vst [vmem:[#allocation33_spill] sm:$0xff] %v14527_v61  ;;  %v10815_v34 = vpop.eup %10814  ;;  %v6621_v7 = vsel %vm354_vm2, %v10813_v49, 0.0  ;;  %v6601_v13 = vrot.slane %v6600_v35, 4  ;;  %v14563_v49 = vadd.f32 %v14489_v38, %v15944_v17 }
 0x603   :  { %v14529_v22 = vpop.f32.mrf.mxu1  ;;  %v10817_v28 = vpop.eup %10816  ;;  %v6614_v16 = vsel %vm354_vm2, %v10815_v34, 0.0  ;;  %v6622_v54 = vrot.slane %v6621_v7, 4  ;;  %v6609_v51 = vadd.f32 %v6608_v53, %v6607_v30 }
 0x604   :  { %15950 = vst [vmem:[#allocation40_spill] sm:$0xff] %v14529_v22  ;;  %v10819_v21 = vpop.eup %10818  ;;  %v6615_v47 = vrot.slane %v6614_v16, 4  ;;  %v6635_v58 = vsel %vm354_vm2, %v10817_v28, 0.0  ;;  %v6602_v55 = vadd.f32 %v6601_v13, %v6600_v35  ;;  %v6073_v28 = vrot.slane %v6072_v32, 4 }
 0x605   :  { %v14532_v45 = vpop.f32.mrf.mxu1  ;;  %v10821_v50 = vpop.eup %10820  ;;  %v6628_v5 = vsel %vm354_vm2, %v10819_v21, 0.0  ;;  %v6623_v26 = vadd.f32 %v6622_v54, %v6621_v7  ;;  %v6610_v62 = vrot.slane %v6609_v51, 2  ;;  %v6636_v46 = vrot.slane %v6635_v58, 4 }
 0x606   :  { %15951 = vst [vmem:[#allocation38_spill] sm:$0xff] %v14532_v45  ;;  %v10823_v36 = vpop.eup %10822  ;;  %v6616_v30 = vadd.f32 %v6615_v47, %v6614_v16  ;;  %v6629_v34 = vrot.slane %v6628_v5, 4  ;;  %v6649_v53 = vsel %vm354_vm2, %v10821_v50, 0.0  ;;  %v6094_v35 = vrot.slane %v6093_v52, 4 }
 0x607   :  { %v14549_v23 = vpop.f32.mrf.mxu1  ;;  %v6603_v7 = vrot.slane %v6602_v55, 2  ;;  %v6624_v13 = vrot.slane %v6623_v26, 2  ;;  %v6642_v54 = vsel %vm354_vm2, %v10823_v36, 0.0  ;;  %v6611_v45 = vadd.f32 %v6610_v62, %v6609_v51  ;;  %v15957_v51 = vld [vmem:[#allocation21_spill] sm:$0xff] }
 0x608   :  { %15952 = vst [vmem:[#allocation46_spill] sm:$0xff] %v14549_v23  ;;  %v6637_v19 = vadd.f32 %v6636_v46, %v6635_v58  ;;  %v6650_v8 = vrot.slane %v6649_v53, 4  ;;  %v6086_v38 = vsel %vm354_vm2, %v14563_v49, -inf  ;;  %v6617_v16 = vrot.slane %v6616_v30, 2 }
 0x609   :  { %v14554_v9 = vpop.f32.mrf.mxu1  ;;  %v6630_v47 = vadd.f32 %v6629_v34, %v6628_v5  ;;  %v6074_v50 = vmax.f32 %v6072_v32, %v6073_v28  ;;  %v593_v23 = vrot.slane %v14362_v42, %v15956_v33  ;;  %v14586_v58 = vrot.slane %v14582_v57, %v15957_v51 }
 0x60a   :  { %15953 = vst [vmem:[#allocation60_spill] sm:$0xff] %v14554_v9  ;;  %v6643_v24 = vrot.slane %v6642_v54, 4  ;;  %v6095_v36 = vmax.f32 %v6093_v52, %v6094_v35  ;;  %v6604_v5 = vadd.f32 %v6603_v7, %v6602_v55  ;;  %v6625_v32 = vadd.f32 %v6624_v13, %v6623_v26  ;;  %v15960_v55 = vld [vmem:[#allocation75_spill] sm:$0xff] }
 0x60b   :  { %v14566_v21 = vpop.f32.mrf.mxu1  ;;  %15958 = vst [vmem:[#allocation50_spill] sm:$0xff] %v14586_v58  ;;  %v6082_v62 = vrot.slane %v6081_v41, 2  ;;  %v6087_v46 = vrot.slane %v6086_v38, 4  ;;  %v6612_v34 = vrot.slane %v6611_v45, 1  ;;  %v6638_v28 = vrot.slane %v6637_v19, 2  ;;  %v15961_v35 = vld [vmem:[#allocation79_spill] sm:$0xff] }
 0x60c   :  { %15954 = vst [vmem:[#allocation48_spill] sm:$0xff] %v14566_v21  ;;  %v14575_v21 = vadd.f32 %v14499_v3, %v15944_v17  ;;  %v6651_v42 = vadd.f32 %v6650_v8, %v6649_v53  ;;  %v14592_v33 = vadd.f32 %v14509_v59, %v15944_v17  ;;  %v6631_v22 = vrot.slane %v6630_v47, 2 }
 0x60d   :  { %v14569_v9 = vpop.f32.mrf.mxu1  ;;  %v6075_v61 = vrot.slane %v6074_v50, 2  ;;  %v14597_v26 = vadd.f32 %v15960_v55, %v593_v23  ;;  %v14601_v7 = vadd.f32 %v15961_v35, %v14586_v58  ;;  %v6644_v13 = vadd.f32 %v6643_v24, %v6642_v54 }
 0x60e   :  { %15955 = vst [vmem:[#allocation35_spill] sm:$0xff] %v14569_v9  ;;  %v6618_v9 = vadd.f32 %v6617_v16, %v6616_v30  ;;  %v6107_v51 = vsel %vm354_vm2, %v14575_v21, -inf  ;;  %v6096_v8 = vrot.slane %v6095_v36, 2  ;;  %v6605_v53 = vrot.slane %v6604_v5, 1 }
 0x60f   :  { %v14588_v3 = vpop.f32.mrf.mxu1  ;;  %v6083_v59 = vmax.f32 %v6081_v41, %v6082_v62  ;;  %v6088_v40 = vmax.f32 %v6086_v38, %v6087_v46  ;;  %v6639_v30 = vadd.f32 %v6638_v28, %v6637_v19  ;;  %v6652_v16 = vrot.slane %v6651_v42, 2 }
 0x610   :  { %15959 = vst [vmem:[#allocation43_spill] sm:$0xff] %v14588_v3  ;;  %v6626_v3 = vrot.slane %v6625_v32, 1  ;;  %v6108_v1 = vrot.slane %v6107_v51, 4  ;;  %v6100_v56 = vsel %vm354_vm2, %v14592_v33, -inf  ;;  %v6613_v48 = vadd.f32 %v6612_v34, %v6611_v45 }
 0x611   :  { %v10363_v52 = vpop.f32.mrf.mxu1  ;;  %v6619_v31 = vrot.slane %v6618_v9, 1  ;;  %v6632_v23 = vadd.f32 %v6631_v22, %v6630_v47  ;;  %v6076_v55 = vmax.f32 %v6074_v50, %v6075_v61  ;;  %v6972_v54 = vsel %vm6944_vm3, %v14485_v27, %v14487_v2 }
 0x612   :  { %v6645_v24 = vrot.slane %v6644_v13, 2  ;;  %v6097_v35 = vmax.f32 %v6095_v36, %v6096_v8  ;;  %v14610_v41 = vadd.f32 %v14519_v6, %v15944_v17  ;;  %v6606_v19 = vadd.f32 %v6605_v53, %v6604_v5 }
 0x613   :  { %v5384_v37 = vpop.f32.mrf.mxu1  ;;  %v6084_v38 = vrot.slane %v6083_v59, 1  ;;  %v6089_v62 = vrot.slane %v6088_v40, 2  ;;  %v6101_v46 = vrot.slane %v6100_v56, 4  ;;  %v6627_v45 = vadd.f32 %v6626_v3, %v6625_v32 }
 0x614   :  { %v6640_v34 = vrot.slane %v6639_v30, 1  ;;  %v6653_v22 = vadd.f32 %v6652_v16, %v6651_v42  ;;  %v6109_v61 = vmax.f32 %v6107_v51, %v6108_v1  ;;  %10824 = vrcp.f32 %v6613_v48 }
 0x615   :  { %v10366_v28 = vpop.f32.mrf.mxu1  ;;  %v6620_v47 = vadd.f32 %v6619_v31, %v6618_v9  ;;  %v6633_v50 = vrot.slane %v6632_v23, 1  ;;  %v6077_v58 = vrot.slane %v6076_v55, 1  ;;  %v6646_v27 = vadd.f32 %v6645_v24, %v6644_v13 }
 0x616   :  { %v6098_v2 = vrot.slane %v6097_v35, 1  ;;  %v6121_v36 = vsel %vm354_vm2, %v14610_v41, -inf  ;;  %v14615_v6 = vadd.f32 %v10363_v52, %v15944_v17  ;;  %10826 = vrcp.f32 %v6606_v19 }
 0x617   :  { %v14617_v5 = vmax.f32 %v6083_v59, %v6084_v38  ;;  %v6090_v8 = vmax.f32 %v6088_v40, %v6089_v62  ;;  %v6102_v32 = vmax.f32 %v6100_v56, %v6101_v46  ;;  %v5394_v3 = vpop.f32.mrf.mxu1  ;;  %10828 = vrcp.f32 %v6627_v45 }
 0x618   :  { %v6641_v1 = vadd.f32 %v6640_v34, %v6639_v30  ;;  %v6654_v48 = vrot.slane %v6653_v22, 1  ;;  %v6110_v31 = vrot.slane %v6109_v61, 2  ;;  %v6973_v9 = vsel %vm6946_vm4, %v14495_v4, %v6972_v54 }
 0x619   :  { %10830 = vrcp.f32 %v6620_v47  ;;  %v14621_v42 = vmax.f32 %v6076_v55, %v6077_v58  ;;  %v6122_v51 = vrot.slane %v6121_v36, 4  ;;  %v10369_v13 = vpop.f32.mrf.mxu1  ;;  %v6634_v52 = vadd.f32 %v6633_v50, %v6632_v23 }
 0x61a   :  { %v6647_v53 = vrot.slane %v6646_v27, 1  ;;  %v14623_v16 = vmax.f32 %v6097_v35, %v6098_v2  ;;  %v6191_v56 = vsel %vm354_vm2, %v14615_v6, -inf  ;;  %v6281_v40 = vsub.f32 %v14538_v11, %v14617_v5 }
 0x61b   :  { %v6091_v59 = vrot.slane %v6090_v8, 1  ;;  %v6103_v30 = vrot.slane %v6102_v32, 2  ;;  %v14631_v4 = vadd.f32 %v14525_v14, %v15944_v17  ;;  %10832 = vrcp.f32 %v6641_v1  ;;  %v5404_v11 = vpop.f32.mrf.mxu1 }
 0x61c   :  { %v6655_v58 = vadd.f32 %v6654_v48, %v6653_v22  ;;  %v6111_v55 = vmax.f32 %v6109_v61, %v6110_v31  ;;  %v14634_v23 = vadd.f32 %v5384_v37, %v15944_v17  ;;  %v6280_v54 = vsub.f32 %v14543_v60, %v14621_v42 }
 0x61d   :  { %v6123_v24 = vmax.f32 %v6121_v36, %v6122_v51  ;;  %v6192_v35 = vrot.slane %v6191_v56, 4  ;;  %v14639_v19 = vadd.f32 %v5394_v3, %v15944_v17  ;;  %v6974_v38 = vsel %vm6948_vm5, %v14491_v39, %v6973_v9  ;;  %v10372_v34 = vpop.f32.mrf.mxu1 }
 0x61e   :  { %10834 = vrcp.f32 %v6634_v52  ;;  %v6648_v14 = vadd.f32 %v6647_v53, %v6646_v27  ;;  %v6283_v62 = vsub.f32 %v14547_v12, %v14623_v16  ;;  %v6386_v46 = vmul.f32 1.442695, %v6281_v40 }
 0x61f   :  { %v14645_v37 = vmax.f32 %v6090_v8, %v6091_v59  ;;  %v6104_v45 = vmax.f32 %v6102_v32, %v6103_v30  ;;  %v6114_v60 = vsel %vm354_vm2, %v14631_v4, -inf  ;;  %10836 = vrcp.f32 %v6655_v58  ;;  %v5414_v48 = vpop.f32.mrf.mxu1 }
 0x620   :  { %v6112_v22 = vrot.slane %v6111_v55, 1  ;;  %v6184_v61 = vsel %vm354_vm2, %v14634_v23, -inf  ;;  %v14652_v39 = vadd.f32 %v10366_v28, %v15944_v17  ;;  %v6384_v47 = vmul.f32 1.442695, %v6280_v54 }
 0x621   :  { %v6124_v50 = vrot.slane %v6123_v24, 2  ;;  %v6193_v27 = vmax.f32 %v6191_v56, %v6192_v35  ;;  %v6198_v12 = vsel %vm354_vm2, %v14639_v19, -inf  ;;  %v14656_v2 = vpop.eup %10824  ;;  %10838 = vrcp.f32 %v6648_v14 }
 0x622   :  { %v6390_v36 = vmul.f32 1.442695, %v6283_v62  ;;  %v6115_v8 = vrot.slane %v6114_v60, 4  ;;  %v14659_v32 = vadd.f32 %v5404_v11, %v15944_v17  ;;  %10840 = vpow2.f32 %v6386_v46 }
 0x623   :  { %v6282_v3 = vsub.f32 %v14563_v49, %v14645_v37  ;;  %v6105_v28 = vrot.slane %v6104_v45, 1  ;;  %v6185_v1 = vrot.slane %v6184_v61, 4  ;;  %v14663_v31 = vpop.eup %10826  ;;  %v14665_v9 = vmax.f32 %v6111_v55, %v6112_v22 }
 0x624   :  { %v6205_v51 = vsel %vm354_vm2, %v14652_v39, -inf  ;;  %v6199_v52 = vrot.slane %v6198_v12, 4  ;;  %v14670_v53 = vadd.f32 %v10369_v13, %v15944_v17  ;;  %v14672_v56 = vpop.eup %10828  ;;  %v6975_v40 = vsel %vm6950_vm6, %v14507_v25, %v6974_v38 }
 0x625   :  { %15962 = vst [vmem:[#allocation49_spill] sm:$0xff] %v14665_v9  ;;  %10842 = vpow2.f32 %v6384_v47  ;;  %v6125_v49 = vmax.f32 %v6123_v24, %v6124_v50  ;;  %v6194_v59 = vrot.slane %v6193_v27, 2  ;;  %v6116_v58 = vmax.f32 %v6114_v60, %v6115_v8 }
 0x626   :  { %v14676_v30 = vpop.eup %10830  ;;  %10844 = vpow2.f32 %v6390_v36  ;;  %v6212_v55 = vsel %vm354_vm2, %v14659_v32, -inf  ;;  %v14681_v54 = vadd.f32 %v5414_v48, %v15944_v17  ;;  %v14683_v13 = vmul.f32 1.442695, %v6282_v3 }
 0x627   :  { %v14685_v35 = vmax.f32 %v6104_v45, %v6105_v28  ;;  %v6186_v11 = vmax.f32 %v6184_v61, %v6185_v1  ;;  %v6206_v14 = vrot.slane %v6205_v51, 4  ;;  %v6285_v24 = vsub.f32 %v14575_v21, %v14665_v9 }
 0x628   :  { %v6200_v38 = vmax.f32 %v6198_v12, %v6199_v52  ;;  %v6219_v62 = vsel %vm354_vm2, %v14670_v53, -inf  ;;  %v14692_v60 = vpop.eup %10832  ;;  %v6126_v22 = vrot.slane %v6125_v49, 1  ;;  %v6195_v47 = vmax.f32 %v6193_v27, %v6194_v59 }
 0x629   :  { %v6213_v50 = vrot.slane %v6212_v55, 4  ;;  %v6976_v45 = vsel %vm6952_vm7, %v14503_v63, %v6975_v40  ;;  %v6226_v61 = vsel %vm354_vm2, %v14681_v54, -inf  ;;  %v6187_v28 = vrot.slane %v6186_v11, 2 }
 0x62a   :  { %v6977_v8 = vsel %vm6954_vm8, %v14517_v18, %v6976_v45  ;;  %v6207_v27 = vmax.f32 %v6205_v51, %v6206_v14  ;;  %v6220_v1 = vrot.slane %v6219_v62, 4  ;;  %v14707_v48 = vadd.f32 %v10372_v34, %v15944_v17 }
 0x62b   :  { %v14704_v3 = vpop.eup %10834  ;;  %v6201_v52 = vrot.slane %v6200_v38, 2  ;;  %v6214_v18 = vmax.f32 %v6212_v55, %v6213_v50  ;;  %v6978_v51 = vsel %vm6956_vm9, %v14513_v44, %v6977_v8  ;;  %v6196_v45 = vrot.slane %v6195_v47, 1 }
 0x62c   :  { %v6208_v15 = vrot.slane %v6207_v27, 2  ;;  %v6284_v44 = vsub.f32 %v14592_v33, %v14685_v35 }
 0x62d   :  { %v6202_v8 = vmax.f32 %v6200_v38, %v6201_v52 }
 0x62e   :  { %v6209_v52 = vmax.f32 %v6207_v27, %v6208_v15  ;;  %v15965_v27 = vld [vmem:[#allocation17_spill] sm:$0xff] }
 0x685   :  { %v10402_v25 = vpop.f32.mrf.mxu0 }
 0x686   :  { %v5759_v46 = vadd.f32 %v10402_v25, %v15944_v17  ;;  %v14712_v25 = vpop.eup %10836 }
 0x687   :  { %v5753_v36 = vpop.f32.mrf.mxu0 }
 0x688   :  { %v7016_v21 = vsub.f32 %v5759_v46, %v14331_v0  ;;  %v14700_v12 = vadd.f32 %v5753_v36, %v15944_v17  ;;  %v6117_v46 = vrot.slane %v6116_v58, 2  ;;  %v6227_v36 = vrot.slane %v6226_v61, 4 }
 0x689   :  { %v6188_v0 = vmax.f32 %v6186_v11, %v6187_v28  ;;  %v6215_v11 = vrot.slane %v6214_v18, 2 }
 0x68a   :  { %15963 = vst [vmem:[#allocation53_spill] sm:$0xff] %v14700_v12  ;;  %v7025_v40 = vmul.f32 1.442695, %v7016_v21  ;;  %v14719_v21 = vpop.eup %10838  ;;  %v6233_v12 = vsel %vm354_vm2, %v14707_v48, -inf  ;;  %v6228_v28 = vmax.f32 %v6226_v61, %v6227_v36  ;;  %v6203_v61 = vrot.slane %v6202_v8, 1 }
 0x68b   :  { %v10405_v63 = vpop.f32.mrf.mxu0  ;;  %v10841_v50 = vpop.eup %10840  ;;  %v6234_v9 = vrot.slane %v6233_v12, 4  ;;  %v6189_v38 = vrot.slane %v6188_v0, 1 }
 0x68c   :  { %v5769_v59 = vadd.f32 %v10405_v63, %v15944_v17  ;;  %10846 = vpow2.f32 %v7025_v40  ;;  %v6221_v63 = vmax.f32 %v6219_v62, %v6220_v1  ;;  %v14733_v1 = vpop.eup %10842  ;;  %v6229_v36 = vrot.slane %v6228_v28, 2 }
 0x68d   :  { %v5763_v14 = vpop.f32.mrf.mxu0  ;;  %v14737_v33 = vpop.eup %10844 }
 0x68e   :  { %v7018_v34 = vsub.f32 %v5769_v59, %v6978_v51  ;;  %v14717_v29 = vadd.f32 %v5763_v14, %v15944_v17  ;;  %v6394_v51 = vmul.f32 1.442695, %v6285_v24  ;;  %v14729_v14 = vmax.f32 %v6125_v49, %v6126_v22 }
 0x68f   :  { %v6118_v17 = vmax.f32 %v6116_v58, %v6117_v46  ;;  %v7188_v49 = vsel %vm6944_vm3, %v14656_v2, %v14663_v31  ;;  %v6392_v22 = vmul.f32 1.442695, %v6284_v44  ;;  %v6216_v46 = vmax.f32 %v6214_v18, %v6215_v11 }
 0x690   :  { %v7029_v40 = vmul.f32 1.442695, %v7018_v34  ;;  %v6222_v34 = vrot.slane %v6221_v63, 2  ;;  %v7189_v58 = vsel %vm6946_vm4, %v14676_v30, %v7188_v49  ;;  %v14757_v44 = vmax.f32 %v6188_v0, %v6189_v38 }
 0x691   :  { %v6119_v2 = vrot.slane %v6118_v17, 1  ;;  %v6210_v30 = vrot.slane %v6209_v52, 1  ;;  %v14762_v11 = vsel %vm354_vm2, %v10841_v50, 0.0  ;;  %v14764_v49 = vmax.f32 %v6202_v8, %v6203_v61 }
 0x692   :  { %10848 = vpow2.f32 %v7029_v40  ;;  %v6223_v40 = vmax.f32 %v6221_v63, %v6222_v34  ;;  %v6296_v8 = vsub.f32 %v14634_v23, %v14757_v44 }
 0x693   :  { %10850 = vpow2.f32 %v14683_v13  ;;  %v6235_v13 = vmax.f32 %v6233_v12, %v6234_v9  ;;  %v6230_v9 = vmax.f32 %v6228_v28, %v6229_v36  ;;  %v14769_v63 = vmax.f32 %v6118_v17, %v6119_v2 }
 0x694   :  { %v14723_v55 = vpop.f32.mrf.mxu0  ;;  %10852 = vpow2.f32 %v6394_v51  ;;  %v6224_v61 = vrot.slane %v6223_v40, 1 }
 0x695   :  { %15964 = vst [vmem:[#allocation61_spill] sm:$0xff] %v14723_v55  ;;  %v14735_v55 = vmax.f32 %v6195_v47, %v6196_v45  ;;  %v6287_v47 = vsub.f32 %v14610_v41, %v14729_v14  ;;  %v14753_v45 = vrot.slane %v14582_v57, %v15965_v27  ;;  %v7190_v41 = vsel %vm6948_vm5, %v14672_v56, %v7189_v58 }
 0x696   :  { %v14731_v62 = vpop.f32.mrf.mxu0  ;;  %10854 = vpow2.f32 %v6392_v22  ;;  %v7191_v51 = vsel %vm6950_vm6, %v14704_v3, %v7190_v41  ;;  %v6236_v56 = vrot.slane %v6235_v13, 2  ;;  %v14774_v22 = vmax.f32 %v6209_v52, %v6210_v30 }
 0x697   :  { %v6297_v31 = vsub.f32 %v14615_v6, %v14735_v55  ;;  %v6398_v59 = vmul.f32 1.442695, %v6287_v47  ;;  %v6217_v6 = vrot.slane %v6216_v46, 1  ;;  %v7192_v3 = vsel %vm6952_vm7, %v14692_v60, %v7191_v51 }
 0x698   :  { %v14742_v24 = vpop.f32.mrf.mxu0  ;;  %v6298_v58 = vsub.f32 %v14639_v19, %v14764_v49  ;;  %v7193_v47 = vsel %vm6954_vm8, %v14719_v21, %v7192_v3  ;;  %v6237_v41 = vmax.f32 %v6235_v13, %v6236_v56  ;;  %v6286_v19 = vsub.f32 %v14631_v4, %v14769_v63 }
 0x699   :  { %v6418_v38 = vmul.f32 1.442695, %v6297_v31  ;;  %v10847_v50 = vpop.eup %10846  ;;  %v14783_v2 = vmax.f32 %v6216_v46, %v6217_v6  ;;  %v6231_v31 = vrot.slane %v6230_v9, 1  ;;  %10856 = vpow2.f32 %v6398_v59 }
 0x69a   :  { %v14749_v15 = vpop.f32.mrf.mxu0  ;;  %v7232_v17 = vmul.f32 %v10847_v50, %v14379_v43  ;;  %v6416_v21 = vmul.f32 1.442695, %v6296_v8  ;;  %v7194_v46 = vsel %vm6956_vm9, %v14712_v25, %v7193_v47  ;;  %v6299_v56 = vsub.f32 %v14652_v39, %v14774_v22 }
 0x69b   :  { %10858 = vpow2.f32 %v6418_v38  ;;  %v6300_v59 = vsub.f32 %v14659_v32, %v14783_v2  ;;  %v14802_v4 = vmax.f32 %v6230_v9, %v6231_v31  ;;  %v6238_v50 = vrot.slane %v6237_v41, 1 }
 0x69c   :  { %v10418_v18 = vpop.f32.mrf.mxu0  ;;  %v14787_v60 = vmul.f32 %v7232_v17, %v14601_v7  ;;  %v6420_v7 = vmul.f32 1.442695, %v6298_v58  ;;  %v6396_v9 = vmul.f32 1.442695, %v6286_v19  ;;  %10860 = vpow2.f32 %v6416_v21 }
 0x69d   :  { %v7326_v12 = vadd.f32 %v10418_v18, %v14753_v45  ;;  %v6720_v3 = vrot.slane %v14762_v11, 4  ;;  %v6424_v17 = vmul.f32 1.442695, %v6300_v59  ;;  %v6302_v39 = vsub.f32 %v14681_v54, %v14802_v4 }
 0x69e   :  { %v7320_v0 = vpop.f32.mrf.mxu0  ;;  %15966 = vst [vmem:[#allocation55_spill] sm:$0xff] %v14787_v60  ;;  %10862 = vpow2.f32 %v6420_v7  ;;  %v6712_v54 = vsel %vm354_vm2, %v14733_v1, 0.0 }
 0x69f   :  { %v7321_v34 = vadd.f32 %v7320_v0, %v14753_v45  ;;  %v7360_v23 = vmax.f32 %v7326_v12, 0.0  ;;  %v10849_v43 = vpop.eup %10848  ;;  %10864 = vpow2.f32 %v6396_v9 }
 0x6a0   :  { %v10421_v28 = vpop.f32.mrf.mxu0  ;;  %v14796_v13 = vmul.f32 %v10849_v43, %v7194_v46  ;;  %v10851_v12 = vpop.eup %10850  ;;  %v6733_v43 = vsel %vm354_vm2, %v14737_v33, 0.0  ;;  %10866 = vpow2.f32 %v6424_v17 }
 0x6a1   :  { %v7359_v36 = vmax.f32 %v7321_v34, 0.0  ;;  %v7336_v52 = vadd.f32 %v10421_v28, %v14753_v45  ;;  %v14809_v34 = vmax.f32 %v6223_v40, %v6224_v61  ;;  %v10853_v32 = vpop.eup %10852  ;;  %v6726_v19 = vsel %vm354_vm2, %v10851_v12, 0.0 }
 0x6a2   :  { %v7330_v30 = vpop.f32.mrf.mxu0  ;;  %v6734_v46 = vrot.slane %v6733_v43, 4  ;;  %v6727_v7 = vrot.slane %v6726_v19, 4 }
 0x6a3   :  { %v7331_v18 = vadd.f32 %v7330_v30, %v14753_v45  ;;  %10432 = vmatprep.mubr.msk.f32.mxu0 %vm354_vm2, %v7359_v36  ;;  %v7362_v0 = vmax.f32 %v7336_v52, 0.0  ;;  %v10855_v58 = vpop.eup %10854  ;;  %v6422_v36 = vmul.f32 1.442695, %v6299_v56  ;;  %v6301_v31 = vsub.f32 %v14670_v53, %v14809_v34 }
 0x6a4   :  { %v10424_v51 = vpop.f32.mrf.mxu0  ;;  %10433 = vmatmul.mubr.msk.f32.vlgmr.msra.gmra.mxu0 %vm354_vm2, %v7360_v23  ;;  %v14820_v23 = vmax.f32 %v6237_v41, %v6238_v50  ;;  %v6721_v30 = vadd.f32 %v6720_v3, %v14762_v11  ;;  %v6428_v53 = vmul.f32 1.442695, %v6302_v39  ;;  %v6713_v11 = vrot.slane %v6712_v54, 4 }
 0x6a5   :  { %v7361_v6 = vmax.f32 %v7331_v18, 0.0  ;;  %10445 = vmatpush3.xpose.msk.msra.mxu0 %vm354_vm2, %v14386_v10  ;;  %v7346_v25 = vadd.f32 %v10424_v51, %v14753_v45  ;;  %10868 = vpow2.f32 %v6422_v36  ;;  %v6747_v51 = vsel %vm354_vm2, %v10853_v32, 0.0 }
 0x6a6   :  { %10458 = vmatprep.subr.msk.mxu0 %vm7668_vm10, %v14597_v26  ;;  %v7340_v38 = vpop.f32.mrf.mxu0  ;;  %v6303_v21 = vsub.f32 %v14707_v48, %v14820_v23  ;;  %v10857_v1 = vpop.eup %10856  ;;  %10870 = vpow2.f32 %v6428_v53  ;;  %v6714_v59 = vadd.f32 %v6713_v11, %v6712_v54  ;;  %v6728_v50 = vadd.f32 %v6727_v7, %v6726_v19 }
 0x6a7   :  { %v7341_v10 = vadd.f32 %v7340_v38, %v14753_v45  ;;  %10435 = vmatprep.mubr.msk.f32.mxu0 %vm354_vm2, %v7361_v6  ;;  %v7364_v40 = vmax.f32 %v7346_v25, 0.0  ;;  %v6722_v6 = vrot.slane %v6721_v30, 2  ;;  %v6740_v25 = vsel %vm354_vm2, %v10855_v58, 0.0 }
 0x6a8   :  { %v10427_v8 = vpop.f32.mrf.mxu0  ;;  %10436 = vmatmul.mubr.msk.f32.gmra.mxu0 %vm354_vm2, %v7362_v0  ;;  %v10859_v33 = vpop.eup %10858  ;;  %v6430_v12 = vmul.f32 1.442695, %v6303_v21  ;;  %v6748_v0 = vrot.slane %v6747_v51, 4  ;;  %v6735_v38 = vadd.f32 %v6734_v46, %v6733_v43  ;;  %v6715_v32 = vrot.slane %v6714_v59, 2 }
 0x6a9   :  { %v7363_v28 = vmax.f32 %v7341_v10, 0.0  ;;  %v7356_v61 = vadd.f32 %v10427_v8, %v14753_v45  ;;  %v10861_v48 = vpop.eup %10860  ;;  %v6761_v10 = vsel %vm354_vm2, %v10857_v1, 0.0  ;;  %v6723_v9 = vadd.f32 %v6722_v6, %v6721_v30 }
 0x6aa   :  { %v7350_v47 = vpop.f32.mrf.mxu0  ;;  %v6741_v8 = vrot.slane %v6740_v25, 4  ;;  %v6749_v3 = vadd.f32 %v6748_v0, %v6747_v51  ;;  %v6736_v39 = vrot.slane %v6735_v38, 2  ;;  %v6716_v30 = vadd.f32 %v6715_v32, %v6714_v59 }
 0x6ab   :  { %v7351_v52 = vadd.f32 %v7350_v47, %v14753_v45  ;;  %10438 = vmatprep.mubr.msk.f32.mxu0 %vm354_vm2, %v7363_v28  ;;  %v7366_v41 = vmax.f32 %v7356_v61, 0.0  ;;  %v6426_v45 = vmul.f32 1.442695, %v6301_v31  ;;  %v10863_v56 = vpop.eup %10862  ;;  %v6824_v28 = vsel %vm354_vm2, %v10861_v48, 0.0 }
 0x6ac   :  { %10439 = vmatmul.mubr.msk.f32.gmra.mxu0 %vm354_vm2, %v7364_v40  ;;  %v10865_v17 = vpop.eup %10864  ;;  %v6762_v40 = vrot.slane %v6761_v10, 4  ;;  %v6838_v61 = vsel %vm354_vm2, %v10863_v56, 0.0  ;;  %v6729_v47 = vrot.slane %v6728_v50, 2  ;;  %v6724_v36 = vrot.slane %v6723_v9, 1 }
 0x6ad   :  { %v7365_v18 = vmax.f32 %v7351_v52, 0.0  ;;  %10872 = vpow2.f32 %v6426_v45  ;;  %v10867_v58 = vpop.eup %10866  ;;  %v6742_v31 = vadd.f32 %v6741_v8, %v6740_v25  ;;  %v6831_v52 = vsel %vm354_vm2, %v10859_v33, 0.0 }
 0x6ae   :  { %10874 = vpow2.f32 %v6430_v12  ;;  %v6825_v54 = vrot.slane %v6824_v28, 4  ;;  %v6750_v43 = vrot.slane %v6749_v3, 2  ;;  %v6754_v53 = vsel %vm354_vm2, %v10865_v17, 0.0 }
 0x6af   :  { %10441 = vmatprep.mubr.msk.f32.mxu0 %vm354_vm2, %v7365_v18  ;;  %v6737_v19 = vadd.f32 %v6736_v39, %v6735_v38  ;;  %v6763_v45 = vadd.f32 %v6762_v40, %v6761_v10  ;;  %v6986_v21 = vsel %vm6944_vm3, %v14617_v5, %v14621_v42  ;;  %v6730_v11 = vadd.f32 %v6729_v47, %v6728_v50 }
 0x6b0   :  { %10442 = vmatmul.mubr.msk.f32.gmra.mxu0 %vm354_vm2, %v7366_v41  ;;  %v6839_v41 = vrot.slane %v6838_v61, 4  ;;  %v6832_v1 = vrot.slane %v6831_v52, 4  ;;  %v6852_v46 = vsel %vm354_vm2, %v10867_v58, 0.0  ;;  %v6743_v7 = vrot.slane %v6742_v31, 2 }
 0x6b1   :  { %v6755_v33 = vrot.slane %v6754_v53, 4  ;;  %v6826_v6 = vadd.f32 %v6825_v54, %v6824_v28  ;;  %v6725_v0 = vadd.f32 %v6724_v36, %v6723_v9  ;;  %v6717_v25 = vrot.slane %v6716_v30, 1 }
 0x6b2   :  { %v10869_v18 = vpop.eup %10868  ;;  %v6751_v48 = vadd.f32 %v6750_v43, %v6749_v3  ;;  %v6840_v38 = vadd.f32 %v6839_v41, %v6838_v61  ;;  %v6738_v56 = vrot.slane %v6737_v19, 1  ;;  %v6987_v10 = vsel %vm6946_vm4, %v14645_v37, %v6986_v21 }
 0x6b3   :  { %v10871_v51 = vpop.eup %10870  ;;  %v6845_v12 = vsel %vm354_vm2, %v10869_v18, 0.0  ;;  %v6764_v5 = vrot.slane %v6763_v45, 2  ;;  %v6853_v42 = vrot.slane %v6852_v46, 4  ;;  %v6731_v50 = vrot.slane %v6730_v11, 1 }
 0x6b4   :  { %v6833_v8 = vadd.f32 %v6832_v1, %v6831_v52  ;;  %v6846_v32 = vrot.slane %v6845_v12, 4  ;;  %v6866_v17 = vsel %vm354_vm2, %v10871_v51, 0.0  ;;  %v6744_v39 = vadd.f32 %v6743_v7, %v6742_v31 }
 0x6b5   :  { %v6756_v28 = vadd.f32 %v6755_v33, %v6754_v53  ;;  %v6827_v40 = vrot.slane %v6826_v6, 2  ;;  %10876 = vrcp.f32 %v6725_v0  ;;  %v6718_v3 = vadd.f32 %v6717_v25, %v6716_v30 }
 0x6b6   :  { %v6752_v61 = vrot.slane %v6751_v48, 1  ;;  %v6841_v58 = vrot.slane %v6840_v38, 2  ;;  %v6739_v36 = vadd.f32 %v6738_v56, %v6737_v19  ;;  %v6765_v54 = vadd.f32 %v6764_v5, %v6763_v45 }
 0x6b7   :  { %v6854_v37 = vadd.f32 %v6853_v42, %v6852_v46  ;;  %v6867_v18 = vrot.slane %v6866_v17, 4  ;;  %v6732_v43 = vadd.f32 %v6731_v50, %v6730_v11  ;;  %v6834_v41 = vrot.slane %v6833_v8, 2 }
 0x6b8   :  { %v6847_v52 = vadd.f32 %v6846_v32, %v6845_v12  ;;  %v6745_v1 = vrot.slane %v6744_v39, 1  ;;  %v6757_v51 = vrot.slane %v6756_v28, 2  ;;  %v6828_v31 = vadd.f32 %v6827_v40, %v6826_v6 }
 0x6b9   :  { %10878 = vrcp.f32 %v6718_v3  ;;  %v6753_v7 = vadd.f32 %v6752_v61, %v6751_v48  ;;  %v6988_v30 = vsel %vm6948_vm5, %v14623_v16, %v6987_v10  ;;  %v6842_v33 = vadd.f32 %v6841_v58, %v6840_v38  ;;  %v15969_v3 = vld [vmem:[#allocation61_spill] sm:$0xff] }
 0x6ba   :  { %v10873_v59 = vpop.eup %10872  ;;  %10880 = vrcp.f32 %v6739_v36  ;;  %v6766_v19 = vrot.slane %v6765_v54, 1  ;;  %v6855_v45 = vrot.slane %v6854_v37, 2  ;;  %v6868_v46 = vadd.f32 %v6867_v18, %v6866_v17 }
 0x6bb   :  { %v6859_v47 = vsel %vm354_vm2, %v10873_v59, 0.0  ;;  %v10875_v9 = vpop.eup %10874  ;;  %v6835_v59 = vadd.f32 %v6834_v41, %v6833_v8  ;;  %v6848_v11 = vrot.slane %v6847_v52, 2  ;;  %10882 = vrcp.f32 %v6732_v43 }
 0x6bc   :  { %v6860_v21 = vrot.slane %v6859_v47, 4  ;;  %v6873_v53 = vsel %vm354_vm2, %v10875_v9, 0.0  ;;  %v6746_v25 = vadd.f32 %v6745_v1, %v6744_v39  ;;  %v6758_v56 = vadd.f32 %v6757_v51, %v6756_v28 }
 0x6bd   :  { %v6874_v12 = vrot.slane %v6873_v53, 4  ;;  %v6829_v6 = vrot.slane %v6828_v31, 1  ;;  %10884 = vrcp.f32 %v6753_v7  ;;  %v6989_v48 = vsel %vm6950_vm6, %v14685_v35, %v6988_v30 }
 0x6be   :  { %v6861_v0 = vadd.f32 %v6860_v21, %v6859_v47  ;;  %v7000_v16 = vsel %vm6944_vm3, %v14735_v55, %v14757_v44  ;;  %v6843_v38 = vrot.slane %v6842_v33, 1  ;;  %v6767_v10 = vadd.f32 %v6766_v19, %v6765_v54  ;;  %v15967_v47 = vld [vmem:[#allocation49_spill] sm:$0xff] }
 0x6bf   :  { %v7001_v5 = vsel %vm6946_vm4, %v14764_v49, %v7000_v16  ;;  %v6856_v42 = vadd.f32 %v6855_v45, %v6854_v37  ;;  %v6869_v50 = vrot.slane %v6868_v46, 2  ;;  %v6836_v8 = vrot.slane %v6835_v59, 1  ;;  %v15968_v44 = vld [vmem:[#allocation93_spill] sm:$0xff] }
 0x6c0   :  { %v6849_v32 = vadd.f32 %v6848_v11, %v6847_v52  ;;  %v6862_v17 = vrot.slane %v6861_v0, 2  ;;  %v6875_v39 = vadd.f32 %v6874_v12, %v6873_v53  ;;  %10886 = vrcp.f32 %v6746_v25  ;;  %v15970_v21 = vld [vmem:[#allocation53_spill] sm:$0xff] }
 0x6c1   :  { %v6759_v28 = vrot.slane %v6758_v56, 1  ;;  %v6830_v40 = vadd.f32 %v6829_v6, %v6828_v31  ;;  %v6990_v35 = vsel %vm6952_vm7, %v15967_v47, %v6989_v48  ;;  %v6844_v9 = vadd.f32 %v6843_v38, %v6842_v33 }
 0x6c2   :  { %v7002_v55 = vsel %vm6948_vm5, %v14774_v22, %v7001_v5  ;;  %v5779_v61 = vadd.f32 %v15969_v3, %v15968_v44  ;;  %v6991_v49 = vsel %vm6954_vm8, %v14769_v63, %v6990_v35  ;;  %v10877_v58 = vpop.eup %10876  ;;  %10888 = vrcp.f32 %v6767_v10  ;;  %v15971_v22 = vld [vmem:[#allocation97_spill] sm:$0xff]  ;;  %v15974_v3 = vld [vmem:[#allocation34_spill] sm:$0xff] }
 0x6c3   :  { %v6857_v36 = vrot.slane %v6856_v42, 1  ;;  %v7003_v54 = vsel %vm6950_vm6, %v14783_v2, %v7002_v55  ;;  %v6870_v37 = vadd.f32 %v6869_v50, %v6868_v46  ;;  %v6837_v18 = vadd.f32 %v6836_v8, %v6835_v59 }
 0x6c4   :  { %v6850_v43 = vrot.slane %v6849_v32, 1  ;;  %v6863_v41 = vadd.f32 %v6862_v17, %v6861_v0  ;;  %v6876_v52 = vrot.slane %v6875_v39, 2  ;;  %10890 = vrcp.f32 %v6830_v40 }
 0x6c5   :  { %v15972_v1 = vsub.f32 %v15970_v21, %v15971_v22  ;;  %v6992_v31 = vsel %vm6956_vm9, %v14729_v14, %v6991_v49  ;;  %v6760_v63 = vadd.f32 %v6759_v28, %v6758_v56  ;;  %10892 = vrcp.f32 %v6844_v9 }
 0x6c6   :  { %v7020_v53 = vsub.f32 %v5779_v61, %v6992_v31  ;;  %v7004_v7 = vsel %vm6952_vm7, %v14809_v34, %v7003_v54  ;;  %v10879_v2 = vpop.eup %10878  ;;  %v6858_v30 = vadd.f32 %v6857_v36, %v6856_v42  ;;  %v6871_v33 = vrot.slane %v6870_v37, 1 }
 0x6c7   :  { %v7023_v51 = vmul.f32 1.442695, %v15972_v1  ;;  %v5789_v19 = vadd.f32 %v14742_v24, %v15968_v44  ;;  %v7005_v45 = vsel %vm6954_vm8, %v14802_v4, %v7004_v7  ;;  %v10881_v46 = vpop.eup %10880  ;;  %10894 = vrcp.f32 %v6837_v18  ;;  %v15976_v18 = vld [vmem:[#allocation84_spill] sm:$0xff]  ;;  %v15977_v1 = vld [vmem:[#allocation29_spill] sm:$0xff] }
 0x6c8   :  { %v6851_v59 = vadd.f32 %v6850_v43, %v6849_v32  ;;  %v6864_v11 = vrot.slane %v6863_v41, 1  ;;  %v6877_v14 = vadd.f32 %v6876_v52, %v6875_v39  ;;  %v15973_v0 = vsub.f32 %v14717_v29, %v14383_v20  ;;  %v10883_v34 = vpop.eup %10882 }
 0x6c9   :  { %10896 = vpow2.f32 %v7023_v51  ;;  %v7033_v25 = vmul.f32 1.442695, %v7020_v53  ;;  %v7006_v56 = vsel %vm6956_vm9, %v14820_v23, %v7005_v45  ;;  %v6872_v6 = vadd.f32 %v6871_v33, %v6870_v37  ;;  %v15975_v37 = vld [vmem:[#allocation50_spill] sm:$0xff] }
 0x6ca   :  { %v7027_v12 = vmul.f32 1.442695, %v15973_v0  ;;  %10898 = vrcp.f32 %v6760_v63  ;;  %v10885_v24 = vpop.eup %10884  ;;  %v7022_v4 = vsub.f32 %v5789_v19, %v7006_v56  ;;  %v6865_v48 = vadd.f32 %v6864_v11, %v6863_v41  ;;  %v15981_v11 = vld [vmem:[#allocation90_spill] sm:$0xff]  ;;  %v15983_v0 = vld [vmem:[#allocation23_spill] sm:$0xff] }
 0x6cb   :  { %10900 = vrcp.f32 %v6858_v30  ;;  %v6878_v16 = vrot.slane %v6877_v14, 1  ;;  %v7202_v5 = vsel %vm6944_vm3, %v10877_v58, %v10879_v2  ;;  %v1454_v43 = vadd.f32 %v15976_v18, %v15975_v37  ;;  %v15979_v30 = vld [vmem:[#allocation88_spill] sm:$0xff] }
 0x6cc   :  { %10902 = vrcp.f32 %v6851_v59  ;;  %v7037_v10 = vmul.f32 1.442695, %v7022_v4  ;;  %v7203_v23 = vsel %vm6946_vm4, %v10883_v34, %v7202_v5  ;;  %v1464_v33 = vadd.f32 %v15979_v30, %v15975_v37 }
 0x6cd   :  { %10904 = vpow2.f32 %v7027_v12  ;;  %v10887_v38 = vpop.eup %10886  ;;  %v6879_v29 = vadd.f32 %v6878_v16, %v6877_v14  ;;  %v7204_v32 = vsel %vm6948_vm5, %v10881_v46, %v7203_v23  ;;  %v14907_v31 = vmul.f32 %v14796_v13, %v1454_v43 }
 0x6ce   :  { %10906 = vpow2.f32 %v7033_v25  ;;  %v7205_v39 = vsel %vm6950_vm6, %v10887_v38, %v7204_v32  ;;  %v1474_v14 = vadd.f32 %v15981_v11, %v15975_v37  ;;  %v7373_v12 = vrot.slane %v14582_v57, %v15983_v0 }
 0x6cf   :  { %10908 = vrcp.f32 %v6872_v6  ;;  %v10889_v20 = vpop.eup %10888  ;;  %v7206_v55 = vsel %vm6952_vm7, %v10885_v24, %v7205_v39  ;;  %15978 = vst [vmem:[#allocation51_spill] sm:$0xff] %v14907_v31 }
 0x6d0   :  { %10910 = vrcp.f32 %v6865_v48 }
 0x6d1   :  { %v10891_v42 = vpop.eup %10890  ;;  %10912 = vpow2.f32 %v7037_v10 }
 0x6d2   :  { %v10893_v50 = vpop.eup %10892  ;;  %10914 = vrcp.f32 %v6879_v29 }
 0x6d4   :  { %v10895_v8 = vpop.eup %10894 }
 0x6d5   :  { %v7216_v28 = vsel %vm6944_vm3, %v10895_v8, %v10891_v42 }
 0x6d6   :  { %v10897_v17 = vpop.eup %10896  ;;  %v7217_v47 = vsel %vm6946_vm4, %v10893_v50, %v7216_v28  ;;  %v15984_v50 = vld [vmem:[#allocation41_spill] sm:$0xff]  ;;  %v15986_v28 = vld [vmem:[#allocation27_spill] sm:$0xff] }
 0x6d7   :  { %v10899_v40 = vpop.eup %10898  ;;  %v14895_v61 = vmul.f32 %v10897_v17, %v15974_v3  ;;  %v14937_v8 = vadd.f32 %v15984_v50, %v15968_v44  ;;  %v15985_v17 = vld [vmem:[#allocation54_spill] sm:$0xff] }
 0x6d8   :  { %v10901_v35 = vpop.eup %10900  ;;  %v7207_v58 = vsel %vm6954_vm8, %v10899_v40, %v7206_v55  ;;  %v14943_v39 = vadd.f32 %v15985_v17, %v15968_v44  ;;  %v14947_v40 = vadd.f32 %v15986_v28, %v15968_v44 }
 0x6d9   :  { %v10903_v9 = vpop.eup %10902  ;;  %v7208_v22 = vsel %vm6956_vm9, %v10889_v20, %v7207_v58  ;;  %v6023_v32 = vsel %vm354_vm2, %v14937_v8, -inf }
 0x6da   :  { %v10905_v49 = vpop.eup %10904  ;;  %v7218_v36 = vsel %vm6948_vm5, %v10903_v9, %v7217_v47  ;;  %v6024_v47 = vrot.slane %v6023_v32, 4  ;;  %v15987_v9 = vld [vmem:[#allocation100_spill] sm:$0xff]  ;;  %v6037_v3 = vsel %vm354_vm2, %v14947_v40, -inf }
 0x6db   :  { %v10907_v54 = vpop.eup %10906  ;;  %v7219_v41 = vsel %vm6950_vm6, %v10901_v35, %v7218_v36  ;;  %v14904_v51 = vmul.f32 %v10905_v49, %v15977_v1  ;;  %v6016_v35 = vsel %vm354_vm2, %v14943_v39, -inf  ;;  %v14953_v55 = vadd.f32 %v15987_v9, %v15968_v44  ;;  %v15988_v49 = vld [vmem:[#allocation36_spill] sm:$0xff]  ;;  %v15997_v9 = vld [vmem:[#allocation43_spill] sm:$0xff] }
 0x6dc   :  { %v10909_v52 = vpop.eup %10908  ;;  %v7236_v63 = vmul.f32 %v10907_v54, %v7208_v22  ;;  %v14959_v58 = vadd.f32 %v15988_v49, %v15968_v44  ;;  %v6025_v36 = vmax.f32 %v6023_v32, %v6024_v47  ;;  %v6017_v54 = vrot.slane %v6016_v35, 4 }
 0x6dd   :  { %v10911_v21 = vpop.eup %10910  ;;  %v6038_v18 = vrot.slane %v6037_v3, 4  ;;  %v6030_v43 = vsel %vm354_vm2, %v14953_v55, -inf }
 0x6de   :  { %v7220_v53 = vsel %vm6952_vm7, %v10911_v21, %v7219_v41  ;;  %v10913_v2 = vpop.eup %10912  ;;  %v14914_v46 = vmul.f32 %v7236_v63, %v1464_v33  ;;  %v6044_v41 = vsel %vm354_vm2, %v14959_v58, -inf  ;;  %v15989_v21 = vld [vmem:[#allocation33_spill] sm:$0xff]  ;;  %v6018_v1 = vmax.f32 %v6016_v35, %v6017_v54  ;;  %v15991_v33 = vld [vmem:[#allocation46_spill] sm:$0xff] }
 0x6df   :  { %v7221_v7 = vsel %vm6954_vm8, %v10909_v52, %v7220_v53  ;;  %v10915_v19 = vpop.eup %10914  ;;  %v6026_v52 = vrot.slane %v6025_v36, 2  ;;  %v14967_v22 = vadd.f32 %v15989_v21, %v15968_v44  ;;  %v6031_v63 = vrot.slane %v6030_v43, 4  ;;  %v15990_v53 = vld [vmem:[#allocation40_spill] sm:$0xff] }
 0x6e0   :  { %v7222_v45 = vsel %vm6956_vm9, %v10915_v19, %v7221_v7  ;;  %15980 = vst [vmem:[#allocation57_spill] sm:$0xff] %v14914_v46  ;;  %v14971_v7 = vadd.f32 %v15990_v53, %v15968_v44  ;;  %v6045_v30 = vrot.slane %v6044_v41, 4  ;;  %v14975_v19 = vadd.f32 %v15991_v33, %v15968_v44  ;;  %v15998_v21 = vld [vmem:[#allocation60_spill] sm:$0xff] }
 0x6e1   :  { %v7238_v59 = vmul.f32 %v10913_v2, %v7222_v45  ;;  %v6039_v2 = vmax.f32 %v6037_v3, %v6038_v18  ;;  %v15992_v45 = vld [vmem:[#allocation45_spill] sm:$0xff]  ;;  %v6027_v11 = vmax.f32 %v6025_v36, %v6026_v52  ;;  %v6019_v0 = vrot.slane %v6018_v1, 2 }
 0x6e2   :  { %v15009_v3 = vadd.f32 %v15997_v9, %v15968_v44 }
 0x6e3   :  { %v14918_v13 = vmul.f32 %v7238_v59, %v1474_v14  ;;  %v14979_v59 = vadd.f32 %v15992_v45, %v15968_v44  ;;  %v6135_v14 = vsel %vm354_vm2, %v14967_v22, -inf  ;;  %v6020_v50 = vmax.f32 %v6018_v1, %v6019_v0 }
 0x6e4   :  { %v15019_v1 = vadd.f32 %v15998_v21, %v15968_v44  ;;  %v6170_v0 = vsel %vm354_vm2, %v15009_v3, -inf }
 0x6e5   :  { %15982 = vst [vmem:[#allocation102_spill] sm:$0xff] %v14918_v13  ;;  %v6021_v53 = vrot.slane %v6020_v50, 1 }
 0x764   :  { %v10434_v34 = vpop.f32.mrf.mxu0 }
 0x765   :  { %v7470_v24 = vadd.f32 %v10434_v34, %v7373_v12  ;;  %v15993_v34 = vld [vmem:[#allocation31_spill] sm:$0xff] }
 0x766   :  { %v7464_v25 = vpop.f32.mrf.mxu0 }
 0x767   :  { %v7465_v56 = vadd.f32 %v7464_v25, %v7373_v12  ;;  %v14985_v25 = vadd.f32 %v15993_v34, %v15968_v44 }
 0x768   :  { %v10437_v6 = vpop.f32.mrf.mxu0 }
 0x769   :  { %10446 = vmatprep.mubr.msk.f32.mxu0 %vm354_vm2, %v7465_v56  ;;  %v7480_v16 = vadd.f32 %v10437_v6, %v7373_v12  ;;  %v6128_v56 = vsel %vm354_vm2, %v14971_v7, -inf  ;;  %v6046_v6 = vmax.f32 %v6044_v41, %v6045_v30  ;;  %v6058_v17 = vsel %vm354_vm2, %v14985_v25, -inf }
 0x76a   :  { %v7474_v4 = vpop.f32.mrf.mxu0  ;;  %10447 = vmatmul.mubr.msk.f32.vlgmr.msra.gmra.mxu0 %vm354_vm2, %v7470_v24  ;;  %v6040_v24 = vrot.slane %v6039_v2, 2 }
 0x76b   :  { %v7475_v48 = vadd.f32 %v7474_v4, %v7373_v12  ;;  %10459 = vmatpush3.msk.msra.mxu0 %vm7668_vm10, %v14597_v26  ;;  %v14932_v26 = vld [vmem:[#allocation7 + $0x18] sm:$0xff]  ;;  %v6142_v4 = vsel %vm354_vm2, %v14975_v19, -inf  ;;  %v6047_v35 = vrot.slane %v6046_v6, 2 }
 0x76c   :  { %v10440_v38 = vpop.f32.mrf.mxu0  ;;  %10472 = vmatprep.subr.mxu0 %v14932_v26  ;;  %v6143_v28 = vrot.slane %v6142_v4, 4  ;;  %v6041_v49 = vmax.f32 %v6039_v2, %v6040_v24 }
 0x76d   :  { %10449 = vmatprep.mubr.msk.f32.mxu0 %vm354_vm2, %v7475_v48  ;;  %v7490_v20 = vadd.f32 %v10440_v38, %v7373_v12  ;;  %v6051_v48 = vsel %vm354_vm2, %v14979_v59, -inf  ;;  %v6048_v45 = vmax.f32 %v6046_v6, %v6047_v35 }
 0x76e   :  { %v7484_v10 = vpop.f32.mrf.mxu0  ;;  %10450 = vmatmul.mubr.msk.f32.gmra.mxu0 %vm354_vm2, %v7480_v16  ;;  %v15994_v16 = vld [vmem:[#allocation56_spill] sm:$0xff]  ;;  %v6052_v47 = vrot.slane %v6051_v48, 4  ;;  %v6144_v30 = vmax.f32 %v6142_v4, %v6143_v28  ;;  %v6042_v34 = vrot.slane %v6041_v49, 1 }
 0x76f   :  { %v7485_v57 = vadd.f32 %v7484_v10, %v7373_v12  ;;  %v14995_v38 = vadd.f32 %v15994_v16, %v15968_v44  ;;  %v6136_v10 = vrot.slane %v6135_v14, 4  ;;  %v6049_v28 = vrot.slane %v6048_v45, 1 }
 0x770   :  { %v10443_v29 = vpop.f32.mrf.mxu0  ;;  %v6053_v33 = vmax.f32 %v6051_v48, %v6052_v47  ;;  %v6145_v4 = vrot.slane %v6144_v30, 2  ;;  %v6171_v48 = vrot.slane %v6170_v0, 4 }
 0x771   :  { %10452 = vmatprep.mubr.msk.f32.mxu0 %vm354_vm2, %v7485_v57  ;;  %v7500_v23 = vadd.f32 %v10443_v29, %v7373_v12  ;;  %v15995_v57 = vld [vmem:[#allocation48_spill] sm:$0xff]  ;;  %v6028_v29 = vrot.slane %v6027_v11, 1  ;;  %v6065_v36 = vsel %vm354_vm2, %v14995_v38, -inf  ;;  %v6137_v54 = vmax.f32 %v6135_v14, %v6136_v10 }
 0x772   :  { %v7494_v5 = vpop.f32.mrf.mxu0  ;;  %10453 = vmatmul.mubr.msk.f32.gmra.mxu0 %vm354_vm2, %v7490_v20  ;;  %v14999_v20 = vadd.f32 %v15995_v57, %v15968_v44  ;;  %v6172_v31 = vmax.f32 %v6170_v0, %v6171_v48 }
 0x773   :  { %v7495_v42 = vadd.f32 %v7494_v5, %v7373_v12  ;;  %v6032_v12 = vmax.f32 %v6030_v43, %v6031_v63  ;;  %v6129_v5 = vrot.slane %v6128_v56, 4  ;;  %v6059_v43 = vrot.slane %v6058_v17, 4 }
 0x774   :  { %v6156_v18 = vsel %vm354_vm2, %v14999_v20, -inf  ;;  %v15021_v63 = vmax.f32 %v6027_v11, %v6028_v29  ;;  %v6138_v24 = vrot.slane %v6137_v54, 2  ;;  %v15999_v11 = vld [vmem:[#allocation35_spill] sm:$0xff]  ;;  %v6173_v0 = vrot.slane %v6172_v31, 2 }
 0x775   :  { %10455 = vmatprep.mubr.msk.f32.mxu0 %vm354_vm2, %v7495_v42  ;;  %v15996_v42 = vld [vmem:[#allocation38_spill] sm:$0xff]  ;;  %v6033_v32 = vrot.slane %v6032_v12, 2  ;;  %v6130_v41 = vmax.f32 %v6128_v56, %v6129_v5  ;;  %v6157_v14 = vrot.slane %v6156_v18, 4  ;;  %v6066_v56 = vrot.slane %v6065_v36, 4 }
 0x776   :  { %10456 = vmatmul.mubr.msk.f32.gmra.mxu0 %vm354_vm2, %v7500_v23  ;;  %v15003_v23 = vadd.f32 %v15996_v42, %v15968_v44  ;;  %v6060_v10 = vmax.f32 %v6058_v17, %v6059_v43  ;;  %v6163_v5 = vsel %vm354_vm2, %v15019_v1, -inf  ;;  %v15029_v29 = vadd.f32 %v15999_v11, %v15968_v44 }
 0x777   :  { %v6034_v2 = vmax.f32 %v6032_v12, %v6033_v32  ;;  %v6131_v57 = vrot.slane %v6130_v41, 2  ;;  %v15031_v12 = vmax.f32 %v6020_v50, %v6021_v53  ;;  %v6273_v42 = vsub.f32 %v14937_v8, %v15021_v63 }
 0x778   :  { %v6149_v52 = vsel %vm354_vm2, %v15003_v23, -inf  ;;  %v6054_v32 = vrot.slane %v6053_v33, 2  ;;  %v6158_v47 = vmax.f32 %v6156_v18, %v6157_v14  ;;  %v15035_v17 = vmax.f32 %v6041_v49, %v6042_v34  ;;  %v7973_v14 = vld [vmem:[#allocation7 + $0x20] sm:$0xff] }
 0x779   :  { %v6150_v16 = vrot.slane %v6149_v52, 4  ;;  %v6035_v6 = vrot.slane %v6034_v2, 1  ;;  %v6139_v35 = vmax.f32 %v6137_v54, %v6138_v24  ;;  %v6164_v43 = vrot.slane %v6163_v5, 4 }
 0x77a   :  { %v6067_v21 = vmax.f32 %v6065_v36, %v6066_v56  ;;  %v6061_v13 = vrot.slane %v6060_v10, 2  ;;  %v6132_v11 = vmax.f32 %v6130_v41, %v6131_v57  ;;  %v6177_v50 = vsel %vm354_vm2, %v15029_v29, -inf }
 0x77b   :  { %v6151_v9 = vmax.f32 %v6149_v52, %v6150_v16  ;;  %v6272_v53 = vsub.f32 %v14943_v39, %v15031_v12  ;;  %v15041_v46 = vmax.f32 %v6034_v2, %v6035_v6  ;;  %v6146_v8 = vmax.f32 %v6144_v30, %v6145_v4  ;;  %v7974_v52 = vld [vmem:[#allocation7 + $0x28] sm:$0xff] }
 0x77c   :  { %v6370_v60 = vmul.f32 1.442695, %v6273_v42  ;;  %v6055_v18 = vmax.f32 %v6053_v33, %v6054_v32  ;;  %v15043_v49 = vmax.f32 %v6048_v45, %v6049_v28  ;;  %v6159_v54 = vrot.slane %v6158_v47, 2  ;;  %10504 = vmatprep.subr.mxu1 %v7974_v52 }
 0x77d   :  { %v6140_v36 = vrot.slane %v6139_v35, 1  ;;  %v6152_v34 = vrot.slane %v6151_v9, 2  ;;  %v6165_v41 = vmax.f32 %v6163_v5, %v6164_v43  ;;  %v6178_v56 = vrot.slane %v6177_v50, 4  ;;  %10505 = vmatpush3.msra.mxu1 %v7974_v52 }
 0x77e   :  { %v6275_v24 = vsub.f32 %v14947_v40, %v15035_v17  ;;  %v6068_v39 = vrot.slane %v6067_v21, 2  ;;  %v6062_v2 = vmax.f32 %v6060_v10, %v6061_v13  ;;  %v6133_v16 = vrot.slane %v6132_v11, 1  ;;  %10506 = vmatprep.subr.mxu1 %v7973_v14 }
 0x77f   :  { %v6368_v30 = vmul.f32 1.442695, %v6272_v53  ;;  %v6274_v33 = vsub.f32 %v14953_v55, %v15041_v46  ;;  %v6147_v45 = vrot.slane %v6146_v8, 1  ;;  %10916 = vpow2.f32 %v6370_v60  ;;  %10507 = vmatpush3.msra.mxu1 %v7973_v14 }
 0x780   :  { %v6056_v57 = vrot.slane %v6055_v18, 1  ;;  %v6276_v5 = vsub.f32 %v14959_v58, %v15043_v49  ;;  %v6160_v6 = vmax.f32 %v6158_v47, %v6159_v54  ;;  %v15051_v4 = vmax.f32 %v6139_v35, %v6140_v36 }
 0x781   :  { %v6153_v40 = vmax.f32 %v6151_v9, %v6152_v34  ;;  %v6166_v13 = vrot.slane %v6165_v41, 2  ;;  %v6179_v10 = vmax.f32 %v6177_v50, %v6178_v56  ;;  %v6374_v48 = vmul.f32 1.442695, %v6275_v24 }
 0x782   :  { %v6069_v42 = vmax.f32 %v6067_v21, %v6068_v39  ;;  %v6063_v32 = vrot.slane %v6062_v2, 1  ;;  %v15053_v28 = vmax.f32 %v6132_v11, %v6133_v16  ;;  %10918 = vpow2.f32 %v6368_v30 }
 0x783   :  { %v6372_v55 = vmul.f32 1.442695, %v6274_v33  ;;  %v15055_v43 = vmax.f32 %v6146_v8, %v6147_v45  ;;  %v6174_v60 = vmax.f32 %v6172_v31, %v6173_v0  ;;  %v15057_v53 = vmax.f32 %v6055_v18, %v6056_v57 }
 0x784   :  { %v6376_v58 = vmul.f32 1.442695, %v6276_v5  ;;  %v6161_v47 = vrot.slane %v6160_v6, 1  ;;  %v6289_v35 = vsub.f32 %v14967_v22, %v15051_v4  ;;  %v6154_v9 = vrot.slane %v6153_v40, 1 }
 0x785   :  { %v6167_v54 = vmax.f32 %v6165_v41, %v6166_v13  ;;  %v6180_v50 = vrot.slane %v6179_v10, 2  ;;  %10920 = vpow2.f32 %v6374_v48  ;;  %v6070_v21 = vrot.slane %v6069_v42, 1 }
 0x786   :  { %v15061_v52 = vmax.f32 %v6062_v2, %v6063_v32  ;;  %v6288_v11 = vsub.f32 %v14971_v7, %v15053_v28  ;;  %10922 = vpow2.f32 %v6372_v55  ;;  %v6290_v31 = vsub.f32 %v14975_v19, %v15055_v43 }
 0x787   :  { %v6175_v8 = vrot.slane %v6174_v60, 1  ;;  %v6277_v18 = vsub.f32 %v14979_v59, %v15057_v53  ;;  %10924 = vpow2.f32 %v6376_v58  ;;  %v15069_v22 = vmax.f32 %v6160_v6, %v6161_v47 }
 0x788   :  { %v6402_v14 = vmul.f32 1.442695, %v6289_v35  ;;  %v15071_v36 = vmax.f32 %v6153_v40, %v6154_v9  ;;  %v6168_v34 = vrot.slane %v6167_v54, 1  ;;  %v6181_v41 = vmax.f32 %v6179_v10, %v6180_v50 }
 0x789   :  { %v15073_v56 = vmax.f32 %v6069_v42, %v6070_v21  ;;  %v6278_v7 = vsub.f32 %v14985_v25, %v15061_v52  ;;  %v6400_v24 = vmul.f32 1.442695, %v6288_v11  ;;  %v6404_v39 = vmul.f32 1.442695, %v6290_v31 }
 0x78a   :  { %v15077_v19 = vmax.f32 %v6174_v60, %v6175_v8  ;;  %v6378_v2 = vmul.f32 1.442695, %v6277_v18  ;;  %v6292_v59 = vsub.f32 %v14999_v20, %v15069_v22  ;;  %10926 = vpow2.f32 %v6402_v14 }
 0x78b   :  { %v6291_v30 = vsub.f32 %v15003_v23, %v15071_v36  ;;  %v15083_v33 = vmax.f32 %v6167_v54, %v6168_v34  ;;  %v6182_v45 = vrot.slane %v6181_v41, 1  ;;  %v6279_v0 = vsub.f32 %v14995_v38, %v15073_v56 }
 0x78c   :  { %v10917_v16 = vpop.eup %10916  ;;  %v6380_v25 = vmul.f32 1.442695, %v6278_v7  ;;  %10928 = vpow2.f32 %v6400_v24  ;;  %v6294_v57 = vsub.f32 %v15009_v3, %v15077_v19  ;;  %v6408_v20 = vmul.f32 1.442695, %v6292_v59 }
 0x78d   :  { %10930 = vpow2.f32 %v6404_v39  ;;  %v6406_v6 = vmul.f32 1.442695, %v6291_v30  ;;  %v6293_v40 = vsub.f32 %v15019_v1, %v15083_v33  ;;  %v15091_v23 = vmax.f32 %v6181_v41, %v6182_v45 }
 0x78e   :  { %10932 = vpow2.f32 %v6378_v2  ;;  %v6663_v13 = vsel %vm354_vm2, %v10917_v16, 0.0  ;;  %v6382_v10 = vmul.f32 1.442695, %v6279_v0  ;;  %v6412_v42 = vmul.f32 1.442695, %v6294_v57 }
 0x78f   :  { %v10919_v5 = vpop.eup %10918  ;;  %10934 = vpow2.f32 %v6380_v25  ;;  %v6664_v55 = vrot.slane %v6663_v13, 4  ;;  %v6410_v60 = vmul.f32 1.442695, %v6293_v40  ;;  %v6295_v58 = vsub.f32 %v15029_v29, %v15091_v23 }
 0x790   :  { %v6656_v48 = vsel %vm354_vm2, %v10919_v5, 0.0  ;;  %10936 = vpow2.f32 %v6408_v20  ;;  %v6979_v45 = vsel %vm6944_vm3, %v15021_v63, %v15031_v12 }
 0x791   :  { %10938 = vpow2.f32 %v6406_v6  ;;  %v6657_v1 = vrot.slane %v6656_v48, 4  ;;  %v6665_v9 = vadd.f32 %v6664_v55, %v6663_v13  ;;  %v6414_v50 = vmul.f32 1.442695, %v6295_v58 }
 0x792   :  { %v10921_v38 = vpop.eup %10920  ;;  %10940 = vpow2.f32 %v6382_v10  ;;  %v6980_v6 = vsel %vm6946_vm4, %v15041_v46, %v6979_v45 }
 0x793   :  { %v10923_v32 = vpop.eup %10922  ;;  %v6677_v47 = vsel %vm354_vm2, %v10921_v38, 0.0  ;;  %10942 = vpow2.f32 %v6412_v42  ;;  %v6658_v11 = vadd.f32 %v6657_v1, %v6656_v48  ;;  %v6666_v41 = vrot.slane %v6665_v9, 2 }
 0x794   :  { %v10925_v3 = vpop.eup %10924  ;;  %v6670_v35 = vsel %vm354_vm2, %v10923_v32, 0.0  ;;  %10944 = vpow2.f32 %v6410_v60  ;;  %v6678_v31 = vrot.slane %v6677_v47, 4  ;;  %v6981_v60 = vsel %vm6948_vm5, %v15035_v17, %v6980_v6 }
 0x795   :  { %v6684_v54 = vsel %vm354_vm2, %v10925_v3, 0.0  ;;  %v6671_v18 = vrot.slane %v6670_v35, 4  ;;  %10946 = vpow2.f32 %v6414_v50  ;;  %v6659_v24 = vrot.slane %v6658_v11, 2 }
 0x796   :  { %v6685_v34 = vrot.slane %v6684_v54, 4  ;;  %v6679_v39 = vadd.f32 %v6678_v31, %v6677_v47  ;;  %v6667_v20 = vadd.f32 %v6666_v41, %v6665_v9 }
 0x797   :  { %v10927_v21 = vpop.eup %10926  ;;  %v6672_v16 = vadd.f32 %v6671_v18, %v6670_v35  ;;  %v6660_v10 = vadd.f32 %v6659_v24, %v6658_v11 }
 0x798   :  { %v6775_v7 = vsel %vm354_vm2, %v10927_v21, 0.0  ;;  %v6686_v25 = vadd.f32 %v6685_v34, %v6684_v54  ;;  %v6680_v38 = vrot.slane %v6679_v39, 2  ;;  %v6668_v47 = vrot.slane %v6667_v20, 1 }
 0x799   :  { %v10929_v8 = vpop.eup %10928  ;;  %v6776_v57 = vrot.slane %v6775_v7, 4  ;;  %v6673_v3 = vrot.slane %v6672_v16, 2  ;;  %v6661_v50 = vrot.slane %v6660_v10, 1 }
 0x79a   :  { %v10931_v14 = vpop.eup %10930  ;;  %v6768_v2 = vsel %vm354_vm2, %v10929_v8, 0.0  ;;  %v6687_v12 = vrot.slane %v6686_v25, 2  ;;  %v6681_v21 = vadd.f32 %v6680_v38, %v6679_v39 }
 0x79b   :  { %v10933_v29 = vpop.eup %10932  ;;  %v6782_v30 = vsel %vm354_vm2, %v10931_v14, 0.0  ;;  %v6769_v40 = vrot.slane %v6768_v2, 4  ;;  %v6777_v58 = vadd.f32 %v6776_v57, %v6775_v7  ;;  %v6674_v8 = vadd.f32 %v6673_v3, %v6672_v16 }
 0x79c   :  { %v10935_v59 = vpop.eup %10934  ;;  %v6691_v0 = vsel %vm354_vm2, %v10933_v29, 0.0  ;;  %v6783_v42 = vrot.slane %v6782_v30, 4  ;;  %v6688_v17 = vadd.f32 %v6687_v12, %v6686_v25  ;;  %v6982_v29 = vsel %vm6950_vm6, %v15043_v49, %v6981_v60 }
 0x79d   :  { %v10937_v5 = vpop.eup %10936  ;;  %v6698_v48 = vsel %vm354_vm2, %v10935_v59, 0.0  ;;  %v6692_v55 = vrot.slane %v6691_v0, 4  ;;  %v6770_v35 = vadd.f32 %v6769_v40, %v6768_v2  ;;  %v6778_v41 = vrot.slane %v6777_v58, 2 }
 0x79e   :  { %v10939_v13 = vpop.eup %10938  ;;  %v6796_v1 = vsel %vm354_vm2, %v10937_v5, 0.0  ;;  %v6699_v46 = vrot.slane %v6698_v48, 4  ;;  %v6784_v31 = vadd.f32 %v6783_v42, %v6782_v30  ;;  %v6669_v57 = vadd.f32 %v6668_v47, %v6667_v20 }
 0x79f   :  { %v10941_v32 = vpop.eup %10940  ;;  %v6789_v9 = vsel %vm354_vm2, %v10939_v13, 0.0  ;;  %v6693_v18 = vadd.f32 %v6692_v55, %v6691_v0  ;;  %v6797_v14 = vrot.slane %v6796_v1, 4  ;;  %v6771_v59 = vrot.slane %v6770_v35, 2 }
 0x7a0   :  { %v10943_v63 = vpop.eup %10942  ;;  %v6705_v11 = vsel %vm354_vm2, %v10941_v32, 0.0  ;;  %v6790_v7 = vrot.slane %v6789_v9, 4  ;;  %v6700_v2 = vadd.f32 %v6699_v46, %v6698_v48  ;;  %v6682_v5 = vrot.slane %v6681_v21, 1 }
 0x7a1   :  { %v10945_v54 = vpop.eup %10944  ;;  %v6810_v34 = vsel %vm354_vm2, %v10943_v63, 0.0  ;;  %v6706_v24 = vrot.slane %v6705_v11, 4  ;;  %v6785_v30 = vrot.slane %v6784_v31, 2  ;;  %v6662_v0 = vadd.f32 %v6661_v50, %v6660_v10 }
 0x7a2   :  { %v6803_v45 = vsel %vm354_vm2, %v10945_v54, 0.0  ;;  %v10947_v39 = vpop.eup %10946  ;;  %v6811_v16 = vrot.slane %v6810_v34, 4  ;;  %v6675_v6 = vrot.slane %v6674_v8, 1  ;;  %v6694_v40 = vrot.slane %v6693_v18, 2 }
 0x7a3   :  { %v6798_v13 = vadd.f32 %v6797_v14, %v6796_v1  ;;  %v6689_v25 = vrot.slane %v6688_v17, 1  ;;  %v6779_v38 = vadd.f32 %v6778_v41, %v6777_v58  ;;  %v6791_v42 = vadd.f32 %v6790_v7, %v6789_v9 }
 0x7a4   :  { %v6804_v49 = vrot.slane %v6803_v45, 4  ;;  %v6707_v32 = vadd.f32 %v6706_v24, %v6705_v11  ;;  %v6701_v3 = vrot.slane %v6700_v2, 2  ;;  %v6772_v55 = vadd.f32 %v6771_v59, %v6770_v35 }
 0x7a5   :  { %v6817_v48 = vsel %vm354_vm2, %v10947_v39, 0.0  ;;  %10948 = vrcp.f32 %v6669_v57  ;;  %v6683_v63 = vadd.f32 %v6682_v5, %v6681_v21  ;;  %v6786_v12 = vadd.f32 %v6785_v30, %v6784_v31 }
 0x7a6   :  { %v6812_v20 = vadd.f32 %v6811_v16, %v6810_v34  ;;  %10950 = vrcp.f32 %v6662_v0  ;;  %v6676_v60 = vadd.f32 %v6675_v6, %v6674_v8  ;;  %v6695_v47 = vadd.f32 %v6694_v40, %v6693_v18 }
 0x7a7   :  { %v6799_v10 = vrot.slane %v6798_v13, 2  ;;  %v6780_v46 = vrot.slane %v6779_v38, 1  ;;  %v6792_v54 = vrot.slane %v6791_v42, 2  ;;  %v6805_v1 = vadd.f32 %v6804_v49, %v6803_v45 }
 0x7a8   :  { %v6818_v50 = vrot.slane %v6817_v48, 4  ;;  %v6690_v58 = vadd.f32 %v6689_v25, %v6688_v17  ;;  %v6708_v9 = vrot.slane %v6707_v32, 2  ;;  %v6702_v14 = vadd.f32 %v6701_v3, %v6700_v2 }
 0x7a9   :  { %v6773_v11 = vrot.slane %v6772_v55, 1  ;;  %10952 = vrcp.f32 %v6683_v63  ;;  %v6993_v35 = vsel %vm6944_vm3, %v15051_v4, %v15053_v28  ;;  %v6787_v21 = vrot.slane %v6786_v12, 1 }
 0x7aa   :  { %v6813_v31 = vrot.slane %v6812_v20, 2  ;;  %10954 = vrcp.f32 %v6676_v60  ;;  %v6696_v34 = vrot.slane %v6695_v47, 1  ;;  %v6994_v8 = vsel %vm6946_vm4, %v15055_v43, %v6993_v35 }
 0x7ab   :  { %v6800_v18 = vadd.f32 %v6799_v10, %v6798_v13  ;;  %v6781_v41 = vadd.f32 %v6780_v46, %v6779_v38  ;;  %v6793_v7 = vadd.f32 %v6792_v54, %v6791_v42  ;;  %v6806_v24 = vrot.slane %v6805_v1, 2  ;;  %v7971_v46 = vld [vmem:[#allocation7 + $0x10] sm:$0xff] }
 0x7ac   :  { %v6819_v17 = vadd.f32 %v6818_v50, %v6817_v48  ;;  %10956 = vrcp.f32 %v6690_v58  ;;  %v6709_v2 = vadd.f32 %v6708_v9, %v6707_v32  ;;  %v6703_v59 = vrot.slane %v6702_v14, 1 }
 0x7ad   :  { %v6774_v45 = vadd.f32 %v6773_v11, %v6772_v55  ;;  %v6788_v39 = vadd.f32 %v6787_v21, %v6786_v12  ;;  %v6995_v4 = vsel %vm6948_vm5, %v15071_v36, %v6994_v8  ;;  %v6814_v28 = vadd.f32 %v6813_v31, %v6812_v20 }
 0x7ae   :  { %v6983_v57 = vsel %vm6952_vm7, %v15057_v53, %v6982_v29  ;;  %v6801_v5 = vrot.slane %v6800_v18, 1  ;;  %v6996_v43 = vsel %vm6950_vm6, %v15069_v22, %v6995_v4  ;;  %v5774_v30 = vadd.f32 %v14731_v62, %v15968_v44 }
 0x7af   :  { %v6984_v16 = vsel %vm6954_vm8, %v15061_v52, %v6983_v57  ;;  %10958 = vrcp.f32 %v6781_v41  ;;  %v6794_v0 = vrot.slane %v6793_v7, 1  ;;  %v6807_v6 = vadd.f32 %v6806_v24, %v6805_v1 }
 0x7b0   :  { %v6820_v40 = vrot.slane %v6819_v17, 2  ;;  %v6697_v13 = vadd.f32 %v6696_v34, %v6695_v47  ;;  %v6710_v36 = vrot.slane %v6709_v2, 1  ;;  %v6704_v25 = vadd.f32 %v6703_v59, %v6702_v14 }
 0x7b1   :  { %10960 = vrcp.f32 %v6774_v45  ;;  %v6815_v53 = vrot.slane %v6814_v28, 1  ;;  %v6985_v29 = vsel %vm6956_vm9, %v15073_v56, %v6984_v16  ;;  %v6997_v22 = vsel %vm6952_vm7, %v15083_v33, %v6996_v43 }
 0x7b2   :  { %10962 = vrcp.f32 %v6788_v39  ;;  %v10949_v38 = vpop.eup %10948  ;;  %v6802_v42 = vadd.f32 %v6801_v5, %v6800_v18  ;;  %v7019_v52 = vsub.f32 %v5774_v30, %v6985_v29  ;;  %v5784_v49 = vadd.f32 %v14749_v15, %v15968_v44 }
 0x7b3   :  { %v6998_v32 = vsel %vm6954_vm8, %v15077_v19, %v6997_v22  ;;  %v10951_v3 = vpop.eup %10950  ;;  %v6795_v55 = vadd.f32 %v6794_v0, %v6793_v7  ;;  %v6808_v48 = vrot.slane %v6807_v6, 1  ;;  %v6821_v63 = vadd.f32 %v6820_v40, %v6819_v17 }
 0x7b4   :  { %10964 = vrcp.f32 %v6697_v13  ;;  %v6711_v56 = vadd.f32 %v6710_v36, %v6709_v2  ;;  %v6816_v33 = vadd.f32 %v6815_v53, %v6814_v28  ;;  %v6999_v60 = vsel %vm6956_vm9, %v15091_v23, %v6998_v32  ;;  %v7970_v23 = vld [vmem:[#allocation7 + $0x8] sm:$0xff]  ;;  %v16001_v13 = vld [vmem:[#allocation72_spill] sm:$0xff] }
 0x7b5   :  { %10966 = vrcp.f32 %v6704_v25  ;;  %v7031_v44 = vmul.f32 1.442695, %v7019_v52  ;;  %v7021_v19 = vsub.f32 %v5784_v49, %v6999_v60  ;;  %v6809_v1 = vadd.f32 %v6808_v48, %v6807_v6  ;;  %v16000_v6 = vld [vmem:[#allocation82_spill] sm:$0xff]  ;;  %v16003_v32 = vld [vmem:[#allocation71_spill] sm:$0xff]  ;;  %v16005_v48 = vld [vmem:[#allocation25_spill] sm:$0xff] }
 0x7b6   :  { %v10953_v15 = vpop.eup %10952  ;;  %10968 = vrcp.f32 %v6802_v42  ;;  %v6822_v50 = vrot.slane %v6821_v63, 1  ;;  %v7195_v24 = vsel %vm6944_vm3, %v10949_v38, %v10951_v3  ;;  %v1439_v40 = vadd.f32 %v16000_v6, %v15975_v37  ;;  %v7969_v38 = vld [vmem:[#allocation7] sm:$0xff]  ;;  %v7976_v60 = vld [vmem:[#allocation7 + $0x38] sm:$0xff] }
 0x7b7   :  { %v10955_v54 = vpop.eup %10954  ;;  %10970 = vrcp.f32 %v6795_v55  ;;  %v7035_v21 = vmul.f32 1.442695, %v7021_v19  ;;  %v16002_v36 = vmax.f32 %v16001_v13, 0.0  ;;  %v16004_v3 = vmax.f32 %v16003_v32, 0.0 }
 0x7b8   :  { %10972 = vrcp.f32 %v6711_v56  ;;  %v6823_v31 = vadd.f32 %v6822_v50, %v6821_v63  ;;  %v7196_v2 = vsel %vm6946_vm4, %v10955_v54, %v7195_v24  ;;  %v1449_v63 = vadd.f32 %v16005_v48, %v15975_v37  ;;  %v16017_v24 = vld [vmem:[#allocation28_spill] sm:$0xff]  ;;  %v16026_v48 = vld [vmem:[#allocation110_spill] sm:$0xff] }
 0x7b9   :  { %v10957_v14 = vpop.eup %10956  ;;  %10974 = vrcp.f32 %v6816_v33  ;;  %v7197_v28 = vsel %vm6948_vm5, %v10953_v15, %v7196_v2 }
 0x7ba   :  { %10976 = vpow2.f32 %v7031_v44  ;;  %v7198_v43 = vsel %vm6950_vm6, %v10957_v14, %v7197_v28  ;;  %v7241_v44 = vmul.f32 %v14904_v51, %v1449_v63  ;;  %v16014_v51 = vld [vmem:[#allocation55_spill] sm:$0xff]  ;;  %v16027_v63 = vmax.f32 %v16026_v48, 0.0 }
 0x7bb   :  { %10978 = vrcp.f32 %v6809_v1  ;;  %v16009_v1 = vld [vmem:[#allocation85_spill] sm:$0xff] }
 0x7bc   :  { %v10959_v8 = vpop.eup %10958  ;;  %10980 = vpow2.f32 %v7035_v21  ;;  %v16010_v50 = vmax.f32 %v16009_v1, 0.0 }
 0x7bd   :  { %10982 = vrcp.f32 %v6823_v31 }
 0x82a   :  { %v10448_v62 = vpop.f32.mrf.mxu0 }
 0x82b   :  { %v7636_v47 = vmul.f32 0.25, %v10448_v62  ;;  %v7239_v62 = vmul.f32 %v14895_v61, %v1439_v40  ;;  %v16006_v61 = vld [vmem:[#allocation16_spill] sm:$0xff] }
 0x82c   :  { %v7596_v12 = vpop.f32.mrf.mxu0 }
 0x82d   :  { %v7635_v20 = vmul.f32 0.25, %v7596_v12  ;;  %v15178_v12 = vld [vmem:[%s15472_s7 + $0x10] sm:$0xff] }
 0x82e   :  { %v10451_v10 = vpop.f32.mrf.mxu0  ;;  %v7788_v56 = vrot.slane %v15178_v12, %v16006_v61  ;;  %v7800_v14 = vrot.slane %v15178_v12, %v15965_v27  ;;  %v1469_v27 = vadd.f32 %v16017_v24, %v15975_v37 }
 0x82f   :  { %10460 = vmatprep.mubr.msk.f32.mxu0 %vm7643_vm11, %v7635_v20  ;;  %v7638_v11 = vmul.f32 0.25, %v10451_v10  ;;  %v16007_v20 = vld [vmem:[#allocation80_spill] sm:$0xff] }
 0x830   :  { %v7606_v58 = vpop.f32.mrf.mxu0  ;;  %10461 = vmatmul.mubr.msk.f32.vlgmr.msra.gmra.mxu0 %vm7643_vm11, %v7636_v47  ;;  %v16008_v33 = vmax.f32 %v16007_v20, 0.0  ;;  %v7789_v15 = vmul.f32 %v7788_v56, %v7239_v62  ;;  %v7790_v21 = vmul.f32 %v7788_v56, %v16014_v51  ;;  %v11002_v51 = vld [vmem:[%s15472_s7 + $0x18] sm:$0x7]  ;;  %s11124_s7 = smov 32  }
 0x831   :  { %v7637_v9 = vmul.f32 0.25, %v7606_v58  ;;  %10473 = vmatpush3.msra.mxu0 %v14932_v26  ;;  %v10961_v26 = vpop.eup %10960 }
 0x832   :  { %v10454_v35 = vpop.f32.mrf.mxu0  ;;  %10474 = vmatprep.subr.mxu0 %v7971_v46  ;;  %v10963_v17 = vpop.eup %10962  ;;  %v7209_v57 = vsel %vm6944_vm3, %v10959_v8, %v10961_v26  ;;  %v7791_v8 = vmul.f32 %v7788_v56, %v7241_v44 }
 0x833   :  { %10463 = vmatprep.mubr.msk.f32.mxu0 %vm7643_vm11, %v7637_v9  ;;  %10475 = vmatpush3.msra.mxu0 %v7971_v46  ;;  %v7640_v41 = vmul.f32 0.25, %v10454_v35  ;;  %v10965_v39 = vpop.eup %10964  ;;  %v7210_v30 = vsel %vm6946_vm4, %v10963_v17, %v7209_v57  ;;  %v16011_v9 = vld [vmem:[#allocation26_spill] sm:$0xff]  ;;  %v16018_v17 = vld [vmem:[#allocation87_spill] sm:$0xff] }
 0x834   :  { %v7616_v34 = vpop.f32.mrf.mxu0  ;;  %10464 = vmatmul.mubr.msk.f32.gmra.mxu0 %vm7643_vm11, %v7638_v11  ;;  %10488 = vmatprep.subr.mxu0 %v7970_v23  ;;  %v10967_v5 = vpop.eup %10966  ;;  %v7199_v53 = vsel %vm6952_vm7, %v10965_v39, %v7198_v43  ;;  %v16012_v11 = vld [vmem:[#allocation86_spill] sm:$0xff]  ;;  %v16019_v2 = vmax.f32 %v16018_v17, 0.0  ;;  %v15215_v28 = vadd.f32 %v7800_v14, %v7791_v8  ;;  %v16046_v17 = vld [vmem:[#allocation116_spill] sm:$0xff] }
 0x835   :  { %v7639_v18 = vmul.f32 0.25, %v7616_v34  ;;  %v10969_v16 = vpop.eup %10968  ;;  %v7200_v42 = vsel %vm6954_vm8, %v10967_v5, %v7199_v53  ;;  %v16013_v35 = vmax.f32 %v16012_v11, 0.0  ;;  %v15201_v34 = vadd.f32 %v7800_v14, %v7789_v15  ;;  %v16021_v43 = vld [vmem:[#allocation22_spill] sm:$0xff]  ;;  %v16034_v15 = vld [vmem:[#allocation117_spill] sm:$0xff] }
 0x836   :  { %v10457_v7 = vpop.f32.mrf.mxu0  ;;  %v10971_v0 = vpop.eup %10970  ;;  %v7811_v40 = vmax.f32 %v15215_v28, 0.0  ;;  %v16035_v44 = vmax.f32 %v16034_v15, 0.0  ;;  %v16043_v11 = vld [vmem:[#allocation114_spill] sm:$0xff] }
 0x837   :  { %10466 = vmatprep.mubr.msk.f32.mxu0 %vm7643_vm11, %v7639_v18  ;;  %v7642_v4 = vmul.f32 0.25, %v10457_v7  ;;  %v10973_v25 = vpop.eup %10972  ;;  %v7211_v29 = vsel %vm6948_vm5, %v10971_v0, %v7210_v30  ;;  %v16022_v30 = vmax.f32 %v16021_v43, 0.0  ;;  %v16023_v0 = vld [vmem:[#allocation57_spill] sm:$0xff] }
 0x838   :  { %v7626_v59 = vpop.f32.mrf.mxu0  ;;  %10467 = vmatmul.mubr.msk.f32.gmra.mxu0 %vm7643_vm11, %v7640_v41  ;;  %v10975_v22 = vpop.eup %10974  ;;  %v7212_v52 = vsel %vm6950_vm6, %v10969_v16, %v7211_v29  ;;  %v7201_v47 = vsel %vm6956_vm9, %v10973_v25, %v7200_v42  ;;  %v16015_v41 = vld [vmem:[#allocation83_spill] sm:$0xff]  ;;  %v7794_v6 = vmul.f32 %v7788_v56, %v16023_v0 }
 0x839   :  { %v7641_v45 = vmul.f32 0.25, %v7626_v59  ;;  %v10977_v49 = vpop.eup %10976  ;;  %v16016_v7 = vmax.f32 %v16015_v41, 0.0  ;;  %v15211_v59 = vadd.f32 %v7800_v14, %v7790_v21  ;;  %v7975_v25 = vld [vmem:[#allocation7 + $0x30] sm:$0xff] }
 0x83a   :  { %v10979_v55 = vpop.eup %10978  ;;  %v7235_v19 = vmul.f32 %v10977_v49, %v7201_v47  ;;  %v15237_v29 = vadd.f32 %v7800_v14, %v7794_v6  ;;  %v16032_v47 = vld [vmem:[#allocation119_spill] sm:$0xff] }
 0x83b   :  { %10469 = vmatprep.mubr.msk.f32.mxu0 %vm7643_vm11, %v7641_v45  ;;  %v7213_v10 = vsel %vm6952_vm7, %v10979_v55, %v7212_v52  ;;  %v10981_v54 = vpop.eup %10980  ;;  %v16020_v45 = vld [vmem:[#allocation51_spill] sm:$0xff]  ;;  %v16025_v52 = vmov 0.0  }
 0x83c   :  { %10470 = vmatmul.mubr.msk.f32.gmra.mxu0 %vm7643_vm11, %v7642_v4  ;;  %v7214_v46 = vsel %vm6954_vm8, %v10975_v22, %v7213_v10  ;;  %v10983_v58 = vpop.eup %10982  ;;  %v7792_v39 = vmul.f32 %v7788_v56, %v16020_v45  ;;  %v7809_v4 = vmax.f32 %v15201_v34, 0.0  ;;  %v16024_v22 = vld [vmem:[#allocation102_spill] sm:$0xff]  ;;  %v7814_v49 = vmax.f32 %v15237_v29, 0.0  ;;  %v16044_v21 = vld [vmem:[#allocation15_spill] sm:$0xff] }
 0x83d   :  { %10476 = vmatprep.mubr.msk.f32.mxu0 %vm354_vm2, %v16002_v36  ;;  %v7215_v31 = vsel %vm6956_vm9, %v10983_v58, %v7214_v46  ;;  %v7796_v62 = vmul.f32 %v7788_v56, %v16024_v22  ;;  %v16033_v10 = vmax.f32 %v16032_v47, 0.0 }
 0x83e   :  { %v7237_v26 = vmul.f32 %v10981_v54, %v7215_v31  ;;  %v15224_v16 = vadd.f32 %v7800_v14, %v7792_v39  ;;  %v16038_v54 = vld [vmem:[#allocation78_spill] sm:$0xff]  ;;  %v7912_v31 = vrot.slane %v11002_v51, %v16044_v21 }
 0x83f   :  { %v15251_v32 = vadd.f32 %v7800_v14, %v7796_v62  ;;  %v16039_v1 = vmax.f32 %v16038_v54, 0.0  ;;  %v16048_v62 = vld [vmem:[#allocation92_spill] sm:$0xff] }
 0x840   :  { %10477 = vmatmul.mubr.msk.f32.vlgmr.msra.gmra.mxu0 %vm354_vm2, %v16004_v3  ;;  %v7245_v5 = vmul.f32 %v7237_v26, %v1469_v27  ;;  %v7812_v53 = vmax.f32 %v15224_v16, 0.0  ;;  %v16045_v26 = vld [vmem:[#allocation112_spill] sm:$0xff] }
 0x841   :  { %10479 = vmatprep.mubr.msk.f32.mxu0 %vm354_vm2, %v16008_v33  ;;  %10489 = vmatpush3.msra.mxu0 %v7970_v23  ;;  %v1459_v23 = vadd.f32 %v16011_v9, %v15975_v37  ;;  %v7810_v37 = vmax.f32 %v15211_v59, 0.0  ;;  %v7816_v55 = vmax.f32 %v15251_v32, 0.0  ;;  %v16030_v33 = vld [vmem:[#allocation89_spill] sm:$0xff]  ;;  %v16042_v9 = vld [vmem:[#allocation18_spill] sm:$0xff] }
 0x842   :  { %10490 = vmatprep.subr.mxu0 %v7969_v38  ;;  %v7795_v36 = vmul.f32 %v7788_v56, %v7245_v5  ;;  %v16047_v5 = vld [vmem:[#allocation73_spill] sm:$0xff]  ;;  %v8750_v34 = vsel %vm354_vm2, %v7812_v53, -inf }
 0x843   :  { %10491 = vmatpush3.msra.mxu0 %v7969_v38  ;;  %v7243_v18 = vmul.f32 %v7235_v19, %v1459_v23  ;;  %v16036_v19 = vld [vmem:[#allocation94_spill] sm:$0xff]  ;;  %v7900_v23 = vrot.slane %v15178_v12, %v16042_v9 }
 0x844   :  { %10480 = vmatmul.mubr.msk.f32.gmra.mxu0 %vm354_vm2, %v16010_v50  ;;  %10520 = vmatprep.subr.mxu0 %v7976_v60  ;;  %v15241_v42 = vadd.f32 %v7800_v14, %v7795_v36  ;;  %v16037_v46 = vmax.f32 %v16036_v19, 0.0  ;;  %v16040_v50 = vld [vmem:[#allocation74_spill] sm:$0xff] }
 0x845   :  { %10482 = vmatprep.mubr.msk.f32.mxu0 %vm354_vm2, %v16013_v35  ;;  %v7793_v57 = vmul.f32 %v7788_v56, %v7243_v18  ;;  %v16028_v56 = vld [vmem:[#allocation77_spill] sm:$0xff]  ;;  %v16041_v58 = vmax.f32 %v16040_v50, 0.0  ;;  %v16050_v50 = vld [vmem:[#allocation91_spill] sm:$0xff] }
 0x846   :  { %v7815_v3 = vmax.f32 %v15241_v42, 0.0  ;;  %v16029_v20 = vmax.f32 %v16028_v56, 0.0 }
 0x847   :  { %v15228_v13 = vadd.f32 %v7800_v14, %v7793_v57 }
 0x848   :  { %10483 = vmatmul.mubr.msk.f32.gmra.mxu0 %vm354_vm2, %v16016_v7  ;;  %v8771_v59 = vsel %vm354_vm2, %v7815_v3, -inf }
 0x849   :  { %10485 = vmatprep.mubr.msk.f32.mxu0 %vm354_vm2, %v16019_v2  ;;  %v7813_v38 = vmax.f32 %v15228_v13, 0.0 }
 0x84c   :  { %10486 = vmatmul.mubr.msk.f32.gmra.mxu0 %vm354_vm2, %v16022_v30 }
 0x84d   :  { %10492 = vmatprep.mubr.msk.f32.mxu0 %vm354_vm2, %v7809_v4 }
 0x850   :  { %10493 = vmatmul.mubr.msk.f32.vlgmr.msra.gmra.mxu0 %vm354_vm2, %v7810_v37 }
 0x851   :  { %10495 = vmatprep.mubr.msk.f32.mxu0 %vm354_vm2, %v7811_v40  ;;  %10521 = vmatpush3.msra.mxu0 %v7976_v60  ;;  %v16031_v60 = vmax.f32 %v16030_v33, 0.0 }
 0x852   :  { %10522 = vmatprep.subr.mxu0 %v7975_v25 }
 0x853   :  { %10523 = vmatpush3.msra.mxu0 %v7975_v25 }
 0x854   :  { %10496 = vmatmul.mubr.msk.f32.gmra.mxu0 %vm354_vm2, %v7812_v53  ;;  %10564 = vmatprep.subr.mxu0 %v16025_v52 }
 0x855   :  { %10498 = vmatprep.mubr.msk.f32.mxu0 %vm354_vm2, %v7813_v38 }
 0x858   :  { %10499 = vmatmul.mubr.msk.f32.gmra.mxu0 %vm354_vm2, %v7814_v49 }
 0x859   :  { %10501 = vmatprep.mubr.msk.f32.mxu0 %vm354_vm2, %v7815_v3 }
 0x85c   :  { %10502 = vmatmul.mubr.msk.f32.gmra.mxu0 %vm354_vm2, %v7816_v55 }
 0x85d   :  { %10524 = vmatprep.mubr.msk.f32.mxu0 %vm354_vm2, %v16027_v63 }
 0x860   :  { %10525 = vmatmul.mubr.msk.f32.vlgmr.msra.gmra.mxu0 %vm354_vm2, %v16029_v20 }
 0x861   :  { %10527 = vmatprep.mubr.msk.f32.mxu0 %vm354_vm2, %v16031_v60  ;;  %v16049_v60 = vld [vmem:[#allocation121_spill] sm:$0xff] }
 0x864   :  { %10528 = vmatmul.mubr.msk.f32.gmra.mxu0 %vm354_vm2, %v16033_v10 }
 0x865   :  { %10530 = vmatprep.mubr.msk.f32.mxu0 %vm354_vm2, %v16035_v44 }
 0x868   :  { %10531 = vmatmul.mubr.msk.f32.gmra.mxu0 %vm354_vm2, %v16037_v46 }
 0x869   :  { %10533 = vmatprep.mubr.msk.f32.mxu0 %vm354_vm2, %v16039_v1 }
 0x86c   :  { %10534 = vmatmul.mubr.msk.f32.gmra.mxu0 %vm354_vm2, %v16041_v58 }
 0x86d   :  { %10580 = vmatprep.mubr.msk.f32.mxu0 %vm11120_vm0, %v16025_v52 }
 0x8f0   :  { %v10462_v14 = vpop.f32.mrf.mxu0 }
 0x8f1   :  { %v7890_v35 = vmul.f32 %v10462_v14, %v16043_v11 }
 0x8f2   :  { %v7738_v8 = vpop.f32.mrf.mxu0 }
 0x8f3   :  { %v7902_v18 = vmul.f32 %v7900_v23, %v7890_v35  ;;  %v7889_v41 = vmul.f32 %v16045_v26, %v7738_v8 }
 0x8f4   :  { %v10465_v7 = vpop.f32.mrf.mxu0 }
 0x8f5   :  { %v7914_v24 = vadd.f32 %v7912_v31, %v7902_v18  ;;  %v7901_v27 = vmul.f32 %v7900_v23, %v7889_v41  ;;  %v7892_v2 = vmul.f32 %v10465_v7, %v16046_v17  ;;  %v16051_v41 = vld [vmem:[#allocation24_spill] sm:$0xff] }
 0x8f6   :  { %v7748_v45 = vpop.f32.mrf.mxu0 }
 0x8f7   :  { %v7922_v12 = vmax.f32 %v7914_v24, 0.0  ;;  %v7913_v39 = vadd.f32 %v7912_v31, %v7901_v27  ;;  %v7904_v57 = vmul.f32 %v7900_v23, %v7892_v2  ;;  %v7891_v43 = vmul.f32 %v16047_v5, %v7748_v45 }
 0x8f8   :  { %v10468_v30 = vpop.f32.mrf.mxu0 }
 0x8f9   :  { %v8848_v0 = vsel %vm354_vm2, %v7922_v12, -inf  ;;  %v7921_v6 = vmax.f32 %v7913_v39, 0.0  ;;  %v7916_v36 = vadd.f32 %v7912_v31, %v7904_v57  ;;  %v7903_v25 = vmul.f32 %v7900_v23, %v7891_v43 }
 0x8fa   :  { %v8849_v22 = vrot.slane %v8848_v0, 4  ;;  %v7894_v48 = vmul.f32 %v10468_v30, %v16048_v62  ;;  %v7758_v63 = vpop.f32.mrf.mxu0 }
 0x8fb   :  { %v8841_v56 = vsel %vm354_vm2, %v7921_v6, -inf  ;;  %v7924_v20 = vmax.f32 %v7916_v36, 0.0  ;;  %v7915_v33 = vadd.f32 %v7912_v31, %v7903_v25  ;;  %v7893_v47 = vmul.f32 %v16049_v60, %v7758_v63  ;;  %10508 = vmatprep.mubr.msk.f32.mxu1 %vm354_vm2, %v7921_v6 }
 0x8fc   :  { %v8850_v10 = vmax.f32 %v8848_v0, %v8849_v22  ;;  %v8842_v15 = vrot.slane %v8841_v56, 4  ;;  %v7906_v44 = vmul.f32 %v7900_v23, %v7894_v48  ;;  %v10471_v19 = vpop.f32.mrf.mxu0  ;;  %10509 = vmatmul.mubr.msk.f32.vlgmr.msra.gmra.mxu1 %vm354_vm2, %v7922_v12 }
 0x8fd   :  { %v8862_v46 = vsel %vm354_vm2, %v7924_v20, -inf  ;;  %v7923_v54 = vmax.f32 %v7915_v33, 0.0  ;;  %v7905_v1 = vmul.f32 %v7900_v23, %v7893_v47  ;;  %v7896_v58 = vmul.f32 %v10471_v19, %v16050_v50 }
 0x8fe   :  { %v8851_v9 = vrot.slane %v8850_v10, 2  ;;  %v8843_v14 = vmax.f32 %v8841_v56, %v8842_v15  ;;  %v8863_v11 = vrot.slane %v8862_v46, 4  ;;  %v7918_v35 = vadd.f32 %v7912_v31, %v7906_v44  ;;  %v7768_v51 = vpop.f32.mrf.mxu0 }
 0x8ff   :  { %v8855_v8 = vsel %vm354_vm2, %v7923_v54, -inf  ;;  %v7917_v18 = vadd.f32 %v7912_v31, %v7905_v1  ;;  %v7908_v26 = vmul.f32 %v7900_v23, %v7896_v58  ;;  %v7895_v7 = vmul.f32 %v16051_v41, %v7768_v51  ;;  %10511 = vmatprep.mubr.msk.f32.mxu1 %vm354_vm2, %v7923_v54 }
 0x900   :  { %v8844_v24 = vrot.slane %v8843_v14, 2  ;;  %v8864_v27 = vmax.f32 %v8862_v46, %v8863_v11  ;;  %v8856_v17 = vrot.slane %v8855_v8, 4  ;;  %10512 = vmatmul.mubr.msk.f32.gmra.mxu1 %vm354_vm2, %v7924_v20  ;;  %v7926_v2 = vmax.f32 %v7918_v35, 0.0 }
 0x901   :  { %v7925_v45 = vmax.f32 %v7917_v18, 0.0  ;;  %v7920_v12 = vadd.f32 %v7912_v31, %v7908_v26  ;;  %v7907_v39 = vmul.f32 %v7900_v23, %v7895_v7  ;;  %v8852_v57 = vmax.f32 %v8850_v10, %v8851_v9  ;;  %v7985_v18 = vld [vmem:[#allocation7 + $0x78] sm:$0xff]  ;;  %v7984_v26 = vld [vmem:[#allocation7 + $0x70] sm:$0xff] }
 0x902   :  { %v8845_v5 = vmax.f32 %v8843_v14, %v8844_v24  ;;  %v8865_v43 = vrot.slane %v8864_v27, 2  ;;  %v8857_v30 = vmax.f32 %v8855_v8, %v8856_v17  ;;  %v8876_v0 = vsel %vm354_vm2, %v7926_v2, -inf  ;;  %10536 = vmatprep.subr.mxu1 %v7985_v18 }
 0x903   :  { %v8869_v6 = vsel %vm354_vm2, %v7925_v45, -inf  ;;  %v7928_v36 = vmax.f32 %v7920_v12, 0.0  ;;  %v7919_v25 = vadd.f32 %v7912_v31, %v7907_v39  ;;  %10514 = vmatprep.mubr.msk.f32.mxu1 %vm354_vm2, %v7925_v45  ;;  %v8877_v48 = vrot.slane %v8876_v0, 4  ;;  %10537 = vmatpush3.msra.mxu1 %v7985_v18 }
 0x904   :  { %v8846_v22 = vrot.slane %v8845_v5, 1  ;;  %v8858_v62 = vrot.slane %v8857_v30, 2  ;;  %10515 = vmatmul.mubr.msk.f32.gmra.mxu1 %vm354_vm2, %v7926_v2  ;;  %v8870_v63 = vrot.slane %v8869_v6, 4  ;;  %v8853_v20 = vrot.slane %v8852_v57, 1  ;;  %v7983_v2 = vld [vmem:[#allocation7 + $0x68] sm:$0xff]  ;;  %10538 = vmatprep.subr.mxu1 %v7984_v26 }
 0x905   :  { %v8890_v23 = vsel %vm354_vm2, %v7928_v36, -inf  ;;  %v7927_v56 = vmax.f32 %v7919_v25, 0.0  ;;  %v8866_v33 = vmax.f32 %v8864_v27, %v8865_v43  ;;  %v8878_v10 = vmax.f32 %v8876_v0, %v8877_v48  ;;  %10539 = vmatpush3.msra.mxu1 %v7984_v26 }
 0x906   :  { %v8859_v60 = vmax.f32 %v8857_v30, %v8858_v62  ;;  %v8891_v47 = vrot.slane %v8890_v23, 4  ;;  %v8871_v15 = vmax.f32 %v8869_v6, %v8870_v63  ;;  %v8847_v31 = vmax.f32 %v8845_v5, %v8846_v22  ;;  %10540 = vmatprep.subr.mxu1 %v7983_v2  ;;  %v7982_v63 = vld [vmem:[#allocation7 + $0x60] sm:$0xff] }
 0x907   :  { %v8883_v44 = vsel %vm354_vm2, %v7927_v56, -inf  ;;  %10517 = vmatprep.mubr.msk.f32.mxu1 %vm354_vm2, %v7927_v56  ;;  %v8879_v54 = vrot.slane %v8878_v10, 2  ;;  %v8854_v58 = vmax.f32 %v8852_v57, %v8853_v20  ;;  %v8867_v9 = vrot.slane %v8866_v33, 1  ;;  %10541 = vmatpush3.msra.mxu1 %v7983_v2  ;;  %v7980_v56 = vld [vmem:[#allocation7 + $0x50] sm:$0xff]  ;;  %v7979_v20 = vld [vmem:[#allocation7 + $0x48] sm:$0xff] }
 0x908   :  { %v8860_v19 = vrot.slane %v8859_v60, 1  ;;  %v8892_v46 = vmax.f32 %v8890_v23, %v8891_v47  ;;  %10518 = vmatmul.mubr.msk.f32.gmra.mxu1 %vm354_vm2, %v7928_v36  ;;  %v8872_v1 = vrot.slane %v8871_v15, 2  ;;  %v8884_v50 = vrot.slane %v8883_v44, 4  ;;  %10542 = vmatprep.subr.mxu1 %v7982_v63  ;;  %v7981_v23 = vld [vmem:[#allocation7 + $0x58] sm:$0xff]  ;;  %v16052_v2 = vld [vmem:[#allocation19_spill] sm:$0xff] }
 0x909   :  { %v8880_v35 = vmax.f32 %v8878_v10, %v8879_v54  ;;  %v8995_v41 = vsel %vm6944_vm3, %v8854_v58, %v8847_v31  ;;  %v8868_v45 = vmax.f32 %v8866_v33, %v8867_v9  ;;  %10543 = vmatpush3.msra.mxu1 %v7982_v63  ;;  %v7978_v33 = vld [vmem:[#allocation7 + $0x40] sm:$0xff] }
 0x90a   :  { %v8861_v14 = vmax.f32 %v8859_v60, %v8860_v19  ;;  %v8893_v11 = vrot.slane %v8892_v46, 2  ;;  %v8873_v51 = vmax.f32 %v8871_v15, %v8872_v1  ;;  %v8885_v8 = vmax.f32 %v8883_v44, %v8884_v50  ;;  %10544 = vmatprep.subr.mxu1 %v7981_v23  ;;  %v10478_v60 = vpop.f32.mrf.mxu0 }
 0x90b   :  { %v8881_v12 = vrot.slane %v8880_v35, 1  ;;  %10545 = vmatpush3.msra.mxu1 %v7981_v23 }
 0x90c   :  { %v8894_v7 = vmax.f32 %v8892_v46, %v8893_v11  ;;  %v8874_v24 = vrot.slane %v8873_v51, 1  ;;  %v8886_v27 = vrot.slane %v8885_v8, 2  ;;  %v8996_v17 = vsel %vm6946_vm4, %v8861_v14, %v8995_v41  ;;  %10546 = vmatprep.subr.mxu1 %v7980_v56  ;;  %v8077_v47 = vpop.f32.mrf.mxu0  ;;  %v15327_v41 = vld [vmem:[#allocation8] sm:$0xf] }
 0x90d   :  { %v8997_v43 = vsel %vm6948_vm5, %v8868_v45, %v8996_v17  ;;  %v8882_v6 = vmax.f32 %v8880_v35, %v8881_v12  ;;  %10547 = vmatpush3.msra.mxu1 %v7980_v56  ;;  %v8522_v45 = vrot.slane %v15327_v41, %v16052_v2 }
 0x90e   :  { %v8875_v39 = vmax.f32 %v8873_v51, %v8874_v24  ;;  %v8887_v57 = vmax.f32 %v8885_v8, %v8886_v27  ;;  %v8895_v5 = vrot.slane %v8894_v7, 1  ;;  %10548 = vmatprep.subr.mxu1 %v7979_v20  ;;  %v10481_v10 = vpop.f32.mrf.mxu0 }
 0x90f   :  { %10549 = vmatpush3.msra.mxu1 %v7979_v20 }
 0x910   :  { %v8888_v30 = vrot.slane %v8887_v57, 1  ;;  %v8998_v0 = vsel %vm6950_vm6, %v8875_v39, %v8997_v43  ;;  %v8896_v25 = vmax.f32 %v8894_v7, %v8895_v5  ;;  %10550 = vmatprep.subr.mxu1 %v7978_v33  ;;  %v8087_v15 = vpop.f32.mrf.mxu0 }
 0x911   :  { %v8999_v22 = vsel %vm6952_vm7, %v8882_v6, %v8998_v0  ;;  %10551 = vmatpush3.msra.mxu1 %v7978_v33 }
 0x912   :  { %v8889_v36 = vmax.f32 %v8887_v57, %v8888_v30  ;;  %v10484_v44 = vpop.f32.mrf.mxu0 }
 0x914   :  { %v9000_v62 = vsel %vm6954_vm8, %v8889_v36, %v8999_v22  ;;  %v8097_v31 = vpop.f32.mrf.mxu0 }
 0x915   :  { %v9001_v48 = vsel %vm6956_vm9, %v8896_v25, %v9000_v62 }
 0x916   :  { %9002 = vrot.lane.b32.xlu0 %v9001_v48, %s11124_s7  ;;  %v10487_v19 = vpop.f32.mrf.mxu0 }
 0x918   :  { %v8107_v46 = vpop.f32.mrf.mxu0 }
 0x91a   :  { %v10494_v54 = vpop.f32.mrf.mxu0 }
 0x91b   :  { %v8212_v26 = vadd.f32 %v10494_v54, %v10478_v60 }
 0x91c   :  { %v8206_v1 = vpop.f32.mrf.mxu0 }
 0x91d   :  { %v8207_v27 = vadd.f32 %v8206_v1, %v8077_v47 }
 0x91e   :  { %v10497_v50 = vpop.f32.mrf.mxu0 }
 0x91f   :  { %v8222_v39 = vadd.f32 %v10497_v50, %v10481_v10 }
 0x920   :  { %v8216_v58 = vpop.f32.mrf.mxu0 }
 0x921   :  { %v8217_v0 = vadd.f32 %v8216_v58, %v8087_v15 }
 0x922   :  { %v10500_v9 = vpop.f32.mrf.mxu0 }
 0x923   :  { %v8232_v62 = vadd.f32 %v10500_v9, %v10484_v44 }
 0x924   :  { %v8226_v14 = vpop.f32.mrf.mxu0 }
 0x925   :  { %v8227_v33 = vadd.f32 %v8226_v14, %v8097_v31 }
 0x926   :  { %v10503_v11 = vpop.f32.mrf.mxu0 }
 0x928   :  { %v8236_v35 = vpop.f32.mrf.mxu0 }
 0x92a   :  { %v10526_v51 = vpop.f32.mrf.mxu0 }
 0x92c   :  { %v8472_v8 = vpop.f32.mrf.mxu0 }
 0x92e   :  { %v10529_v18 = vpop.f32.mrf.mxu0 }
 0x930   :  { %v8482_v7 = vpop.f32.mrf.mxu0 }
 0x932   :  { %v10532_v43 = vpop.f32.mrf.mxu0 }
 0x934   :  { %v8492_v56 = vpop.f32.mrf.mxu0 }
 0x936   :  { %v10535_v44 = vpop.f32.mrf.mxu0 }
 0x9bc   :  { %v10510_v24 = vpop.f32.mrf.mxu1 }
 0x9bd   :  { %v8375_v17 = vadd.f32 %v10510_v24, %v8212_v26 }
 0x9be   :  { %v8335_v12 = vpop.f32.mrf.mxu1 }
 0x9bf   :  { %v8512_v57 = vadd.f32 %v10526_v51, %v8375_v17  ;;  %v8374_v5 = vadd.f32 %v8335_v12, %v8207_v27  ;;  %v8242_v51 = vadd.f32 %v10503_v11, %v10487_v19  ;;  %v8502_v19 = vpop.f32.mrf.mxu0 }
 0x9c0   :  { %v10513_v30 = vpop.f32.mrf.mxu1 }
 0x9c1   :  { %v8511_v6 = vadd.f32 %v8472_v8, %v8374_v5  ;;  %v8377_v36 = vadd.f32 %v10513_v30, %v8222_v39  ;;  %v8524_v25 = vadd.f32 %v8522_v45, %v8512_v57 }
 0x9c2   :  { %v8345_v22 = vpop.f32.mrf.mxu1 }
 0x9c3   :  { %v8523_v48 = vadd.f32 %v8522_v45, %v8511_v6  ;;  %v8514_v63 = vadd.f32 %v10529_v18, %v8377_v36  ;;  %v8376_v23 = vadd.f32 %v8345_v22, %v8217_v0  ;;  %v8532_v54 = vmax.f32 %v8524_v25, 0.0  ;;  %v9092_v0 = vld [vmem:[%s15475_s10 + $0x38] sm:$0xff]  ;;  %v9091_v6 = vld [vmem:[%s15475_s10 + $0x30] sm:$0xff]  ;;  %v9089_v36 = vld [vmem:[%s15475_s10 + $0x20] sm:$0xff] }
 0x9c4   :  { %v10516_v20 = vpop.f32.mrf.mxu1  ;;  %v8237_v18 = vadd.f32 %v8236_v35, %v8107_v46  ;;  %10565 = vmatpush3.msra.mxu0 %v9092_v0  ;;  %v9088_v25 = vld [vmem:[%s15475_s10 + $0x18] sm:$0xff]  ;;  %v9087_v22 = vld [vmem:[%s15475_s10 + $0x10] sm:$0xff] }
 0x9c5   :  { %v8531_v60 = vmax.f32 %v8523_v48, 0.0  ;;  %v8513_v47 = vadd.f32 %v8482_v7, %v8376_v23  ;;  %v8379_v10 = vadd.f32 %v10516_v20, %v8232_v62  ;;  %v8526_v1 = vadd.f32 %v8522_v45, %v8514_v63  ;;  %10566 = vmatprep.subr.mxu0 %v16025_v52  ;;  %v9086_v62 = vld [vmem:[%s15475_s10 + $0x8] sm:$0xff]  ;;  %v9085_v48 = vld [vmem:[%s15475_s10] sm:$0xff] }
 0x9c6   :  { %v8355_v50 = vpop.f32.mrf.mxu1  ;;  %10567 = vmatpush3.msra.mxu0 %v9091_v6  ;;  %v8729_v63 = vsel %vm354_vm2, %v7809_v4, -inf  ;;  %v8743_v23 = vsel %vm354_vm2, %v7811_v40, -inf  ;;  %v8751_v40 = vrot.slane %v8750_v34, 4 }
 0x9c7   :  { %v8525_v15 = vadd.f32 %v8522_v45, %v8513_v47  ;;  %v8516_v58 = vadd.f32 %v10532_v43, %v8379_v10  ;;  %v8378_v8 = vadd.f32 %v8355_v50, %v8227_v33  ;;  %10552 = vmatprep.mubr.msk.f32.mxu1 %vm8543_vm12, %v8531_v60  ;;  %v8534_v14 = vmax.f32 %v8526_v1, 0.0  ;;  %10568 = vmatprep.subr.mxu0 %v16025_v52 }
 0x9c8   :  { %v10519_v9 = vpop.f32.mrf.mxu1  ;;  %10553 = vmatmul.mubr.msk.f32.vlgmr.msra.gmra.mxu1 %vm8543_vm12, %v8532_v54  ;;  %v8730_v20 = vrot.slane %v8729_v63, 4  ;;  %v8744_v33 = vrot.slane %v8743_v23, 4  ;;  %v8772_v1 = vrot.slane %v8771_v59, 4  ;;  %v8752_v50 = vmax.f32 %v8750_v34, %v8751_v40 }
 0x9c9   :  { %v8533_v26 = vmax.f32 %v8525_v15, 0.0  ;;  %v8515_v24 = vadd.f32 %v8492_v56, %v8378_v8  ;;  %v8381_v31 = vadd.f32 %v10519_v9, %v8242_v51  ;;  %v8528_v7 = vadd.f32 %v8522_v45, %v8516_v58 }
 0x9ca   :  { %v8365_v27 = vpop.f32.mrf.mxu1  ;;  %v8736_v56 = vsel %vm354_vm2, %v7810_v37, -inf  ;;  %v8731_v4 = vmax.f32 %v8729_v63, %v8730_v20  ;;  %v8745_v47 = vmax.f32 %v8743_v23, %v8744_v33  ;;  %v8764_v37 = vsel %vm354_vm2, %v7814_v49, -inf  ;;  %v9003_v33 = vpop.permute.xlu0 %9002 }
 0x9cb   :  { %v8527_v17 = vadd.f32 %v8522_v45, %v8515_v24  ;;  %v8518_v12 = vadd.f32 %v10535_v44, %v8381_v31  ;;  %v8380_v39 = vadd.f32 %v8365_v27, %v8237_v18  ;;  %10555 = vmatprep.mubr.msk.f32.mxu1 %vm8543_vm12, %v8533_v26  ;;  %v8536_v5 = vmax.f32 %v8528_v7, 0.0 }
 0x9cc   :  { %10556 = vmatmul.mubr.msk.f32.gmra.mxu1 %vm8543_vm12, %v8534_v14  ;;  %v8737_v60 = vrot.slane %v8736_v56, 4  ;;  %v8732_v13 = vrot.slane %v8731_v4, 2  ;;  %v8746_v54 = vrot.slane %v8745_v47, 2  ;;  %v8765_v53 = vrot.slane %v8764_v37, 4 }
 0x9cd   :  { %v8535_v11 = vmax.f32 %v8527_v17, 0.0  ;;  %v8517_v57 = vadd.f32 %v8502_v19, %v8380_v39  ;;  %v8530_v43 = vadd.f32 %v8522_v45, %v8518_v12  ;;  %v8778_v51 = vsel %vm354_vm2, %v7816_v55, -inf }
 0x9ce   :  { %v8738_v10 = vmax.f32 %v8736_v56, %v8737_v60  ;;  %v8733_v15 = vmax.f32 %v8731_v4, %v8732_v13  ;;  %v8747_v58 = vmax.f32 %v8745_v47, %v8746_v54  ;;  %v8773_v8 = vmax.f32 %v8771_v59, %v8772_v1 }
 0x9cf   :  { %v8529_v30 = vadd.f32 %v8522_v45, %v8517_v57  ;;  %10558 = vmatprep.mubr.msk.f32.mxu1 %vm8543_vm12, %v8535_v11  ;;  %v8538_v35 = vmax.f32 %v8530_v43, 0.0  ;;  %v9090_v45 = vld [vmem:[%s15475_s10 + $0x28] sm:$0xff]  ;;  %v8753_v44 = vrot.slane %v8752_v50, 2  ;;  %v8766_v29 = vmax.f32 %v8764_v37, %v8765_v53 }
 0x9d0   :  { %10559 = vmatmul.mubr.msk.f32.gmra.mxu1 %vm8543_vm12, %v8536_v5  ;;  %10569 = vmatpush3.msra.mxu0 %v9090_v45  ;;  %v8739_v16 = vrot.slane %v8738_v10, 2  ;;  %v8779_v9 = vrot.slane %v8778_v51, 4  ;;  %v8734_v49 = vrot.slane %v8733_v15, 1  ;;  %v8748_v18 = vrot.slane %v8747_v58, 1 }
 0x9d1   :  { %v8537_v46 = vmax.f32 %v8529_v30, 0.0  ;;  %10570 = vmatprep.subr.mxu0 %v16025_v52  ;;  %v8774_v24 = vrot.slane %v8773_v8, 2  ;;  %v8754_v14 = vmax.f32 %v8752_v50, %v8753_v44  ;;  %v8767_v7 = vrot.slane %v8766_v29, 2 }
 0x9d2   :  { %10571 = vmatpush3.msra.mxu0 %v9089_v36  ;;  %v8740_v3 = vmax.f32 %v8738_v10, %v8739_v16  ;;  %v8780_v27 = vmax.f32 %v8778_v51, %v8779_v9  ;;  %v8735_v17 = vmax.f32 %v8733_v15, %v8734_v49  ;;  %v8749_v32 = vmax.f32 %v8747_v58, %v8748_v18 }
 0x9d3   :  { %10561 = vmatprep.mubr.msk.f32.mxu1 %vm8543_vm12, %v8537_v46  ;;  %10572 = vmatprep.subr.mxu0 %v16025_v52  ;;  %v8775_v55 = vmax.f32 %v8773_v8, %v8774_v24  ;;  %v8755_v19 = vrot.slane %v8754_v14, 1  ;;  %v8768_v11 = vmax.f32 %v8766_v29, %v8767_v7  ;;  %v8542_v56 = vrot.slane %v15327_v41, %v16044_v21 }
 0x9d4   :  { %10562 = vmatmul.mubr.msk.f32.gmra.mxu1 %vm8543_vm12, %v8538_v35  ;;  %10573 = vmatpush3.msra.mxu0 %v9088_v25  ;;  %v8741_v31 = vrot.slane %v8740_v3, 1  ;;  %v8781_v57 = vrot.slane %v8780_v27, 2  ;;  %v15412_v44 = vrot.slane %v15327_v41, %v16006_v61 }
 0x9d5   :  { %10574 = vmatprep.subr.mxu0 %v16025_v52  ;;  %v8776_v30 = vrot.slane %v8775_v55, 1  ;;  %v8756_v35 = vmax.f32 %v8754_v14, %v8755_v19  ;;  %v8769_v0 = vrot.slane %v8768_v11, 1 }
 0x9d6   :  { %10575 = vmatpush3.msra.mxu0 %v9087_v22  ;;  %v8742_v39 = vmax.f32 %v8740_v3, %v8741_v31  ;;  %v8782_v6 = vmax.f32 %v8780_v27, %v8781_v57 }
 0x9d7   :  { %10576 = vmatprep.subr.mxu0 %v16025_v52  ;;  %v8777_v36 = vmax.f32 %v8775_v55, %v8776_v30  ;;  %v8770_v22 = vmax.f32 %v8768_v11, %v8769_v0  ;;  %v16053_v11 = vld [vmem:[#allocation20_spill] sm:$0xff] }
 0x9d8   :  { %10577 = vmatpush3.msra.mxu0 %v9086_v62  ;;  %v8961_v5 = vsel %vm6944_vm3, %v8742_v39, %v8735_v17  ;;  %v8783_v62 = vrot.slane %v8782_v6, 1  ;;  %v15421_v57 = vrot.slane %v15327_v41, %v16053_v11 }
 0x9d9   :  { %10578 = vmatprep.subr.mxu0 %v16025_v52  ;;  %v8757_v52 = vsel %vm354_vm2, %v7813_v38, -inf  ;;  %v8962_v46 = vsel %vm6946_vm4, %v8749_v32, %v8961_v5 }
 0x9da   :  { %10579 = vmatpush3.msra.mxu0 %v9085_v48  ;;  %v8758_v28 = vrot.slane %v8757_v52, 4  ;;  %v8963_v45 = vsel %vm6948_vm5, %v8756_v35, %v8962_v46  ;;  %v8784_v23 = vmax.f32 %v8782_v6, %v8783_v62 }
 0x9dc   :  { %v8759_v38 = vmax.f32 %v8757_v52, %v8758_v28  ;;  %v8985_v52 = vpop.permute.xlu1 %8984 }
 0x9de   :  { %v8760_v42 = vrot.slane %v8759_v38, 2 }
 0x9e0   :  { %v8761_v26 = vmax.f32 %v8759_v38, %v8760_v42  ;;  %v9021_v13 = vpop.permute.xlu1 %9020 }
 0x9e2   :  { %v8762_v12 = vrot.slane %v8761_v26, 1 }
 0x9e4   :  { %v8763_v43 = vmax.f32 %v8761_v26, %v8762_v12 }
 0x9e6   :  { %v8964_v25 = vsel %vm6950_vm6, %v8763_v43, %v8963_v45 }
 0x9e7   :  { %v8965_v48 = vsel %vm6952_vm7, %v8770_v22, %v8964_v25 }
 0x9e8   :  { %v8966_v63 = vsel %vm6954_vm8, %v8777_v36, %v8965_v48 }
 0x9e9   :  { %v8967_v20 = vsel %vm6956_vm9, %v8784_v23, %v8966_v63 }
 0x9ea   :  { %v9023_v4 = vsel %vm354_vm2, %v8967_v20, %v8985_v52 }
 0x9eb   :  { %v9025_v28 = vsel %vm9024_vm13, %v9023_v4, %v9003_v33 }
 0x9ec   :  { %v15407_v1 = vsel %vm9026_vm14, %v9025_v28, %v9021_v13 }
 0x9ed   :  { %v9029_v29 = vrot.slane %v15407_v1, 1  ;;  %v9031_v7 = vrot.slane %v15407_v1, 3  ;;  %v9030_v27 = vrot.slane %v15407_v1, 2 }
 0xa88   :  { %v10554_v60 = vpop.f32.mrf.mxu1 }
 0xa89   :  { %v8640_v34 = vadd.f32 %v10554_v60, %v8542_v56 }
 0xa8a   :  { %v8634_v47 = vpop.f32.mrf.mxu1 }
 0xa8b   :  { %v8680_v10 = vsel %vm8543_vm12, %v8640_v34, 0.0  ;;  %v8635_v40 = vadd.f32 %v8634_v47, %v8542_v56 }
 0xa8c   :  { %v8681_v59 = vrot.slane %v8680_v10, 4  ;;  %v10557_v37 = vpop.f32.mrf.mxu1 }
 0xa8d   :  { %v8673_v54 = vsel %vm8543_vm12, %v8635_v40, 0.0  ;;  %v8650_v38 = vadd.f32 %v10557_v37, %v8542_v56 }
 0xa8e   :  { %v8682_v16 = vadd.f32 %v8681_v59, %v8680_v10  ;;  %v8674_v50 = vrot.slane %v8673_v54, 4  ;;  %v8644_v53 = vpop.f32.mrf.mxu1 }
 0xa8f   :  { %v8694_v51 = vsel %vm8543_vm12, %v8650_v38, 0.0  ;;  %v8645_v15 = vadd.f32 %v8644_v53, %v8542_v56 }
 0xa90   :  { %v8683_v58 = vrot.slane %v8682_v16, 2  ;;  %v8675_v42 = vadd.f32 %v8674_v50, %v8673_v54  ;;  %v8695_v8 = vrot.slane %v8694_v51, 4  ;;  %v10560_v3 = vpop.f32.mrf.mxu1 }
 0xa91   :  { %v8687_v9 = vsel %vm8543_vm12, %v8645_v15, 0.0  ;;  %v8660_v49 = vadd.f32 %v10560_v3, %v8542_v56 }
 0xa92   :  { %v8684_v18 = vadd.f32 %v8683_v58, %v8682_v16  ;;  %v8676_v26 = vrot.slane %v8675_v42, 2  ;;  %v8696_v24 = vadd.f32 %v8695_v8, %v8694_v51  ;;  %v8688_v31 = vrot.slane %v8687_v9, 4  ;;  %v8654_v14 = vpop.f32.mrf.mxu1 }
 0xa93   :  { %v8708_v17 = vsel %vm8543_vm12, %v8660_v49, 0.0  ;;  %v8655_v32 = vadd.f32 %v8654_v14, %v8542_v56 }
 0xa94   :  { %v8685_v12 = vrot.slane %v8684_v18, 1  ;;  %v8677_v61 = vadd.f32 %v8676_v26, %v8675_v42  ;;  %v8697_v55 = vrot.slane %v8696_v24, 2  ;;  %v8689_v39 = vadd.f32 %v8688_v31, %v8687_v9  ;;  %v10563_v19 = vpop.f32.mrf.mxu1 }
 0xa95   :  { %v8709_v5 = vrot.slane %v8708_v17, 4  ;;  %v8701_v43 = vsel %vm8543_vm12, %v8655_v32, 0.0  ;;  %v8670_v30 = vadd.f32 %v10563_v19, %v8542_v56  ;;  %v9033_v42 = vrot.slane %v15407_v1, 5 }
 0xa96   :  { %v8686_v46 = vadd.f32 %v8685_v12, %v8684_v18  ;;  %v8678_v35 = vrot.slane %v8677_v61, 1  ;;  %v8698_v0 = vadd.f32 %v8697_v55, %v8696_v24  ;;  %v8690_v6 = vrot.slane %v8689_v39, 2  ;;  %v8664_v45 = vpop.f32.mrf.mxu1 }
 0xa97   :  { %v8710_v36 = vadd.f32 %v8709_v5, %v8708_v17  ;;  %v8702_v25 = vrot.slane %v8701_v43, 4  ;;  %v8722_v22 = vsel %vm8543_vm12, %v8670_v30, 0.0  ;;  %v8665_v62 = vadd.f32 %v8664_v45, %v8542_v56 }
 0xa98   :  { %v9045_v48 = vadd.f32 %v9029_v29, %v8686_v46  ;;  %v8679_v63 = vadd.f32 %v8678_v35, %v8677_v61  ;;  %v8699_v23 = vrot.slane %v8698_v0, 1  ;;  %v8691_v20 = vadd.f32 %v8690_v6, %v8689_v39 }
 0xa99   :  { %v8711_v41 = vrot.slane %v8710_v36, 2  ;;  %v8703_v33 = vadd.f32 %v8702_v25, %v8701_v43  ;;  %v8723_v60 = vrot.slane %v8722_v22, 4  ;;  %v8715_v52 = vsel %vm8543_vm12, %v8665_v62, 0.0 }
 0xa9a   :  { %v9057_v34 = vmul.f32 %v15421_v57, %v9045_v48  ;;  %v9044_v4 = vadd.f32 %v15407_v1, %v8679_v63  ;;  %v8700_v47 = vadd.f32 %v8699_v23, %v8698_v0  ;;  %v8692_v28 = vrot.slane %v8691_v20, 1 }
 0xa9b   :  { %v8712_v10 = vadd.f32 %v8711_v41, %v8710_v36  ;;  %v8704_v40 = vrot.slane %v8703_v33, 2  ;;  %v8724_v59 = vadd.f32 %v8723_v60, %v8722_v22  ;;  %v8716_v37 = vrot.slane %v8715_v52, 4 }
 0xa9c   :  { %v9069_v56 = vadd.f32 %v15412_v44, %v9057_v34  ;;  %v9056_v13 = vmul.f32 %v15421_v57, %v9044_v4  ;;  %v9047_v54 = vadd.f32 %v9031_v7, %v8700_v47  ;;  %v8693_v38 = vadd.f32 %v8692_v28, %v8691_v20 }
 0xa9d   :  { %v8713_v16 = vrot.slane %v8712_v10, 1  ;;  %v8705_v50 = vadd.f32 %v8704_v40, %v8703_v33  ;;  %v8725_v53 = vrot.slane %v8724_v59, 2  ;;  %v8717_v51 = vadd.f32 %v8716_v37, %v8715_v52 }
 0xa9e   :  { %v9059_v15 = vmul.f32 %v15421_v57, %v9047_v54  ;;  %v9046_v58 = vadd.f32 %v9030_v27, %v8693_v38  ;;  %v9077_v49 = vmax.f32 %v9069_v56, 0.0  ;;  %v9068_v18 = vadd.f32 %v15412_v44, %v9056_v13 }
 0xa9f   :  { %v8714_v8 = vadd.f32 %v8713_v16, %v8712_v10  ;;  %v8706_v3 = vrot.slane %v8705_v50, 1  ;;  %v8726_v29 = vadd.f32 %v8725_v53, %v8724_v59  ;;  %v8718_v9 = vrot.slane %v8717_v51, 2 }
 0xaa0   :  { %v9058_v26 = vmul.f32 %v15421_v57, %v9046_v58  ;;  %v9032_v24 = vrot.slane %v15407_v1, 4  ;;  %v9071_v32 = vadd.f32 %v15412_v44, %v9059_v15  ;;  %v9035_v12 = vrot.slane %v15407_v1, 7 }
 0xaa1   :  { %v9049_v31 = vadd.f32 %v9033_v42, %v8714_v8  ;;  %v8707_v14 = vadd.f32 %v8706_v3, %v8705_v50  ;;  %v8727_v7 = vrot.slane %v8726_v29, 1  ;;  %v8719_v17 = vadd.f32 %v8718_v9, %v8717_v51 }
 0xaa2   :  { %v9070_v27 = vadd.f32 %v15412_v44, %v9058_v26  ;;  %v9105_v5 = vrot.slane %v9077_v49, 7  ;;  %v9076_v43 = vmax.f32 %v9068_v18, 0.0  ;;  %v9034_v6 = vrot.slane %v15407_v1, 6 }
 0xaa3   :  { %v9061_v61 = vmul.f32 %v15421_v57, %v9049_v31  ;;  %v9048_v55 = vadd.f32 %v9032_v24, %v8707_v14  ;;  %v8728_v39 = vadd.f32 %v8727_v7, %v8726_v29  ;;  %v8720_v19 = vrot.slane %v8719_v17, 1 }
 0xaa4   :  { %v9078_v30 = vmax.f32 %v9070_v27, 0.0  ;;  %v9079_v45 = vmax.f32 %v9071_v32, 0.0  ;;  %v9106_v63 = vsel %vm6944_vm3, %v9105_v5, %v9076_v43 }
 0xaa5   :  { %v9060_v46 = vmul.f32 %v15421_v57, %v9048_v55  ;;  %v9051_v35 = vadd.f32 %v9035_v12, %v8728_v39  ;;  %v8721_v0 = vadd.f32 %v8720_v19, %v8719_v17  ;;  %v9073_v25 = vadd.f32 %v15412_v44, %v9061_v61 }
 0xaa6   :  { %v9107_v36 = vrot.slane %v9078_v30, 6  ;;  %v9109_v60 = vrot.slane %v9079_v45, 5 }
 0xaa7   :  { %v9072_v22 = vadd.f32 %v15412_v44, %v9060_v46  ;;  %v9063_v62 = vmul.f32 %v15421_v57, %v9051_v35  ;;  %v9050_v48 = vadd.f32 %v9034_v6, %v8721_v0  ;;  %v9081_v1 = vmax.f32 %v9073_v25, 0.0 }
 0xaa8   :  { %v9108_v23 = vsel %vm6946_vm4, %v9107_v36, %v9106_v63 }
 0xaa9   :  { %v9080_v20 = vmax.f32 %v9072_v22, 0.0  ;;  %v9075_v41 = vadd.f32 %v15412_v44, %v9063_v62  ;;  %v9062_v33 = vmul.f32 %v15421_v57, %v9050_v48  ;;  %v9110_v47 = vsel %vm6948_vm5, %v9109_v60, %v9108_v23 }
 0xaaa   :  { %v9113_v40 = vrot.slane %v9081_v1, 3 }
 0xaab   :  { %v9111_v52 = vrot.slane %v9080_v20, 4  ;;  %v9074_v34 = vadd.f32 %v15412_v44, %v9062_v33  ;;  %v9083_v4 = vmax.f32 %v9075_v41, 0.0  ;;  %v9084_v44 = vld [vmem:[%s15476_s11] sm:$0x7] }
 0xaac   :  { %v9096_v54 = vrot.slane %v9084_v44, %v16052_v2  ;;  %v9194_v38 = vrot.slane %v9084_v44, %v16044_v21  ;;  %v9199_v53 = vrot.slane %v9084_v44, %v16053_v11 }
 0xaad   :  { %v9082_v28 = vmax.f32 %v9074_v34, 0.0  ;;  %v9112_v10 = vsel %vm6950_vm6, %v9111_v52, %v9110_v47  ;;  %v9117_v37 = vrot.slane %v9083_v4, 1 }
 0xaae   :  { %v9114_v56 = vsel %vm6952_vm7, %v9113_v40, %v9112_v10 }
 0xaaf   :  { %v9115_v59 = vrot.slane %v9082_v28, 2 }
 0xab1   :  { %v9116_v13 = vsel %vm6954_vm8, %v9115_v59, %v9114_v56 }
 0xab2   :  { %v9118_v57 = vsel %vm6956_vm9, %v9117_v37, %v9116_v13 }
 0xab3   :  { %10581 = vmatmul.mubr.msk.f32.vlgmr.msra.gmra.mxu0 %vm8543_vm12, %v9118_v57 }
 0xb73   :  { %v9187_v16 = vpop.f32.mrf.mxu0 }
 0xb74   :  { %v9188_v50 = vadd.f32 %v9187_v16, %v9096_v54 }
 0xb75   :  { %v10582_v51 = vpop.f32.mrf.mxu0 }
 0xb76   :  { %v9195_v15 = vmul.f32 %v9194_v38, %v9188_v50 }
 0xb78   :  { %v9200_v58 = vadd.f32 %v9199_v53, %v9195_v15 }
 0xb7a   :  { %v9201_v42 = vmax.f32 %v9200_v58, 0.0 }
 0xb7c   :  { %9202 = vst.msk [vmem:[#allocation10] sm:$0xff] %vm9024_vm13, %v9201_v42 }
 0xb7d   :  { %11094 = shalt.err (!%p11091_p10)
}
 0xb7e   :  { %9212 = dma.vmem_to_hbm [thread:$0]  %s9210_s8, 128, %s15477_s12, [#allocation4]  }
 0xb7f   :  { %11109 = dma.done.wait [#allocation4], 128  }
 0xb80   :  { %11110 = vsyncadd [#allocation4], 4294967168 }
 0xb81   :  { %9216 = vsyncpa [#allocation3], 1 }
 0xb82   :  { %9217 = vsyncpa [#allocation6], 1 }
 0xb83   :  { %9218 = vsyncpa [#allocation9], 1 }
 0xb84   :  { %9219 = vsyncpa [#allocation4], 1 }

</bundles_post_ra>
